<compile_context>
chip_gen: v7x
topology: tpu7x:2x2x1
jax: 0.10.0
libtpu: 0.0.40
codegen_flags: <defaults>
</compile_context>

<pallas_src>
import functools
import math

import jax
import jax.numpy as jnp
from jax.experimental import pallas as pl
from jax.experimental.pallas import tpu as pltpu

BN_EPS = 1e-5
_TILE_ROWS = 512     # row tile for the gridded matmul (multiple of 8)


def _round_up(x, m):
    return ((x + m - 1) // m) * m


# ----------------------------- Pallas kernels ------------------------------

def _matmul_bias_kernel(x_ref, w_ref, b_ref, o_ref):
    # y = x @ w + b ; x/w are bf16, accumulation + bias + output are f32.
    o_ref[...] = (
        jnp.dot(x_ref[...], w_ref[...], preferred_element_type=jnp.float32)
        + b_ref[...]
    )


def matmul_bias(x, w, b):
    """(R, Ci) @ (Ci, Co) + (Co,) -> (R, Co) float32.

    bf16 MXU operands with f32 accumulation.  Rows are tiled into _TILE_ROWS
    blocks with the weights/bias resident across the grid, so large activations
    never exceed the scoped VMEM budget and the row grid can be sharded across
    TensorCores via dimension_semantics=("parallel",).
    """
    R, Ci = x.shape
    Co = w.shape[1]
    xb = x.astype(jnp.bfloat16)
    wb = w.astype(jnp.bfloat16)
    bb = b.reshape(1, Co).astype(jnp.float32)

    if R <= _TILE_ROWS:
        return pl.pallas_call(
            _matmul_bias_kernel,
            out_shape=jax.ShapeDtypeStruct((R, Co), jnp.float32),
            in_specs=[pl.BlockSpec(memory_space=pltpu.MemorySpace.VMEM)] * 3,
            out_specs=pl.BlockSpec(memory_space=pltpu.MemorySpace.VMEM),
        )(xb, wb, bb)

    n_blk = pl.cdiv(R, _TILE_ROWS)
    Rp = n_blk * _TILE_ROWS
    if Rp != R:
        xb = jnp.pad(xb, ((0, Rp - R), (0, 0)))
    y = pl.pallas_call(
        _matmul_bias_kernel,
        out_shape=jax.ShapeDtypeStruct((Rp, Co), jnp.float32),
        grid=(n_blk,),
        in_specs=[
            pl.BlockSpec((_TILE_ROWS, Ci), lambda i: (i, 0)),
            pl.BlockSpec((Ci, Co), lambda i: (0, 0)),    # resident weights
            pl.BlockSpec((1, Co), lambda i: (0, 0)),     # resident bias
        ],
        out_specs=pl.BlockSpec((_TILE_ROWS, Co), lambda i: (i, 0)),
        compiler_params=pltpu.CompilerParams(
            dimension_semantics=("parallel",)),
    )(xb, wb, bb)
    return y[:R] if Rp != R else y


def _tconv_kernel(x_ref, w_ref, b_ref, o_ref, *, dil, row_stride):
    # x_ref: ((T+2*pad)*BVp, Ci) bf16, rows ordered (t, b, v), BVp 8-aligned
    # w_ref: (K, Ci, Co) bf16 ; b_ref: (1, Co) f32 ; o_ref: (T_out*BVp, Co) f32
    k_taps = w_ref.shape[0]
    r_out = o_ref.shape[0]
    acc = jnp.zeros(o_ref.shape, jnp.float32) + b_ref[...]
    for k in range(k_taps):                      # K-tap accumulation in registers
        start = k * dil * row_stride             # multiple of 8 -> aligned slice
        acc = acc + jnp.dot(x_ref[start:start + r_out, :], w_ref[k],
                            preferred_element_type=jnp.float32)
    o_ref[...] = acc                             # single VMEM store


def temporal_conv(z, w, b, stride, dilation):
    """TemporalConv's Conv2d: kernel (K,1), padding (pad,0), stride (s,1),
    dilation (d,1) on a channels-last input z: (B, T, V, Ci).

    The K taps are accumulated inside the kernel from a single padded copy of
    the input (no K*Ci im2col tensor materialized in HBM).  Striding is done by
    computing the stride-1 output and temporally subsampling (exact equivalent).
    """
    K, Ci, Co = w.shape
    pad = (K + (K - 1) * (dilation - 1) - 1) // 2
    B, T, V, _ = z.shape
    T_full = T + 2 * pad - (K - 1) * dilation          # stride-1 output length
    BV = B * V
    BVp = _round_up(BV, 8)
    zt = jnp.transpose(z, (1, 0, 2, 3)).reshape(T, BV, Ci)
    zt = jnp.pad(zt, ((pad, pad), (0, BVp - BV), (0, 0)))
    x2d = zt.reshape((T + 2 * pad) * BVp, Ci).astype(jnp.bfloat16)
    # TODO(synk): for much larger B*T this single-block kernel should get a row
    # grid (tap offsets would then need element-offset index maps).
    y = pl.pallas_call(
        functools.partial(_tconv_kernel, dil=dilation, row_stride=BVp),
        out_shape=jax.ShapeDtypeStruct((T_full * BVp, Co), jnp.float32),
        in_specs=[pl.BlockSpec(memory_space=pltpu.MemorySpace.VMEM)] * 3,
        out_specs=pl.BlockSpec(memory_space=pltpu.MemorySpace.VMEM),
    )(x2d, w.astype(jnp.bfloat16), b.reshape(1, Co).astype(jnp.float32))
    y = y.reshape(T_full, BVp, Co)[::stride, :BV]
    return y.reshape(-1, B, V, Co).transpose(1, 0, 2, 3)


# ----------------------------- layer helpers -------------------------------

def batchnorm(x, bn):
    """Training-mode BatchNorm2d (batch statistics), channels-last."""
    # TODO(synk): batch-stat BN needs a full pass over the producer's output,
    # so it cannot be folded into the matmul epilogue without a second pass.
    axes = tuple(range(x.ndim - 1))
    mean = jnp.mean(x, axis=axes, keepdims=True)
    var = jnp.mean(jnp.square(x - mean), axis=axes, keepdims=True)
    return (x - mean) * jax.lax.rsqrt(var + BN_EPS) * bn["g"] + bn["b"]


def maxpool_t(x, stride):
    """MaxPool2d kernel (3,1), stride (s,1), padding (1,0), channels-last."""
    B, T, V, C = x.shape
    xp = jnp.pad(x, ((0, 0), (1, 1), (0, 0), (0, 0)), constant_values=-jnp.inf)
    T_out = (T - 1) // stride + 1
    taps = [xp[:, k: k + stride * (T_out - 1) + 1: stride] for k in range(3)]
    return jnp.maximum(jnp.maximum(taps[0], taps[1]), taps[2])


# --------------------------- module forward --------------------------------

def ms_tcn_forward(x, p, *, stride, dilations, residual_mode,
                   residual_kernel_size=1):
    """MultiScale_TemporalConv.forward; x: (N, Cin, T, V) -> (N, Cout, T_out, V)."""
    h = jnp.transpose(x, (0, 2, 3, 1))            # channels-last (N, T, V, Cin)
    N, T, V, Cin = h.shape
    nbr = len(dilations)
    bc = p["branches"][0]["w1"].shape[1]

    # ---- every 1x1 conv that reads x is fused into ONE lane-dense matmul ----
    w_list = [br["w1"] for br in p["branches"]] + [p["branch_pool"]["w1"],
                                                   p["branch_1x1"]["w1"]]
    b_list = [br["b1"] for br in p["branches"]] + [p["branch_pool"]["b1"],
                                                   p["branch_1x1"]["b1"]]
    fuse_res = (residual_mode == "conv") and (residual_kernel_size == 1)
    if fuse_res:
        w_list.append(p["res"]["w"][0])           # (Cin, Cout) slice of (1,Cin,Cout)
        b_list.append(p["res"]["b"])
    w_cat = jnp.concatenate(w_list, axis=1)
    b_cat = jnp.concatenate(b_list, axis=0)
    y = matmul_bias(h.reshape(-1, Cin), w_cat, b_cat).reshape(N, T, V, -1)

    outs = []
    # 4 dilation branches: 1x1 -> BN -> ReLU -> TemporalConv (conv + BN)
    for i, dil in enumerate(dilations):
        br = p["branches"][i]
        z = y[..., i * bc:(i + 1) * bc]
        z = jax.nn.relu(batchnorm(z, br["bn1"]))
        z = temporal_conv(z, br["wt"], br["bt"], stride, dil)
        outs.append(batchnorm(z, br["bn2"]))

    # maxpool branch: 1x1 -> BN -> ReLU -> MaxPool(3,1) -> BN
    bp = p["branch_pool"]
    z = y[..., nbr * bc:(nbr + 1) * bc]
    z = jax.nn.relu(batchnorm(z, bp["bn1"]))
    outs.append(batchnorm(maxpool_t(z, stride), bp["bn2"]))

    # strided 1x1 branch: stride-(s,1) 1x1 conv == stride-1 conv + subsample
    b1 = p["branch_1x1"]
    z = y[..., (nbr + 1) * bc:(nbr + 2) * bc][:, ::stride]
    outs.append(batchnorm(z, b1["bn1"]))

    out = jnp.concatenate(outs, axis=-1)

    # residual
    if residual_mode == "zero":
        res = 0.0
    elif residual_mode == "identity":
        res = h
    elif fuse_res:        # TemporalConv(in, out, kernel=1, stride) via fused matmul
        res = batchnorm(y[..., (nbr + 2) * bc:][:, ::stride], p["res"]["bn"])
    else:                 # general residual_kernel_size
        res = batchnorm(
            temporal_conv(h, p["res"]["w"], p["res"]["b"], stride, 1),
            p["res"]["bn"])

    out = out + res
    return jnp.transpose(out, (0, 3, 1, 2))       # back to (N, Cout, T_out, V)


# ----------------------------- parameter init ------------------------------

class KeyGen:
    def __init__(self, key):
        self.key = key

    def __call__(self):
        self.key, sub = jax.random.split(self.key)
        return sub


def init_params(key, in_channels, out_channels, *, kernel_size=3, stride=1,
                dilations=(1, 2, 3, 4), residual=True, residual_kernel_size=1):
    """Mirrors MultiScale_TemporalConv.__init__ + weights_init."""
    n_branches = len(dilations) + 2
    assert out_channels % n_branches == 0, \
        "# out channels should be multiples of # branches"
    bc = out_channels // n_branches
    kg = KeyGen(key)

    def conv1x1_w(cin, cout):                      # kaiming_normal fan_out = cout
        return math.sqrt(2.0 / cout) * jax.random.normal(
            kg(), (cin, cout), jnp.float32)

    def tconv_w(cin, cout, k):                     # fan_out = cout * k * 1
        return math.sqrt(2.0 / (cout * k)) * jax.random.normal(
            kg(), (k, cin, cout), jnp.float32)

    def bn(c):                                     # BN weight ~ N(1, 0.02), bias 0
        return {"g": 1.0 + 0.02 * jax.random.normal(kg(), (c,), jnp.float32),
                "b": jnp.zeros((c,), jnp.float32)}

    branches = []
    for _ in dilations:
        branches.append({
            "w1": conv1x1_w(in_channels, bc),
            "b1": jnp.zeros((bc,), jnp.float32),
            "bn1": bn(bc),
            "wt": tconv_w(bc, bc, kernel_size),
            "bt": jnp.zeros((bc,), jnp.float32),
            "bn2": bn(bc),
        })
    p = {
        "branches": branches,
        "branch_pool": {"w1": conv1x1_w(in_channels, bc),
                        "b1": jnp.zeros((bc,), jnp.float32),
                        "bn1": bn(bc), "bn2": bn(bc)},
        "branch_1x1": {"w1": conv1x1_w(in_channels, bc),
                       "b1": jnp.zeros((bc,), jnp.float32),
                       "bn1": bn(bc)},
    }
    if not residual:
        mode = "zero"
    elif in_channels == out_channels and stride == 1:
        mode = "identity"
    else:
        mode = "conv"
        p["res"] = {"w": tconv_w(in_channels, out_channels, residual_kernel_size),
                    "b": jnp.zeros((out_channels,), jnp.float32),
                    "bn": bn(out_channels)}
    return p, mode


# --------------------------------- main -------------------------------------

if __name__ == "__main__":
    key = jax.random.PRNGKey(0)
    k1, k2, kx1, kx2 = jax.random.split(key, 4)
    dils = (1, 2, 3, 4)

    # Config A: in==out, stride 1 -> identity residual
    N, Cin, T, V = 2, 12, 16, 25
    Cout = 12
    pA, modeA = init_params(k1, Cin, Cout, stride=1, dilations=dils)
    xA = jax.random.normal(kx1, (N, Cin, T, V), jnp.float32)
    fwdA = jax.jit(functools.partial(ms_tcn_forward, stride=1,
                                     dilations=dils, residual_mode=modeA))
    outA = fwdA(xA, pA)
    jax.block_until_ready(outA)
    assert outA.shape == (N, Cout, T, V), outA.shape
    assert outA.dtype == jnp.float32
    assert bool(jnp.all(jnp.isfinite(outA)))

    # Config B: channel expansion + temporal stride 2 -> TemporalConv residual
    Cin2, Cout2, stride2 = 6, 12, 2
    pB, modeB = init_params(k2, Cin2, Cout2, stride=stride2, dilations=dils)
    xB = jax.random.normal(kx2, (N, Cin2, T, V), jnp.float32)
    fwdB = jax.jit(functools.partial(ms_tcn_forward, stride=stride2,
                                     dilations=dils, residual_mode=modeB))
    outB = fwdB(xB, pB)
    jax.block_until_ready(outB)
    T_out = (T - 1) // stride2 + 1
    assert outB.shape == (N, Cout2, T_out, V), outB.shape
    assert bool(jnp.all(jnp.isfinite(outB)))

    print("KERNEL_OK")
</pallas_src>

<mosaic_0001>
module attributes {stable_mosaic.version = 11 : i64} {
  func.func @_matmul_bias_kernel(%arg0: i32, %arg1: memref<512x12xbf16, #tpu.memory_space<vmem>>, %arg2: memref<12x12xbf16, #tpu.memory_space<vmem>>, %arg3: memref<1x12xf32, #tpu.memory_space<vmem>>, %arg4: memref<512x12xf32, #tpu.memory_space<vmem>>) attributes {dimension_semantics = [#tpu.dimension_semantics<parallel>], iteration_bounds = array<i64: 2>, scalar_prefetch = 0 : i64, scratch_operands = 0 : i64, tpu.core_type = #tpu.core_type<tc>, window_params = [{transform_indices = @transform_0, window_bounds = array<i64: 512, 12>}, {pipeline_mode = #tpu.pipeline_mode<synchronous>, transform_indices = @transform_1, window_bounds = array<i64: 12, 12>}, {pipeline_mode = #tpu.pipeline_mode<synchronous>, transform_indices = @transform_2, window_bounds = array<i64: 1, 12>}, {transform_indices = @transform_3, window_bounds = array<i64: 512, 12>}]} {
    %c0 = arith.constant 0 : index
    %c0_0 = arith.constant 0 : index
    %0 = vector.load %arg1[%c0, %c0_0] : memref<512x12xbf16, #tpu.memory_space<vmem>>, vector<512x12xbf16>
    %c0_1 = arith.constant 0 : index
    %c0_2 = arith.constant 0 : index
    %1 = vector.load %arg2[%c0_1, %c0_2] : memref<12x12xbf16, #tpu.memory_space<vmem>>, vector<12x12xbf16>
    %cst = arith.constant dense<0.000000e+00> : vector<512x12xf32>
    %2 = tpu.matmul %0, %1, %cst {dimension_numbers = #tpu.dot_dimension_numbers<[1], [0], [0], [1], [0, 0, 1, 1], [], []>} : vector<512x12xbf16>, vector<12x12xbf16>, vector<512x12xf32> -> vector<512x12xf32>
    %c0_3 = arith.constant 0 : index
    %c0_4 = arith.constant 0 : index
    %3 = vector.load %arg3[%c0_3, %c0_4] : memref<1x12xf32, #tpu.memory_space<vmem>>, vector<1x12xf32>
    %4 = vector.broadcast %3 : vector<1x12xf32> to vector<512x12xf32>
    %5 = arith.addf %2, %4 : vector<512x12xf32>
    %c0_5 = arith.constant 0 : index
    %c0_6 = arith.constant 0 : index
    %6 = vector.load %arg4[%c0_5, %c0_6] : memref<512x12xf32, #tpu.memory_space<vmem>>, vector<512x12xf32>
    tpu.vector_store %arg4[%c0_5, %c0_6], %5 {strides = array<i32>} : memref<512x12xf32, #tpu.memory_space<vmem>>, vector<512x12xf32>,
    return
  }
  func.func @transform_0(%arg0: i32) -> (i32, i32) {
    %c0_i32 = arith.constant 0 : i32
    %c0_i32_0 = arith.constant 0 : i32
    return %arg0, %c0_i32 : i32, i32
  }
  func.func @transform_1(%arg0: i32) -> (i32, i32) {
    %c0_i32 = arith.constant 0 : i32
    %c0_i32_0 = arith.constant 0 : i32
    %c0_i32_1 = arith.constant 0 : i32
    return %c0_i32, %c0_i32_0 : i32, i32
  }
  func.func @transform_2(%arg0: i32) -> (i32, i32) {
    %c0_i32 = arith.constant 0 : i32
    %c0_i32_0 = arith.constant 0 : i32
    %c0_i32_1 = arith.constant 0 : i32
    return %c0_i32, %c0_i32_0 : i32, i32
  }
  func.func @transform_3(%arg0: i32) -> (i32, i32) {
    %c0_i32 = arith.constant 0 : i32
    %c0_i32_0 = arith.constant 0 : i32
    return %arg0, %c0_i32 : i32, i32
  }
}

module attributes {stable_mosaic.version = 11 : i64} {
  func.func @_tconv_kernel(%arg0: memref<1344x2xbf16, #tpu.memory_space<vmem>>, %arg1: memref<3x2x2xbf16, #tpu.memory_space<vmem>>, %arg2: memref<1x2xf32, #tpu.memory_space<vmem>>, %arg3: memref<896x2xf32, #tpu.memory_space<vmem>>) attributes {dimension_semantics = [], scalar_prefetch = 0 : i64, scratch_operands = 0 : i64, tpu.core_type = #tpu.core_type<tc>} {
    %cst = arith.constant 0.000000e+00 : f32
    %0 = vector.broadcast %cst : f32 to vector<896x2xf32>
    %c0 = arith.constant 0 : index
    %c0_0 = arith.constant 0 : index
    %1 = vector.load %arg2[%c0, %c0_0] : memref<1x2xf32, #tpu.memory_space<vmem>>, vector<1x2xf32>
    %2 = vector.broadcast %1 : vector<1x2xf32> to vector<896x2xf32>
    %3 = arith.addf %0, %2 : vector<896x2xf32>
    %c0_1 = arith.constant 0 : index
    %c0_2 = arith.constant 0 : index
    %4 = vector.load %arg0[%c0_1, %c0_2] : memref<1344x2xbf16, #tpu.memory_space<vmem>>, vector<896x2xbf16>
    %c0_3 = arith.constant 0 : index
    %c0_4 = arith.constant 0 : index
    %c0_5 = arith.constant 0 : index
    %5 = vector.load %arg1[%c0_3, %c0_4, %c0_5] : memref<3x2x2xbf16, #tpu.memory_space<vmem>>, vector<1x2x2xbf16>
    %6 = vector.shape_cast %5 : vector<1x2x2xbf16> to vector<2x2xbf16>
    %cst_6 = arith.constant dense<0.000000e+00> : vector<896x2xf32>
    %7 = tpu.matmul %4, %6, %cst_6 {dimension_numbers = #tpu.dot_dimension_numbers<[1], [0], [0], [1], [0, 0, 1, 1], [], []>} : vector<896x2xbf16>, vector<2x2xbf16>, vector<896x2xf32> -> vector<896x2xf32>
    %8 = arith.addf %3, %7 : vector<896x2xf32>
    %c224 = arith.constant 224 : index
    %c0_7 = arith.constant 0 : index
    %9 = vector.load %arg0[%c224, %c0_7] : memref<1344x2xbf16, #tpu.memory_space<vmem>>, vector<896x2xbf16>
    %c1 = arith.constant 1 : index
    %c0_8 = arith.constant 0 : index
    %c0_9 = arith.constant 0 : index
    %10 = vector.load %arg1[%c1, %c0_8, %c0_9] : memref<3x2x2xbf16, #tpu.memory_space<vmem>>, vector<1x2x2xbf16>
    %11 = vector.shape_cast %10 : vector<1x2x2xbf16> to vector<2x2xbf16>
    %cst_10 = arith.constant dense<0.000000e+00> : vector<896x2xf32>
    %12 = tpu.matmul %9, %11, %cst_10 {dimension_numbers = #tpu.dot_dimension_numbers<[1], [0], [0], [1], [0, 0, 1, 1], [], []>} : vector<896x2xbf16>, vector<2x2xbf16>, vector<896x2xf32> -> vector<896x2xf32>
    %13 = arith.addf %8, %12 : vector<896x2xf32>
    %c448 = arith.constant 448 : index
    %c0_11 = arith.constant 0 : index
    %14 = vector.load %arg0[%c448, %c0_11] : memref<1344x2xbf16, #tpu.memory_space<vmem>>, vector<896x2xbf16>
    %c2 = arith.constant 2 : index
    %c0_12 = arith.constant 0 : index
    %c0_13 = arith.constant 0 : index
    %15 = vector.load %arg1[%c2, %c0_12, %c0_13] : memref<3x2x2xbf16, #tpu.memory_space<vmem>>, vector<1x2x2xbf16>
    %16 = vector.shape_cast %15 : vector<1x2x2xbf16> to vector<2x2xbf16>
    %cst_14 = arith.constant dense<0.000000e+00> : vector<896x2xf32>
    %17 = tpu.matmul %14, %16, %cst_14 {dimension_numbers = #tpu.dot_dimension_numbers<[1], [0], [0], [1], [0, 0, 1, 1], [], []>} : vector<896x2xbf16>, vector<2x2xbf16>, vector<896x2xf32> -> vector<896x2xf32>
    %18 = arith.addf %13, %17 : vector<896x2xf32>
    %c0_15 = arith.constant 0 : index
    %c0_16 = arith.constant 0 : index
    %19 = vector.load %arg3[%c0_15, %c0_16] : memref<896x2xf32, #tpu.memory_space<vmem>>, vector<896x2xf32>
    tpu.vector_store %arg3[%c0_15, %c0_16], %18 {strides = array<i32>} : memref<896x2xf32, #tpu.memory_space<vmem>>, vector<896x2xf32>,
    return
  }
}

module attributes {stable_mosaic.version = 11 : i64} {
  func.func @_tconv_kernel(%arg0: memref<1232x2xbf16, #tpu.memory_space<vmem>>, %arg1: memref<3x2x2xbf16, #tpu.memory_space<vmem>>, %arg2: memref<1x2xf32, #tpu.memory_space<vmem>>, %arg3: memref<896x2xf32, #tpu.memory_space<vmem>>) attributes {dimension_semantics = [], scalar_prefetch = 0 : i64, scratch_operands = 0 : i64, tpu.core_type = #tpu.core_type<tc>} {
    %cst = arith.constant 0.000000e+00 : f32
    %0 = vector.broadcast %cst : f32 to vector<896x2xf32>
    %c0 = arith.constant 0 : index
    %c0_0 = arith.constant 0 : index
    %1 = vector.load %arg2[%c0, %c0_0] : memref<1x2xf32, #tpu.memory_space<vmem>>, vector<1x2xf32>
    %2 = vector.broadcast %1 : vector<1x2xf32> to vector<896x2xf32>
    %3 = arith.addf %0, %2 : vector<896x2xf32>
    %c0_1 = arith.constant 0 : index
    %c0_2 = arith.constant 0 : index
    %4 = vector.load %arg0[%c0_1, %c0_2] : memref<1232x2xbf16, #tpu.memory_space<vmem>>, vector<896x2xbf16>
    %c0_3 = arith.constant 0 : index
    %c0_4 = arith.constant 0 : index
    %c0_5 = arith.constant 0 : index
    %5 = vector.load %arg1[%c0_3, %c0_4, %c0_5] : memref<3x2x2xbf16, #tpu.memory_space<vmem>>, vector<1x2x2xbf16>
    %6 = vector.shape_cast %5 : vector<1x2x2xbf16> to vector<2x2xbf16>
    %cst_6 = arith.constant dense<0.000000e+00> : vector<896x2xf32>
    %7 = tpu.matmul %4, %6, %cst_6 {dimension_numbers = #tpu.dot_dimension_numbers<[1], [0], [0], [1], [0, 0, 1, 1], [], []>} : vector<896x2xbf16>, vector<2x2xbf16>, vector<896x2xf32> -> vector<896x2xf32>
    %8 = arith.addf %3, %7 : vector<896x2xf32>
    %c168 = arith.constant 168 : index
    %c0_7 = arith.constant 0 : index
    %9 = vector.load %arg0[%c168, %c0_7] : memref<1232x2xbf16, #tpu.memory_space<vmem>>, vector<896x2xbf16>
    %c1 = arith.constant 1 : index
    %c0_8 = arith.constant 0 : index
    %c0_9 = arith.constant 0 : index
    %10 = vector.load %arg1[%c1, %c0_8, %c0_9] : memref<3x2x2xbf16, #tpu.memory_space<vmem>>, vector<1x2x2xbf16>
    %11 = vector.shape_cast %10 : vector<1x2x2xbf16> to vector<2x2xbf16>
    %cst_10 = arith.constant dense<0.000000e+00> : vector<896x2xf32>
    %12 = tpu.matmul %9, %11, %cst_10 {dimension_numbers = #tpu.dot_dimension_numbers<[1], [0], [0], [1], [0, 0, 1, 1], [], []>} : vector<896x2xbf16>, vector<2x2xbf16>, vector<896x2xf32> -> vector<896x2xf32>
    %13 = arith.addf %8, %12 : vector<896x2xf32>
    %c336 = arith.constant 336 : index
    %c0_11 = arith.constant 0 : index
    %14 = vector.load %arg0[%c336, %c0_11] : memref<1232x2xbf16, #tpu.memory_space<vmem>>, vector<896x2xbf16>
    %c2 = arith.constant 2 : index
    %c0_12 = arith.constant 0 : index
    %c0_13 = arith.constant 0 : index
    %15 = vector.load %arg1[%c2, %c0_12, %c0_13] : memref<3x2x2xbf16, #tpu.memory_space<vmem>>, vector<1x2x2xbf16>
    %16 = vector.shape_cast %15 : vector<1x2x2xbf16> to vector<2x2xbf16>
    %cst_14 = arith.constant dense<0.000000e+00> : vector<896x2xf32>
    %17 = tpu.matmul %14, %16, %cst_14 {dimension_numbers = #tpu.dot_dimension_numbers<[1], [0], [0], [1], [0, 0, 1, 1], [], []>} : vector<896x2xbf16>, vector<2x2xbf16>, vector<896x2xf32> -> vector<896x2xf32>
    %18 = arith.addf %13, %17 : vector<896x2xf32>
    %c0_15 = arith.constant 0 : index
    %c0_16 = arith.constant 0 : index
    %19 = vector.load %arg3[%c0_15, %c0_16] : memref<896x2xf32, #tpu.memory_space<vmem>>, vector<896x2xf32>
    tpu.vector_store %arg3[%c0_15, %c0_16], %18 {strides = array<i32>} : memref<896x2xf32, #tpu.memory_space<vmem>>, vector<896x2xf32>,
    return
  }
}

module attributes {stable_mosaic.version = 11 : i64} {
  func.func @_tconv_kernel(%arg0: memref<1120x2xbf16, #tpu.memory_space<vmem>>, %arg1: memref<3x2x2xbf16, #tpu.memory_space<vmem>>, %arg2: memref<1x2xf32, #tpu.memory_space<vmem>>, %arg3: memref<896x2xf32, #tpu.memory_space<vmem>>) attributes {dimension_semantics = [], scalar_prefetch = 0 : i64, scratch_operands = 0 : i64, tpu.core_type = #tpu.core_type<tc>} {
    %cst = arith.constant 0.000000e+00 : f32
    %0 = vector.broadcast %cst : f32 to vector<896x2xf32>
    %c0 = arith.constant 0 : index
    %c0_0 = arith.constant 0 : index
    %1 = vector.load %arg2[%c0, %c0_0] : memref<1x2xf32, #tpu.memory_space<vmem>>, vector<1x2xf32>
    %2 = vector.broadcast %1 : vector<1x2xf32> to vector<896x2xf32>
    %3 = arith.addf %0, %2 : vector<896x2xf32>
    %c0_1 = arith.constant 0 : index
    %c0_2 = arith.constant 0 : index
    %4 = vector.load %arg0[%c0_1, %c0_2] : memref<1120x2xbf16, #tpu.memory_space<vmem>>, vector<896x2xbf16>
    %c0_3 = arith.constant 0 : index
    %c0_4 = arith.constant 0 : index
    %c0_5 = arith.constant 0 : index
    %5 = vector.load %arg1[%c0_3, %c0_4, %c0_5] : memref<3x2x2xbf16, #tpu.memory_space<vmem>>, vector<1x2x2xbf16>
    %6 = vector.shape_cast %5 : vector<1x2x2xbf16> to vector<2x2xbf16>
    %cst_6 = arith.constant dense<0.000000e+00> : vector<896x2xf32>
    %7 = tpu.matmul %4, %6, %cst_6 {dimension_numbers = #tpu.dot_dimension_numbers<[1], [0], [0], [1], [0, 0, 1, 1], [], []>} : vector<896x2xbf16>, vector<2x2xbf16>, vector<896x2xf32> -> vector<896x2xf32>
    %8 = arith.addf %3, %7 : vector<896x2xf32>
    %c112 = arith.constant 112 : index
    %c0_7 = arith.constant 0 : index
    %9 = vector.load %arg0[%c112, %c0_7] : memref<1120x2xbf16, #tpu.memory_space<vmem>>, vector<896x2xbf16>
    %c1 = arith.constant 1 : index
    %c0_8 = arith.constant 0 : index
    %c0_9 = arith.constant 0 : index
    %10 = vector.load %arg1[%c1, %c0_8, %c0_9] : memref<3x2x2xbf16, #tpu.memory_space<vmem>>, vector<1x2x2xbf16>
    %11 = vector.shape_cast %10 : vector<1x2x2xbf16> to vector<2x2xbf16>
    %cst_10 = arith.constant dense<0.000000e+00> : vector<896x2xf32>
    %12 = tpu.matmul %9, %11, %cst_10 {dimension_numbers = #tpu.dot_dimension_numbers<[1], [0], [0], [1], [0, 0, 1, 1], [], []>} : vector<896x2xbf16>, vector<2x2xbf16>, vector<896x2xf32> -> vector<896x2xf32>
    %13 = arith.addf %8, %12 : vector<896x2xf32>
    %c224 = arith.constant 224 : index
    %c0_11 = arith.constant 0 : index
    %14 = vector.load %arg0[%c224, %c0_11] : memref<1120x2xbf16, #tpu.memory_space<vmem>>, vector<896x2xbf16>
    %c2 = arith.constant 2 : index
    %c0_12 = arith.constant 0 : index
    %c0_13 = arith.constant 0 : index
    %15 = vector.load %arg1[%c2, %c0_12, %c0_13] : memref<3x2x2xbf16, #tpu.memory_space<vmem>>, vector<1x2x2xbf16>
    %16 = vector.shape_cast %15 : vector<1x2x2xbf16> to vector<2x2xbf16>
    %cst_14 = arith.constant dense<0.000000e+00> : vector<896x2xf32>
    %17 = tpu.matmul %14, %16, %cst_14 {dimension_numbers = #tpu.dot_dimension_numbers<[1], [0], [0], [1], [0, 0, 1, 1], [], []>} : vector<896x2xbf16>, vector<2x2xbf16>, vector<896x2xf32> -> vector<896x2xf32>
    %18 = arith.addf %13, %17 : vector<896x2xf32>
    %c0_15 = arith.constant 0 : index
    %c0_16 = arith.constant 0 : index
    %19 = vector.load %arg3[%c0_15, %c0_16] : memref<896x2xf32, #tpu.memory_space<vmem>>, vector<896x2xf32>
    tpu.vector_store %arg3[%c0_15, %c0_16], %18 {strides = array<i32>} : memref<896x2xf32, #tpu.memory_space<vmem>>, vector<896x2xf32>,
    return
  }
}

module attributes {stable_mosaic.version = 11 : i64} {
  func.func @_tconv_kernel(%arg0: memref<1008x2xbf16, #tpu.memory_space<vmem>>, %arg1: memref<3x2x2xbf16, #tpu.memory_space<vmem>>, %arg2: memref<1x2xf32, #tpu.memory_space<vmem>>, %arg3: memref<896x2xf32, #tpu.memory_space<vmem>>) attributes {dimension_semantics = [], scalar_prefetch = 0 : i64, scratch_operands = 0 : i64, tpu.core_type = #tpu.core_type<tc>} {
    %cst = arith.constant 0.000000e+00 : f32
    %0 = vector.broadcast %cst : f32 to vector<896x2xf32>
    %c0 = arith.constant 0 : index
    %c0_0 = arith.constant 0 : index
    %1 = vector.load %arg2[%c0, %c0_0] : memref<1x2xf32, #tpu.memory_space<vmem>>, vector<1x2xf32>
    %2 = vector.broadcast %1 : vector<1x2xf32> to vector<896x2xf32>
    %3 = arith.addf %0, %2 : vector<896x2xf32>
    %c0_1 = arith.constant 0 : index
    %c0_2 = arith.constant 0 : index
    %4 = vector.load %arg0[%c0_1, %c0_2] : memref<1008x2xbf16, #tpu.memory_space<vmem>>, vector<896x2xbf16>
    %c0_3 = arith.constant 0 : index
    %c0_4 = arith.constant 0 : index
    %c0_5 = arith.constant 0 : index
    %5 = vector.load %arg1[%c0_3, %c0_4, %c0_5] : memref<3x2x2xbf16, #tpu.memory_space<vmem>>, vector<1x2x2xbf16>
    %6 = vector.shape_cast %5 : vector<1x2x2xbf16> to vector<2x2xbf16>
    %cst_6 = arith.constant dense<0.000000e+00> : vector<896x2xf32>
    %7 = tpu.matmul %4, %6, %cst_6 {dimension_numbers = #tpu.dot_dimension_numbers<[1], [0], [0], [1], [0, 0, 1, 1], [], []>} : vector<896x2xbf16>, vector<2x2xbf16>, vector<896x2xf32> -> vector<896x2xf32>
    %8 = arith.addf %3, %7 : vector<896x2xf32>
    %c56 = arith.constant 56 : index
    %c0_7 = arith.constant 0 : index
    %9 = vector.load %arg0[%c56, %c0_7] : memref<1008x2xbf16, #tpu.memory_space<vmem>>, vector<896x2xbf16>
    %c1 = arith.constant 1 : index
    %c0_8 = arith.constant 0 : index
    %c0_9 = arith.constant 0 : index
    %10 = vector.load %arg1[%c1, %c0_8, %c0_9] : memref<3x2x2xbf16, #tpu.memory_space<vmem>>, vector<1x2x2xbf16>
    %11 = vector.shape_cast %10 : vector<1x2x2xbf16> to vector<2x2xbf16>
    %cst_10 = arith.constant dense<0.000000e+00> : vector<896x2xf32>
    %12 = tpu.matmul %9, %11, %cst_10 {dimension_numbers = #tpu.dot_dimension_numbers<[1], [0], [0], [1], [0, 0, 1, 1], [], []>} : vector<896x2xbf16>, vector<2x2xbf16>, vector<896x2xf32> -> vector<896x2xf32>
    %13 = arith.addf %8, %12 : vector<896x2xf32>
    %c112 = arith.constant 112 : index
    %c0_11 = arith.constant 0 : index
    %14 = vector.load %arg0[%c112, %c0_11] : memref<1008x2xbf16, #tpu.memory_space<vmem>>, vector<896x2xbf16>
    %c2 = arith.constant 2 : index
    %c0_12 = arith.constant 0 : index
    %c0_13 = arith.constant 0 : index
    %15 = vector.load %arg1[%c2, %c0_12, %c0_13] : memref<3x2x2xbf16, #tpu.memory_space<vmem>>, vector<1x2x2xbf16>
    %16 = vector.shape_cast %15 : vector<1x2x2xbf16> to vector<2x2xbf16>
    %cst_14 = arith.constant dense<0.000000e+00> : vector<896x2xf32>
    %17 = tpu.matmul %14, %16, %cst_14 {dimension_numbers = #tpu.dot_dimension_numbers<[1], [0], [0], [1], [0, 0, 1, 1], [], []>} : vector<896x2xbf16>, vector<2x2xbf16>, vector<896x2xf32> -> vector<896x2xf32>
    %18 = arith.addf %13, %17 : vector<896x2xf32>
    %c0_15 = arith.constant 0 : index
    %c0_16 = arith.constant 0 : index
    %19 = vector.load %arg3[%c0_15, %c0_16] : memref<896x2xf32, #tpu.memory_space<vmem>>, vector<896x2xf32>
    tpu.vector_store %arg3[%c0_15, %c0_16], %18 {strides = array<i32>} : memref<896x2xf32, #tpu.memory_space<vmem>>, vector<896x2xf32>,
    return
  }
}

</mosaic_0001>

<bundles_post_ra>
// kernel: ms_tcn_forward.5
= control target key start
LH: loop header
LB: loop body
LE: loop exit
PB: predicated region body
PF: predicated region fallthrough
CT: control target
= control target key end

     0   :  { %s1172_s12 = smov 0   ;;  %s1461_s0 = inlined_call_operand.vmem [shape: bf16[1024,12], index: 0, kind: input, shape index: {}]   ;;  %s1462_s1 = inlined_call_operand.vmem [shape: bf16[12,12], index: 1, kind: input, shape index: {}]   ;;  %s1463_s2 = inlined_call_operand.vmem [shape: f32[1,12], index: 2, kind: input, shape index: {}]   ;;  %s1464_s3 = inlined_call_operand.vmem [shape: f32[1024,12], index: 3, kind: output, shape index: {}]  }
   0x1 LB: > { %s923_s13 = sadd.s32 4294967295, %s1150_s12   ;;  %p927_p0 = scmp.ge.s32.totalorder %s1150_s12, 1  ;;  %s1150_s12 = sphi %s1172_s12, %s13_s12  }
   0x2   : > { %p138_p1 = scmp.lt.s32.totalorder %s1150_s12, 3 }
   0x4   : > { %p139_p2 = pnand %p927_p0, %p138_p1 }
   0x5   : > { %v1111_v0 = vld [vmem:[%s1462_s1] sm:$0x3f] (!%p139_p2)   ;;  %vm510_vm0 = vcmask (!%p139_p2), 1045504   ;;  %s928_s16 = sshll.u32 (!%p139_p2), %s923_s13, 6  ;;  %vm413_vm1 = vcmask (!%p139_p2), 97280  }
   0x6   : > { %142 = sbr.rel (%p139_p2) target bundleno = 293 (0x125), region = 32  ;;  %1101 = vmatprep.subr.msk.bf16.mxu0 (!%p139_p2), %vm510_vm0, %v1111_v0  ;;  %1102 = vmatprep.subr.msk.bf16.mxu1 (!%p139_p2), %vm510_vm0, %v1111_v0  ;;  %v512_v1 = vsel (!%p139_p2), %vm510_vm0, %v1111_v0, 0  ;;  %p163_p3 = scmp.lt.s32.totalorder (!%p139_p2), %s928_s16, 127  ;;  %v1259_v34 = vld [vmem:[%s1463_s2] ss:$0 sm:$0xff] (!%p139_p2) }
   0x7   : > { %1034 = vmatpush3.bf16.msra.mxu0 (!%p139_p2), %v512_v1  ;;  %1100 = vmatpush3.bf16.msra.mxu1 (!%p139_p2), %v512_v1 }
   0xd   : > { %s1466_s16 = smov (!%p163_p3, %s928_s16), 127 }
   0xe   : > { %s929_s17 = sshll.u32 %s1466_s16, 2  ;;  %s931_s21 = sshll.u32 %s1466_s16, 3 }
   0xf   : > { %s1189_s20 = scalar_lea.vmem %s1461_s0, %s929_s17  ;;  %s1264_s26 = scalar_lea.vmem %s1464_s3, %s931_s21 }
  0x10   : > { %v1112_v2 = vld [vmem:[%s1189_s20] sm:$0xff]   ;;  %v1114_v4 = vld [vmem:[%s1189_s20 + $0x8] sm:$0xff]   ;;  %v1116_v6 = vld [vmem:[%s1189_s20 + $0x10] sm:$0xff]  }
  0x11   : > { %v1113_v3 = vld [vmem:[%s1189_s20 + $0x80] sm:$0xff]   ;;  %1035 = vmatprep.mubr.msk.bf16.mxu0 %vm413_vm1, %v1112_v2  ;;  %v1115_v5 = vld [vmem:[%s1189_s20 + $0x88] sm:$0xff]   ;;  %v1117_v7 = vld [vmem:[%s1189_s20 + $0x90] sm:$0xff]  }
  0x12   : > { %1067 = vmatprep.mubr.msk.bf16.mxu1 %vm413_vm1, %v1113_v3  ;;  %1036 = vmatmul.mubr.msk.bf16.vlgmr.msra.gmra.mrb[0].mxu0 %vm413_vm1, %v1114_v4  ;;  %v1118_v8 = vld [vmem:[%s1189_s20 + $0x18] sm:$0xff]   ;;  %v1120_v10 = vld [vmem:[%s1189_s20 + $0x20] sm:$0xff]   ;;  %v1122_v12 = vld [vmem:[%s1189_s20 + $0x28] sm:$0xff]  }
  0x13   : > { %1068 = vmatmul.mubr.msk.bf16.vlgmr.msra.gmra.mrb[0].mxu1 %vm413_vm1, %v1115_v5  ;;  %1039 = vmatprep.mubr.msk.bf16.mxu0 %vm413_vm1, %v1116_v6  ;;  %v1119_v9 = vld [vmem:[%s1189_s20 + $0x98] sm:$0xff]   ;;  %v1121_v11 = vld [vmem:[%s1189_s20 + $0xa0] sm:$0xff]   ;;  %v1123_v13 = vld [vmem:[%s1189_s20 + $0xa8] sm:$0xff]  }
  0x14   : > { %1071 = vmatprep.mubr.msk.bf16.mxu1 %vm413_vm1, %v1117_v7  ;;  %v1124_v14 = vld [vmem:[%s1189_s20 + $0x30] sm:$0xff]   ;;  %v1126_v16 = vld [vmem:[%s1189_s20 + $0x38] sm:$0xff]   ;;  %v1128_v18 = vld [vmem:[%s1189_s20 + $0x40] sm:$0xff]  }
  0x15   : > { %v1125_v15 = vld [vmem:[%s1189_s20 + $0xb0] sm:$0xff]   ;;  %v1127_v17 = vld [vmem:[%s1189_s20 + $0xb8] sm:$0xff]   ;;  %v1129_v19 = vld [vmem:[%s1189_s20 + $0xc0] sm:$0xff]  }
  0x16   : > { %v1130_v20 = vld [vmem:[%s1189_s20 + $0x48] sm:$0xff]   ;;  %v1132_v22 = vld [vmem:[%s1189_s20 + $0x50] sm:$0xff]   ;;  %v1134_v24 = vld [vmem:[%s1189_s20 + $0x58] sm:$0xff]  }
  0x17   : > { %v1131_v21 = vld [vmem:[%s1189_s20 + $0xc8] sm:$0xff]   ;;  %v1133_v23 = vld [vmem:[%s1189_s20 + $0xd0] sm:$0xff]   ;;  %v1135_v25 = vld [vmem:[%s1189_s20 + $0xd8] sm:$0xff]  }
  0x18   : > { %v1136_v26 = vld [vmem:[%s1189_s20 + $0x60] sm:$0xff]   ;;  %v1138_v28 = vld [vmem:[%s1189_s20 + $0x68] sm:$0xff]   ;;  %v1140_v30 = vld [vmem:[%s1189_s20 + $0x70] sm:$0xff]  }
  0x19   : > { %v1137_v27 = vld [vmem:[%s1189_s20 + $0xe0] sm:$0xff]   ;;  %v1139_v29 = vld [vmem:[%s1189_s20 + $0xe8] sm:$0xff]   ;;  %v1141_v31 = vld [vmem:[%s1189_s20 + $0xf0] sm:$0xff]  }
  0x1a   : > { %1040 = vmatmul.mubr.msk.bf16.gmra.mrb[4].mxu0 %vm413_vm1, %v1118_v8  ;;  %v1142_v32 = vld [vmem:[%s1189_s20 + $0x78] sm:$0xff]  }
  0x1b   : > { %1072 = vmatmul.mubr.msk.bf16.gmra.mrb[4].mxu1 %vm413_vm1, %v1119_v9  ;;  %1043 = vmatprep.mubr.msk.bf16.mxu0 %vm413_vm1, %v1120_v10  ;;  %v1143_v33 = vld [vmem:[%s1189_s20 + $0xf8] sm:$0xff]  }
  0x1c   : > { %1075 = vmatprep.mubr.msk.bf16.mxu1 %vm413_vm1, %v1121_v11 }
  0x22   : > { %1044 = vmatmul.mubr.msk.bf16.gmra.mrb[8].mxu0 %vm413_vm1, %v1122_v12 }
  0x23   : > { %1076 = vmatmul.mubr.msk.bf16.gmra.mrb[8].mxu1 %vm413_vm1, %v1123_v13  ;;  %1047 = vmatprep.mubr.msk.bf16.mxu0 %vm413_vm1, %v1124_v14 }
  0x24   : > { %1079 = vmatprep.mubr.msk.bf16.mxu1 %vm413_vm1, %v1125_v15 }
  0x2a   : > { %1048 = vmatmul.mubr.msk.bf16.gmra.mrb[12].mxu0 %vm413_vm1, %v1126_v16 }
  0x2b   : > { %1080 = vmatmul.mubr.msk.bf16.gmra.mrb[12].mxu1 %vm413_vm1, %v1127_v17  ;;  %1051 = vmatprep.mubr.msk.bf16.mxu0 %vm413_vm1, %v1128_v18 }
  0x2c   : > { %1083 = vmatprep.mubr.msk.bf16.mxu1 %vm413_vm1, %v1129_v19 }
  0x32   : > { %1052 = vmatmul.mubr.msk.bf16.gmra.mrb[16].mxu0 %vm413_vm1, %v1130_v20 }
  0x33   : > { %1084 = vmatmul.mubr.msk.bf16.gmra.mrb[16].mxu1 %vm413_vm1, %v1131_v21  ;;  %1055 = vmatprep.mubr.msk.bf16.mxu0 %vm413_vm1, %v1132_v22 }
  0x34   : > { %1087 = vmatprep.mubr.msk.bf16.mxu1 %vm413_vm1, %v1133_v23 }
  0x3a   : > { %1056 = vmatmul.mubr.msk.bf16.gmra.mrb[20].mxu0 %vm413_vm1, %v1134_v24 }
  0x3b   : > { %1088 = vmatmul.mubr.msk.bf16.gmra.mrb[20].mxu1 %vm413_vm1, %v1135_v25  ;;  %1059 = vmatprep.mubr.msk.bf16.mxu0 %vm413_vm1, %v1136_v26 }
  0x3c   : > { %1091 = vmatprep.mubr.msk.bf16.mxu1 %vm413_vm1, %v1137_v27 }
  0x42   : > { %1060 = vmatmul.mubr.msk.bf16.gmra.mrb[24].mxu0 %vm413_vm1, %v1138_v28 }
  0x43   : > { %1092 = vmatmul.mubr.msk.bf16.gmra.mrb[24].mxu1 %vm413_vm1, %v1139_v29  ;;  %1063 = vmatprep.mubr.msk.bf16.mxu0 %vm413_vm1, %v1140_v30 }
  0x44   : > { %1095 = vmatprep.mubr.msk.bf16.mxu1 %vm413_vm1, %v1141_v31 }
  0x4a   : > { %1064 = vmatmul.mubr.msk.bf16.gmra.mrb[28].mxu0 %vm413_vm1, %v1142_v32 }
  0x4b   : > { %1096 = vmatmul.mubr.msk.bf16.gmra.mrb[28].mxu1 %vm413_vm1, %v1143_v33 }
  0xe5   : > { %v1037_v35 = vpop.f32.mrb[0].mxu0 }
  0xe6   : > { %v557_v36 = vadd.f32 %v1037_v35, %v1259_v34  ;;  %v1069_v37 = vpop.f32.mrb[0].mxu1  ;;  %v548_v38 = vpop.f32.mrb[1].mxu0 }
  0xe7   : > { %v685_v39 = vadd.f32 %v1069_v37, %v1259_v34  ;;  %v549_v40 = vadd.f32 %v1259_v34, %v548_v38  ;;  %v676_v41 = vpop.f32.mrb[1].mxu1  ;;  %v1038_v42 = vpop.f32.mrb[2].mxu0 }
  0xe8   : > { %805 = vst.msk [vmem:[%s1264_s26 + $0x10] sm:$0xff] %vm413_vm1, %v557_v36  ;;  %v677_v43 = vadd.f32 %v1259_v34, %v676_v41  ;;  %v560_v44 = vadd.f32 %v1038_v42, %v1259_v34  ;;  %v1070_v45 = vpop.f32.mrb[2].mxu1  ;;  %v551_v46 = vpop.f32.mrb[3].mxu0 }
  0xe9   : > { %837 = vst.msk [vmem:[%s1264_s26 + $0x110] sm:$0xff] %vm413_vm1, %v685_v39  ;;  %803 = vst.msk [vmem:[%s1264_s26] sm:$0xff] %vm413_vm1, %v549_v40  ;;  %v688_v47 = vadd.f32 %v1070_v45, %v1259_v34  ;;  %v552_v48 = vadd.f32 %v1259_v34, %v551_v46  ;;  %v679_v49 = vpop.f32.mrb[3].mxu1 }
  0xea   : > { %835 = vst.msk [vmem:[%s1264_s26 + $0x100] sm:$0xff] %vm413_vm1, %v677_v43  ;;  %806 = vst.msk [vmem:[%s1264_s26 + $0x18] sm:$0xff] %vm413_vm1, %v560_v44  ;;  %v680_v50 = vadd.f32 %v1259_v34, %v679_v49 }
  0xeb   : > { %838 = vst.msk [vmem:[%s1264_s26 + $0x118] sm:$0xff] %vm413_vm1, %v688_v47  ;;  %804 = vst.msk [vmem:[%s1264_s26 + $0x8] sm:$0xff] %vm413_vm1, %v552_v48 }
  0xec   : > { %836 = vst.msk [vmem:[%s1264_s26 + $0x108] sm:$0xff] %vm413_vm1, %v680_v50 }
  0xed   : > { %v1041_v51 = vpop.f32.mrb[4].mxu0 }
  0xee   : > { %v573_v52 = vadd.f32 %v1041_v51, %v1259_v34  ;;  %v1073_v53 = vpop.f32.mrb[4].mxu1  ;;  %v564_v54 = vpop.f32.mrb[5].mxu0 }
  0xef   : > { %v701_v55 = vadd.f32 %v1073_v53, %v1259_v34  ;;  %v565_v56 = vadd.f32 %v1259_v34, %v564_v54  ;;  %v692_v57 = vpop.f32.mrb[5].mxu1  ;;  %v1042_v58 = vpop.f32.mrb[6].mxu0 }
  0xf0   : > { %809 = vst.msk [vmem:[%s1264_s26 + $0x30] sm:$0xff] %vm413_vm1, %v573_v52  ;;  %v693_v59 = vadd.f32 %v1259_v34, %v692_v57  ;;  %v576_v60 = vadd.f32 %v1042_v58, %v1259_v34  ;;  %v1074_v61 = vpop.f32.mrb[6].mxu1  ;;  %v567_v62 = vpop.f32.mrb[7].mxu0 }
  0xf1   : > { %841 = vst.msk [vmem:[%s1264_s26 + $0x130] sm:$0xff] %vm413_vm1, %v701_v55  ;;  %807 = vst.msk [vmem:[%s1264_s26 + $0x20] sm:$0xff] %vm413_vm1, %v565_v56  ;;  %v704_v63 = vadd.f32 %v1074_v61, %v1259_v34  ;;  %v568_v0 = vadd.f32 %v1259_v34, %v567_v62  ;;  %v695_v1 = vpop.f32.mrb[7].mxu1 }
  0xf2   : > { %839 = vst.msk [vmem:[%s1264_s26 + $0x120] sm:$0xff] %vm413_vm1, %v693_v59  ;;  %810 = vst.msk [vmem:[%s1264_s26 + $0x38] sm:$0xff] %vm413_vm1, %v576_v60  ;;  %v696_v2 = vadd.f32 %v1259_v34, %v695_v1 }
  0xf3   : > { %842 = vst.msk [vmem:[%s1264_s26 + $0x138] sm:$0xff] %vm413_vm1, %v704_v63  ;;  %808 = vst.msk [vmem:[%s1264_s26 + $0x28] sm:$0xff] %vm413_vm1, %v568_v0 }
  0xf4   : > { %840 = vst.msk [vmem:[%s1264_s26 + $0x128] sm:$0xff] %vm413_vm1, %v696_v2 }
  0xf5   : > { %v1045_v3 = vpop.f32.mrb[8].mxu0 }
  0xf6   : > { %v589_v4 = vadd.f32 %v1045_v3, %v1259_v34  ;;  %v1077_v5 = vpop.f32.mrb[8].mxu1  ;;  %v580_v6 = vpop.f32.mrb[9].mxu0 }
  0xf7   : > { %v717_v7 = vadd.f32 %v1077_v5, %v1259_v34  ;;  %v581_v8 = vadd.f32 %v1259_v34, %v580_v6  ;;  %v708_v9 = vpop.f32.mrb[9].mxu1  ;;  %v1046_v10 = vpop.f32.mrb[10].mxu0 }
  0xf8   : > { %813 = vst.msk [vmem:[%s1264_s26 + $0x50] sm:$0xff] %vm413_vm1, %v589_v4  ;;  %v709_v11 = vadd.f32 %v1259_v34, %v708_v9  ;;  %v592_v12 = vadd.f32 %v1046_v10, %v1259_v34  ;;  %v1078_v13 = vpop.f32.mrb[10].mxu1  ;;  %v583_v14 = vpop.f32.mrb[11].mxu0 }
  0xf9   : > { %845 = vst.msk [vmem:[%s1264_s26 + $0x150] sm:$0xff] %vm413_vm1, %v717_v7  ;;  %811 = vst.msk [vmem:[%s1264_s26 + $0x40] sm:$0xff] %vm413_vm1, %v581_v8  ;;  %v720_v15 = vadd.f32 %v1078_v13, %v1259_v34  ;;  %v584_v16 = vadd.f32 %v1259_v34, %v583_v14  ;;  %v711_v17 = vpop.f32.mrb[11].mxu1 }
  0xfa   : > { %843 = vst.msk [vmem:[%s1264_s26 + $0x140] sm:$0xff] %vm413_vm1, %v709_v11  ;;  %814 = vst.msk [vmem:[%s1264_s26 + $0x58] sm:$0xff] %vm413_vm1, %v592_v12  ;;  %v712_v18 = vadd.f32 %v1259_v34, %v711_v17 }
  0xfb   : > { %846 = vst.msk [vmem:[%s1264_s26 + $0x158] sm:$0xff] %vm413_vm1, %v720_v15  ;;  %812 = vst.msk [vmem:[%s1264_s26 + $0x48] sm:$0xff] %vm413_vm1, %v584_v16 }
  0xfc   : > { %844 = vst.msk [vmem:[%s1264_s26 + $0x148] sm:$0xff] %vm413_vm1, %v712_v18 }
  0xfd   : > { %v1049_v19 = vpop.f32.mrb[12].mxu0 }
  0xfe   : > { %v605_v20 = vadd.f32 %v1049_v19, %v1259_v34  ;;  %v1081_v21 = vpop.f32.mrb[12].mxu1  ;;  %v596_v22 = vpop.f32.mrb[13].mxu0 }
  0xff   : > { %v733_v23 = vadd.f32 %v1081_v21, %v1259_v34  ;;  %v597_v24 = vadd.f32 %v1259_v34, %v596_v22  ;;  %v724_v25 = vpop.f32.mrb[13].mxu1  ;;  %v1050_v26 = vpop.f32.mrb[14].mxu0 }
 0x100   : > { %817 = vst.msk [vmem:[%s1264_s26 + $0x70] sm:$0xff] %vm413_vm1, %v605_v20  ;;  %v725_v27 = vadd.f32 %v1259_v34, %v724_v25  ;;  %v608_v28 = vadd.f32 %v1050_v26, %v1259_v34  ;;  %v1082_v29 = vpop.f32.mrb[14].mxu1  ;;  %v599_v30 = vpop.f32.mrb[15].mxu0 }
 0x101   : > { %849 = vst.msk [vmem:[%s1264_s26 + $0x170] sm:$0xff] %vm413_vm1, %v733_v23  ;;  %815 = vst.msk [vmem:[%s1264_s26 + $0x60] sm:$0xff] %vm413_vm1, %v597_v24  ;;  %v736_v31 = vadd.f32 %v1082_v29, %v1259_v34  ;;  %v600_v32 = vadd.f32 %v1259_v34, %v599_v30  ;;  %v727_v33 = vpop.f32.mrb[15].mxu1 }
 0x102   : > { %847 = vst.msk [vmem:[%s1264_s26 + $0x160] sm:$0xff] %vm413_vm1, %v725_v27  ;;  %818 = vst.msk [vmem:[%s1264_s26 + $0x78] sm:$0xff] %vm413_vm1, %v608_v28  ;;  %v728_v35 = vadd.f32 %v1259_v34, %v727_v33 }
 0x103   : > { %850 = vst.msk [vmem:[%s1264_s26 + $0x178] sm:$0xff] %vm413_vm1, %v736_v31  ;;  %816 = vst.msk [vmem:[%s1264_s26 + $0x68] sm:$0xff] %vm413_vm1, %v600_v32 }
 0x104   : > { %848 = vst.msk [vmem:[%s1264_s26 + $0x168] sm:$0xff] %vm413_vm1, %v728_v35 }
 0x105   : > { %v1053_v36 = vpop.f32.mrb[16].mxu0 }
 0x106   : > { %v621_v37 = vadd.f32 %v1053_v36, %v1259_v34  ;;  %v1085_v38 = vpop.f32.mrb[16].mxu1  ;;  %v612_v39 = vpop.f32.mrb[17].mxu0 }
 0x107   : > { %v749_v40 = vadd.f32 %v1085_v38, %v1259_v34  ;;  %v613_v41 = vadd.f32 %v1259_v34, %v612_v39  ;;  %v740_v42 = vpop.f32.mrb[17].mxu1  ;;  %v1054_v43 = vpop.f32.mrb[18].mxu0 }
 0x108   : > { %821 = vst.msk [vmem:[%s1264_s26 + $0x90] sm:$0xff] %vm413_vm1, %v621_v37  ;;  %v741_v44 = vadd.f32 %v1259_v34, %v740_v42  ;;  %v624_v45 = vadd.f32 %v1054_v43, %v1259_v34  ;;  %v1086_v46 = vpop.f32.mrb[18].mxu1  ;;  %v615_v47 = vpop.f32.mrb[19].mxu0 }
 0x109   : > { %853 = vst.msk [vmem:[%s1264_s26 + $0x190] sm:$0xff] %vm413_vm1, %v749_v40  ;;  %819 = vst.msk [vmem:[%s1264_s26 + $0x80] sm:$0xff] %vm413_vm1, %v613_v41  ;;  %v752_v48 = vadd.f32 %v1086_v46, %v1259_v34  ;;  %v616_v49 = vadd.f32 %v1259_v34, %v615_v47  ;;  %v743_v50 = vpop.f32.mrb[19].mxu1 }
 0x10a   : > { %851 = vst.msk [vmem:[%s1264_s26 + $0x180] sm:$0xff] %vm413_vm1, %v741_v44  ;;  %822 = vst.msk [vmem:[%s1264_s26 + $0x98] sm:$0xff] %vm413_vm1, %v624_v45  ;;  %v744_v51 = vadd.f32 %v1259_v34, %v743_v50 }
 0x10b   : > { %854 = vst.msk [vmem:[%s1264_s26 + $0x198] sm:$0xff] %vm413_vm1, %v752_v48  ;;  %820 = vst.msk [vmem:[%s1264_s26 + $0x88] sm:$0xff] %vm413_vm1, %v616_v49 }
 0x10c   : > { %852 = vst.msk [vmem:[%s1264_s26 + $0x188] sm:$0xff] %vm413_vm1, %v744_v51 }
 0x10d   : > { %v1057_v52 = vpop.f32.mrb[20].mxu0 }
 0x10e   : > { %v637_v53 = vadd.f32 %v1057_v52, %v1259_v34  ;;  %v1089_v54 = vpop.f32.mrb[20].mxu1  ;;  %v628_v55 = vpop.f32.mrb[21].mxu0 }
 0x10f   : > { %v765_v56 = vadd.f32 %v1089_v54, %v1259_v34  ;;  %v629_v57 = vadd.f32 %v1259_v34, %v628_v55  ;;  %v756_v58 = vpop.f32.mrb[21].mxu1  ;;  %v1058_v59 = vpop.f32.mrb[22].mxu0 }
 0x110   : > { %825 = vst.msk [vmem:[%s1264_s26 + $0xb0] sm:$0xff] %vm413_vm1, %v637_v53  ;;  %v757_v60 = vadd.f32 %v1259_v34, %v756_v58  ;;  %v640_v61 = vadd.f32 %v1058_v59, %v1259_v34  ;;  %v1090_v62 = vpop.f32.mrb[22].mxu1  ;;  %v631_v63 = vpop.f32.mrb[23].mxu0 }
 0x111   : > { %857 = vst.msk [vmem:[%s1264_s26 + $0x1b0] sm:$0xff] %vm413_vm1, %v765_v56  ;;  %823 = vst.msk [vmem:[%s1264_s26 + $0xa0] sm:$0xff] %vm413_vm1, %v629_v57  ;;  %v768_v0 = vadd.f32 %v1090_v62, %v1259_v34  ;;  %v632_v1 = vadd.f32 %v1259_v34, %v631_v63  ;;  %v759_v2 = vpop.f32.mrb[23].mxu1 }
 0x112   : > { %855 = vst.msk [vmem:[%s1264_s26 + $0x1a0] sm:$0xff] %vm413_vm1, %v757_v60  ;;  %826 = vst.msk [vmem:[%s1264_s26 + $0xb8] sm:$0xff] %vm413_vm1, %v640_v61  ;;  %v760_v3 = vadd.f32 %v1259_v34, %v759_v2 }
 0x113   : > { %858 = vst.msk [vmem:[%s1264_s26 + $0x1b8] sm:$0xff] %vm413_vm1, %v768_v0  ;;  %824 = vst.msk [vmem:[%s1264_s26 + $0xa8] sm:$0xff] %vm413_vm1, %v632_v1 }
 0x114   : > { %856 = vst.msk [vmem:[%s1264_s26 + $0x1a8] sm:$0xff] %vm413_vm1, %v760_v3 }
 0x115   : > { %v1061_v4 = vpop.f32.mrb[24].mxu0 }
 0x116   : > { %v653_v5 = vadd.f32 %v1061_v4, %v1259_v34  ;;  %v1093_v6 = vpop.f32.mrb[24].mxu1  ;;  %v644_v7 = vpop.f32.mrb[25].mxu0 }
 0x117   : > { %v781_v8 = vadd.f32 %v1093_v6, %v1259_v34  ;;  %v645_v9 = vadd.f32 %v1259_v34, %v644_v7  ;;  %v772_v10 = vpop.f32.mrb[25].mxu1  ;;  %v1062_v11 = vpop.f32.mrb[26].mxu0 }
 0x118   : > { %829 = vst.msk [vmem:[%s1264_s26 + $0xd0] sm:$0xff] %vm413_vm1, %v653_v5  ;;  %v773_v12 = vadd.f32 %v1259_v34, %v772_v10  ;;  %v656_v13 = vadd.f32 %v1062_v11, %v1259_v34  ;;  %v1094_v14 = vpop.f32.mrb[26].mxu1  ;;  %v647_v15 = vpop.f32.mrb[27].mxu0 }
 0x119   : > { %861 = vst.msk [vmem:[%s1264_s26 + $0x1d0] sm:$0xff] %vm413_vm1, %v781_v8  ;;  %827 = vst.msk [vmem:[%s1264_s26 + $0xc0] sm:$0xff] %vm413_vm1, %v645_v9  ;;  %v784_v16 = vadd.f32 %v1094_v14, %v1259_v34  ;;  %v648_v17 = vadd.f32 %v1259_v34, %v647_v15  ;;  %v775_v18 = vpop.f32.mrb[27].mxu1 }
 0x11a   : > { %859 = vst.msk [vmem:[%s1264_s26 + $0x1c0] sm:$0xff] %vm413_vm1, %v773_v12  ;;  %830 = vst.msk [vmem:[%s1264_s26 + $0xd8] sm:$0xff] %vm413_vm1, %v656_v13  ;;  %v776_v19 = vadd.f32 %v1259_v34, %v775_v18 }
 0x11b   : > { %862 = vst.msk [vmem:[%s1264_s26 + $0x1d8] sm:$0xff] %vm413_vm1, %v784_v16  ;;  %828 = vst.msk [vmem:[%s1264_s26 + $0xc8] sm:$0xff] %vm413_vm1, %v648_v17 }
 0x11c   : > { %860 = vst.msk [vmem:[%s1264_s26 + $0x1c8] sm:$0xff] %vm413_vm1, %v776_v19 }
 0x11d   : > { %v1065_v20 = vpop.f32.mrb[28].mxu0 }
 0x11e   : > { %v669_v21 = vadd.f32 %v1065_v20, %v1259_v34  ;;  %v1097_v22 = vpop.f32.mrb[28].mxu1  ;;  %v660_v23 = vpop.f32.mrb[29].mxu0 }
 0x11f   : > { %v797_v24 = vadd.f32 %v1097_v22, %v1259_v34  ;;  %v661_v25 = vadd.f32 %v1259_v34, %v660_v23  ;;  %v788_v26 = vpop.f32.mrb[29].mxu1  ;;  %v1066_v27 = vpop.f32.mrb[30].mxu0 }
 0x120   : > { %833 = vst.msk [vmem:[%s1264_s26 + $0xf0] sm:$0xff] %vm413_vm1, %v669_v21  ;;  %v789_v28 = vadd.f32 %v1259_v34, %v788_v26  ;;  %v672_v29 = vadd.f32 %v1066_v27, %v1259_v34  ;;  %v1098_v30 = vpop.f32.mrb[30].mxu1  ;;  %v663_v31 = vpop.f32.mrb[31].mxu0 }
 0x121   : > { %865 = vst.msk [vmem:[%s1264_s26 + $0x1f0] sm:$0xff] %vm413_vm1, %v797_v24  ;;  %831 = vst.msk [vmem:[%s1264_s26 + $0xe0] sm:$0xff] %vm413_vm1, %v661_v25  ;;  %v800_v32 = vadd.f32 %v1098_v30, %v1259_v34  ;;  %v664_v33 = vadd.f32 %v1259_v34, %v663_v31  ;;  %v791_v35 = vpop.f32.mrb[31].mxu1 }
 0x122   : > { %863 = vst.msk [vmem:[%s1264_s26 + $0x1e0] sm:$0xff] %vm413_vm1, %v789_v28  ;;  %834 = vst.msk [vmem:[%s1264_s26 + $0xf8] sm:$0xff] %vm413_vm1, %v672_v29  ;;  %v792_v36 = vadd.f32 %v1259_v34, %v791_v35 }
 0x123   : > { %866 = vst.msk [vmem:[%s1264_s26 + $0x1f8] sm:$0xff] %vm413_vm1, %v800_v32  ;;  %832 = vst.msk [vmem:[%s1264_s26 + $0xe8] sm:$0xff] %vm413_vm1, %v664_v33 }
 0x124   : > { %864 = vst.msk [vmem:[%s1264_s26 + $0x1e8] sm:$0xff] %vm413_vm1, %v792_v36 }
 0x125 PF: > { %s13_s12 = sadd.s32 1, %s1150_s12  }
 0x126   : > { %p10_p4 = scmp.ge.s32.totalorder %s13_s12, 4  }
 0x128   :  { %12 = sbr.rel (!%p10_p4) target bundleno = 1 (0x1), region = 62 }

// kernel: ms_tcn_forward.9
= control target key start
LH: loop header
LB: loop body
LE: loop exit
PB: predicated region body
PF: predicated region fallthrough
CT: control target
= control target key end

     0   :  { %vm585_vm0 = vcmask 1040384   ;;  %vm416_vm1 = vcmask 15360   ;;  %s6417_s1 = inlined_call_operand.vmem [shape: bf16[3,2,2], index: 1, kind: input, shape index: {}]   ;;  %s6418_s0 = inlined_call_operand.vmem [shape: bf16[1344,2], index: 0, kind: input, shape index: {}]   ;;  %s6419_s2 = inlined_call_operand.vmem [shape: f32[1,2], index: 2, kind: input, shape index: {}]   ;;  %s6420_s3 = inlined_call_operand.vmem [shape: f32[896,2], index: 3, kind: output, shape index: {}]  }
   0x1   :  { %v135_v0 = vld [vmem:[%s6417_s1] sm:$0x1]  ;;  %v3727_v1 = vld [vmem:[%s6417_s1 + $0x1] sm:$0x1]  ;;  %v4809_v5 = vld [vmem:[%s6418_s0 + $0x70] sm:$0xff]  }
   0x2   :  { %4804 = vmatprep.subr.msk.bf16.mxu1 %vm585_vm0, %v135_v0  ;;  %4805 = vmatprep.subr.msk.bf16.mxu0 %vm585_vm0, %v3727_v1  ;;  %v587_v2 = vsel %vm585_vm0, %v135_v0, 0  ;;  %v1745_v3 = vsel %vm585_vm0, %v3727_v1, 0  ;;  %v4808_v4 = vld [vmem:[%s6418_s0] sm:$0xff]   ;;  %v4810_v6 = vld [vmem:[%s6418_s0 + $0x8] sm:$0xff]   ;;  %v4811_v7 = vld [vmem:[%s6418_s0 + $0x78] sm:$0xff]  }
   0x3   :  { %4125 = vmatpush3.bf16.msra.mxu1 %v587_v2  ;;  %4239 = vmatpush3.bf16.msra.mxu0 %v1745_v3  ;;  %v3840_v8 = vld [vmem:[%s6417_s1 + $0x2] sm:$0x1]  ;;  %v4812_v10 = vld [vmem:[%s6418_s0 + $0x10] sm:$0xff]   ;;  %v4814_v12 = vld [vmem:[%s6418_s0 + $0x18] sm:$0xff]  }
   0x4   :  { %4126 = vmatprep.mubr.msk.bf16.mxu1 %vm416_vm1, %v4808_v4  ;;  %4240 = vmatprep.mubr.msk.bf16.mxu0 %vm416_vm1, %v4809_v5  ;;  %v2903_v9 = vsel %vm585_vm0, %v3840_v8, 0  ;;  %v4813_v11 = vld [vmem:[%s6418_s0 + $0x80] sm:$0xff]   ;;  %v4815_v13 = vld [vmem:[%s6418_s0 + $0x88] sm:$0xff]   ;;  %v4817_v15 = vld [vmem:[%s6418_s0 + $0x90] sm:$0xff]  }
   0x5   :  { %4806 = vmatprep.subr.msk.bf16.mxu1 %vm585_vm0, %v3727_v1  ;;  %4807 = vmatprep.subr.msk.bf16.mxu0 %vm585_vm0, %v3840_v8  ;;  %v4816_v14 = vld [vmem:[%s6418_s0 + $0x20] sm:$0xff]   ;;  %v4818_v16 = vld [vmem:[%s6418_s0 + $0x28] sm:$0xff]   ;;  %v4819_v17 = vld [vmem:[%s6418_s0 + $0x98] sm:$0xff]  }
   0x6   :  { %4127 = vmatmul.mubr.msk.bf16.vlgmr.msra.gmra.mrb[0].mxu1 %vm416_vm1, %v4810_v6  ;;  %4241 = vmatmul.mubr.msk.bf16.vlgmr.msra.gmra.mrb[0].mxu0 %vm416_vm1, %v4811_v7  ;;  %v4820_v18 = vld [vmem:[%s6418_s0 + $0x30] sm:$0xff]   ;;  %v4821_v19 = vld [vmem:[%s6418_s0 + $0xa0] sm:$0xff]   ;;  %v4822_v20 = vld [vmem:[%s6418_s0 + $0x38] sm:$0xff]  }
   0x7   :  { %4467 = vmatpush3.bf16.msra.mxu1 %v1745_v3  ;;  %4353 = vmatpush3.bf16.msra.mxu0 %v2903_v9  ;;  %v4823_v21 = vld [vmem:[%s6418_s0 + $0xa8] sm:$0xff]   ;;  %v4824_v22 = vld [vmem:[%s6418_s0 + $0x40] sm:$0xff]   ;;  %v4825_v23 = vld [vmem:[%s6418_s0 + $0xb0] sm:$0xff]  }
   0x8   :  { %4130 = vmatprep.mubr.msk.bf16.mxu1 %vm416_vm1, %v4812_v10  ;;  %4244 = vmatprep.mubr.msk.bf16.mxu0 %vm416_vm1, %v4813_v11  ;;  %v4826_v24 = vld [vmem:[%s6418_s0 + $0x48] sm:$0xff]   ;;  %v4827_v25 = vld [vmem:[%s6418_s0 + $0xb8] sm:$0xff]   ;;  %v4828_v26 = vld [vmem:[%s6418_s0 + $0x50] sm:$0xff]  }
   0x9   :  { %v4829_v27 = vld [vmem:[%s6418_s0 + $0xc0] sm:$0xff]   ;;  %v4830_v28 = vld [vmem:[%s6418_s0 + $0x58] sm:$0xff]   ;;  %v4831_v29 = vld [vmem:[%s6418_s0 + $0xc8] sm:$0xff]  }
   0xa   :  { %v4832_v30 = vld [vmem:[%s6418_s0 + $0x60] sm:$0xff]   ;;  %v4833_v31 = vld [vmem:[%s6418_s0 + $0xd0] sm:$0xff]   ;;  %v4834_v32 = vld [vmem:[%s6418_s0 + $0x68] sm:$0xff]  }
   0xb   :  { %v4835_v33 = vld [vmem:[%s6418_s0 + $0xd8] sm:$0xff]   ;;  %v4836_v34 = vld [vmem:[%s6418_s0 + $0x70] sm:$0xff]   ;;  %v4837_v35 = vld [vmem:[%s6418_s0 + $0xe0] sm:$0xff]  }
   0xc   :  { %v4838_v36 = vld [vmem:[%s6418_s0 + $0x78] sm:$0xff]   ;;  %v4839_v37 = vld [vmem:[%s6418_s0 + $0xe8] sm:$0xff]   ;;  %v4840_v38 = vld [vmem:[%s6418_s0 + $0x80] sm:$0xff]  }
   0xd   :  { %v4841_v39 = vld [vmem:[%s6418_s0 + $0xf0] sm:$0xff]   ;;  %v4842_v40 = vld [vmem:[%s6418_s0 + $0x88] sm:$0xff]   ;;  %v4843_v41 = vld [vmem:[%s6418_s0 + $0xf8] sm:$0xff]  }
   0xe   :  { %4131 = vmatmul.mubr.msk.bf16.gmra.mrb[4].mxu1 %vm416_vm1, %v4814_v12  ;;  %4245 = vmatmul.mubr.msk.bf16.gmra.mrb[4].mxu0 %vm416_vm1, %v4815_v13  ;;  %v4844_v42 = vld [vmem:[%s6418_s0 + $0x90] sm:$0xff]   ;;  %v4845_v43 = vld [vmem:[%s6418_s0 + $0x100] sm:$0xff]   ;;  %v4846_v44 = vld [vmem:[%s6418_s0 + $0x98] sm:$0xff]  }
   0xf   :  { %4134 = vmatprep.mubr.msk.bf16.mxu1 %vm416_vm1, %v4816_v14  ;;  %4248 = vmatprep.mubr.msk.bf16.mxu0 %vm416_vm1, %v4817_v15  ;;  %v4847_v45 = vld [vmem:[%s6418_s0 + $0x108] sm:$0xff]   ;;  %v4848_v46 = vld [vmem:[%s6418_s0 + $0xa0] sm:$0xff]   ;;  %v4849_v47 = vld [vmem:[%s6418_s0 + $0x110] sm:$0xff]  }
  0x10   :  { %v4850_v48 = vld [vmem:[%s6418_s0 + $0xa8] sm:$0xff]   ;;  %v4851_v49 = vld [vmem:[%s6418_s0 + $0x118] sm:$0xff]   ;;  %v4852_v50 = vld [vmem:[%s6418_s0 + $0xb0] sm:$0xff]  }
  0x11   :  { %v4853_v51 = vld [vmem:[%s6418_s0 + $0x120] sm:$0xff]   ;;  %v4854_v52 = vld [vmem:[%s6418_s0 + $0xb8] sm:$0xff]   ;;  %v4855_v53 = vld [vmem:[%s6418_s0 + $0x128] sm:$0xff]  }
  0x12   :  { %v4856_v54 = vld [vmem:[%s6418_s0 + $0xc0] sm:$0xff]   ;;  %v4857_v55 = vld [vmem:[%s6418_s0 + $0x130] sm:$0xff]   ;;  %v4858_v56 = vld [vmem:[%s6418_s0 + $0xc8] sm:$0xff]  }
  0x13   :  { %v4859_v57 = vld [vmem:[%s6418_s0 + $0x138] sm:$0xff]   ;;  %v4860_v58 = vld [vmem:[%s6418_s0 + $0xd0] sm:$0xff]   ;;  %v4861_v59 = vld [vmem:[%s6418_s0 + $0x140] sm:$0xff]  }
  0x14   :  { %v4862_v60 = vld [vmem:[%s6418_s0 + $0xd8] sm:$0xff]   ;;  %v4863_v61 = vld [vmem:[%s6418_s0 + $0x148] sm:$0xff]   ;;  %v4864_v62 = vld [vmem:[%s6418_s0 + $0xe0] sm:$0xff]  }
  0x15   :  { %v4865_v63 = vld [vmem:[%s6418_s0 + $0xe0] sm:$0xff]   ;;  %v4866_v0 = vld [vmem:[%s6418_s0 + $0xe8] sm:$0xff]   ;;  %v4868_v2 = vld [vmem:[%s6418_s0 + $0xf0] sm:$0xff]  }
  0x16   :  { %4135 = vmatmul.mubr.msk.bf16.gmra.mrb[8].mxu1 %vm416_vm1, %v4818_v16  ;;  %4249 = vmatmul.mubr.msk.bf16.gmra.mrb[8].mxu0 %vm416_vm1, %v4819_v17  ;;  %v4867_v1 = vld [vmem:[%s6418_s0 + $0xe8] sm:$0xff]   ;;  %v4869_v3 = vld [vmem:[%s6418_s0 + $0xf0] sm:$0xff]   ;;  %v4870_v4 = vld [vmem:[%s6418_s0 + $0xf8] sm:$0xff]  }
  0x17   :  { %4138 = vmatprep.mubr.msk.bf16.mxu1 %vm416_vm1, %v4820_v18  ;;  %4252 = vmatprep.mubr.msk.bf16.mxu0 %vm416_vm1, %v4821_v19  ;;  %v4871_v5 = vld [vmem:[%s6418_s0 + $0xf8] sm:$0xff]   ;;  %v4872_v6 = vld [vmem:[%s6418_s0 + $0x100] sm:$0xff]   ;;  %v4874_v8 = vld [vmem:[%s6418_s0 + $0x108] sm:$0xff]  }
  0x18   :  { %v4873_v7 = vld [vmem:[%s6418_s0 + $0x100] sm:$0xff]   ;;  %v4875_v9 = vld [vmem:[%s6418_s0 + $0x108] sm:$0xff]   ;;  %v4876_v10 = vld [vmem:[%s6418_s0 + $0x110] sm:$0xff]  }
  0x19   :  { %v4877_v11 = vld [vmem:[%s6418_s0 + $0x110] sm:$0xff]   ;;  %v4878_v12 = vld [vmem:[%s6418_s0 + $0x118] sm:$0xff]   ;;  %v4880_v14 = vld [vmem:[%s6418_s0 + $0x120] sm:$0xff]  }
  0x1a   :  { %v4879_v13 = vld [vmem:[%s6418_s0 + $0x118] sm:$0xff]   ;;  %v4881_v15 = vld [vmem:[%s6418_s0 + $0x120] sm:$0xff]   ;;  %v4882_v16 = vld [vmem:[%s6418_s0 + $0x128] sm:$0xff]  }
  0x1b   :  { %v4883_v17 = vld [vmem:[%s6418_s0 + $0x128] sm:$0xff]   ;;  %v4884_v18 = vld [vmem:[%s6418_s0 + $0x130] sm:$0xff]  }
  0x1c   :  { %v4885_v19 = vld [vmem:[%s6418_s0 + $0x130] sm:$0xff]  }
  0x1e   :  { %4139 = vmatmul.mubr.msk.bf16.gmra.mrb[12].mxu1 %vm416_vm1, %v4822_v20  ;;  %4253 = vmatmul.mubr.msk.bf16.gmra.mrb[12].mxu0 %vm416_vm1, %v4823_v21  ;;  %v4886_v20 = vld [vmem:[%s6418_s0 + $0x138] sm:$0xff]  }
  0x1f   :  { %4142 = vmatprep.mubr.msk.bf16.mxu1 %vm416_vm1, %v4824_v22  ;;  %4256 = vmatprep.mubr.msk.bf16.mxu0 %vm416_vm1, %v4825_v23  ;;  %v4887_v21 = vld [vmem:[%s6418_s0 + $0x138] sm:$0xff]   ;;  %v4888_v22 = vld [vmem:[%s6418_s0 + $0x140] sm:$0xff]  }
  0x20   :  { %v4889_v23 = vld [vmem:[%s6418_s0 + $0x140] sm:$0xff]  }
  0x26   :  { %4143 = vmatmul.mubr.msk.bf16.gmra.mrb[16].mxu1 %vm416_vm1, %v4826_v24  ;;  %4257 = vmatmul.mubr.msk.bf16.gmra.mrb[16].mxu0 %vm416_vm1, %v4827_v25  ;;  %v4890_v24 = vld [vmem:[%s6418_s0 + $0x148] sm:$0xff]  }
  0x27   :  { %4146 = vmatprep.mubr.msk.bf16.mxu1 %vm416_vm1, %v4828_v26  ;;  %4260 = vmatprep.mubr.msk.bf16.mxu0 %vm416_vm1, %v4829_v27  ;;  %v4891_v25 = vld [vmem:[%s6418_s0 + $0x148] sm:$0xff]   ;;  %v4892_v26 = vld [vmem:[%s6418_s0 + $0x150] sm:$0xff]  }
  0x28   :  { %v4893_v27 = vld [vmem:[%s6418_s0 + $0x150] sm:$0xff]  }
  0x2e   :  { %4147 = vmatmul.mubr.msk.bf16.gmra.mrb[20].mxu1 %vm416_vm1, %v4830_v28  ;;  %4261 = vmatmul.mubr.msk.bf16.gmra.mrb[20].mxu0 %vm416_vm1, %v4831_v29  ;;  %v4894_v28 = vld [vmem:[%s6418_s0 + $0x158] sm:$0xff]  }
  0x2f   :  { %4150 = vmatprep.mubr.msk.bf16.mxu1 %vm416_vm1, %v4832_v30  ;;  %4264 = vmatprep.mubr.msk.bf16.mxu0 %vm416_vm1, %v4833_v31  ;;  %v4895_v29 = vld [vmem:[%s6418_s0 + $0x158] sm:$0xff]   ;;  %v4896_v30 = vld [vmem:[%s6418_s0 + $0x160] sm:$0xff]  }
  0x30   :  { %v4897_v31 = vld [vmem:[%s6418_s0 + $0x160] sm:$0xff]  }
  0x36   :  { %4151 = vmatmul.mubr.msk.bf16.gmra.mrb[24].mxu1 %vm416_vm1, %v4834_v32  ;;  %4265 = vmatmul.mubr.msk.bf16.gmra.mrb[24].mxu0 %vm416_vm1, %v4835_v33  ;;  %v4898_v32 = vld [vmem:[%s6418_s0 + $0x168] sm:$0xff]  }
  0x37   :  { %4154 = vmatprep.mubr.msk.bf16.mxu1 %vm416_vm1, %v4836_v34  ;;  %4268 = vmatprep.mubr.msk.bf16.mxu0 %vm416_vm1, %v4837_v35  ;;  %v4899_v33 = vld [vmem:[%s6418_s0 + $0x168] sm:$0xff]   ;;  %v4900_v34 = vld [vmem:[%s6418_s0 + $0x170] sm:$0xff]  }
  0x38   :  { %v4901_v35 = vld [vmem:[%s6418_s0 + $0x170] sm:$0xff]  }
  0x3e   :  { %4155 = vmatmul.mubr.msk.bf16.gmra.mrb[28].mxu1 %vm416_vm1, %v4838_v36  ;;  %4269 = vmatmul.mubr.msk.bf16.gmra.mrb[28].mxu0 %vm416_vm1, %v4839_v37  ;;  %v4902_v36 = vld [vmem:[%s6418_s0 + $0x178] sm:$0xff]  }
  0x3f   :  { %4158 = vmatprep.mubr.msk.bf16.mxu1 %vm416_vm1, %v4840_v38  ;;  %4272 = vmatprep.mubr.msk.bf16.mxu0 %vm416_vm1, %v4841_v39  ;;  %v4903_v37 = vld [vmem:[%s6418_s0 + $0x178] sm:$0xff]   ;;  %v4904_v38 = vld [vmem:[%s6418_s0 + $0x180] sm:$0xff]  }
  0x40   :  { %v4905_v39 = vld [vmem:[%s6418_s0 + $0x180] sm:$0xff]  }
  0x46   :  { %4159 = vmatmul.mubr.msk.bf16.gmra.mrb[32].mxu1 %vm416_vm1, %v4842_v40  ;;  %4273 = vmatmul.mubr.msk.bf16.gmra.mrb[32].mxu0 %vm416_vm1, %v4843_v41  ;;  %v4906_v40 = vld [vmem:[%s6418_s0 + $0x188] sm:$0xff]  }
  0x47   :  { %4162 = vmatprep.mubr.msk.bf16.mxu1 %vm416_vm1, %v4844_v42  ;;  %4276 = vmatprep.mubr.msk.bf16.mxu0 %vm416_vm1, %v4845_v43  ;;  %v4907_v41 = vld [vmem:[%s6418_s0 + $0x188] sm:$0xff]   ;;  %v4908_v42 = vld [vmem:[%s6418_s0 + $0x190] sm:$0xff]  }
  0x48   :  { %v4909_v43 = vld [vmem:[%s6418_s0 + $0x190] sm:$0xff]  }
  0x4e   :  { %4163 = vmatmul.mubr.msk.bf16.gmra.mrb[36].mxu1 %vm416_vm1, %v4846_v44  ;;  %4277 = vmatmul.mubr.msk.bf16.gmra.mrb[36].mxu0 %vm416_vm1, %v4847_v45  ;;  %v4910_v44 = vld [vmem:[%s6418_s0 + $0x198] sm:$0xff]  }
  0x4f   :  { %4166 = vmatprep.mubr.msk.bf16.mxu1 %vm416_vm1, %v4848_v46  ;;  %4280 = vmatprep.mubr.msk.bf16.mxu0 %vm416_vm1, %v4849_v47  ;;  %v4911_v45 = vld [vmem:[%s6418_s0 + $0x198] sm:$0xff]   ;;  %v4912_v46 = vld [vmem:[%s6418_s0 + $0x1a0] sm:$0xff]  }
  0x50   :  { %v4913_v47 = vld [vmem:[%s6418_s0 + $0x1a0] sm:$0xff]  }
  0x56   :  { %4167 = vmatmul.mubr.msk.bf16.gmra.mrb[40].mxu1 %vm416_vm1, %v4850_v48  ;;  %4281 = vmatmul.mubr.msk.bf16.gmra.mrb[40].mxu0 %vm416_vm1, %v4851_v49  ;;  %v4914_v48 = vld [vmem:[%s6418_s0 + $0x1a8] sm:$0xff]  }
  0x57   :  { %4170 = vmatprep.mubr.msk.bf16.mxu1 %vm416_vm1, %v4852_v50  ;;  %4284 = vmatprep.mubr.msk.bf16.mxu0 %vm416_vm1, %v4853_v51  ;;  %v4915_v49 = vld [vmem:[%s6418_s0 + $0x1a8] sm:$0xff]   ;;  %v4916_v50 = vld [vmem:[%s6418_s0 + $0x1b0] sm:$0xff]  }
  0x58   :  { %v4917_v51 = vld [vmem:[%s6418_s0 + $0x1b0] sm:$0xff]  }
  0x5e   :  { %4171 = vmatmul.mubr.msk.bf16.gmra.mrb[44].mxu1 %vm416_vm1, %v4854_v52  ;;  %4285 = vmatmul.mubr.msk.bf16.gmra.mrb[44].mxu0 %vm416_vm1, %v4855_v53 }
  0x5f   :  { %4174 = vmatprep.mubr.msk.bf16.mxu1 %vm416_vm1, %v4856_v54  ;;  %4288 = vmatprep.mubr.msk.bf16.mxu0 %vm416_vm1, %v4857_v55  ;;  %v4918_v54 = vld [vmem:[%s6418_s0 + $0x1b8] sm:$0xff]  }
  0x66   :  { %4175 = vmatmul.mubr.msk.bf16.gmra.mrb[48].mxu1 %vm416_vm1, %v4858_v56  ;;  %4289 = vmatmul.mubr.msk.bf16.gmra.mrb[48].mxu0 %vm416_vm1, %v4859_v57  ;;  %v4919_v56 = vld [vmem:[%s6418_s0 + $0x1b8] sm:$0xff]   ;;  %v4920_v57 = vld [vmem:[%s6418_s0 + $0x150] sm:$0xff]  }
  0x67   :  { %4178 = vmatprep.mubr.msk.bf16.mxu1 %vm416_vm1, %v4860_v58  ;;  %4292 = vmatprep.mubr.msk.bf16.mxu0 %vm416_vm1, %v4861_v59  ;;  %v4921_v59 = vld [vmem:[%s6418_s0 + $0x1c0] sm:$0xff]  }
  0x6e   :  { %4179 = vmatmul.mubr.msk.bf16.gmra.mrb[52].mxu1 %vm416_vm1, %v4862_v60  ;;  %4293 = vmatmul.mubr.msk.bf16.gmra.mrb[52].mxu0 %vm416_vm1, %v4863_v61 }
  0x6f   :  { %4182 = vmatprep.mubr.msk.bf16.mxu1 %vm416_vm1, %v4864_v62  ;;  %4354 = vmatprep.mubr.msk.bf16.mxu0 %vm416_vm1, %v4865_v63  ;;  %v4922_v62 = vld [vmem:[%s6418_s0 + $0x158] sm:$0xff]  }
  0x76   :  { %4183 = vmatmul.mubr.msk.bf16.gmra.mrb[56].mxu1 %vm416_vm1, %v4866_v0  ;;  %4355 = vmatmul.mubr.msk.bf16.vlgmr.msra.gmra.mrb[0].mxu0 %vm416_vm1, %v4867_v1  ;;  %v4923_v0 = vld [vmem:[%s6418_s0 + $0x1c8] sm:$0xff]   ;;  %v4924_v1 = vld [vmem:[%s6418_s0 + $0x160] sm:$0xff]  }
  0x77   :  { %4186 = vmatprep.mubr.msk.bf16.mxu1 %vm416_vm1, %v4868_v2  ;;  %4358 = vmatprep.mubr.msk.bf16.mxu0 %vm416_vm1, %v4869_v3  ;;  %v4925_v3 = vld [vmem:[%s6418_s0 + $0x1d0] sm:$0xff]  }
  0x7e   :  { %4187 = vmatmul.mubr.msk.bf16.gmra.mrb[60].mxu1 %vm416_vm1, %v4870_v4  ;;  %4359 = vmatmul.mubr.msk.bf16.gmra.mrb[4].mxu0 %vm416_vm1, %v4871_v5 }
  0x7f   :  { %4190 = vmatprep.mubr.msk.bf16.mxu1 %vm416_vm1, %v4872_v6  ;;  %4362 = vmatprep.mubr.msk.bf16.mxu0 %vm416_vm1, %v4873_v7  ;;  %v4926_v6 = vld [vmem:[%s6418_s0 + $0x168] sm:$0xff]  }
  0x86   :  { %4191 = vmatmul.mubr.msk.bf16.gmra.mrb[64].mxu1 %vm416_vm1, %v4874_v8  ;;  %4363 = vmatmul.mubr.msk.bf16.gmra.mrb[8].mxu0 %vm416_vm1, %v4875_v9  ;;  %v4927_v8 = vld [vmem:[%s6418_s0 + $0x1d8] sm:$0xff]   ;;  %v4928_v9 = vld [vmem:[%s6418_s0 + $0x170] sm:$0xff]  }
  0x87   :  { %4194 = vmatprep.mubr.msk.bf16.mxu1 %vm416_vm1, %v4876_v10  ;;  %4366 = vmatprep.mubr.msk.bf16.mxu0 %vm416_vm1, %v4877_v11  ;;  %v4929_v11 = vld [vmem:[%s6418_s0 + $0x1e0] sm:$0xff]  }
  0x8e   :  { %4195 = vmatmul.mubr.msk.bf16.gmra.mrb[68].mxu1 %vm416_vm1, %v4878_v12  ;;  %4367 = vmatmul.mubr.msk.bf16.gmra.mrb[12].mxu0 %vm416_vm1, %v4879_v13 }
  0x8f   :  { %4198 = vmatprep.mubr.msk.bf16.mxu1 %vm416_vm1, %v4880_v14  ;;  %4370 = vmatprep.mubr.msk.bf16.mxu0 %vm416_vm1, %v4881_v15  ;;  %v4930_v14 = vld [vmem:[%s6418_s0 + $0x178] sm:$0xff]  }
  0x96   :  { %4199 = vmatmul.mubr.msk.bf16.gmra.mrb[72].mxu1 %vm416_vm1, %v4882_v16  ;;  %4371 = vmatmul.mubr.msk.bf16.gmra.mrb[16].mxu0 %vm416_vm1, %v4883_v17  ;;  %v4931_v16 = vld [vmem:[%s6418_s0 + $0x1e8] sm:$0xff]   ;;  %v4932_v17 = vld [vmem:[%s6418_s0 + $0x180] sm:$0xff]  }
  0x97   :  { %4202 = vmatprep.mubr.msk.bf16.mxu1 %vm416_vm1, %v4884_v18  ;;  %4374 = vmatprep.mubr.msk.bf16.mxu0 %vm416_vm1, %v4885_v19  ;;  %v4933_v19 = vld [vmem:[%s6418_s0 + $0x1f0] sm:$0xff]  }
  0x9e   :  { %4203 = vmatmul.mubr.msk.bf16.gmra.mrb[76].mxu1 %vm416_vm1, %v4886_v20  ;;  %4375 = vmatmul.mubr.msk.bf16.gmra.mrb[20].mxu0 %vm416_vm1, %v4887_v21 }
  0x9f   :  { %4206 = vmatprep.mubr.msk.bf16.mxu1 %vm416_vm1, %v4888_v22  ;;  %4378 = vmatprep.mubr.msk.bf16.mxu0 %vm416_vm1, %v4889_v23  ;;  %v4934_v22 = vld [vmem:[%s6418_s0 + $0x188] sm:$0xff]  }
  0xa6   :  { %4207 = vmatmul.mubr.msk.bf16.gmra.mrb[80].mxu1 %vm416_vm1, %v4890_v24  ;;  %4379 = vmatmul.mubr.msk.bf16.gmra.mrb[24].mxu0 %vm416_vm1, %v4891_v25  ;;  %v4935_v24 = vld [vmem:[%s6418_s0 + $0x1f8] sm:$0xff]   ;;  %v4936_v25 = vld [vmem:[%s6418_s0 + $0x190] sm:$0xff]  }
  0xa7   :  { %4210 = vmatprep.mubr.msk.bf16.mxu1 %vm416_vm1, %v4892_v26  ;;  %4382 = vmatprep.mubr.msk.bf16.mxu0 %vm416_vm1, %v4893_v27  ;;  %v4937_v27 = vld [vmem:[%s6418_s0 + $0x200] sm:$0xff]  }
  0xae   :  { %4211 = vmatmul.mubr.msk.bf16.gmra.mrb[84].mxu1 %vm416_vm1, %v4894_v28  ;;  %4383 = vmatmul.mubr.msk.bf16.gmra.mrb[28].mxu0 %vm416_vm1, %v4895_v29 }
  0xaf   :  { %4214 = vmatprep.mubr.msk.bf16.mxu1 %vm416_vm1, %v4896_v30  ;;  %4386 = vmatprep.mubr.msk.bf16.mxu0 %vm416_vm1, %v4897_v31  ;;  %v4938_v30 = vld [vmem:[%s6418_s0 + $0x198] sm:$0xff]  }
  0xb6   :  { %4215 = vmatmul.mubr.msk.bf16.gmra.mrb[88].mxu1 %vm416_vm1, %v4898_v32  ;;  %4387 = vmatmul.mubr.msk.bf16.gmra.mrb[32].mxu0 %vm416_vm1, %v4899_v33  ;;  %v4939_v32 = vld [vmem:[%s6418_s0 + $0x208] sm:$0xff]   ;;  %v4940_v33 = vld [vmem:[%s6418_s0 + $0x1a0] sm:$0xff]  }
  0xb7   :  { %4218 = vmatprep.mubr.msk.bf16.mxu1 %vm416_vm1, %v4900_v34  ;;  %4390 = vmatprep.mubr.msk.bf16.mxu0 %vm416_vm1, %v4901_v35  ;;  %v4941_v35 = vld [vmem:[%s6418_s0 + $0x210] sm:$0xff]  }
  0xbe   :  { %4219 = vmatmul.mubr.msk.bf16.gmra.mrb[92].mxu1 %vm416_vm1, %v4902_v36  ;;  %4391 = vmatmul.mubr.msk.bf16.gmra.mrb[36].mxu0 %vm416_vm1, %v4903_v37 }
  0xbf   :  { %4222 = vmatprep.mubr.msk.bf16.mxu1 %vm416_vm1, %v4904_v38  ;;  %4394 = vmatprep.mubr.msk.bf16.mxu0 %vm416_vm1, %v4905_v39  ;;  %v4942_v38 = vld [vmem:[%s6418_s0 + $0x1a8] sm:$0xff]  }
  0xc6   :  { %4223 = vmatmul.mubr.msk.bf16.gmra.mrb[96].mxu1 %vm416_vm1, %v4906_v40  ;;  %4395 = vmatmul.mubr.msk.bf16.gmra.mrb[40].mxu0 %vm416_vm1, %v4907_v41  ;;  %v4943_v40 = vld [vmem:[%s6418_s0 + $0x218] sm:$0xff]   ;;  %v4944_v41 = vld [vmem:[%s6418_s0 + $0x1b0] sm:$0xff]  }
  0xc7   :  { %4226 = vmatprep.mubr.msk.bf16.mxu1 %vm416_vm1, %v4908_v42  ;;  %4398 = vmatprep.mubr.msk.bf16.mxu0 %vm416_vm1, %v4909_v43  ;;  %v4945_v43 = vld [vmem:[%s6418_s0 + $0x220] sm:$0xff]  }
  0xce   :  { %4227 = vmatmul.mubr.msk.bf16.gmra.mrb[100].mxu1 %vm416_vm1, %v4910_v44  ;;  %4399 = vmatmul.mubr.msk.bf16.gmra.mrb[44].mxu0 %vm416_vm1, %v4911_v45 }
  0xcf   :  { %4230 = vmatprep.mubr.msk.bf16.mxu1 %vm416_vm1, %v4912_v46  ;;  %4402 = vmatprep.mubr.msk.bf16.mxu0 %vm416_vm1, %v4913_v47  ;;  %v4946_v46 = vld [vmem:[%s6418_s0 + $0x1b8] sm:$0xff]  }
  0xd6   :  { %4231 = vmatmul.mubr.msk.bf16.gmra.mrb[104].mxu1 %vm416_vm1, %v4914_v48  ;;  %4403 = vmatmul.mubr.msk.bf16.gmra.mrb[48].mxu0 %vm416_vm1, %v4915_v49  ;;  %v4947_v48 = vld [vmem:[%s6418_s0 + $0x228] sm:$0xff]   ;;  %v4948_v49 = vld [vmem:[%s6418_s0 + $0x1c0] sm:$0xff]  }
  0xd7   :  { %4234 = vmatprep.mubr.msk.bf16.mxu1 %vm416_vm1, %v4916_v50  ;;  %4406 = vmatprep.mubr.msk.bf16.mxu0 %vm416_vm1, %v4917_v51  ;;  %v4949_v51 = vld [vmem:[%s6418_s0 + $0x230] sm:$0xff]  }
  0xd9   :  { %v5452_v52 = vpop.f32.mrb[0].mxu1 }
  0xda   :  { %v5454_v53 = vpop.f32.mrb[1].mxu1 }
  0xdb   :  { %v5459_v55 = vpop.f32.mrb[2].mxu1 }
  0xdc   :  { %v5467_v58 = vpop.f32.mrb[3].mxu1 }
  0xde   :  { %4235 = vmatmul.mubr.msk.bf16.gmra.mrb[108].mxu1 %vm416_vm1, %v4918_v54  ;;  %4407 = vmatmul.mubr.msk.bf16.gmra.mrb[52].mxu0 %vm416_vm1, %v4919_v56 }
  0xdf   :  { %4296 = vmatprep.mubr.msk.bf16.mxu1 %vm416_vm1, %v4920_v57  ;;  %4410 = vmatprep.mubr.msk.bf16.mxu0 %vm416_vm1, %v4921_v59  ;;  %v4950_v57 = vld [vmem:[%s6418_s0 + $0x1c8] sm:$0xff]  }
  0xe1   :  { %v5476_v60 = vpop.f32.mrb[4].mxu1 }
  0xe2   :  { %v5478_v61 = vpop.f32.mrb[5].mxu1 }
  0xe3   :  { %v5483_v63 = vpop.f32.mrb[6].mxu1 }
  0xe4   :  { %v5491_v2 = vpop.f32.mrb[7].mxu1 }
  0xe6   :  { %4297 = vmatmul.mubr.msk.bf16.vlgmr.msra.gmra.mrb[56].mxu1 %vm416_vm1, %v4922_v62  ;;  %4411 = vmatmul.mubr.msk.bf16.gmra.mrb[56].mxu0 %vm416_vm1, %v4923_v0  ;;  %v4951_v62 = vld [vmem:[%s6418_s0 + $0x238] sm:$0xff]   ;;  %v4952_v0 = vld [vmem:[%s6418_s0 + $0x1d0] sm:$0xff]  }
  0xe7   :  { %4300 = vmatprep.mubr.msk.bf16.mxu1 %vm416_vm1, %v4924_v1  ;;  %4414 = vmatprep.mubr.msk.bf16.mxu0 %vm416_vm1, %v4925_v3  ;;  %v4953_v3 = vld [vmem:[%s6418_s0 + $0x240] sm:$0xff]  }
  0xe9   :  { %v5500_v4 = vpop.f32.mrb[8].mxu1 }
  0xea   :  { %v5502_v5 = vpop.f32.mrb[9].mxu1 }
  0xeb   :  { %v5507_v7 = vpop.f32.mrb[10].mxu1 }
  0xec   :  { %v5515_v10 = vpop.f32.mrb[11].mxu1 }
  0xee   :  { %4301 = vmatmul.mubr.msk.bf16.gmra.mrb[60].mxu1 %vm416_vm1, %v4926_v6  ;;  %4415 = vmatmul.mubr.msk.bf16.gmra.mrb[60].mxu0 %vm416_vm1, %v4927_v8 }
  0xef   :  { %4304 = vmatprep.mubr.msk.bf16.mxu1 %vm416_vm1, %v4928_v9  ;;  %4418 = vmatprep.mubr.msk.bf16.mxu0 %vm416_vm1, %v4929_v11  ;;  %v4954_v9 = vld [vmem:[%s6418_s0 + $0x1d8] sm:$0xff]  }
  0xf1   :  { %v5524_v12 = vpop.f32.mrb[12].mxu1 }
  0xf2   :  { %v5526_v13 = vpop.f32.mrb[13].mxu1 }
  0xf3   :  { %v5531_v15 = vpop.f32.mrb[14].mxu1 }
  0xf4   :  { %v5539_v18 = vpop.f32.mrb[15].mxu1 }
  0xf6   :  { %4305 = vmatmul.mubr.msk.bf16.gmra.mrb[64].mxu1 %vm416_vm1, %v4930_v14  ;;  %4419 = vmatmul.mubr.msk.bf16.gmra.mrb[64].mxu0 %vm416_vm1, %v4931_v16  ;;  %v4955_v14 = vld [vmem:[%s6418_s0 + $0x248] sm:$0xff]   ;;  %v4956_v16 = vld [vmem:[%s6418_s0 + $0x1e0] sm:$0xff]  }
  0xf7   :  { %4308 = vmatprep.mubr.msk.bf16.mxu1 %vm416_vm1, %v4932_v17  ;;  %4422 = vmatprep.mubr.msk.bf16.mxu0 %vm416_vm1, %v4933_v19  ;;  %v4957_v19 = vld [vmem:[%s6418_s0 + $0x250] sm:$0xff]  }
  0xf9   :  { %v5548_v20 = vpop.f32.mrb[16].mxu1 }
  0xfa   :  { %v5550_v21 = vpop.f32.mrb[17].mxu1 }
  0xfb   :  { %v5555_v23 = vpop.f32.mrb[18].mxu1 }
  0xfc   :  { %v5563_v26 = vpop.f32.mrb[19].mxu1 }
  0xfe   :  { %4309 = vmatmul.mubr.msk.bf16.gmra.mrb[68].mxu1 %vm416_vm1, %v4934_v22  ;;  %4423 = vmatmul.mubr.msk.bf16.gmra.mrb[68].mxu0 %vm416_vm1, %v4935_v24 }
  0xff   :  { %4312 = vmatprep.mubr.msk.bf16.mxu1 %vm416_vm1, %v4936_v25  ;;  %4426 = vmatprep.mubr.msk.bf16.mxu0 %vm416_vm1, %v4937_v27  ;;  %v4958_v25 = vld [vmem:[%s6418_s0 + $0x1e8] sm:$0xff]  }
 0x101   :  { %v5572_v28 = vpop.f32.mrb[20].mxu1 }
 0x102   :  { %v5574_v29 = vpop.f32.mrb[21].mxu1 }
 0x103   :  { %v5579_v31 = vpop.f32.mrb[22].mxu1 }
 0x104   :  { %v5587_v34 = vpop.f32.mrb[23].mxu1 }
 0x106   :  { %4313 = vmatmul.mubr.msk.bf16.gmra.mrb[72].mxu1 %vm416_vm1, %v4938_v30  ;;  %4427 = vmatmul.mubr.msk.bf16.gmra.mrb[72].mxu0 %vm416_vm1, %v4939_v32  ;;  %v4959_v30 = vld [vmem:[%s6418_s0 + $0x258] sm:$0xff]   ;;  %v4960_v32 = vld [vmem:[%s6418_s0 + $0x1f0] sm:$0xff]  }
 0x107   :  { %4316 = vmatprep.mubr.msk.bf16.mxu1 %vm416_vm1, %v4940_v33  ;;  %4430 = vmatprep.mubr.msk.bf16.mxu0 %vm416_vm1, %v4941_v35  ;;  %v4961_v35 = vld [vmem:[%s6418_s0 + $0x260] sm:$0xff]  }
 0x109   :  { %v5596_v36 = vpop.f32.mrb[24].mxu1 }
 0x10a   :  { %v5598_v37 = vpop.f32.mrb[25].mxu1 }
 0x10b   :  { %v5603_v39 = vpop.f32.mrb[26].mxu1 }
 0x10c   :  { %v5611_v42 = vpop.f32.mrb[27].mxu1 }
 0x10e   :  { %4317 = vmatmul.mubr.msk.bf16.gmra.mrb[76].mxu1 %vm416_vm1, %v4942_v38  ;;  %4431 = vmatmul.mubr.msk.bf16.gmra.mrb[76].mxu0 %vm416_vm1, %v4943_v40 }
 0x10f   :  { %4320 = vmatprep.mubr.msk.bf16.mxu1 %vm416_vm1, %v4944_v41  ;;  %4434 = vmatprep.mubr.msk.bf16.mxu0 %vm416_vm1, %v4945_v43  ;;  %v4962_v41 = vld [vmem:[%s6418_s0 + $0x1f8] sm:$0xff]  }
 0x111   :  { %v5620_v44 = vpop.f32.mrb[28].mxu1 }
 0x112   :  { %v5622_v45 = vpop.f32.mrb[29].mxu1 }
 0x113   :  { %v5627_v47 = vpop.f32.mrb[30].mxu1 }
 0x114   :  { %v5635_v50 = vpop.f32.mrb[31].mxu1 }
 0x116   :  { %4321 = vmatmul.mubr.msk.bf16.gmra.mrb[80].mxu1 %vm416_vm1, %v4946_v46  ;;  %4435 = vmatmul.mubr.msk.bf16.gmra.mrb[80].mxu0 %vm416_vm1, %v4947_v48  ;;  %v4963_v46 = vld [vmem:[%s6418_s0 + $0x268] sm:$0xff]   ;;  %v4964_v48 = vld [vmem:[%s6418_s0 + $0x200] sm:$0xff]  }
 0x117   :  { %4324 = vmatprep.mubr.msk.bf16.mxu1 %vm416_vm1, %v4948_v49  ;;  %4438 = vmatprep.mubr.msk.bf16.mxu0 %vm416_vm1, %v4949_v51  ;;  %v4965_v51 = vld [vmem:[%s6418_s0 + $0x270] sm:$0xff]  }
 0x119   :  { %v5644_v54 = vpop.f32.mrb[32].mxu1 }
 0x11a   :  { %v5646_v56 = vpop.f32.mrb[33].mxu1 }
 0x11b   :  { %v5651_v59 = vpop.f32.mrb[34].mxu1 }
 0x11c   :  { %v5659_v1 = vpop.f32.mrb[35].mxu1 }
 0x11e   :  { %4325 = vmatmul.mubr.msk.bf16.gmra.mrb[84].mxu1 %vm416_vm1, %v4950_v57  ;;  %4439 = vmatmul.mubr.msk.bf16.gmra.mrb[84].mxu0 %vm416_vm1, %v4951_v62 }
 0x11f   :  { %4328 = vmatprep.mubr.msk.bf16.mxu1 %vm416_vm1, %v4952_v0  ;;  %4442 = vmatprep.mubr.msk.bf16.mxu0 %vm416_vm1, %v4953_v3  ;;  %v4966_v0 = vld [vmem:[%s6418_s0 + $0x208] sm:$0xff]  }
 0x121   :  { %v5668_v6 = vpop.f32.mrb[36].mxu1 }
 0x122   :  { %v5670_v8 = vpop.f32.mrb[37].mxu1 }
 0x123   :  { %v5675_v11 = vpop.f32.mrb[38].mxu1 }
 0x124   :  { %v5683_v17 = vpop.f32.mrb[39].mxu1 }
 0x126   :  { %4329 = vmatmul.mubr.msk.bf16.gmra.mrb[88].mxu1 %vm416_vm1, %v4954_v9  ;;  %4443 = vmatmul.mubr.msk.bf16.gmra.mrb[88].mxu0 %vm416_vm1, %v4955_v14  ;;  %v4967_v9 = vld [vmem:[%s6418_s0 + $0x278] sm:$0xff]   ;;  %v4968_v14 = vld [vmem:[%s6418_s0 + $0x210] sm:$0xff]  }
 0x127   :  { %4332 = vmatprep.mubr.msk.bf16.mxu1 %vm416_vm1, %v4956_v16  ;;  %4446 = vmatprep.mubr.msk.bf16.mxu0 %vm416_vm1, %v4957_v19  ;;  %v4969_v19 = vld [vmem:[%s6418_s0 + $0x280] sm:$0xff]  }
 0x129   :  { %v5692_v22 = vpop.f32.mrb[40].mxu1 }
 0x12a   :  { %v5694_v24 = vpop.f32.mrb[41].mxu1 }
 0x12b   :  { %v5699_v27 = vpop.f32.mrb[42].mxu1 }
 0x12c   :  { %v5707_v33 = vpop.f32.mrb[43].mxu1 }
 0x12e   :  { %4333 = vmatmul.mubr.msk.bf16.gmra.mrb[92].mxu1 %vm416_vm1, %v4958_v25  ;;  %4447 = vmatmul.mubr.msk.bf16.gmra.mrb[92].mxu0 %vm416_vm1, %v4959_v30 }
 0x12f   :  { %4336 = vmatprep.mubr.msk.bf16.mxu1 %vm416_vm1, %v4960_v32  ;;  %4450 = vmatprep.mubr.msk.bf16.mxu0 %vm416_vm1, %v4961_v35  ;;  %v4970_v32 = vld [vmem:[%s6418_s0 + $0x218] sm:$0xff]  }
 0x131   :  { %v5716_v38 = vpop.f32.mrb[44].mxu1 }
 0x132   :  { %v5718_v40 = vpop.f32.mrb[45].mxu1 }
 0x133   :  { %v5723_v43 = vpop.f32.mrb[46].mxu1 }
 0x134   :  { %v5731_v49 = vpop.f32.mrb[47].mxu1 }
 0x136   :  { %4337 = vmatmul.mubr.msk.bf16.gmra.mrb[96].mxu1 %vm416_vm1, %v4962_v41  ;;  %4451 = vmatmul.mubr.msk.bf16.gmra.mrb[96].mxu0 %vm416_vm1, %v4963_v46  ;;  %v4971_v41 = vld [vmem:[%s6418_s0 + $0x288] sm:$0xff]   ;;  %v4972_v46 = vld [vmem:[%s6418_s0 + $0x220] sm:$0xff]  }
 0x137   :  { %4340 = vmatprep.mubr.msk.bf16.mxu1 %vm416_vm1, %v4964_v48  ;;  %4454 = vmatprep.mubr.msk.bf16.mxu0 %vm416_vm1, %v4965_v51  ;;  %v4973_v51 = vld [vmem:[%s6418_s0 + $0x290] sm:$0xff]  }
 0x139   :  { %v5740_v57 = vpop.f32.mrb[48].mxu1 }
 0x13a   :  { %v5742_v62 = vpop.f32.mrb[49].mxu1 }
 0x13b   :  { %v5747_v3 = vpop.f32.mrb[50].mxu1 }
 0x13c   :  { %v5755_v16 = vpop.f32.mrb[51].mxu1 }
 0x13e   :  { %4341 = vmatmul.mubr.msk.bf16.gmra.mrb[100].mxu1 %vm416_vm1, %v4966_v0  ;;  %4455 = vmatmul.mubr.msk.bf16.gmra.mrb[100].mxu0 %vm416_vm1, %v4967_v9  ;;  %v5787_v0 = vld [vmem:[%s6419_s2] ss:$0 sm:$0xff] }
 0x13f   :  { %4344 = vmatprep.mubr.msk.bf16.mxu1 %vm416_vm1, %v4968_v14  ;;  %4458 = vmatprep.mubr.msk.bf16.mxu0 %vm416_vm1, %v4969_v19  ;;  %v1072_v9 = vadd.f32 %v5452_v52, %v5787_v0  ;;  %v1070_v14 = vadd.f32 %v5787_v0, %v5454_v53  ;;  %v1071_v52 = vadd.f32 %v5787_v0, %v5467_v58 }
 0x140   :  { %v1076_v58 = vadd.f32 %v5476_v60, %v5787_v0 }
 0x141   :  { %v5764_v25 = vpop.f32.mrb[52].mxu1 }
 0x142   :  { %6421 = vst [vmem:[#allocation2_spill] sm:$0xff] %v5764_v25  ;;  %v5766_v30 = vpop.f32.mrb[53].mxu1 }
 0x143   :  { %6422 = vst [vmem:[#allocation3_spill] sm:$0xff] %v5766_v30  ;;  %v5771_v35 = vpop.f32.mrb[54].mxu1 }
 0x144   :  { %6423 = vst [vmem:[#allocation4_spill] sm:$0xff] %v5771_v35  ;;  %v5779_v48 = vpop.f32.mrb[55].mxu1 }
 0x145   :  { %6424 = vst [vmem:[#allocation5_spill] sm:$0xff] %v5779_v48  ;;  %v4974_v48 = vld [vmem:[%s6418_s0 + $0x228] sm:$0xff]  }
 0x146   :  { %4345 = vmatmul.mubr.msk.bf16.gmra.mrb[104].mxu1 %vm416_vm1, %v4970_v32  ;;  %4459 = vmatmul.mubr.msk.bf16.gmra.mrb[104].mxu0 %vm416_vm1, %v4971_v41  ;;  %v1073_v32 = vadd.f32 %v5459_v55, %v5787_v0 }
 0x147   :  { %4348 = vmatprep.mubr.msk.bf16.mxu1 %vm416_vm1, %v4972_v46  ;;  %4462 = vmatprep.mubr.msk.bf16.mxu0 %vm416_vm1, %v4973_v51  ;;  %v4975_v46 = vld [vmem:[%s6418_s0 + $0x298] sm:$0xff]  }
 0x149   :  { %v4356_v19 = vpop.f32.mrb[0].mxu0 }
 0x14a   :  { %v4469_v35 = vadd.f32 %v4356_v19, %v1072_v9  ;;  %v2939_v41 = vpop.f32.mrb[1].mxu0 }
 0x14b   :  { %v4471_v51 = vadd.f32 %v2939_v41, %v1070_v14  ;;  %v4357_v30 = vpop.f32.mrb[2].mxu0  ;;  %v1075_v14 = vadd.f32 %v5787_v0, %v5491_v2  ;;  %v1078_v2 = vadd.f32 %v5787_v0, %v5502_v5 }
 0x14c   :  { %3500 = vst.msk [vmem:[%s6420_s3 + $0x10] sm:$0xff] %vm416_vm1, %v4469_v35  ;;  %v4473_v53 = vadd.f32 %v4357_v30, %v1073_v32  ;;  %v2942_v25 = vpop.f32.mrb[3].mxu0  ;;  %v1077_v35 = vadd.f32 %v5483_v63, %v5787_v0  ;;  %v1080_v63 = vadd.f32 %v5500_v4, %v5787_v0 }
 0x14d   :  { %3498 = vst.msk [vmem:[%s6420_s3] sm:$0xff] %vm416_vm1, %v4471_v51  ;;  %v4475_v55 = vadd.f32 %v2942_v25, %v1071_v52  ;;  %v1074_v25 = vadd.f32 %v5787_v0, %v5478_v61  ;;  %v1081_v52 = vadd.f32 %v5507_v7, %v5787_v0  ;;  %v1084_v7 = vadd.f32 %v5524_v12, %v5787_v0 }
 0x14e   :  { %4349 = vmatmul.mubr.msk.bf16.gmra.mrb[108].mxu1 %vm416_vm1, %v4974_v48  ;;  %3501 = vst.msk [vmem:[%s6420_s3 + $0x18] sm:$0xff] %vm416_vm1, %v4473_v53  ;;  %4463 = vmatmul.mubr.msk.bf16.gmra.mrb[108].mxu0 %vm416_vm1, %v4975_v46 }
 0x14f   :  { %3499 = vst.msk [vmem:[%s6420_s3 + $0x8] sm:$0xff] %vm416_vm1, %v4475_v55  ;;  %v1079_v55 = vadd.f32 %v5787_v0, %v5515_v10  ;;  %v1082_v10 = vadd.f32 %v5787_v0, %v5526_v13 }
 0x151   :  { %v4360_v30 = vpop.f32.mrb[4].mxu0 }
 0x152   :  { %v4477_v48 = vadd.f32 %v4360_v30, %v1076_v58  ;;  %v2955_v9 = vpop.f32.mrb[5].mxu0 }
 0x153   :  { %v4479_v19 = vadd.f32 %v2955_v9, %v1074_v25  ;;  %v4361_v32 = vpop.f32.mrb[6].mxu0 }
 0x154   :  { %3504 = vst.msk [vmem:[%s6420_s3 + $0x30] sm:$0xff] %vm416_vm1, %v4477_v48  ;;  %v4481_v60 = vadd.f32 %v4361_v32, %v1077_v35  ;;  %v2958_v41 = vpop.f32.mrb[7].mxu0  ;;  %v1085_v48 = vadd.f32 %v5531_v15, %v5787_v0  ;;  %v1088_v15 = vadd.f32 %v5548_v20, %v5787_v0 }
 0x155   :  { %3502 = vst.msk [vmem:[%s6420_s3 + $0x20] sm:$0xff] %vm416_vm1, %v4479_v19  ;;  %v4483_v61 = vadd.f32 %v2958_v41, %v1075_v14  ;;  %v1083_v19 = vadd.f32 %v5787_v0, %v5539_v18  ;;  %v1086_v18 = vadd.f32 %v5787_v0, %v5550_v21 }
 0x156   :  { %3505 = vst.msk [vmem:[%s6420_s3 + $0x38] sm:$0xff] %vm416_vm1, %v4481_v60 }
 0x157   :  { %3503 = vst.msk [vmem:[%s6420_s3 + $0x28] sm:$0xff] %vm416_vm1, %v4483_v61 }
 0x159   :  { %v4364_v46 = vpop.f32.mrb[8].mxu0 }
 0x15a   :  { %v4485_v51 = vadd.f32 %v4364_v46, %v1080_v63  ;;  %v2971_v53 = vpop.f32.mrb[9].mxu0  ;;  %v1089_v63 = vadd.f32 %v5555_v23, %v5787_v0  ;;  %v1092_v23 = vadd.f32 %v5572_v28, %v5787_v0 }
 0x15b   :  { %v4487_v58 = vadd.f32 %v2971_v53, %v1078_v2  ;;  %v4365_v25 = vpop.f32.mrb[10].mxu0 }
 0x15c   :  { %3508 = vst.msk [vmem:[%s6420_s3 + $0x50] sm:$0xff] %vm416_vm1, %v4485_v51  ;;  %v4489_v4 = vadd.f32 %v4365_v25, %v1081_v52  ;;  %v2974_v30 = vpop.f32.mrb[11].mxu0  ;;  %v1087_v52 = vadd.f32 %v5787_v0, %v5563_v26  ;;  %v1090_v26 = vadd.f32 %v5787_v0, %v5574_v29  ;;  %v1093_v25 = vadd.f32 %v5579_v31, %v5787_v0 }
 0x15d   :  { %3506 = vst.msk [vmem:[%s6420_s3 + $0x40] sm:$0xff] %vm416_vm1, %v4487_v58  ;;  %v4491_v5 = vadd.f32 %v2974_v30, %v1079_v55  ;;  %v1096_v31 = vadd.f32 %v5596_v36, %v5787_v0 }
 0x15e   :  { %3509 = vst.msk [vmem:[%s6420_s3 + $0x58] sm:$0xff] %vm416_vm1, %v4489_v4 }
 0x15f   :  { %3507 = vst.msk [vmem:[%s6420_s3 + $0x48] sm:$0xff] %vm416_vm1, %v4491_v5  ;;  %v1091_v5 = vadd.f32 %v5787_v0, %v5587_v34  ;;  %v1094_v34 = vadd.f32 %v5787_v0, %v5598_v37 }
 0x161   :  { %v4368_v35 = vpop.f32.mrb[12].mxu0 }
 0x162   :  { %v4493_v9 = vadd.f32 %v4368_v35, %v1084_v7  ;;  %v2987_v14 = vpop.f32.mrb[13].mxu0 }
 0x163   :  { %v4495_v32 = vadd.f32 %v2987_v14, %v1082_v10  ;;  %v4369_v60 = vpop.f32.mrb[14].mxu0 }
 0x164   :  { %3512 = vst.msk [vmem:[%s6420_s3 + $0x70] sm:$0xff] %vm416_vm1, %v4493_v9  ;;  %v4497_v12 = vadd.f32 %v4369_v60, %v1085_v48  ;;  %v2990_v41 = vpop.f32.mrb[15].mxu0  ;;  %v1097_v9 = vadd.f32 %v5603_v39, %v5787_v0  ;;  %v1100_v39 = vadd.f32 %v5620_v44, %v5787_v0 }
 0x165   :  { %3510 = vst.msk [vmem:[%s6420_s3 + $0x60] sm:$0xff] %vm416_vm1, %v4495_v32  ;;  %v4499_v13 = vadd.f32 %v2990_v41, %v1083_v19  ;;  %v1095_v32 = vadd.f32 %v5787_v0, %v5611_v42  ;;  %v1098_v42 = vadd.f32 %v5787_v0, %v5622_v45 }
 0x166   :  { %3513 = vst.msk [vmem:[%s6420_s3 + $0x78] sm:$0xff] %vm416_vm1, %v4497_v12 }
 0x167   :  { %3511 = vst.msk [vmem:[%s6420_s3 + $0x68] sm:$0xff] %vm416_vm1, %v4499_v13 }
 0x169   :  { %v4372_v61 = vpop.f32.mrb[16].mxu0 }
 0x16a   :  { %v4501_v2 = vadd.f32 %v4372_v61, %v1088_v15  ;;  %v3003_v46 = vpop.f32.mrb[17].mxu0  ;;  %v1101_v15 = vadd.f32 %v5627_v47, %v5787_v0  ;;  %v1104_v47 = vadd.f32 %v5644_v54, %v5787_v0 }
 0x16b   :  { %v4503_v51 = vadd.f32 %v3003_v46, %v1086_v18  ;;  %v4373_v53 = vpop.f32.mrb[18].mxu0 }
 0x16c   :  { %3516 = vst.msk [vmem:[%s6420_s3 + $0x90] sm:$0xff] %vm416_vm1, %v4501_v2  ;;  %v4505_v20 = vadd.f32 %v4373_v53, %v1089_v63  ;;  %v3006_v55 = vpop.f32.mrb[19].mxu0  ;;  %v1099_v63 = vadd.f32 %v5787_v0, %v5635_v50  ;;  %v1102_v50 = vadd.f32 %v5787_v0, %v5646_v56  ;;  %v1105_v53 = vadd.f32 %v5651_v59, %v5787_v0 }
 0x16d   :  { %3514 = vst.msk [vmem:[%s6420_s3 + $0x80] sm:$0xff] %vm416_vm1, %v4503_v51  ;;  %v4507_v21 = vadd.f32 %v3006_v55, %v1087_v52  ;;  %v1108_v59 = vadd.f32 %v5668_v6, %v5787_v0 }
 0x16e   :  { %3517 = vst.msk [vmem:[%s6420_s3 + $0x98] sm:$0xff] %vm416_vm1, %v4505_v20 }
 0x16f   :  { %3515 = vst.msk [vmem:[%s6420_s3 + $0x88] sm:$0xff] %vm416_vm1, %v4507_v21  ;;  %v1103_v21 = vadd.f32 %v5787_v0, %v5659_v1  ;;  %v1106_v1 = vadd.f32 %v5787_v0, %v5670_v8 }
 0x171   :  { %v4376_v58 = vpop.f32.mrb[20].mxu0 }
 0x172   :  { %v4509_v4 = vadd.f32 %v4376_v58, %v1092_v23  ;;  %v3019_v30 = vpop.f32.mrb[21].mxu0 }
 0x173   :  { %v4511_v7 = vadd.f32 %v3019_v30, %v1090_v26  ;;  %v4377_v10 = vpop.f32.mrb[22].mxu0 }
 0x174   :  { %3520 = vst.msk [vmem:[%s6420_s3 + $0xb0] sm:$0xff] %vm416_vm1, %v4509_v4  ;;  %v4513_v28 = vadd.f32 %v4377_v10, %v1093_v25  ;;  %v3022_v35 = vpop.f32.mrb[23].mxu0  ;;  %v1109_v4 = vadd.f32 %v5675_v11, %v5787_v0  ;;  %v1112_v11 = vadd.f32 %v5692_v22, %v5787_v0 }
 0x175   :  { %3518 = vst.msk [vmem:[%s6420_s3 + $0xa0] sm:$0xff] %vm416_vm1, %v4511_v7  ;;  %v4515_v29 = vadd.f32 %v3022_v35, %v1091_v5  ;;  %v1107_v7 = vadd.f32 %v5787_v0, %v5683_v17  ;;  %v1110_v17 = vadd.f32 %v5787_v0, %v5694_v24 }
 0x176   :  { %3521 = vst.msk [vmem:[%s6420_s3 + $0xb8] sm:$0xff] %vm416_vm1, %v4513_v28 }
 0x177   :  { %3519 = vst.msk [vmem:[%s6420_s3 + $0xa8] sm:$0xff] %vm416_vm1, %v4515_v29 }
 0x179   :  { %v4380_v48 = vpop.f32.mrb[24].mxu0 }
 0x17a   :  { %v4517_v14 = vadd.f32 %v4380_v48, %v1096_v31  ;;  %v3035_v19 = vpop.f32.mrb[25].mxu0  ;;  %v1113_v31 = vadd.f32 %v5699_v27, %v5787_v0  ;;  %v1116_v27 = vadd.f32 %v5716_v38, %v5787_v0 }
 0x17b   :  { %v4519_v60 = vadd.f32 %v3035_v19, %v1094_v34  ;;  %v4381_v12 = vpop.f32.mrb[26].mxu0 }
 0x17c   :  { %3524 = vst.msk [vmem:[%s6420_s3 + $0xd0] sm:$0xff] %vm416_vm1, %v4517_v14  ;;  %v4521_v36 = vadd.f32 %v4381_v12, %v1097_v9  ;;  %v3038_v41 = vpop.f32.mrb[27].mxu0  ;;  %v1111_v9 = vadd.f32 %v5787_v0, %v5707_v33  ;;  %v1114_v33 = vadd.f32 %v5787_v0, %v5718_v40  ;;  %v1117_v12 = vadd.f32 %v5723_v43, %v5787_v0 }
 0x17d   :  { %3522 = vst.msk [vmem:[%s6420_s3 + $0xc0] sm:$0xff] %vm416_vm1, %v4519_v60  ;;  %v4523_v37 = vadd.f32 %v3038_v41, %v1095_v32  ;;  %v1120_v43 = vadd.f32 %v5740_v57, %v5787_v0 }
 0x17e   :  { %3525 = vst.msk [vmem:[%s6420_s3 + $0xd8] sm:$0xff] %vm416_vm1, %v4521_v36 }
 0x17f   :  { %3523 = vst.msk [vmem:[%s6420_s3 + $0xc8] sm:$0xff] %vm416_vm1, %v4523_v37  ;;  %v1115_v37 = vadd.f32 %v5787_v0, %v5731_v49  ;;  %v1118_v49 = vadd.f32 %v5787_v0, %v5742_v62 }
 0x181   :  { %v4384_v13 = vpop.f32.mrb[28].mxu0 }
 0x182   :  { %v4525_v18 = vadd.f32 %v4384_v13, %v1100_v39  ;;  %v3051_v61 = vpop.f32.mrb[29].mxu0 }
 0x183   :  { %v4527_v2 = vadd.f32 %v3051_v61, %v1098_v42  ;;  %v4385_v46 = vpop.f32.mrb[30].mxu0 }
 0x184   :  { %3528 = vst.msk [vmem:[%s6420_s3 + $0xf0] sm:$0xff] %vm416_vm1, %v4525_v18  ;;  %v4529_v44 = vadd.f32 %v4385_v46, %v1101_v15  ;;  %v3054_v52 = vpop.f32.mrb[31].mxu0  ;;  %v1121_v18 = vadd.f32 %v5747_v3, %v5787_v0  ;;  %v6425_v3 = vld [vmem:[#allocation2_spill] sm:$0xff] }
 0x185   :  { %3526 = vst.msk [vmem:[%s6420_s3 + $0xe0] sm:$0xff] %vm416_vm1, %v4527_v2  ;;  %v4531_v45 = vadd.f32 %v3054_v52, %v1099_v63  ;;  %v1119_v2 = vadd.f32 %v5787_v0, %v5755_v16  ;;  %v1124_v16 = vadd.f32 %v6425_v3, %v5787_v0 }
 0x186   :  { %3529 = vst.msk [vmem:[%s6420_s3 + $0xf8] sm:$0xff] %vm416_vm1, %v4529_v44 }
 0x187   :  { %3527 = vst.msk [vmem:[%s6420_s3 + $0xe8] sm:$0xff] %vm416_vm1, %v4531_v45  ;;  %v6426_v45 = vld [vmem:[#allocation3_spill] sm:$0xff] }
 0x189   :  { %v4388_v51 = vpop.f32.mrb[32].mxu0 }
 0x18a   :  { %v4533_v20 = vadd.f32 %v4388_v51, %v1104_v47  ;;  %v3067_v55 = vpop.f32.mrb[33].mxu0  ;;  %v1122_v47 = vadd.f32 %v5787_v0, %v6426_v45  ;;  %v6427_v51 = vld [vmem:[#allocation4_spill] sm:$0xff] }
 0x18b   :  { %v4535_v23 = vadd.f32 %v3067_v55, %v1102_v50  ;;  %v4389_v26 = vpop.f32.mrb[34].mxu0 }
 0x18c   :  { %3532 = vst.msk [vmem:[%s6420_s3 + $0x110] sm:$0xff] %vm416_vm1, %v4533_v20  ;;  %v4537_v54 = vadd.f32 %v4389_v26, %v1105_v53  ;;  %v3070_v58 = vpop.f32.mrb[35].mxu0  ;;  %v1125_v53 = vadd.f32 %v6427_v51, %v5787_v0 }
 0x18d   :  { %3530 = vst.msk [vmem:[%s6420_s3 + $0x100] sm:$0xff] %vm416_vm1, %v4535_v23  ;;  %v4539_v56 = vadd.f32 %v3070_v58, %v1103_v21  ;;  %v6428_v21 = vld [vmem:[#allocation5_spill] sm:$0xff] }
 0x18e   :  { %3533 = vst.msk [vmem:[%s6420_s3 + $0x118] sm:$0xff] %vm416_vm1, %v4537_v54  ;;  %v1123_v23 = vadd.f32 %v5787_v0, %v6428_v21 }
 0x18f   :  { %3531 = vst.msk [vmem:[%s6420_s3 + $0x108] sm:$0xff] %vm416_vm1, %v4539_v56 }
 0x191   :  { %v4392_v25 = vpop.f32.mrb[36].mxu0 }
 0x192   :  { %v4541_v30 = vadd.f32 %v4392_v25, %v1108_v59  ;;  %v3083_v5 = vpop.f32.mrb[37].mxu0 }
 0x193   :  { %v4543_v10 = vadd.f32 %v3083_v5, %v1106_v1  ;;  %v4393_v28 = vpop.f32.mrb[38].mxu0 }
 0x194   :  { %3536 = vst.msk [vmem:[%s6420_s3 + $0x130] sm:$0xff] %vm416_vm1, %v4541_v30  ;;  %v4545_v6 = vadd.f32 %v4393_v28, %v1109_v4  ;;  %v3086_v35 = vpop.f32.mrb[39].mxu0 }
 0x195   :  { %3534 = vst.msk [vmem:[%s6420_s3 + $0x120] sm:$0xff] %vm416_vm1, %v4543_v10  ;;  %v4547_v8 = vadd.f32 %v3086_v35, %v1107_v7 }
 0x196   :  { %3537 = vst.msk [vmem:[%s6420_s3 + $0x138] sm:$0xff] %vm416_vm1, %v4545_v6 }
 0x197   :  { %3535 = vst.msk [vmem:[%s6420_s3 + $0x128] sm:$0xff] %vm416_vm1, %v4547_v8 }
 0x199   :  { %v4396_v29 = vpop.f32.mrb[40].mxu0 }
 0x19a   :  { %v4549_v34 = vadd.f32 %v4396_v29, %v1112_v11  ;;  %v3099_v48 = vpop.f32.mrb[41].mxu0 }
 0x19b   :  { %v4551_v14 = vadd.f32 %v3099_v48, %v1110_v17  ;;  %v4397_v19 = vpop.f32.mrb[42].mxu0 }
 0x19c   :  { %3540 = vst.msk [vmem:[%s6420_s3 + $0x150] sm:$0xff] %vm416_vm1, %v4549_v34  ;;  %v4553_v22 = vadd.f32 %v4397_v19, %v1113_v31  ;;  %v3102_v32 = vpop.f32.mrb[43].mxu0 }
 0x19d   :  { %3538 = vst.msk [vmem:[%s6420_s3 + $0x140] sm:$0xff] %vm416_vm1, %v4551_v14  ;;  %v4555_v24 = vadd.f32 %v3102_v32, %v1111_v9 }
 0x19e   :  { %3541 = vst.msk [vmem:[%s6420_s3 + $0x158] sm:$0xff] %vm416_vm1, %v4553_v22 }
 0x19f   :  { %3539 = vst.msk [vmem:[%s6420_s3 + $0x148] sm:$0xff] %vm416_vm1, %v4555_v24 }
 0x1a1   :  { %v4400_v60 = vpop.f32.mrb[44].mxu0 }
 0x1a2   :  { %v4557_v36 = vadd.f32 %v4400_v60, %v1116_v27  ;;  %v3115_v41 = vpop.f32.mrb[45].mxu0 }
 0x1a3   :  { %v4559_v39 = vadd.f32 %v3115_v41, %v1114_v33  ;;  %v4401_v42 = vpop.f32.mrb[46].mxu0 }
 0x1a4   :  { %3544 = vst.msk [vmem:[%s6420_s3 + $0x170] sm:$0xff] %vm416_vm1, %v4557_v36  ;;  %v4561_v38 = vadd.f32 %v4401_v42, %v1117_v12  ;;  %v3118_v13 = vpop.f32.mrb[47].mxu0 }
 0x1a5   :  { %3542 = vst.msk [vmem:[%s6420_s3 + $0x160] sm:$0xff] %vm416_vm1, %v4559_v39  ;;  %v4563_v40 = vadd.f32 %v3118_v13, %v1115_v37 }
 0x1a6   :  { %3545 = vst.msk [vmem:[%s6420_s3 + $0x178] sm:$0xff] %vm416_vm1, %v4561_v38 }
 0x1a7   :  { %3543 = vst.msk [vmem:[%s6420_s3 + $0x168] sm:$0xff] %vm416_vm1, %v4563_v40 }
 0x1a9   :  { %v4404_v15 = vpop.f32.mrb[48].mxu0 }
 0x1aa   :  { %v4565_v61 = vadd.f32 %v4404_v15, %v1120_v43  ;;  %v3131_v63 = vpop.f32.mrb[49].mxu0 }
 0x1ab   :  { %v4567_v46 = vadd.f32 %v3131_v63, %v1118_v49  ;;  %v4405_v44 = vpop.f32.mrb[50].mxu0 }
 0x1ac   :  { %3548 = vst.msk [vmem:[%s6420_s3 + $0x190] sm:$0xff] %vm416_vm1, %v4565_v61  ;;  %v4569_v57 = vadd.f32 %v4405_v44, %v1121_v18  ;;  %v3134_v52 = vpop.f32.mrb[51].mxu0 }
 0x1ad   :  { %3546 = vst.msk [vmem:[%s6420_s3 + $0x180] sm:$0xff] %vm416_vm1, %v4567_v46  ;;  %v4571_v62 = vadd.f32 %v3134_v52, %v1119_v2 }
 0x1ae   :  { %3549 = vst.msk [vmem:[%s6420_s3 + $0x198] sm:$0xff] %vm416_vm1, %v4569_v57 }
 0x1af   :  { %3547 = vst.msk [vmem:[%s6420_s3 + $0x188] sm:$0xff] %vm416_vm1, %v4571_v62 }
 0x1b1   :  { %v4408_v50 = vpop.f32.mrb[52].mxu0 }
 0x1b2   :  { %v4573_v20 = vadd.f32 %v4408_v50, %v1124_v16  ;;  %v3147_v55 = vpop.f32.mrb[53].mxu0 }
 0x1b3   :  { %v4575_v26 = vadd.f32 %v3147_v55, %v1122_v47  ;;  %v4409_v54 = vpop.f32.mrb[54].mxu0 }
 0x1b4   :  { %3552 = vst.msk [vmem:[%s6420_s3 + $0x1b0] sm:$0xff] %vm416_vm1, %v4573_v20  ;;  %v4577_v58 = vadd.f32 %v4409_v54, %v1125_v53  ;;  %v3150_v56 = vpop.f32.mrb[55].mxu0 }
 0x1b5   :  { %3550 = vst.msk [vmem:[%s6420_s3 + $0x1a0] sm:$0xff] %vm416_vm1, %v4575_v26  ;;  %v4579_v59 = vadd.f32 %v3150_v56, %v1123_v23 }
 0x1b6   :  { %3553 = vst.msk [vmem:[%s6420_s3 + $0x1b8] sm:$0xff] %vm416_vm1, %v4577_v58 }
 0x1b7   :  { %3551 = vst.msk [vmem:[%s6420_s3 + $0x1a8] sm:$0xff] %vm416_vm1, %v4579_v59 }
 0x1b9   :  { %v4298_v1 = vpop.f32.mrb[56].mxu1  ;;  %v4412_v4 = vpop.f32.mrb[56].mxu0 }
 0x1ba   :  { %v4580_v25 = vadd.f32 %v4298_v1, %v5787_v0  ;;  %v2005_v30 = vpop.f32.mrb[57].mxu1  ;;  %v3163_v7 = vpop.f32.mrb[57].mxu0 }
 0x1bb   :  { %v4582_v5 = vadd.f32 %v5787_v0, %v2005_v30  ;;  %v4299_v10 = vpop.f32.mrb[58].mxu1  ;;  %v4413_v35 = vpop.f32.mrb[58].mxu0 }
 0x1bc   :  { %v4581_v28 = vadd.f32 %v4580_v25, %v4412_v4  ;;  %v4584_v6 = vadd.f32 %v4299_v10, %v5787_v0  ;;  %v2008_v8 = vpop.f32.mrb[59].mxu1  ;;  %v3166_v29 = vpop.f32.mrb[59].mxu0 }
 0x1bd   :  { %v4583_v11 = vadd.f32 %v4582_v5, %v3163_v7  ;;  %v4586_v17 = vadd.f32 %v5787_v0, %v2008_v8 }
 0x1be   :  { %3556 = vst.msk [vmem:[%s6420_s3 + $0x1d0] sm:$0xff] %vm416_vm1, %v4581_v28  ;;  %v4585_v31 = vadd.f32 %v4584_v6, %v4413_v35 }
 0x1bf   :  { %3554 = vst.msk [vmem:[%s6420_s3 + $0x1c0] sm:$0xff] %vm416_vm1, %v4583_v11  ;;  %v4587_v34 = vadd.f32 %v4586_v17, %v3166_v29 }
 0x1c0   :  { %3557 = vst.msk [vmem:[%s6420_s3 + $0x1d8] sm:$0xff] %vm416_vm1, %v4585_v31 }
 0x1c1   :  { %3555 = vst.msk [vmem:[%s6420_s3 + $0x1c8] sm:$0xff] %vm416_vm1, %v4587_v34  ;;  %v4302_v48 = vpop.f32.mrb[60].mxu1  ;;  %v4416_v14 = vpop.f32.mrb[60].mxu0 }
 0x1c2   :  { %v4588_v9 = vadd.f32 %v4302_v48, %v5787_v0  ;;  %v2021_v19 = vpop.f32.mrb[61].mxu1  ;;  %v3179_v32 = vpop.f32.mrb[61].mxu0 }
 0x1c3   :  { %v4590_v22 = vadd.f32 %v5787_v0, %v2021_v19  ;;  %v4303_v24 = vpop.f32.mrb[62].mxu1  ;;  %v4417_v60 = vpop.f32.mrb[62].mxu0 }
 0x1c4   :  { %v4589_v27 = vadd.f32 %v4588_v9, %v4416_v14  ;;  %v4592_v33 = vadd.f32 %v4303_v24, %v5787_v0  ;;  %v2024_v12 = vpop.f32.mrb[63].mxu1  ;;  %v3182_v37 = vpop.f32.mrb[63].mxu0 }
 0x1c5   :  { %v4591_v36 = vadd.f32 %v4590_v22, %v3179_v32  ;;  %v4594_v41 = vadd.f32 %v5787_v0, %v2024_v12 }
 0x1c6   :  { %3560 = vst.msk [vmem:[%s6420_s3 + $0x1f0] sm:$0xff] %vm416_vm1, %v4589_v27  ;;  %v4593_v39 = vadd.f32 %v4592_v33, %v4417_v60 }
 0x1c7   :  { %3558 = vst.msk [vmem:[%s6420_s3 + $0x1e0] sm:$0xff] %vm416_vm1, %v4591_v36  ;;  %v4595_v42 = vadd.f32 %v4594_v41, %v3182_v37 }
 0x1c8   :  { %3561 = vst.msk [vmem:[%s6420_s3 + $0x1f8] sm:$0xff] %vm416_vm1, %v4593_v39 }
 0x1c9   :  { %3559 = vst.msk [vmem:[%s6420_s3 + $0x1e8] sm:$0xff] %vm416_vm1, %v4595_v42  ;;  %v4306_v38 = vpop.f32.mrb[64].mxu1  ;;  %v4420_v40 = vpop.f32.mrb[64].mxu0 }
 0x1ca   :  { %v4596_v13 = vadd.f32 %v4306_v38, %v5787_v0  ;;  %v2037_v43 = vpop.f32.mrb[65].mxu1  ;;  %v3195_v15 = vpop.f32.mrb[65].mxu0 }
 0x1cb   :  { %v4598_v49 = vadd.f32 %v5787_v0, %v2037_v43  ;;  %v4307_v18 = vpop.f32.mrb[66].mxu1  ;;  %v4421_v2 = vpop.f32.mrb[66].mxu0 }
 0x1cc   :  { %v4597_v61 = vadd.f32 %v4596_v13, %v4420_v40  ;;  %v4600_v63 = vadd.f32 %v4307_v18, %v5787_v0  ;;  %v2040_v46 = vpop.f32.mrb[67].mxu1  ;;  %v3198_v52 = vpop.f32.mrb[67].mxu0 }
 0x1cd   :  { %v4599_v44 = vadd.f32 %v4598_v49, %v3195_v15  ;;  %v4602_v57 = vadd.f32 %v5787_v0, %v2040_v46 }
 0x1ce   :  { %3564 = vst.msk [vmem:[%s6420_s3 + $0x210] sm:$0xff] %vm416_vm1, %v4597_v61  ;;  %v4601_v62 = vadd.f32 %v4600_v63, %v4421_v2 }
 0x1cf   :  { %3562 = vst.msk [vmem:[%s6420_s3 + $0x200] sm:$0xff] %vm416_vm1, %v4599_v44  ;;  %v4603_v3 = vadd.f32 %v4602_v57, %v3198_v52 }
 0x1d0   :  { %3565 = vst.msk [vmem:[%s6420_s3 + $0x218] sm:$0xff] %vm416_vm1, %v4601_v62 }
 0x1d1   :  { %3563 = vst.msk [vmem:[%s6420_s3 + $0x208] sm:$0xff] %vm416_vm1, %v4603_v3  ;;  %v4310_v16 = vpop.f32.mrb[68].mxu1  ;;  %v4424_v47 = vpop.f32.mrb[68].mxu0 }
 0x1d2   :  { %v4604_v45 = vadd.f32 %v4310_v16, %v5787_v0  ;;  %v2053_v50 = vpop.f32.mrb[69].mxu1  ;;  %v3211_v53 = vpop.f32.mrb[69].mxu0 }
 0x1d3   :  { %v4606_v51 = vadd.f32 %v5787_v0, %v2053_v50  ;;  %v4311_v20 = vpop.f32.mrb[70].mxu1  ;;  %v4425_v23 = vpop.f32.mrb[70].mxu0 }
 0x1d4   :  { %v4605_v55 = vadd.f32 %v4604_v45, %v4424_v47  ;;  %v4608_v21 = vadd.f32 %v4311_v20, %v5787_v0  ;;  %v2056_v26 = vpop.f32.mrb[71].mxu1  ;;  %v3214_v56 = vpop.f32.mrb[71].mxu0 }
 0x1d5   :  { %v4607_v54 = vadd.f32 %v4606_v51, %v3211_v53  ;;  %v4610_v58 = vadd.f32 %v5787_v0, %v2056_v26 }
 0x1d6   :  { %3568 = vst.msk [vmem:[%s6420_s3 + $0x230] sm:$0xff] %vm416_vm1, %v4605_v55  ;;  %v4609_v59 = vadd.f32 %v4608_v21, %v4425_v23 }
 0x1d7   :  { %3566 = vst.msk [vmem:[%s6420_s3 + $0x220] sm:$0xff] %vm416_vm1, %v4607_v54  ;;  %v4611_v1 = vadd.f32 %v4610_v58, %v3214_v56 }
 0x1d8   :  { %3569 = vst.msk [vmem:[%s6420_s3 + $0x238] sm:$0xff] %vm416_vm1, %v4609_v59 }
 0x1d9   :  { %3567 = vst.msk [vmem:[%s6420_s3 + $0x228] sm:$0xff] %vm416_vm1, %v4611_v1  ;;  %v4314_v25 = vpop.f32.mrb[72].mxu1  ;;  %v4428_v30 = vpop.f32.mrb[72].mxu0 }
 0x1da   :  { %v4612_v4 = vadd.f32 %v4314_v25, %v5787_v0  ;;  %v2069_v5 = vpop.f32.mrb[73].mxu1  ;;  %v3227_v10 = vpop.f32.mrb[73].mxu0 }
 0x1db   :  { %v4614_v7 = vadd.f32 %v5787_v0, %v2069_v5  ;;  %v4315_v28 = vpop.f32.mrb[74].mxu1  ;;  %v4429_v8 = vpop.f32.mrb[74].mxu0 }
 0x1dc   :  { %v4613_v6 = vadd.f32 %v4612_v4, %v4428_v30  ;;  %v4616_v35 = vadd.f32 %v4315_v28, %v5787_v0  ;;  %v2072_v11 = vpop.f32.mrb[75].mxu1  ;;  %v3230_v31 = vpop.f32.mrb[75].mxu0 }
 0x1dd   :  { %v4615_v17 = vadd.f32 %v4614_v7, %v3227_v10  ;;  %v4618_v29 = vadd.f32 %v5787_v0, %v2072_v11 }
 0x1de   :  { %3572 = vst.msk [vmem:[%s6420_s3 + $0x250] sm:$0xff] %vm416_vm1, %v4613_v6  ;;  %v4617_v34 = vadd.f32 %v4616_v35, %v4429_v8 }
 0x1df   :  { %3570 = vst.msk [vmem:[%s6420_s3 + $0x240] sm:$0xff] %vm416_vm1, %v4615_v17  ;;  %v4619_v48 = vadd.f32 %v4618_v29, %v3230_v31 }
 0x1e0   :  { %3573 = vst.msk [vmem:[%s6420_s3 + $0x258] sm:$0xff] %vm416_vm1, %v4617_v34 }
 0x1e1   :  { %3571 = vst.msk [vmem:[%s6420_s3 + $0x248] sm:$0xff] %vm416_vm1, %v4619_v48  ;;  %v4318_v9 = vpop.f32.mrb[76].mxu1  ;;  %v4432_v19 = vpop.f32.mrb[76].mxu0 }
 0x1e2   :  { %v4620_v14 = vadd.f32 %v4318_v9, %v5787_v0  ;;  %v2085_v22 = vpop.f32.mrb[77].mxu1  ;;  %v3243_v24 = vpop.f32.mrb[77].mxu0 }
 0x1e3   :  { %v4622_v32 = vadd.f32 %v5787_v0, %v2085_v22  ;;  %v4319_v27 = vpop.f32.mrb[78].mxu1  ;;  %v4433_v12 = vpop.f32.mrb[78].mxu0 }
 0x1e4   :  { %v4621_v33 = vadd.f32 %v4620_v14, %v4432_v19  ;;  %v4624_v60 = vadd.f32 %v4319_v27, %v5787_v0  ;;  %v2088_v36 = vpop.f32.mrb[79].mxu1  ;;  %v3246_v39 = vpop.f32.mrb[79].mxu0 }
 0x1e5   :  { %v4623_v41 = vadd.f32 %v4622_v32, %v3243_v24  ;;  %v4626_v37 = vadd.f32 %v5787_v0, %v2088_v36 }
 0x1e6   :  { %3576 = vst.msk [vmem:[%s6420_s3 + $0x270] sm:$0xff] %vm416_vm1, %v4621_v33  ;;  %v4625_v42 = vadd.f32 %v4624_v60, %v4433_v12 }
 0x1e7   :  { %3574 = vst.msk [vmem:[%s6420_s3 + $0x260] sm:$0xff] %vm416_vm1, %v4623_v41  ;;  %v4627_v38 = vadd.f32 %v4626_v37, %v3246_v39 }
 0x1e8   :  { %3577 = vst.msk [vmem:[%s6420_s3 + $0x278] sm:$0xff] %vm416_vm1, %v4625_v42 }
 0x1e9   :  { %3575 = vst.msk [vmem:[%s6420_s3 + $0x268] sm:$0xff] %vm416_vm1, %v4627_v38  ;;  %v4322_v13 = vpop.f32.mrb[80].mxu1  ;;  %v4436_v43 = vpop.f32.mrb[80].mxu0 }
 0x1ea   :  { %v4628_v40 = vadd.f32 %v4322_v13, %v5787_v0  ;;  %v2101_v49 = vpop.f32.mrb[81].mxu1  ;;  %v3259_v18 = vpop.f32.mrb[81].mxu0 }
 0x1eb   :  { %v4630_v15 = vadd.f32 %v5787_v0, %v2101_v49  ;;  %v4323_v61 = vpop.f32.mrb[82].mxu1  ;;  %v4437_v46 = vpop.f32.mrb[82].mxu0 }
 0x1ec   :  { %v4629_v63 = vadd.f32 %v4628_v40, %v4436_v43  ;;  %v4632_v2 = vadd.f32 %v4323_v61, %v5787_v0  ;;  %v2104_v44 = vpop.f32.mrb[83].mxu1  ;;  %v3262_v62 = vpop.f32.mrb[83].mxu0 }
 0x1ed   :  { %v4631_v57 = vadd.f32 %v4630_v15, %v3259_v18  ;;  %v4634_v52 = vadd.f32 %v5787_v0, %v2104_v44 }
 0x1ee   :  { %3580 = vst.msk [vmem:[%s6420_s3 + $0x290] sm:$0xff] %vm416_vm1, %v4629_v63  ;;  %v4633_v3 = vadd.f32 %v4632_v2, %v4437_v46 }
 0x1ef   :  { %3578 = vst.msk [vmem:[%s6420_s3 + $0x280] sm:$0xff] %vm416_vm1, %v4631_v57  ;;  %v4635_v16 = vadd.f32 %v4634_v52, %v3262_v62 }
 0x1f0   :  { %3581 = vst.msk [vmem:[%s6420_s3 + $0x298] sm:$0xff] %vm416_vm1, %v4633_v3 }
 0x1f1   :  { %3579 = vst.msk [vmem:[%s6420_s3 + $0x288] sm:$0xff] %vm416_vm1, %v4635_v16  ;;  %v4326_v45 = vpop.f32.mrb[84].mxu1  ;;  %v4440_v50 = vpop.f32.mrb[84].mxu0 }
 0x1f2   :  { %v4636_v47 = vadd.f32 %v4326_v45, %v5787_v0  ;;  %v2117_v51 = vpop.f32.mrb[85].mxu1  ;;  %v3275_v20 = vpop.f32.mrb[85].mxu0 }
 0x1f3   :  { %v4638_v53 = vadd.f32 %v5787_v0, %v2117_v51  ;;  %v4327_v55 = vpop.f32.mrb[86].mxu1  ;;  %v4441_v26 = vpop.f32.mrb[86].mxu0 }
 0x1f4   :  { %v4637_v21 = vadd.f32 %v4636_v47, %v4440_v50  ;;  %v4640_v23 = vadd.f32 %v4327_v55, %v5787_v0  ;;  %v2120_v54 = vpop.f32.mrb[87].mxu1  ;;  %v3278_v59 = vpop.f32.mrb[87].mxu0 }
 0x1f5   :  { %v4639_v58 = vadd.f32 %v4638_v53, %v3275_v20  ;;  %v4642_v56 = vadd.f32 %v5787_v0, %v2120_v54 }
 0x1f6   :  { %3584 = vst.msk [vmem:[%s6420_s3 + $0x2b0] sm:$0xff] %vm416_vm1, %v4637_v21  ;;  %v4641_v1 = vadd.f32 %v4640_v23, %v4441_v26 }
 0x1f7   :  { %3582 = vst.msk [vmem:[%s6420_s3 + $0x2a0] sm:$0xff] %vm416_vm1, %v4639_v58  ;;  %v4643_v25 = vadd.f32 %v4642_v56, %v3278_v59 }
 0x1f8   :  { %3585 = vst.msk [vmem:[%s6420_s3 + $0x2b8] sm:$0xff] %vm416_vm1, %v4641_v1 }
 0x1f9   :  { %3583 = vst.msk [vmem:[%s6420_s3 + $0x2a8] sm:$0xff] %vm416_vm1, %v4643_v25  ;;  %v4330_v4 = vpop.f32.mrb[88].mxu1  ;;  %v4444_v5 = vpop.f32.mrb[88].mxu0 }
 0x1fa   :  { %v4644_v30 = vadd.f32 %v4330_v4, %v5787_v0  ;;  %v2133_v7 = vpop.f32.mrb[89].mxu1  ;;  %v3291_v28 = vpop.f32.mrb[89].mxu0 }
 0x1fb   :  { %v4646_v10 = vadd.f32 %v5787_v0, %v2133_v7  ;;  %v4331_v6 = vpop.f32.mrb[90].mxu1  ;;  %v4445_v11 = vpop.f32.mrb[90].mxu0 }
 0x1fc   :  { %v4645_v35 = vadd.f32 %v4644_v30, %v4444_v5  ;;  %v4648_v8 = vadd.f32 %v4331_v6, %v5787_v0  ;;  %v2136_v17 = vpop.f32.mrb[91].mxu1  ;;  %v3294_v34 = vpop.f32.mrb[91].mxu0 }
 0x1fd   :  { %v4647_v29 = vadd.f32 %v4646_v10, %v3291_v28  ;;  %v4650_v31 = vadd.f32 %v5787_v0, %v2136_v17 }
 0x1fe   :  { %3588 = vst.msk [vmem:[%s6420_s3 + $0x2d0] sm:$0xff] %vm416_vm1, %v4645_v35  ;;  %v4649_v48 = vadd.f32 %v4648_v8, %v4445_v11 }
 0x1ff   :  { %3586 = vst.msk [vmem:[%s6420_s3 + $0x2c0] sm:$0xff] %vm416_vm1, %v4647_v29  ;;  %v4651_v9 = vadd.f32 %v4650_v31, %v3294_v34 }
 0x200   :  { %3589 = vst.msk [vmem:[%s6420_s3 + $0x2d8] sm:$0xff] %vm416_vm1, %v4649_v48 }
 0x201   :  { %3587 = vst.msk [vmem:[%s6420_s3 + $0x2c8] sm:$0xff] %vm416_vm1, %v4651_v9  ;;  %v4334_v14 = vpop.f32.mrb[92].mxu1  ;;  %v4448_v22 = vpop.f32.mrb[92].mxu0 }
 0x202   :  { %v4652_v19 = vadd.f32 %v4334_v14, %v5787_v0  ;;  %v2149_v32 = vpop.f32.mrb[93].mxu1  ;;  %v3307_v27 = vpop.f32.mrb[93].mxu0 }
 0x203   :  { %v4654_v24 = vadd.f32 %v5787_v0, %v2149_v32  ;;  %v4335_v33 = vpop.f32.mrb[94].mxu1  ;;  %v4449_v36 = vpop.f32.mrb[94].mxu0 }
 0x204   :  { %v4653_v60 = vadd.f32 %v4652_v19, %v4448_v22  ;;  %v4656_v12 = vadd.f32 %v4335_v33, %v5787_v0  ;;  %v2152_v41 = vpop.f32.mrb[95].mxu1  ;;  %v3310_v42 = vpop.f32.mrb[95].mxu0 }
 0x205   :  { %v4655_v37 = vadd.f32 %v4654_v24, %v3307_v27  ;;  %v4658_v39 = vadd.f32 %v5787_v0, %v2152_v41 }
 0x206   :  { %3592 = vst.msk [vmem:[%s6420_s3 + $0x2f0] sm:$0xff] %vm416_vm1, %v4653_v60  ;;  %v4657_v38 = vadd.f32 %v4656_v12, %v4449_v36 }
 0x207   :  { %3590 = vst.msk [vmem:[%s6420_s3 + $0x2e0] sm:$0xff] %vm416_vm1, %v4655_v37  ;;  %v4659_v13 = vadd.f32 %v4658_v39, %v3310_v42 }
 0x208   :  { %3593 = vst.msk [vmem:[%s6420_s3 + $0x2f8] sm:$0xff] %vm416_vm1, %v4657_v38 }
 0x209   :  { %3591 = vst.msk [vmem:[%s6420_s3 + $0x2e8] sm:$0xff] %vm416_vm1, %v4659_v13  ;;  %v4338_v40 = vpop.f32.mrb[96].mxu1  ;;  %v4452_v49 = vpop.f32.mrb[96].mxu0 }
 0x20a   :  { %v4660_v43 = vadd.f32 %v4338_v40, %v5787_v0  ;;  %v2165_v15 = vpop.f32.mrb[97].mxu1  ;;  %v3323_v61 = vpop.f32.mrb[97].mxu0 }
 0x20b   :  { %v4662_v18 = vadd.f32 %v5787_v0, %v2165_v15  ;;  %v4339_v63 = vpop.f32.mrb[98].mxu1  ;;  %v4453_v44 = vpop.f32.mrb[98].mxu0 }
 0x20c   :  { %v4661_v2 = vadd.f32 %v4660_v43, %v4452_v49  ;;  %v4664_v46 = vadd.f32 %v4339_v63, %v5787_v0  ;;  %v2168_v57 = vpop.f32.mrb[99].mxu1  ;;  %v3326_v3 = vpop.f32.mrb[99].mxu0 }
 0x20d   :  { %v4663_v52 = vadd.f32 %v4662_v18, %v3323_v61  ;;  %v4666_v62 = vadd.f32 %v5787_v0, %v2168_v57 }
 0x20e   :  { %3596 = vst.msk [vmem:[%s6420_s3 + $0x310] sm:$0xff] %vm416_vm1, %v4661_v2  ;;  %v4665_v16 = vadd.f32 %v4664_v46, %v4453_v44 }
 0x20f   :  { %3594 = vst.msk [vmem:[%s6420_s3 + $0x300] sm:$0xff] %vm416_vm1, %v4663_v52  ;;  %v4667_v45 = vadd.f32 %v4666_v62, %v3326_v3 }
 0x210   :  { %3597 = vst.msk [vmem:[%s6420_s3 + $0x318] sm:$0xff] %vm416_vm1, %v4665_v16 }
 0x211   :  { %3595 = vst.msk [vmem:[%s6420_s3 + $0x308] sm:$0xff] %vm416_vm1, %v4667_v45  ;;  %v4342_v47 = vpop.f32.mrb[100].mxu1  ;;  %v4456_v51 = vpop.f32.mrb[100].mxu0 }
 0x212   :  { %v4668_v50 = vadd.f32 %v4342_v47, %v5787_v0  ;;  %v2181_v53 = vpop.f32.mrb[101].mxu1  ;;  %v3339_v55 = vpop.f32.mrb[101].mxu0 }
 0x213   :  { %v4670_v20 = vadd.f32 %v5787_v0, %v2181_v53  ;;  %v4343_v21 = vpop.f32.mrb[102].mxu1  ;;  %v4457_v54 = vpop.f32.mrb[102].mxu0 }
 0x214   :  { %v4669_v23 = vadd.f32 %v4668_v50, %v4456_v51  ;;  %v4672_v26 = vadd.f32 %v4343_v21, %v5787_v0  ;;  %v2184_v58 = vpop.f32.mrb[103].mxu1  ;;  %v3342_v1 = vpop.f32.mrb[103].mxu0 }
 0x215   :  { %v4671_v56 = vadd.f32 %v4670_v20, %v3339_v55  ;;  %v4674_v59 = vadd.f32 %v5787_v0, %v2184_v58 }
 0x216   :  { %3600 = vst.msk [vmem:[%s6420_s3 + $0x330] sm:$0xff] %vm416_vm1, %v4669_v23  ;;  %v4673_v25 = vadd.f32 %v4672_v26, %v4457_v54 }
 0x217   :  { %3598 = vst.msk [vmem:[%s6420_s3 + $0x320] sm:$0xff] %vm416_vm1, %v4671_v56  ;;  %v4675_v4 = vadd.f32 %v4674_v59, %v3342_v1 }
 0x218   :  { %3601 = vst.msk [vmem:[%s6420_s3 + $0x338] sm:$0xff] %vm416_vm1, %v4673_v25 }
 0x219   :  { %3599 = vst.msk [vmem:[%s6420_s3 + $0x328] sm:$0xff] %vm416_vm1, %v4675_v4  ;;  %v4346_v30 = vpop.f32.mrb[104].mxu1  ;;  %v4460_v7 = vpop.f32.mrb[104].mxu0 }
 0x21a   :  { %v4676_v5 = vadd.f32 %v4346_v30, %v5787_v0  ;;  %v2197_v10 = vpop.f32.mrb[105].mxu1  ;;  %v3355_v6 = vpop.f32.mrb[105].mxu0 }
 0x21b   :  { %v4678_v28 = vadd.f32 %v5787_v0, %v2197_v10  ;;  %v4347_v35 = vpop.f32.mrb[106].mxu1  ;;  %v4461_v17 = vpop.f32.mrb[106].mxu0 }
 0x21c   :  { %v4677_v8 = vadd.f32 %v4676_v5, %v4460_v7  ;;  %v4680_v11 = vadd.f32 %v4347_v35, %v5787_v0  ;;  %v2200_v29 = vpop.f32.mrb[107].mxu1  ;;  %v3358_v48 = vpop.f32.mrb[107].mxu0 }
 0x21d   :  { %v4679_v31 = vadd.f32 %v4678_v28, %v3355_v6  ;;  %v4682_v34 = vadd.f32 %v5787_v0, %v2200_v29 }
 0x21e   :  { %3604 = vst.msk [vmem:[%s6420_s3 + $0x350] sm:$0xff] %vm416_vm1, %v4677_v8  ;;  %v4681_v9 = vadd.f32 %v4680_v11, %v4461_v17 }
 0x21f   :  { %3602 = vst.msk [vmem:[%s6420_s3 + $0x340] sm:$0xff] %vm416_vm1, %v4679_v31  ;;  %v4683_v14 = vadd.f32 %v4682_v34, %v3358_v48 }
 0x220   :  { %3605 = vst.msk [vmem:[%s6420_s3 + $0x358] sm:$0xff] %vm416_vm1, %v4681_v9 }
 0x221   :  { %3603 = vst.msk [vmem:[%s6420_s3 + $0x348] sm:$0xff] %vm416_vm1, %v4683_v14  ;;  %v4350_v19 = vpop.f32.mrb[108].mxu1  ;;  %v4464_v32 = vpop.f32.mrb[108].mxu0 }
 0x222   :  { %v4684_v22 = vadd.f32 %v4350_v19, %v5787_v0  ;;  %v2213_v24 = vpop.f32.mrb[109].mxu1  ;;  %v3371_v33 = vpop.f32.mrb[109].mxu0 }
 0x223   :  { %v4686_v27 = vadd.f32 %v5787_v0, %v2213_v24  ;;  %v4351_v60 = vpop.f32.mrb[110].mxu1  ;;  %v4465_v41 = vpop.f32.mrb[110].mxu0 }
 0x224   :  { %v4685_v12 = vadd.f32 %v4684_v22, %v4464_v32  ;;  %v4688_v36 = vadd.f32 %v4351_v60, %v5787_v0  ;;  %v2216_v37 = vpop.f32.mrb[111].mxu1  ;;  %v3374_v38 = vpop.f32.mrb[111].mxu0 }
 0x225   :  { %v4687_v39 = vadd.f32 %v4686_v27, %v3371_v33  ;;  %v4690_v42 = vadd.f32 %v5787_v0, %v2216_v37 }
 0x226   :  { %3608 = vst.msk [vmem:[%s6420_s3 + $0x370] sm:$0xff] %vm416_vm1, %v4685_v12  ;;  %v4689_v13 = vadd.f32 %v4688_v36, %v4465_v41 }
 0x227   :  { %3606 = vst.msk [vmem:[%s6420_s3 + $0x360] sm:$0xff] %vm416_vm1, %v4687_v39  ;;  %v4691_v40 = vadd.f32 %v4690_v42, %v3374_v38 }
 0x228   :  { %3609 = vst.msk [vmem:[%s6420_s3 + $0x378] sm:$0xff] %vm416_vm1, %v4689_v13 }
 0x229   :  { %3607 = vst.msk [vmem:[%s6420_s3 + $0x368] sm:$0xff] %vm416_vm1, %v4691_v40 }

// kernel: ms_tcn_forward.8
= control target key start
LH: loop header
LB: loop body
LE: loop exit
PB: predicated region body
PF: predicated region fallthrough
CT: control target
= control target key end

     0   :  { %vm585_vm0 = vcmask 1040384   ;;  %vm416_vm1 = vcmask 15360   ;;  %s6417_s1 = inlined_call_operand.vmem [shape: bf16[3,2,2], index: 1, kind: input, shape index: {}]   ;;  %s6418_s0 = inlined_call_operand.vmem [shape: bf16[1232,2], index: 0, kind: input, shape index: {}]   ;;  %s6419_s2 = inlined_call_operand.vmem [shape: f32[1,2], index: 2, kind: input, shape index: {}]   ;;  %s6420_s3 = inlined_call_operand.vmem [shape: f32[896,2], index: 3, kind: output, shape index: {}]  }
   0x1   :  { %v135_v0 = vld [vmem:[%s6417_s1] sm:$0x1]  ;;  %v3727_v1 = vld [vmem:[%s6417_s1 + $0x1] sm:$0x1]  ;;  %v4809_v5 = vld [vmem:[%s6418_s0 + $0x54] sm:$0xff]  }
   0x2   :  { %4804 = vmatprep.subr.msk.bf16.mxu1 %vm585_vm0, %v135_v0  ;;  %4805 = vmatprep.subr.msk.bf16.mxu0 %vm585_vm0, %v3727_v1  ;;  %v587_v2 = vsel %vm585_vm0, %v135_v0, 0  ;;  %v1745_v3 = vsel %vm585_vm0, %v3727_v1, 0  ;;  %v4808_v4 = vld [vmem:[%s6418_s0] sm:$0xff]   ;;  %v4810_v6 = vld [vmem:[%s6418_s0 + $0x8] sm:$0xff]   ;;  %v4812_v10 = vld [vmem:[%s6418_s0 + $0x10] sm:$0xff]  }
   0x3   :  { %4125 = vmatpush3.bf16.msra.mxu1 %v587_v2  ;;  %4239 = vmatpush3.bf16.msra.mxu0 %v1745_v3  ;;  %v4811_v7 = vld [vmem:[%s6418_s0 + $0x5c] sm:$0xff]   ;;  %v4813_v11 = vld [vmem:[%s6418_s0 + $0x64] sm:$0xff]   ;;  %v4815_v13 = vld [vmem:[%s6418_s0 + $0x6c] sm:$0xff]  }
   0x4   :  { %4126 = vmatprep.mubr.msk.bf16.mxu1 %vm416_vm1, %v4808_v4  ;;  %4240 = vmatprep.mubr.msk.bf16.mxu0 %vm416_vm1, %v4809_v5  ;;  %v3840_v8 = vld [vmem:[%s6417_s1 + $0x2] sm:$0x1]  ;;  %v4814_v12 = vld [vmem:[%s6418_s0 + $0x18] sm:$0xff]   ;;  %v4818_v16 = vld [vmem:[%s6418_s0 + $0x28] sm:$0xff]  }
   0x5   :  { %4806 = vmatprep.subr.msk.bf16.mxu1 %vm585_vm0, %v3727_v1  ;;  %4807 = vmatprep.subr.msk.bf16.mxu0 %vm585_vm0, %v3840_v8  ;;  %v2903_v9 = vsel %vm585_vm0, %v3840_v8, 0  ;;  %v4816_v14 = vld [vmem:[%s6418_s0 + $0x20] sm:$0xff]   ;;  %v4817_v15 = vld [vmem:[%s6418_s0 + $0x74] sm:$0xff]   ;;  %v4823_v21 = vld [vmem:[%s6418_s0 + $0x8c] sm:$0xff]  }
   0x6   :  { %4127 = vmatmul.mubr.msk.bf16.vlgmr.msra.gmra.mrb[0].mxu1 %vm416_vm1, %v4810_v6  ;;  %4241 = vmatmul.mubr.msk.bf16.vlgmr.msra.gmra.mrb[0].mxu0 %vm416_vm1, %v4811_v7  ;;  %v4819_v17 = vld [vmem:[%s6418_s0 + $0x7c] sm:$0xff]   ;;  %v4820_v18 = vld [vmem:[%s6418_s0 + $0x30] sm:$0xff]   ;;  %v4821_v19 = vld [vmem:[%s6418_s0 + $0x84] sm:$0xff]  }
   0x7   :  { %4467 = vmatpush3.bf16.msra.mxu1 %v1745_v3  ;;  %4353 = vmatpush3.bf16.msra.mxu0 %v2903_v9  ;;  %v4822_v20 = vld [vmem:[%s6418_s0 + $0x38] sm:$0xff]   ;;  %v4824_v22 = vld [vmem:[%s6418_s0 + $0x40] sm:$0xff]   ;;  %v4826_v24 = vld [vmem:[%s6418_s0 + $0x48] sm:$0xff]  }
   0x8   :  { %4130 = vmatprep.mubr.msk.bf16.mxu1 %vm416_vm1, %v4812_v10  ;;  %4244 = vmatprep.mubr.msk.bf16.mxu0 %vm416_vm1, %v4813_v11  ;;  %v4825_v23 = vld [vmem:[%s6418_s0 + $0x94] sm:$0xff]   ;;  %v4827_v25 = vld [vmem:[%s6418_s0 + $0x9c] sm:$0xff]   ;;  %v4829_v27 = vld [vmem:[%s6418_s0 + $0xa4] sm:$0xff]  }
   0x9   :  { %v4828_v26 = vld [vmem:[%s6418_s0 + $0x50] sm:$0xff]   ;;  %v4830_v28 = vld [vmem:[%s6418_s0 + $0x58] sm:$0xff]   ;;  %v4832_v30 = vld [vmem:[%s6418_s0 + $0x60] sm:$0xff]  }
   0xa   :  { %v4831_v29 = vld [vmem:[%s6418_s0 + $0xac] sm:$0xff]   ;;  %v4833_v31 = vld [vmem:[%s6418_s0 + $0xb4] sm:$0xff]   ;;  %v4835_v33 = vld [vmem:[%s6418_s0 + $0xbc] sm:$0xff]  }
   0xb   :  { %v4834_v32 = vld [vmem:[%s6418_s0 + $0x68] sm:$0xff]   ;;  %v4836_v34 = vld [vmem:[%s6418_s0 + $0x70] sm:$0xff]   ;;  %v4838_v36 = vld [vmem:[%s6418_s0 + $0x78] sm:$0xff]  }
   0xc   :  { %v4837_v35 = vld [vmem:[%s6418_s0 + $0xc4] sm:$0xff]   ;;  %v4839_v37 = vld [vmem:[%s6418_s0 + $0xcc] sm:$0xff]   ;;  %v4841_v39 = vld [vmem:[%s6418_s0 + $0xd4] sm:$0xff]  }
   0xd   :  { %v4840_v38 = vld [vmem:[%s6418_s0 + $0x80] sm:$0xff]   ;;  %v4842_v40 = vld [vmem:[%s6418_s0 + $0x88] sm:$0xff]   ;;  %v4844_v42 = vld [vmem:[%s6418_s0 + $0x90] sm:$0xff]  }
   0xe   :  { %4131 = vmatmul.mubr.msk.bf16.gmra.mrb[4].mxu1 %vm416_vm1, %v4814_v12  ;;  %4245 = vmatmul.mubr.msk.bf16.gmra.mrb[4].mxu0 %vm416_vm1, %v4815_v13  ;;  %v4843_v41 = vld [vmem:[%s6418_s0 + $0xdc] sm:$0xff]   ;;  %v4845_v43 = vld [vmem:[%s6418_s0 + $0xe4] sm:$0xff]   ;;  %v4847_v45 = vld [vmem:[%s6418_s0 + $0xec] sm:$0xff]  }
   0xf   :  { %4134 = vmatprep.mubr.msk.bf16.mxu1 %vm416_vm1, %v4816_v14  ;;  %4248 = vmatprep.mubr.msk.bf16.mxu0 %vm416_vm1, %v4817_v15  ;;  %v4846_v44 = vld [vmem:[%s6418_s0 + $0x98] sm:$0xff]   ;;  %v4848_v46 = vld [vmem:[%s6418_s0 + $0xa0] sm:$0xff]   ;;  %v4850_v48 = vld [vmem:[%s6418_s0 + $0xa8] sm:$0xff]  }
  0x10   :  { %v4849_v47 = vld [vmem:[%s6418_s0 + $0xf4] sm:$0xff]   ;;  %v4851_v49 = vld [vmem:[%s6418_s0 + $0xfc] sm:$0xff]   ;;  %v4853_v51 = vld [vmem:[%s6418_s0 + $0x104] sm:$0xff]  }
  0x11   :  { %v4852_v50 = vld [vmem:[%s6418_s0 + $0xb0] sm:$0xff]   ;;  %v4854_v52 = vld [vmem:[%s6418_s0 + $0xb8] sm:$0xff]   ;;  %v4856_v54 = vld [vmem:[%s6418_s0 + $0xc0] sm:$0xff]  }
  0x12   :  { %v4855_v53 = vld [vmem:[%s6418_s0 + $0x10c] sm:$0xff]   ;;  %v4857_v55 = vld [vmem:[%s6418_s0 + $0x114] sm:$0xff]   ;;  %v4859_v57 = vld [vmem:[%s6418_s0 + $0x11c] sm:$0xff]  }
  0x13   :  { %v4858_v56 = vld [vmem:[%s6418_s0 + $0xc8] sm:$0xff]   ;;  %v4860_v58 = vld [vmem:[%s6418_s0 + $0xd0] sm:$0xff]   ;;  %v4862_v60 = vld [vmem:[%s6418_s0 + $0xd8] sm:$0xff]  }
  0x14   :  { %v4861_v59 = vld [vmem:[%s6418_s0 + $0x124] sm:$0xff]   ;;  %v4863_v61 = vld [vmem:[%s6418_s0 + $0x12c] sm:$0xff]   ;;  %v4869_v3 = vld [vmem:[%s6418_s0 + $0xb8] sm:$0xff]  }
  0x15   :  { %v4864_v62 = vld [vmem:[%s6418_s0 + $0xe0] sm:$0xff]   ;;  %v4865_v63 = vld [vmem:[%s6418_s0 + $0xa8] sm:$0xff]   ;;  %v4867_v1 = vld [vmem:[%s6418_s0 + $0xb0] sm:$0xff]  }
  0x16   :  { %4135 = vmatmul.mubr.msk.bf16.gmra.mrb[8].mxu1 %vm416_vm1, %v4818_v16  ;;  %4249 = vmatmul.mubr.msk.bf16.gmra.mrb[8].mxu0 %vm416_vm1, %v4819_v17  ;;  %v4866_v0 = vld [vmem:[%s6418_s0 + $0xe8] sm:$0xff]   ;;  %v4868_v2 = vld [vmem:[%s6418_s0 + $0xf0] sm:$0xff]   ;;  %v4870_v4 = vld [vmem:[%s6418_s0 + $0xf8] sm:$0xff]  }
  0x17   :  { %4138 = vmatprep.mubr.msk.bf16.mxu1 %vm416_vm1, %v4820_v18  ;;  %4252 = vmatprep.mubr.msk.bf16.mxu0 %vm416_vm1, %v4821_v19  ;;  %v4871_v5 = vld [vmem:[%s6418_s0 + $0xc0] sm:$0xff]   ;;  %v4873_v7 = vld [vmem:[%s6418_s0 + $0xc8] sm:$0xff]   ;;  %v4875_v9 = vld [vmem:[%s6418_s0 + $0xd0] sm:$0xff]  }
  0x18   :  { %v4872_v6 = vld [vmem:[%s6418_s0 + $0x100] sm:$0xff]   ;;  %v4874_v8 = vld [vmem:[%s6418_s0 + $0x108] sm:$0xff]   ;;  %v4876_v10 = vld [vmem:[%s6418_s0 + $0x110] sm:$0xff]  }
  0x19   :  { %v4877_v11 = vld [vmem:[%s6418_s0 + $0xd8] sm:$0xff]   ;;  %v4879_v13 = vld [vmem:[%s6418_s0 + $0xe0] sm:$0xff]   ;;  %v4881_v15 = vld [vmem:[%s6418_s0 + $0xe8] sm:$0xff]  }
  0x1a   :  { %v4878_v12 = vld [vmem:[%s6418_s0 + $0x118] sm:$0xff]   ;;  %v4880_v14 = vld [vmem:[%s6418_s0 + $0x120] sm:$0xff]   ;;  %v4882_v16 = vld [vmem:[%s6418_s0 + $0x128] sm:$0xff]  }
  0x1b   :  { %v4883_v17 = vld [vmem:[%s6418_s0 + $0xf0] sm:$0xff]   ;;  %v4885_v19 = vld [vmem:[%s6418_s0 + $0xf8] sm:$0xff]  }
  0x1c   :  { %v4884_v18 = vld [vmem:[%s6418_s0 + $0x130] sm:$0xff]  }
  0x1e   :  { %4139 = vmatmul.mubr.msk.bf16.gmra.mrb[12].mxu1 %vm416_vm1, %v4822_v20  ;;  %4253 = vmatmul.mubr.msk.bf16.gmra.mrb[12].mxu0 %vm416_vm1, %v4823_v21  ;;  %v4886_v20 = vld [vmem:[%s6418_s0 + $0x138] sm:$0xff]   ;;  %v4887_v21 = vld [vmem:[%s6418_s0 + $0x100] sm:$0xff]  }
  0x1f   :  { %4142 = vmatprep.mubr.msk.bf16.mxu1 %vm416_vm1, %v4824_v22  ;;  %4256 = vmatprep.mubr.msk.bf16.mxu0 %vm416_vm1, %v4825_v23  ;;  %v4888_v22 = vld [vmem:[%s6418_s0 + $0x140] sm:$0xff]   ;;  %v4889_v23 = vld [vmem:[%s6418_s0 + $0x108] sm:$0xff]  }
  0x26   :  { %4143 = vmatmul.mubr.msk.bf16.gmra.mrb[16].mxu1 %vm416_vm1, %v4826_v24  ;;  %4257 = vmatmul.mubr.msk.bf16.gmra.mrb[16].mxu0 %vm416_vm1, %v4827_v25  ;;  %v4890_v24 = vld [vmem:[%s6418_s0 + $0x148] sm:$0xff]   ;;  %v4891_v25 = vld [vmem:[%s6418_s0 + $0x110] sm:$0xff]  }
  0x27   :  { %4146 = vmatprep.mubr.msk.bf16.mxu1 %vm416_vm1, %v4828_v26  ;;  %4260 = vmatprep.mubr.msk.bf16.mxu0 %vm416_vm1, %v4829_v27  ;;  %v4892_v26 = vld [vmem:[%s6418_s0 + $0x150] sm:$0xff]   ;;  %v4893_v27 = vld [vmem:[%s6418_s0 + $0x118] sm:$0xff]  }
  0x2e   :  { %4147 = vmatmul.mubr.msk.bf16.gmra.mrb[20].mxu1 %vm416_vm1, %v4830_v28  ;;  %4261 = vmatmul.mubr.msk.bf16.gmra.mrb[20].mxu0 %vm416_vm1, %v4831_v29  ;;  %v4894_v28 = vld [vmem:[%s6418_s0 + $0x158] sm:$0xff]   ;;  %v4895_v29 = vld [vmem:[%s6418_s0 + $0x120] sm:$0xff]  }
  0x2f   :  { %4150 = vmatprep.mubr.msk.bf16.mxu1 %vm416_vm1, %v4832_v30  ;;  %4264 = vmatprep.mubr.msk.bf16.mxu0 %vm416_vm1, %v4833_v31  ;;  %v4896_v30 = vld [vmem:[%s6418_s0 + $0x160] sm:$0xff]   ;;  %v4897_v31 = vld [vmem:[%s6418_s0 + $0x128] sm:$0xff]  }
  0x36   :  { %4151 = vmatmul.mubr.msk.bf16.gmra.mrb[24].mxu1 %vm416_vm1, %v4834_v32  ;;  %4265 = vmatmul.mubr.msk.bf16.gmra.mrb[24].mxu0 %vm416_vm1, %v4835_v33  ;;  %v4898_v32 = vld [vmem:[%s6418_s0 + $0x168] sm:$0xff]   ;;  %v4899_v33 = vld [vmem:[%s6418_s0 + $0x130] sm:$0xff]  }
  0x37   :  { %4154 = vmatprep.mubr.msk.bf16.mxu1 %vm416_vm1, %v4836_v34  ;;  %4268 = vmatprep.mubr.msk.bf16.mxu0 %vm416_vm1, %v4837_v35  ;;  %v4900_v34 = vld [vmem:[%s6418_s0 + $0x170] sm:$0xff]   ;;  %v4901_v35 = vld [vmem:[%s6418_s0 + $0x138] sm:$0xff]  }
  0x3e   :  { %4155 = vmatmul.mubr.msk.bf16.gmra.mrb[28].mxu1 %vm416_vm1, %v4838_v36  ;;  %4269 = vmatmul.mubr.msk.bf16.gmra.mrb[28].mxu0 %vm416_vm1, %v4839_v37  ;;  %v4902_v36 = vld [vmem:[%s6418_s0 + $0x178] sm:$0xff]   ;;  %v4903_v37 = vld [vmem:[%s6418_s0 + $0x140] sm:$0xff]  }
  0x3f   :  { %4158 = vmatprep.mubr.msk.bf16.mxu1 %vm416_vm1, %v4840_v38  ;;  %4272 = vmatprep.mubr.msk.bf16.mxu0 %vm416_vm1, %v4841_v39  ;;  %v4904_v38 = vld [vmem:[%s6418_s0 + $0x180] sm:$0xff]   ;;  %v4905_v39 = vld [vmem:[%s6418_s0 + $0x148] sm:$0xff]  }
  0x46   :  { %4159 = vmatmul.mubr.msk.bf16.gmra.mrb[32].mxu1 %vm416_vm1, %v4842_v40  ;;  %4273 = vmatmul.mubr.msk.bf16.gmra.mrb[32].mxu0 %vm416_vm1, %v4843_v41  ;;  %v4906_v40 = vld [vmem:[%s6418_s0 + $0x188] sm:$0xff]   ;;  %v4907_v41 = vld [vmem:[%s6418_s0 + $0x150] sm:$0xff]  }
  0x47   :  { %4162 = vmatprep.mubr.msk.bf16.mxu1 %vm416_vm1, %v4844_v42  ;;  %4276 = vmatprep.mubr.msk.bf16.mxu0 %vm416_vm1, %v4845_v43  ;;  %v4908_v42 = vld [vmem:[%s6418_s0 + $0x190] sm:$0xff]   ;;  %v4909_v43 = vld [vmem:[%s6418_s0 + $0x158] sm:$0xff]  }
  0x4e   :  { %4163 = vmatmul.mubr.msk.bf16.gmra.mrb[36].mxu1 %vm416_vm1, %v4846_v44  ;;  %4277 = vmatmul.mubr.msk.bf16.gmra.mrb[36].mxu0 %vm416_vm1, %v4847_v45  ;;  %v4910_v44 = vld [vmem:[%s6418_s0 + $0x198] sm:$0xff]   ;;  %v4911_v45 = vld [vmem:[%s6418_s0 + $0x160] sm:$0xff]  }
  0x4f   :  { %4166 = vmatprep.mubr.msk.bf16.mxu1 %vm416_vm1, %v4848_v46  ;;  %4280 = vmatprep.mubr.msk.bf16.mxu0 %vm416_vm1, %v4849_v47  ;;  %v4912_v46 = vld [vmem:[%s6418_s0 + $0x1a0] sm:$0xff]   ;;  %v4913_v47 = vld [vmem:[%s6418_s0 + $0x168] sm:$0xff]  }
  0x56   :  { %4167 = vmatmul.mubr.msk.bf16.gmra.mrb[40].mxu1 %vm416_vm1, %v4850_v48  ;;  %4281 = vmatmul.mubr.msk.bf16.gmra.mrb[40].mxu0 %vm416_vm1, %v4851_v49  ;;  %v4914_v48 = vld [vmem:[%s6418_s0 + $0x1a8] sm:$0xff]   ;;  %v4915_v49 = vld [vmem:[%s6418_s0 + $0x170] sm:$0xff]  }
  0x57   :  { %4170 = vmatprep.mubr.msk.bf16.mxu1 %vm416_vm1, %v4852_v50  ;;  %4284 = vmatprep.mubr.msk.bf16.mxu0 %vm416_vm1, %v4853_v51  ;;  %v4916_v50 = vld [vmem:[%s6418_s0 + $0x1b0] sm:$0xff]   ;;  %v4917_v51 = vld [vmem:[%s6418_s0 + $0x178] sm:$0xff]  }
  0x5e   :  { %4171 = vmatmul.mubr.msk.bf16.gmra.mrb[44].mxu1 %vm416_vm1, %v4854_v52  ;;  %4285 = vmatmul.mubr.msk.bf16.gmra.mrb[44].mxu0 %vm416_vm1, %v4855_v53 }
  0x5f   :  { %4174 = vmatprep.mubr.msk.bf16.mxu1 %vm416_vm1, %v4856_v54  ;;  %4288 = vmatprep.mubr.msk.bf16.mxu0 %vm416_vm1, %v4857_v55  ;;  %v4918_v54 = vld [vmem:[%s6418_s0 + $0x1b8] sm:$0xff]  }
  0x66   :  { %4175 = vmatmul.mubr.msk.bf16.gmra.mrb[48].mxu1 %vm416_vm1, %v4858_v56  ;;  %4289 = vmatmul.mubr.msk.bf16.gmra.mrb[48].mxu0 %vm416_vm1, %v4859_v57  ;;  %v4919_v56 = vld [vmem:[%s6418_s0 + $0x180] sm:$0xff]   ;;  %v4920_v57 = vld [vmem:[%s6418_s0 + $0x134] sm:$0xff]  }
  0x67   :  { %4178 = vmatprep.mubr.msk.bf16.mxu1 %vm416_vm1, %v4860_v58  ;;  %4292 = vmatprep.mubr.msk.bf16.mxu0 %vm416_vm1, %v4861_v59  ;;  %v4921_v59 = vld [vmem:[%s6418_s0 + $0x188] sm:$0xff]  }
  0x6e   :  { %4179 = vmatmul.mubr.msk.bf16.gmra.mrb[52].mxu1 %vm416_vm1, %v4862_v60  ;;  %4293 = vmatmul.mubr.msk.bf16.gmra.mrb[52].mxu0 %vm416_vm1, %v4863_v61 }
  0x6f   :  { %4182 = vmatprep.mubr.msk.bf16.mxu1 %vm416_vm1, %v4864_v62  ;;  %4354 = vmatprep.mubr.msk.bf16.mxu0 %vm416_vm1, %v4865_v63  ;;  %v4922_v62 = vld [vmem:[%s6418_s0 + $0x13c] sm:$0xff]  }
  0x76   :  { %4183 = vmatmul.mubr.msk.bf16.gmra.mrb[56].mxu1 %vm416_vm1, %v4866_v0  ;;  %4355 = vmatmul.mubr.msk.bf16.vlgmr.msra.gmra.mrb[0].mxu0 %vm416_vm1, %v4867_v1  ;;  %v4923_v0 = vld [vmem:[%s6418_s0 + $0x190] sm:$0xff]   ;;  %v4924_v1 = vld [vmem:[%s6418_s0 + $0x144] sm:$0xff]  }
  0x77   :  { %4186 = vmatprep.mubr.msk.bf16.mxu1 %vm416_vm1, %v4868_v2  ;;  %4358 = vmatprep.mubr.msk.bf16.mxu0 %vm416_vm1, %v4869_v3  ;;  %v4925_v3 = vld [vmem:[%s6418_s0 + $0x198] sm:$0xff]  }
  0x7e   :  { %4187 = vmatmul.mubr.msk.bf16.gmra.mrb[60].mxu1 %vm416_vm1, %v4870_v4  ;;  %4359 = vmatmul.mubr.msk.bf16.gmra.mrb[4].mxu0 %vm416_vm1, %v4871_v5 }
  0x7f   :  { %4190 = vmatprep.mubr.msk.bf16.mxu1 %vm416_vm1, %v4872_v6  ;;  %4362 = vmatprep.mubr.msk.bf16.mxu0 %vm416_vm1, %v4873_v7  ;;  %v4926_v6 = vld [vmem:[%s6418_s0 + $0x14c] sm:$0xff]  }
  0x86   :  { %4191 = vmatmul.mubr.msk.bf16.gmra.mrb[64].mxu1 %vm416_vm1, %v4874_v8  ;;  %4363 = vmatmul.mubr.msk.bf16.gmra.mrb[8].mxu0 %vm416_vm1, %v4875_v9  ;;  %v4927_v8 = vld [vmem:[%s6418_s0 + $0x1a0] sm:$0xff]   ;;  %v4928_v9 = vld [vmem:[%s6418_s0 + $0x154] sm:$0xff]  }
  0x87   :  { %4194 = vmatprep.mubr.msk.bf16.mxu1 %vm416_vm1, %v4876_v10  ;;  %4366 = vmatprep.mubr.msk.bf16.mxu0 %vm416_vm1, %v4877_v11  ;;  %v4929_v11 = vld [vmem:[%s6418_s0 + $0x1a8] sm:$0xff]  }
  0x8e   :  { %4195 = vmatmul.mubr.msk.bf16.gmra.mrb[68].mxu1 %vm416_vm1, %v4878_v12  ;;  %4367 = vmatmul.mubr.msk.bf16.gmra.mrb[12].mxu0 %vm416_vm1, %v4879_v13 }
  0x8f   :  { %4198 = vmatprep.mubr.msk.bf16.mxu1 %vm416_vm1, %v4880_v14  ;;  %4370 = vmatprep.mubr.msk.bf16.mxu0 %vm416_vm1, %v4881_v15  ;;  %v4930_v14 = vld [vmem:[%s6418_s0 + $0x15c] sm:$0xff]  }
  0x96   :  { %4199 = vmatmul.mubr.msk.bf16.gmra.mrb[72].mxu1 %vm416_vm1, %v4882_v16  ;;  %4371 = vmatmul.mubr.msk.bf16.gmra.mrb[16].mxu0 %vm416_vm1, %v4883_v17  ;;  %v4931_v16 = vld [vmem:[%s6418_s0 + $0x1b0] sm:$0xff]   ;;  %v4932_v17 = vld [vmem:[%s6418_s0 + $0x164] sm:$0xff]  }
  0x97   :  { %4202 = vmatprep.mubr.msk.bf16.mxu1 %vm416_vm1, %v4884_v18  ;;  %4374 = vmatprep.mubr.msk.bf16.mxu0 %vm416_vm1, %v4885_v19  ;;  %v4933_v19 = vld [vmem:[%s6418_s0 + $0x1b8] sm:$0xff]  }
  0x9e   :  { %4203 = vmatmul.mubr.msk.bf16.gmra.mrb[76].mxu1 %vm416_vm1, %v4886_v20  ;;  %4375 = vmatmul.mubr.msk.bf16.gmra.mrb[20].mxu0 %vm416_vm1, %v4887_v21 }
  0x9f   :  { %4206 = vmatprep.mubr.msk.bf16.mxu1 %vm416_vm1, %v4888_v22  ;;  %4378 = vmatprep.mubr.msk.bf16.mxu0 %vm416_vm1, %v4889_v23  ;;  %v4934_v22 = vld [vmem:[%s6418_s0 + $0x16c] sm:$0xff]  }
  0xa6   :  { %4207 = vmatmul.mubr.msk.bf16.gmra.mrb[80].mxu1 %vm416_vm1, %v4890_v24  ;;  %4379 = vmatmul.mubr.msk.bf16.gmra.mrb[24].mxu0 %vm416_vm1, %v4891_v25  ;;  %v4935_v24 = vld [vmem:[%s6418_s0 + $0x1c0] sm:$0xff]   ;;  %v4936_v25 = vld [vmem:[%s6418_s0 + $0x174] sm:$0xff]  }
  0xa7   :  { %4210 = vmatprep.mubr.msk.bf16.mxu1 %vm416_vm1, %v4892_v26  ;;  %4382 = vmatprep.mubr.msk.bf16.mxu0 %vm416_vm1, %v4893_v27  ;;  %v4937_v27 = vld [vmem:[%s6418_s0 + $0x1c8] sm:$0xff]  }
  0xae   :  { %4211 = vmatmul.mubr.msk.bf16.gmra.mrb[84].mxu1 %vm416_vm1, %v4894_v28  ;;  %4383 = vmatmul.mubr.msk.bf16.gmra.mrb[28].mxu0 %vm416_vm1, %v4895_v29 }
  0xaf   :  { %4214 = vmatprep.mubr.msk.bf16.mxu1 %vm416_vm1, %v4896_v30  ;;  %4386 = vmatprep.mubr.msk.bf16.mxu0 %vm416_vm1, %v4897_v31  ;;  %v4938_v30 = vld [vmem:[%s6418_s0 + $0x17c] sm:$0xff]  }
  0xb6   :  { %4215 = vmatmul.mubr.msk.bf16.gmra.mrb[88].mxu1 %vm416_vm1, %v4898_v32  ;;  %4387 = vmatmul.mubr.msk.bf16.gmra.mrb[32].mxu0 %vm416_vm1, %v4899_v33  ;;  %v4939_v32 = vld [vmem:[%s6418_s0 + $0x1d0] sm:$0xff]   ;;  %v4940_v33 = vld [vmem:[%s6418_s0 + $0x184] sm:$0xff]  }
  0xb7   :  { %4218 = vmatprep.mubr.msk.bf16.mxu1 %vm416_vm1, %v4900_v34  ;;  %4390 = vmatprep.mubr.msk.bf16.mxu0 %vm416_vm1, %v4901_v35  ;;  %v4941_v35 = vld [vmem:[%s6418_s0 + $0x1d8] sm:$0xff]  }
  0xbe   :  { %4219 = vmatmul.mubr.msk.bf16.gmra.mrb[92].mxu1 %vm416_vm1, %v4902_v36  ;;  %4391 = vmatmul.mubr.msk.bf16.gmra.mrb[36].mxu0 %vm416_vm1, %v4903_v37 }
  0xbf   :  { %4222 = vmatprep.mubr.msk.bf16.mxu1 %vm416_vm1, %v4904_v38  ;;  %4394 = vmatprep.mubr.msk.bf16.mxu0 %vm416_vm1, %v4905_v39  ;;  %v4942_v38 = vld [vmem:[%s6418_s0 + $0x18c] sm:$0xff]  }
  0xc6   :  { %4223 = vmatmul.mubr.msk.bf16.gmra.mrb[96].mxu1 %vm416_vm1, %v4906_v40  ;;  %4395 = vmatmul.mubr.msk.bf16.gmra.mrb[40].mxu0 %vm416_vm1, %v4907_v41  ;;  %v4943_v40 = vld [vmem:[%s6418_s0 + $0x1e0] sm:$0xff]   ;;  %v4944_v41 = vld [vmem:[%s6418_s0 + $0x194] sm:$0xff]  }
  0xc7   :  { %4226 = vmatprep.mubr.msk.bf16.mxu1 %vm416_vm1, %v4908_v42  ;;  %4398 = vmatprep.mubr.msk.bf16.mxu0 %vm416_vm1, %v4909_v43  ;;  %v4945_v43 = vld [vmem:[%s6418_s0 + $0x1e8] sm:$0xff]  }
  0xce   :  { %4227 = vmatmul.mubr.msk.bf16.gmra.mrb[100].mxu1 %vm416_vm1, %v4910_v44  ;;  %4399 = vmatmul.mubr.msk.bf16.gmra.mrb[44].mxu0 %vm416_vm1, %v4911_v45 }
  0xcf   :  { %4230 = vmatprep.mubr.msk.bf16.mxu1 %vm416_vm1, %v4912_v46  ;;  %4402 = vmatprep.mubr.msk.bf16.mxu0 %vm416_vm1, %v4913_v47  ;;  %v4946_v46 = vld [vmem:[%s6418_s0 + $0x19c] sm:$0xff]  }
  0xd6   :  { %4231 = vmatmul.mubr.msk.bf16.gmra.mrb[104].mxu1 %vm416_vm1, %v4914_v48  ;;  %4403 = vmatmul.mubr.msk.bf16.gmra.mrb[48].mxu0 %vm416_vm1, %v4915_v49  ;;  %v4947_v48 = vld [vmem:[%s6418_s0 + $0x1f0] sm:$0xff]   ;;  %v4948_v49 = vld [vmem:[%s6418_s0 + $0x1a4] sm:$0xff]  }
  0xd7   :  { %4234 = vmatprep.mubr.msk.bf16.mxu1 %vm416_vm1, %v4916_v50  ;;  %4406 = vmatprep.mubr.msk.bf16.mxu0 %vm416_vm1, %v4917_v51  ;;  %v4949_v51 = vld [vmem:[%s6418_s0 + $0x1f8] sm:$0xff]  }
  0xd9   :  { %v5452_v52 = vpop.f32.mrb[0].mxu1 }
  0xda   :  { %v5454_v53 = vpop.f32.mrb[1].mxu1 }
  0xdb   :  { %v5459_v55 = vpop.f32.mrb[2].mxu1 }
  0xdc   :  { %v5467_v58 = vpop.f32.mrb[3].mxu1 }
  0xde   :  { %4235 = vmatmul.mubr.msk.bf16.gmra.mrb[108].mxu1 %vm416_vm1, %v4918_v54  ;;  %4407 = vmatmul.mubr.msk.bf16.gmra.mrb[52].mxu0 %vm416_vm1, %v4919_v56 }
  0xdf   :  { %4296 = vmatprep.mubr.msk.bf16.mxu1 %vm416_vm1, %v4920_v57  ;;  %4410 = vmatprep.mubr.msk.bf16.mxu0 %vm416_vm1, %v4921_v59  ;;  %v4950_v57 = vld [vmem:[%s6418_s0 + $0x1ac] sm:$0xff]  }
  0xe1   :  { %v5476_v60 = vpop.f32.mrb[4].mxu1 }
  0xe2   :  { %v5478_v61 = vpop.f32.mrb[5].mxu1 }
  0xe3   :  { %v5483_v63 = vpop.f32.mrb[6].mxu1 }
  0xe4   :  { %v5491_v2 = vpop.f32.mrb[7].mxu1 }
  0xe6   :  { %4297 = vmatmul.mubr.msk.bf16.vlgmr.msra.gmra.mrb[56].mxu1 %vm416_vm1, %v4922_v62  ;;  %4411 = vmatmul.mubr.msk.bf16.gmra.mrb[56].mxu0 %vm416_vm1, %v4923_v0  ;;  %v4951_v62 = vld [vmem:[%s6418_s0 + $0x200] sm:$0xff]   ;;  %v4952_v0 = vld [vmem:[%s6418_s0 + $0x1b4] sm:$0xff]  }
  0xe7   :  { %4300 = vmatprep.mubr.msk.bf16.mxu1 %vm416_vm1, %v4924_v1  ;;  %4414 = vmatprep.mubr.msk.bf16.mxu0 %vm416_vm1, %v4925_v3  ;;  %v4953_v3 = vld [vmem:[%s6418_s0 + $0x208] sm:$0xff]  }
  0xe9   :  { %v5500_v4 = vpop.f32.mrb[8].mxu1 }
  0xea   :  { %v5502_v5 = vpop.f32.mrb[9].mxu1 }
  0xeb   :  { %v5507_v7 = vpop.f32.mrb[10].mxu1 }
  0xec   :  { %v5515_v10 = vpop.f32.mrb[11].mxu1 }
  0xee   :  { %4301 = vmatmul.mubr.msk.bf16.gmra.mrb[60].mxu1 %vm416_vm1, %v4926_v6  ;;  %4415 = vmatmul.mubr.msk.bf16.gmra.mrb[60].mxu0 %vm416_vm1, %v4927_v8 }
  0xef   :  { %4304 = vmatprep.mubr.msk.bf16.mxu1 %vm416_vm1, %v4928_v9  ;;  %4418 = vmatprep.mubr.msk.bf16.mxu0 %vm416_vm1, %v4929_v11  ;;  %v4954_v9 = vld [vmem:[%s6418_s0 + $0x1bc] sm:$0xff]  }
  0xf1   :  { %v5524_v12 = vpop.f32.mrb[12].mxu1 }
  0xf2   :  { %v5526_v13 = vpop.f32.mrb[13].mxu1 }
  0xf3   :  { %v5531_v15 = vpop.f32.mrb[14].mxu1 }
  0xf4   :  { %v5539_v18 = vpop.f32.mrb[15].mxu1 }
  0xf6   :  { %4305 = vmatmul.mubr.msk.bf16.gmra.mrb[64].mxu1 %vm416_vm1, %v4930_v14  ;;  %4419 = vmatmul.mubr.msk.bf16.gmra.mrb[64].mxu0 %vm416_vm1, %v4931_v16  ;;  %v4955_v14 = vld [vmem:[%s6418_s0 + $0x210] sm:$0xff]   ;;  %v4956_v16 = vld [vmem:[%s6418_s0 + $0x1c4] sm:$0xff]  }
  0xf7   :  { %4308 = vmatprep.mubr.msk.bf16.mxu1 %vm416_vm1, %v4932_v17  ;;  %4422 = vmatprep.mubr.msk.bf16.mxu0 %vm416_vm1, %v4933_v19  ;;  %v4957_v19 = vld [vmem:[%s6418_s0 + $0x218] sm:$0xff]  }
  0xf9   :  { %v5548_v20 = vpop.f32.mrb[16].mxu1 }
  0xfa   :  { %v5550_v21 = vpop.f32.mrb[17].mxu1 }
  0xfb   :  { %v5555_v23 = vpop.f32.mrb[18].mxu1 }
  0xfc   :  { %v5563_v26 = vpop.f32.mrb[19].mxu1 }
  0xfe   :  { %4309 = vmatmul.mubr.msk.bf16.gmra.mrb[68].mxu1 %vm416_vm1, %v4934_v22  ;;  %4423 = vmatmul.mubr.msk.bf16.gmra.mrb[68].mxu0 %vm416_vm1, %v4935_v24 }
  0xff   :  { %4312 = vmatprep.mubr.msk.bf16.mxu1 %vm416_vm1, %v4936_v25  ;;  %4426 = vmatprep.mubr.msk.bf16.mxu0 %vm416_vm1, %v4937_v27  ;;  %v4958_v25 = vld [vmem:[%s6418_s0 + $0x1cc] sm:$0xff]  }
 0x101   :  { %v5572_v28 = vpop.f32.mrb[20].mxu1 }
 0x102   :  { %v5574_v29 = vpop.f32.mrb[21].mxu1 }
 0x103   :  { %v5579_v31 = vpop.f32.mrb[22].mxu1 }
 0x104   :  { %v5587_v34 = vpop.f32.mrb[23].mxu1 }
 0x106   :  { %4313 = vmatmul.mubr.msk.bf16.gmra.mrb[72].mxu1 %vm416_vm1, %v4938_v30  ;;  %4427 = vmatmul.mubr.msk.bf16.gmra.mrb[72].mxu0 %vm416_vm1, %v4939_v32  ;;  %v4959_v30 = vld [vmem:[%s6418_s0 + $0x220] sm:$0xff]   ;;  %v4960_v32 = vld [vmem:[%s6418_s0 + $0x1d4] sm:$0xff]  }
 0x107   :  { %4316 = vmatprep.mubr.msk.bf16.mxu1 %vm416_vm1, %v4940_v33  ;;  %4430 = vmatprep.mubr.msk.bf16.mxu0 %vm416_vm1, %v4941_v35  ;;  %v4961_v35 = vld [vmem:[%s6418_s0 + $0x228] sm:$0xff]  }
 0x109   :  { %v5596_v36 = vpop.f32.mrb[24].mxu1 }
 0x10a   :  { %v5598_v37 = vpop.f32.mrb[25].mxu1 }
 0x10b   :  { %v5603_v39 = vpop.f32.mrb[26].mxu1 }
 0x10c   :  { %v5611_v42 = vpop.f32.mrb[27].mxu1 }
 0x10e   :  { %4317 = vmatmul.mubr.msk.bf16.gmra.mrb[76].mxu1 %vm416_vm1, %v4942_v38  ;;  %4431 = vmatmul.mubr.msk.bf16.gmra.mrb[76].mxu0 %vm416_vm1, %v4943_v40 }
 0x10f   :  { %4320 = vmatprep.mubr.msk.bf16.mxu1 %vm416_vm1, %v4944_v41  ;;  %4434 = vmatprep.mubr.msk.bf16.mxu0 %vm416_vm1, %v4945_v43  ;;  %v4962_v41 = vld [vmem:[%s6418_s0 + $0x1dc] sm:$0xff]  }
 0x111   :  { %v5620_v44 = vpop.f32.mrb[28].mxu1 }
 0x112   :  { %v5622_v45 = vpop.f32.mrb[29].mxu1 }
 0x113   :  { %v5627_v47 = vpop.f32.mrb[30].mxu1 }
 0x114   :  { %v5635_v50 = vpop.f32.mrb[31].mxu1 }
 0x116   :  { %4321 = vmatmul.mubr.msk.bf16.gmra.mrb[80].mxu1 %vm416_vm1, %v4946_v46  ;;  %4435 = vmatmul.mubr.msk.bf16.gmra.mrb[80].mxu0 %vm416_vm1, %v4947_v48  ;;  %v4963_v46 = vld [vmem:[%s6418_s0 + $0x230] sm:$0xff]   ;;  %v4964_v48 = vld [vmem:[%s6418_s0 + $0x1e4] sm:$0xff]  }
 0x117   :  { %4324 = vmatprep.mubr.msk.bf16.mxu1 %vm416_vm1, %v4948_v49  ;;  %4438 = vmatprep.mubr.msk.bf16.mxu0 %vm416_vm1, %v4949_v51  ;;  %v4965_v51 = vld [vmem:[%s6418_s0 + $0x238] sm:$0xff]  }
 0x119   :  { %v5644_v54 = vpop.f32.mrb[32].mxu1 }
 0x11a   :  { %v5646_v56 = vpop.f32.mrb[33].mxu1 }
 0x11b   :  { %v5651_v59 = vpop.f32.mrb[34].mxu1 }
 0x11c   :  { %v5659_v1 = vpop.f32.mrb[35].mxu1 }
 0x11e   :  { %4325 = vmatmul.mubr.msk.bf16.gmra.mrb[84].mxu1 %vm416_vm1, %v4950_v57  ;;  %4439 = vmatmul.mubr.msk.bf16.gmra.mrb[84].mxu0 %vm416_vm1, %v4951_v62 }
 0x11f   :  { %4328 = vmatprep.mubr.msk.bf16.mxu1 %vm416_vm1, %v4952_v0  ;;  %4442 = vmatprep.mubr.msk.bf16.mxu0 %vm416_vm1, %v4953_v3  ;;  %v4966_v0 = vld [vmem:[%s6418_s0 + $0x1ec] sm:$0xff]  }
 0x121   :  { %v5668_v6 = vpop.f32.mrb[36].mxu1 }
 0x122   :  { %v5670_v8 = vpop.f32.mrb[37].mxu1 }
 0x123   :  { %v5675_v11 = vpop.f32.mrb[38].mxu1 }
 0x124   :  { %v5683_v17 = vpop.f32.mrb[39].mxu1 }
 0x126   :  { %4329 = vmatmul.mubr.msk.bf16.gmra.mrb[88].mxu1 %vm416_vm1, %v4954_v9  ;;  %4443 = vmatmul.mubr.msk.bf16.gmra.mrb[88].mxu0 %vm416_vm1, %v4955_v14  ;;  %v4967_v9 = vld [vmem:[%s6418_s0 + $0x240] sm:$0xff]   ;;  %v4968_v14 = vld [vmem:[%s6418_s0 + $0x1f4] sm:$0xff]  }
 0x127   :  { %4332 = vmatprep.mubr.msk.bf16.mxu1 %vm416_vm1, %v4956_v16  ;;  %4446 = vmatprep.mubr.msk.bf16.mxu0 %vm416_vm1, %v4957_v19  ;;  %v4969_v19 = vld [vmem:[%s6418_s0 + $0x248] sm:$0xff]  }
 0x129   :  { %v5692_v22 = vpop.f32.mrb[40].mxu1 }
 0x12a   :  { %v5694_v24 = vpop.f32.mrb[41].mxu1 }
 0x12b   :  { %v5699_v27 = vpop.f32.mrb[42].mxu1 }
 0x12c   :  { %v5707_v33 = vpop.f32.mrb[43].mxu1 }
 0x12e   :  { %4333 = vmatmul.mubr.msk.bf16.gmra.mrb[92].mxu1 %vm416_vm1, %v4958_v25  ;;  %4447 = vmatmul.mubr.msk.bf16.gmra.mrb[92].mxu0 %vm416_vm1, %v4959_v30 }
 0x12f   :  { %4336 = vmatprep.mubr.msk.bf16.mxu1 %vm416_vm1, %v4960_v32  ;;  %4450 = vmatprep.mubr.msk.bf16.mxu0 %vm416_vm1, %v4961_v35  ;;  %v4970_v32 = vld [vmem:[%s6418_s0 + $0x1fc] sm:$0xff]  }
 0x131   :  { %v5716_v38 = vpop.f32.mrb[44].mxu1 }
 0x132   :  { %v5718_v40 = vpop.f32.mrb[45].mxu1 }
 0x133   :  { %v5723_v43 = vpop.f32.mrb[46].mxu1 }
 0x134   :  { %v5731_v49 = vpop.f32.mrb[47].mxu1 }
 0x136   :  { %4337 = vmatmul.mubr.msk.bf16.gmra.mrb[96].mxu1 %vm416_vm1, %v4962_v41  ;;  %4451 = vmatmul.mubr.msk.bf16.gmra.mrb[96].mxu0 %vm416_vm1, %v4963_v46  ;;  %v4971_v41 = vld [vmem:[%s6418_s0 + $0x250] sm:$0xff]   ;;  %v4972_v46 = vld [vmem:[%s6418_s0 + $0x204] sm:$0xff]  }
 0x137   :  { %4340 = vmatprep.mubr.msk.bf16.mxu1 %vm416_vm1, %v4964_v48  ;;  %4454 = vmatprep.mubr.msk.bf16.mxu0 %vm416_vm1, %v4965_v51  ;;  %v4973_v51 = vld [vmem:[%s6418_s0 + $0x258] sm:$0xff]  }
 0x139   :  { %v5740_v57 = vpop.f32.mrb[48].mxu1 }
 0x13a   :  { %v5742_v62 = vpop.f32.mrb[49].mxu1 }
 0x13b   :  { %v5747_v3 = vpop.f32.mrb[50].mxu1 }
 0x13c   :  { %v5755_v16 = vpop.f32.mrb[51].mxu1 }
 0x13e   :  { %4341 = vmatmul.mubr.msk.bf16.gmra.mrb[100].mxu1 %vm416_vm1, %v4966_v0  ;;  %4455 = vmatmul.mubr.msk.bf16.gmra.mrb[100].mxu0 %vm416_vm1, %v4967_v9  ;;  %v5787_v0 = vld [vmem:[%s6419_s2] ss:$0 sm:$0xff] }
 0x13f   :  { %4344 = vmatprep.mubr.msk.bf16.mxu1 %vm416_vm1, %v4968_v14  ;;  %4458 = vmatprep.mubr.msk.bf16.mxu0 %vm416_vm1, %v4969_v19  ;;  %v1072_v9 = vadd.f32 %v5452_v52, %v5787_v0  ;;  %v1070_v14 = vadd.f32 %v5787_v0, %v5454_v53  ;;  %v1071_v52 = vadd.f32 %v5787_v0, %v5467_v58 }
 0x140   :  { %v1076_v58 = vadd.f32 %v5476_v60, %v5787_v0 }
 0x141   :  { %v5764_v25 = vpop.f32.mrb[52].mxu1 }
 0x142   :  { %6421 = vst [vmem:[#allocation2_spill] sm:$0xff] %v5764_v25  ;;  %v5766_v30 = vpop.f32.mrb[53].mxu1 }
 0x143   :  { %6422 = vst [vmem:[#allocation3_spill] sm:$0xff] %v5766_v30  ;;  %v5771_v35 = vpop.f32.mrb[54].mxu1 }
 0x144   :  { %6423 = vst [vmem:[#allocation4_spill] sm:$0xff] %v5771_v35  ;;  %v5779_v48 = vpop.f32.mrb[55].mxu1 }
 0x145   :  { %6424 = vst [vmem:[#allocation5_spill] sm:$0xff] %v5779_v48  ;;  %v4974_v48 = vld [vmem:[%s6418_s0 + $0x20c] sm:$0xff]  }
 0x146   :  { %4345 = vmatmul.mubr.msk.bf16.gmra.mrb[104].mxu1 %vm416_vm1, %v4970_v32  ;;  %4459 = vmatmul.mubr.msk.bf16.gmra.mrb[104].mxu0 %vm416_vm1, %v4971_v41  ;;  %v1073_v32 = vadd.f32 %v5459_v55, %v5787_v0 }
 0x147   :  { %4348 = vmatprep.mubr.msk.bf16.mxu1 %vm416_vm1, %v4972_v46  ;;  %4462 = vmatprep.mubr.msk.bf16.mxu0 %vm416_vm1, %v4973_v51  ;;  %v4975_v46 = vld [vmem:[%s6418_s0 + $0x260] sm:$0xff]  }
 0x149   :  { %v4356_v19 = vpop.f32.mrb[0].mxu0 }
 0x14a   :  { %v4469_v35 = vadd.f32 %v4356_v19, %v1072_v9  ;;  %v2939_v41 = vpop.f32.mrb[1].mxu0 }
 0x14b   :  { %v4471_v51 = vadd.f32 %v2939_v41, %v1070_v14  ;;  %v4357_v30 = vpop.f32.mrb[2].mxu0  ;;  %v1075_v14 = vadd.f32 %v5787_v0, %v5491_v2  ;;  %v1078_v2 = vadd.f32 %v5787_v0, %v5502_v5 }
 0x14c   :  { %3500 = vst.msk [vmem:[%s6420_s3 + $0x10] sm:$0xff] %vm416_vm1, %v4469_v35  ;;  %v4473_v53 = vadd.f32 %v4357_v30, %v1073_v32  ;;  %v2942_v25 = vpop.f32.mrb[3].mxu0  ;;  %v1077_v35 = vadd.f32 %v5483_v63, %v5787_v0  ;;  %v1080_v63 = vadd.f32 %v5500_v4, %v5787_v0 }
 0x14d   :  { %3498 = vst.msk [vmem:[%s6420_s3] sm:$0xff] %vm416_vm1, %v4471_v51  ;;  %v4475_v55 = vadd.f32 %v2942_v25, %v1071_v52  ;;  %v1074_v25 = vadd.f32 %v5787_v0, %v5478_v61  ;;  %v1081_v52 = vadd.f32 %v5507_v7, %v5787_v0  ;;  %v1084_v7 = vadd.f32 %v5524_v12, %v5787_v0 }
 0x14e   :  { %4349 = vmatmul.mubr.msk.bf16.gmra.mrb[108].mxu1 %vm416_vm1, %v4974_v48  ;;  %3501 = vst.msk [vmem:[%s6420_s3 + $0x18] sm:$0xff] %vm416_vm1, %v4473_v53  ;;  %4463 = vmatmul.mubr.msk.bf16.gmra.mrb[108].mxu0 %vm416_vm1, %v4975_v46 }
 0x14f   :  { %3499 = vst.msk [vmem:[%s6420_s3 + $0x8] sm:$0xff] %vm416_vm1, %v4475_v55  ;;  %v1079_v55 = vadd.f32 %v5787_v0, %v5515_v10  ;;  %v1082_v10 = vadd.f32 %v5787_v0, %v5526_v13 }
 0x151   :  { %v4360_v30 = vpop.f32.mrb[4].mxu0 }
 0x152   :  { %v4477_v48 = vadd.f32 %v4360_v30, %v1076_v58  ;;  %v2955_v9 = vpop.f32.mrb[5].mxu0 }
 0x153   :  { %v4479_v19 = vadd.f32 %v2955_v9, %v1074_v25  ;;  %v4361_v32 = vpop.f32.mrb[6].mxu0 }
 0x154   :  { %3504 = vst.msk [vmem:[%s6420_s3 + $0x30] sm:$0xff] %vm416_vm1, %v4477_v48  ;;  %v4481_v60 = vadd.f32 %v4361_v32, %v1077_v35  ;;  %v2958_v41 = vpop.f32.mrb[7].mxu0  ;;  %v1085_v48 = vadd.f32 %v5531_v15, %v5787_v0  ;;  %v1088_v15 = vadd.f32 %v5548_v20, %v5787_v0 }
 0x155   :  { %3502 = vst.msk [vmem:[%s6420_s3 + $0x20] sm:$0xff] %vm416_vm1, %v4479_v19  ;;  %v4483_v61 = vadd.f32 %v2958_v41, %v1075_v14  ;;  %v1083_v19 = vadd.f32 %v5787_v0, %v5539_v18  ;;  %v1086_v18 = vadd.f32 %v5787_v0, %v5550_v21 }
 0x156   :  { %3505 = vst.msk [vmem:[%s6420_s3 + $0x38] sm:$0xff] %vm416_vm1, %v4481_v60 }
 0x157   :  { %3503 = vst.msk [vmem:[%s6420_s3 + $0x28] sm:$0xff] %vm416_vm1, %v4483_v61 }
 0x159   :  { %v4364_v46 = vpop.f32.mrb[8].mxu0 }
 0x15a   :  { %v4485_v51 = vadd.f32 %v4364_v46, %v1080_v63  ;;  %v2971_v53 = vpop.f32.mrb[9].mxu0  ;;  %v1089_v63 = vadd.f32 %v5555_v23, %v5787_v0  ;;  %v1092_v23 = vadd.f32 %v5572_v28, %v5787_v0 }
 0x15b   :  { %v4487_v58 = vadd.f32 %v2971_v53, %v1078_v2  ;;  %v4365_v25 = vpop.f32.mrb[10].mxu0 }
 0x15c   :  { %3508 = vst.msk [vmem:[%s6420_s3 + $0x50] sm:$0xff] %vm416_vm1, %v4485_v51  ;;  %v4489_v4 = vadd.f32 %v4365_v25, %v1081_v52  ;;  %v2974_v30 = vpop.f32.mrb[11].mxu0  ;;  %v1087_v52 = vadd.f32 %v5787_v0, %v5563_v26  ;;  %v1090_v26 = vadd.f32 %v5787_v0, %v5574_v29  ;;  %v1093_v25 = vadd.f32 %v5579_v31, %v5787_v0 }
 0x15d   :  { %3506 = vst.msk [vmem:[%s6420_s3 + $0x40] sm:$0xff] %vm416_vm1, %v4487_v58  ;;  %v4491_v5 = vadd.f32 %v2974_v30, %v1079_v55  ;;  %v1096_v31 = vadd.f32 %v5596_v36, %v5787_v0 }
 0x15e   :  { %3509 = vst.msk [vmem:[%s6420_s3 + $0x58] sm:$0xff] %vm416_vm1, %v4489_v4 }
 0x15f   :  { %3507 = vst.msk [vmem:[%s6420_s3 + $0x48] sm:$0xff] %vm416_vm1, %v4491_v5  ;;  %v1091_v5 = vadd.f32 %v5787_v0, %v5587_v34  ;;  %v1094_v34 = vadd.f32 %v5787_v0, %v5598_v37 }
 0x161   :  { %v4368_v35 = vpop.f32.mrb[12].mxu0 }
 0x162   :  { %v4493_v9 = vadd.f32 %v4368_v35, %v1084_v7  ;;  %v2987_v14 = vpop.f32.mrb[13].mxu0 }
 0x163   :  { %v4495_v32 = vadd.f32 %v2987_v14, %v1082_v10  ;;  %v4369_v60 = vpop.f32.mrb[14].mxu0 }
 0x164   :  { %3512 = vst.msk [vmem:[%s6420_s3 + $0x70] sm:$0xff] %vm416_vm1, %v4493_v9  ;;  %v4497_v12 = vadd.f32 %v4369_v60, %v1085_v48  ;;  %v2990_v41 = vpop.f32.mrb[15].mxu0  ;;  %v1097_v9 = vadd.f32 %v5603_v39, %v5787_v0  ;;  %v1100_v39 = vadd.f32 %v5620_v44, %v5787_v0 }
 0x165   :  { %3510 = vst.msk [vmem:[%s6420_s3 + $0x60] sm:$0xff] %vm416_vm1, %v4495_v32  ;;  %v4499_v13 = vadd.f32 %v2990_v41, %v1083_v19  ;;  %v1095_v32 = vadd.f32 %v5787_v0, %v5611_v42  ;;  %v1098_v42 = vadd.f32 %v5787_v0, %v5622_v45 }
 0x166   :  { %3513 = vst.msk [vmem:[%s6420_s3 + $0x78] sm:$0xff] %vm416_vm1, %v4497_v12 }
 0x167   :  { %3511 = vst.msk [vmem:[%s6420_s3 + $0x68] sm:$0xff] %vm416_vm1, %v4499_v13 }
 0x169   :  { %v4372_v61 = vpop.f32.mrb[16].mxu0 }
 0x16a   :  { %v4501_v2 = vadd.f32 %v4372_v61, %v1088_v15  ;;  %v3003_v46 = vpop.f32.mrb[17].mxu0  ;;  %v1101_v15 = vadd.f32 %v5627_v47, %v5787_v0  ;;  %v1104_v47 = vadd.f32 %v5644_v54, %v5787_v0 }
 0x16b   :  { %v4503_v51 = vadd.f32 %v3003_v46, %v1086_v18  ;;  %v4373_v53 = vpop.f32.mrb[18].mxu0 }
 0x16c   :  { %3516 = vst.msk [vmem:[%s6420_s3 + $0x90] sm:$0xff] %vm416_vm1, %v4501_v2  ;;  %v4505_v20 = vadd.f32 %v4373_v53, %v1089_v63  ;;  %v3006_v55 = vpop.f32.mrb[19].mxu0  ;;  %v1099_v63 = vadd.f32 %v5787_v0, %v5635_v50  ;;  %v1102_v50 = vadd.f32 %v5787_v0, %v5646_v56  ;;  %v1105_v53 = vadd.f32 %v5651_v59, %v5787_v0 }
 0x16d   :  { %3514 = vst.msk [vmem:[%s6420_s3 + $0x80] sm:$0xff] %vm416_vm1, %v4503_v51  ;;  %v4507_v21 = vadd.f32 %v3006_v55, %v1087_v52  ;;  %v1108_v59 = vadd.f32 %v5668_v6, %v5787_v0 }
 0x16e   :  { %3517 = vst.msk [vmem:[%s6420_s3 + $0x98] sm:$0xff] %vm416_vm1, %v4505_v20 }
 0x16f   :  { %3515 = vst.msk [vmem:[%s6420_s3 + $0x88] sm:$0xff] %vm416_vm1, %v4507_v21  ;;  %v1103_v21 = vadd.f32 %v5787_v0, %v5659_v1  ;;  %v1106_v1 = vadd.f32 %v5787_v0, %v5670_v8 }
 0x171   :  { %v4376_v58 = vpop.f32.mrb[20].mxu0 }
 0x172   :  { %v4509_v4 = vadd.f32 %v4376_v58, %v1092_v23  ;;  %v3019_v30 = vpop.f32.mrb[21].mxu0 }
 0x173   :  { %v4511_v7 = vadd.f32 %v3019_v30, %v1090_v26  ;;  %v4377_v10 = vpop.f32.mrb[22].mxu0 }
 0x174   :  { %3520 = vst.msk [vmem:[%s6420_s3 + $0xb0] sm:$0xff] %vm416_vm1, %v4509_v4  ;;  %v4513_v28 = vadd.f32 %v4377_v10, %v1093_v25  ;;  %v3022_v35 = vpop.f32.mrb[23].mxu0  ;;  %v1109_v4 = vadd.f32 %v5675_v11, %v5787_v0  ;;  %v1112_v11 = vadd.f32 %v5692_v22, %v5787_v0 }
 0x175   :  { %3518 = vst.msk [vmem:[%s6420_s3 + $0xa0] sm:$0xff] %vm416_vm1, %v4511_v7  ;;  %v4515_v29 = vadd.f32 %v3022_v35, %v1091_v5  ;;  %v1107_v7 = vadd.f32 %v5787_v0, %v5683_v17  ;;  %v1110_v17 = vadd.f32 %v5787_v0, %v5694_v24 }
 0x176   :  { %3521 = vst.msk [vmem:[%s6420_s3 + $0xb8] sm:$0xff] %vm416_vm1, %v4513_v28 }
 0x177   :  { %3519 = vst.msk [vmem:[%s6420_s3 + $0xa8] sm:$0xff] %vm416_vm1, %v4515_v29 }
 0x179   :  { %v4380_v48 = vpop.f32.mrb[24].mxu0 }
 0x17a   :  { %v4517_v14 = vadd.f32 %v4380_v48, %v1096_v31  ;;  %v3035_v19 = vpop.f32.mrb[25].mxu0  ;;  %v1113_v31 = vadd.f32 %v5699_v27, %v5787_v0  ;;  %v1116_v27 = vadd.f32 %v5716_v38, %v5787_v0 }
 0x17b   :  { %v4519_v60 = vadd.f32 %v3035_v19, %v1094_v34  ;;  %v4381_v12 = vpop.f32.mrb[26].mxu0 }
 0x17c   :  { %3524 = vst.msk [vmem:[%s6420_s3 + $0xd0] sm:$0xff] %vm416_vm1, %v4517_v14  ;;  %v4521_v36 = vadd.f32 %v4381_v12, %v1097_v9  ;;  %v3038_v41 = vpop.f32.mrb[27].mxu0  ;;  %v1111_v9 = vadd.f32 %v5787_v0, %v5707_v33  ;;  %v1114_v33 = vadd.f32 %v5787_v0, %v5718_v40  ;;  %v1117_v12 = vadd.f32 %v5723_v43, %v5787_v0 }
 0x17d   :  { %3522 = vst.msk [vmem:[%s6420_s3 + $0xc0] sm:$0xff] %vm416_vm1, %v4519_v60  ;;  %v4523_v37 = vadd.f32 %v3038_v41, %v1095_v32  ;;  %v1120_v43 = vadd.f32 %v5740_v57, %v5787_v0 }
 0x17e   :  { %3525 = vst.msk [vmem:[%s6420_s3 + $0xd8] sm:$0xff] %vm416_vm1, %v4521_v36 }
 0x17f   :  { %3523 = vst.msk [vmem:[%s6420_s3 + $0xc8] sm:$0xff] %vm416_vm1, %v4523_v37  ;;  %v1115_v37 = vadd.f32 %v5787_v0, %v5731_v49  ;;  %v1118_v49 = vadd.f32 %v5787_v0, %v5742_v62 }
 0x181   :  { %v4384_v13 = vpop.f32.mrb[28].mxu0 }
 0x182   :  { %v4525_v18 = vadd.f32 %v4384_v13, %v1100_v39  ;;  %v3051_v61 = vpop.f32.mrb[29].mxu0 }
 0x183   :  { %v4527_v2 = vadd.f32 %v3051_v61, %v1098_v42  ;;  %v4385_v46 = vpop.f32.mrb[30].mxu0 }
 0x184   :  { %3528 = vst.msk [vmem:[%s6420_s3 + $0xf0] sm:$0xff] %vm416_vm1, %v4525_v18  ;;  %v4529_v44 = vadd.f32 %v4385_v46, %v1101_v15  ;;  %v3054_v52 = vpop.f32.mrb[31].mxu0  ;;  %v1121_v18 = vadd.f32 %v5747_v3, %v5787_v0  ;;  %v6425_v3 = vld [vmem:[#allocation2_spill] sm:$0xff] }
 0x185   :  { %3526 = vst.msk [vmem:[%s6420_s3 + $0xe0] sm:$0xff] %vm416_vm1, %v4527_v2  ;;  %v4531_v45 = vadd.f32 %v3054_v52, %v1099_v63  ;;  %v1119_v2 = vadd.f32 %v5787_v0, %v5755_v16  ;;  %v1124_v16 = vadd.f32 %v6425_v3, %v5787_v0 }
 0x186   :  { %3529 = vst.msk [vmem:[%s6420_s3 + $0xf8] sm:$0xff] %vm416_vm1, %v4529_v44 }
 0x187   :  { %3527 = vst.msk [vmem:[%s6420_s3 + $0xe8] sm:$0xff] %vm416_vm1, %v4531_v45  ;;  %v6426_v45 = vld [vmem:[#allocation3_spill] sm:$0xff] }
 0x189   :  { %v4388_v51 = vpop.f32.mrb[32].mxu0 }
 0x18a   :  { %v4533_v20 = vadd.f32 %v4388_v51, %v1104_v47  ;;  %v3067_v55 = vpop.f32.mrb[33].mxu0  ;;  %v1122_v47 = vadd.f32 %v5787_v0, %v6426_v45  ;;  %v6427_v51 = vld [vmem:[#allocation4_spill] sm:$0xff] }
 0x18b   :  { %v4535_v23 = vadd.f32 %v3067_v55, %v1102_v50  ;;  %v4389_v26 = vpop.f32.mrb[34].mxu0 }
 0x18c   :  { %3532 = vst.msk [vmem:[%s6420_s3 + $0x110] sm:$0xff] %vm416_vm1, %v4533_v20  ;;  %v4537_v54 = vadd.f32 %v4389_v26, %v1105_v53  ;;  %v3070_v58 = vpop.f32.mrb[35].mxu0  ;;  %v1125_v53 = vadd.f32 %v6427_v51, %v5787_v0 }
 0x18d   :  { %3530 = vst.msk [vmem:[%s6420_s3 + $0x100] sm:$0xff] %vm416_vm1, %v4535_v23  ;;  %v4539_v56 = vadd.f32 %v3070_v58, %v1103_v21  ;;  %v6428_v21 = vld [vmem:[#allocation5_spill] sm:$0xff] }
 0x18e   :  { %3533 = vst.msk [vmem:[%s6420_s3 + $0x118] sm:$0xff] %vm416_vm1, %v4537_v54  ;;  %v1123_v23 = vadd.f32 %v5787_v0, %v6428_v21 }
 0x18f   :  { %3531 = vst.msk [vmem:[%s6420_s3 + $0x108] sm:$0xff] %vm416_vm1, %v4539_v56 }
 0x191   :  { %v4392_v25 = vpop.f32.mrb[36].mxu0 }
 0x192   :  { %v4541_v30 = vadd.f32 %v4392_v25, %v1108_v59  ;;  %v3083_v5 = vpop.f32.mrb[37].mxu0 }
 0x193   :  { %v4543_v10 = vadd.f32 %v3083_v5, %v1106_v1  ;;  %v4393_v28 = vpop.f32.mrb[38].mxu0 }
 0x194   :  { %3536 = vst.msk [vmem:[%s6420_s3 + $0x130] sm:$0xff] %vm416_vm1, %v4541_v30  ;;  %v4545_v6 = vadd.f32 %v4393_v28, %v1109_v4  ;;  %v3086_v35 = vpop.f32.mrb[39].mxu0 }
 0x195   :  { %3534 = vst.msk [vmem:[%s6420_s3 + $0x120] sm:$0xff] %vm416_vm1, %v4543_v10  ;;  %v4547_v8 = vadd.f32 %v3086_v35, %v1107_v7 }
 0x196   :  { %3537 = vst.msk [vmem:[%s6420_s3 + $0x138] sm:$0xff] %vm416_vm1, %v4545_v6 }
 0x197   :  { %3535 = vst.msk [vmem:[%s6420_s3 + $0x128] sm:$0xff] %vm416_vm1, %v4547_v8 }
 0x199   :  { %v4396_v29 = vpop.f32.mrb[40].mxu0 }
 0x19a   :  { %v4549_v34 = vadd.f32 %v4396_v29, %v1112_v11  ;;  %v3099_v48 = vpop.f32.mrb[41].mxu0 }
 0x19b   :  { %v4551_v14 = vadd.f32 %v3099_v48, %v1110_v17  ;;  %v4397_v19 = vpop.f32.mrb[42].mxu0 }
 0x19c   :  { %3540 = vst.msk [vmem:[%s6420_s3 + $0x150] sm:$0xff] %vm416_vm1, %v4549_v34  ;;  %v4553_v22 = vadd.f32 %v4397_v19, %v1113_v31  ;;  %v3102_v32 = vpop.f32.mrb[43].mxu0 }
 0x19d   :  { %3538 = vst.msk [vmem:[%s6420_s3 + $0x140] sm:$0xff] %vm416_vm1, %v4551_v14  ;;  %v4555_v24 = vadd.f32 %v3102_v32, %v1111_v9 }
 0x19e   :  { %3541 = vst.msk [vmem:[%s6420_s3 + $0x158] sm:$0xff] %vm416_vm1, %v4553_v22 }
 0x19f   :  { %3539 = vst.msk [vmem:[%s6420_s3 + $0x148] sm:$0xff] %vm416_vm1, %v4555_v24 }
 0x1a1   :  { %v4400_v60 = vpop.f32.mrb[44].mxu0 }
 0x1a2   :  { %v4557_v36 = vadd.f32 %v4400_v60, %v1116_v27  ;;  %v3115_v41 = vpop.f32.mrb[45].mxu0 }
 0x1a3   :  { %v4559_v39 = vadd.f32 %v3115_v41, %v1114_v33  ;;  %v4401_v42 = vpop.f32.mrb[46].mxu0 }
 0x1a4   :  { %3544 = vst.msk [vmem:[%s6420_s3 + $0x170] sm:$0xff] %vm416_vm1, %v4557_v36  ;;  %v4561_v38 = vadd.f32 %v4401_v42, %v1117_v12  ;;  %v3118_v13 = vpop.f32.mrb[47].mxu0 }
 0x1a5   :  { %3542 = vst.msk [vmem:[%s6420_s3 + $0x160] sm:$0xff] %vm416_vm1, %v4559_v39  ;;  %v4563_v40 = vadd.f32 %v3118_v13, %v1115_v37 }
 0x1a6   :  { %3545 = vst.msk [vmem:[%s6420_s3 + $0x178] sm:$0xff] %vm416_vm1, %v4561_v38 }
 0x1a7   :  { %3543 = vst.msk [vmem:[%s6420_s3 + $0x168] sm:$0xff] %vm416_vm1, %v4563_v40 }
 0x1a9   :  { %v4404_v15 = vpop.f32.mrb[48].mxu0 }
 0x1aa   :  { %v4565_v61 = vadd.f32 %v4404_v15, %v1120_v43  ;;  %v3131_v63 = vpop.f32.mrb[49].mxu0 }
 0x1ab   :  { %v4567_v46 = vadd.f32 %v3131_v63, %v1118_v49  ;;  %v4405_v44 = vpop.f32.mrb[50].mxu0 }
 0x1ac   :  { %3548 = vst.msk [vmem:[%s6420_s3 + $0x190] sm:$0xff] %vm416_vm1, %v4565_v61  ;;  %v4569_v57 = vadd.f32 %v4405_v44, %v1121_v18  ;;  %v3134_v52 = vpop.f32.mrb[51].mxu0 }
 0x1ad   :  { %3546 = vst.msk [vmem:[%s6420_s3 + $0x180] sm:$0xff] %vm416_vm1, %v4567_v46  ;;  %v4571_v62 = vadd.f32 %v3134_v52, %v1119_v2 }
 0x1ae   :  { %3549 = vst.msk [vmem:[%s6420_s3 + $0x198] sm:$0xff] %vm416_vm1, %v4569_v57 }
 0x1af   :  { %3547 = vst.msk [vmem:[%s6420_s3 + $0x188] sm:$0xff] %vm416_vm1, %v4571_v62 }
 0x1b1   :  { %v4408_v50 = vpop.f32.mrb[52].mxu0 }
 0x1b2   :  { %v4573_v20 = vadd.f32 %v4408_v50, %v1124_v16  ;;  %v3147_v55 = vpop.f32.mrb[53].mxu0 }
 0x1b3   :  { %v4575_v26 = vadd.f32 %v3147_v55, %v1122_v47  ;;  %v4409_v54 = vpop.f32.mrb[54].mxu0 }
 0x1b4   :  { %3552 = vst.msk [vmem:[%s6420_s3 + $0x1b0] sm:$0xff] %vm416_vm1, %v4573_v20  ;;  %v4577_v58 = vadd.f32 %v4409_v54, %v1125_v53  ;;  %v3150_v56 = vpop.f32.mrb[55].mxu0 }
 0x1b5   :  { %3550 = vst.msk [vmem:[%s6420_s3 + $0x1a0] sm:$0xff] %vm416_vm1, %v4575_v26  ;;  %v4579_v59 = vadd.f32 %v3150_v56, %v1123_v23 }
 0x1b6   :  { %3553 = vst.msk [vmem:[%s6420_s3 + $0x1b8] sm:$0xff] %vm416_vm1, %v4577_v58 }
 0x1b7   :  { %3551 = vst.msk [vmem:[%s6420_s3 + $0x1a8] sm:$0xff] %vm416_vm1, %v4579_v59 }
 0x1b9   :  { %v4298_v1 = vpop.f32.mrb[56].mxu1  ;;  %v4412_v4 = vpop.f32.mrb[56].mxu0 }
 0x1ba   :  { %v4580_v25 = vadd.f32 %v4298_v1, %v5787_v0  ;;  %v2005_v30 = vpop.f32.mrb[57].mxu1  ;;  %v3163_v7 = vpop.f32.mrb[57].mxu0 }
 0x1bb   :  { %v4582_v5 = vadd.f32 %v5787_v0, %v2005_v30  ;;  %v4299_v10 = vpop.f32.mrb[58].mxu1  ;;  %v4413_v35 = vpop.f32.mrb[58].mxu0 }
 0x1bc   :  { %v4581_v28 = vadd.f32 %v4580_v25, %v4412_v4  ;;  %v4584_v6 = vadd.f32 %v4299_v10, %v5787_v0  ;;  %v2008_v8 = vpop.f32.mrb[59].mxu1  ;;  %v3166_v29 = vpop.f32.mrb[59].mxu0 }
 0x1bd   :  { %v4583_v11 = vadd.f32 %v4582_v5, %v3163_v7  ;;  %v4586_v17 = vadd.f32 %v5787_v0, %v2008_v8 }
 0x1be   :  { %3556 = vst.msk [vmem:[%s6420_s3 + $0x1d0] sm:$0xff] %vm416_vm1, %v4581_v28  ;;  %v4585_v31 = vadd.f32 %v4584_v6, %v4413_v35 }
 0x1bf   :  { %3554 = vst.msk [vmem:[%s6420_s3 + $0x1c0] sm:$0xff] %vm416_vm1, %v4583_v11  ;;  %v4587_v34 = vadd.f32 %v4586_v17, %v3166_v29 }
 0x1c0   :  { %3557 = vst.msk [vmem:[%s6420_s3 + $0x1d8] sm:$0xff] %vm416_vm1, %v4585_v31 }
 0x1c1   :  { %3555 = vst.msk [vmem:[%s6420_s3 + $0x1c8] sm:$0xff] %vm416_vm1, %v4587_v34  ;;  %v4302_v48 = vpop.f32.mrb[60].mxu1  ;;  %v4416_v14 = vpop.f32.mrb[60].mxu0 }
 0x1c2   :  { %v4588_v9 = vadd.f32 %v4302_v48, %v5787_v0  ;;  %v2021_v19 = vpop.f32.mrb[61].mxu1  ;;  %v3179_v32 = vpop.f32.mrb[61].mxu0 }
 0x1c3   :  { %v4590_v22 = vadd.f32 %v5787_v0, %v2021_v19  ;;  %v4303_v24 = vpop.f32.mrb[62].mxu1  ;;  %v4417_v60 = vpop.f32.mrb[62].mxu0 }
 0x1c4   :  { %v4589_v27 = vadd.f32 %v4588_v9, %v4416_v14  ;;  %v4592_v33 = vadd.f32 %v4303_v24, %v5787_v0  ;;  %v2024_v12 = vpop.f32.mrb[63].mxu1  ;;  %v3182_v37 = vpop.f32.mrb[63].mxu0 }
 0x1c5   :  { %v4591_v36 = vadd.f32 %v4590_v22, %v3179_v32  ;;  %v4594_v41 = vadd.f32 %v5787_v0, %v2024_v12 }
 0x1c6   :  { %3560 = vst.msk [vmem:[%s6420_s3 + $0x1f0] sm:$0xff] %vm416_vm1, %v4589_v27  ;;  %v4593_v39 = vadd.f32 %v4592_v33, %v4417_v60 }
 0x1c7   :  { %3558 = vst.msk [vmem:[%s6420_s3 + $0x1e0] sm:$0xff] %vm416_vm1, %v4591_v36  ;;  %v4595_v42 = vadd.f32 %v4594_v41, %v3182_v37 }
 0x1c8   :  { %3561 = vst.msk [vmem:[%s6420_s3 + $0x1f8] sm:$0xff] %vm416_vm1, %v4593_v39 }
 0x1c9   :  { %3559 = vst.msk [vmem:[%s6420_s3 + $0x1e8] sm:$0xff] %vm416_vm1, %v4595_v42  ;;  %v4306_v38 = vpop.f32.mrb[64].mxu1  ;;  %v4420_v40 = vpop.f32.mrb[64].mxu0 }
 0x1ca   :  { %v4596_v13 = vadd.f32 %v4306_v38, %v5787_v0  ;;  %v2037_v43 = vpop.f32.mrb[65].mxu1  ;;  %v3195_v15 = vpop.f32.mrb[65].mxu0 }
 0x1cb   :  { %v4598_v49 = vadd.f32 %v5787_v0, %v2037_v43  ;;  %v4307_v18 = vpop.f32.mrb[66].mxu1  ;;  %v4421_v2 = vpop.f32.mrb[66].mxu0 }
 0x1cc   :  { %v4597_v61 = vadd.f32 %v4596_v13, %v4420_v40  ;;  %v4600_v63 = vadd.f32 %v4307_v18, %v5787_v0  ;;  %v2040_v46 = vpop.f32.mrb[67].mxu1  ;;  %v3198_v52 = vpop.f32.mrb[67].mxu0 }
 0x1cd   :  { %v4599_v44 = vadd.f32 %v4598_v49, %v3195_v15  ;;  %v4602_v57 = vadd.f32 %v5787_v0, %v2040_v46 }
 0x1ce   :  { %3564 = vst.msk [vmem:[%s6420_s3 + $0x210] sm:$0xff] %vm416_vm1, %v4597_v61  ;;  %v4601_v62 = vadd.f32 %v4600_v63, %v4421_v2 }
 0x1cf   :  { %3562 = vst.msk [vmem:[%s6420_s3 + $0x200] sm:$0xff] %vm416_vm1, %v4599_v44  ;;  %v4603_v3 = vadd.f32 %v4602_v57, %v3198_v52 }
 0x1d0   :  { %3565 = vst.msk [vmem:[%s6420_s3 + $0x218] sm:$0xff] %vm416_vm1, %v4601_v62 }
 0x1d1   :  { %3563 = vst.msk [vmem:[%s6420_s3 + $0x208] sm:$0xff] %vm416_vm1, %v4603_v3  ;;  %v4310_v16 = vpop.f32.mrb[68].mxu1  ;;  %v4424_v47 = vpop.f32.mrb[68].mxu0 }
 0x1d2   :  { %v4604_v45 = vadd.f32 %v4310_v16, %v5787_v0  ;;  %v2053_v50 = vpop.f32.mrb[69].mxu1  ;;  %v3211_v53 = vpop.f32.mrb[69].mxu0 }
 0x1d3   :  { %v4606_v51 = vadd.f32 %v5787_v0, %v2053_v50  ;;  %v4311_v20 = vpop.f32.mrb[70].mxu1  ;;  %v4425_v23 = vpop.f32.mrb[70].mxu0 }
 0x1d4   :  { %v4605_v55 = vadd.f32 %v4604_v45, %v4424_v47  ;;  %v4608_v21 = vadd.f32 %v4311_v20, %v5787_v0  ;;  %v2056_v26 = vpop.f32.mrb[71].mxu1  ;;  %v3214_v56 = vpop.f32.mrb[71].mxu0 }
 0x1d5   :  { %v4607_v54 = vadd.f32 %v4606_v51, %v3211_v53  ;;  %v4610_v58 = vadd.f32 %v5787_v0, %v2056_v26 }
 0x1d6   :  { %3568 = vst.msk [vmem:[%s6420_s3 + $0x230] sm:$0xff] %vm416_vm1, %v4605_v55  ;;  %v4609_v59 = vadd.f32 %v4608_v21, %v4425_v23 }
 0x1d7   :  { %3566 = vst.msk [vmem:[%s6420_s3 + $0x220] sm:$0xff] %vm416_vm1, %v4607_v54  ;;  %v4611_v1 = vadd.f32 %v4610_v58, %v3214_v56 }
 0x1d8   :  { %3569 = vst.msk [vmem:[%s6420_s3 + $0x238] sm:$0xff] %vm416_vm1, %v4609_v59 }
 0x1d9   :  { %3567 = vst.msk [vmem:[%s6420_s3 + $0x228] sm:$0xff] %vm416_vm1, %v4611_v1  ;;  %v4314_v25 = vpop.f32.mrb[72].mxu1  ;;  %v4428_v30 = vpop.f32.mrb[72].mxu0 }
 0x1da   :  { %v4612_v4 = vadd.f32 %v4314_v25, %v5787_v0  ;;  %v2069_v5 = vpop.f32.mrb[73].mxu1  ;;  %v3227_v10 = vpop.f32.mrb[73].mxu0 }
 0x1db   :  { %v4614_v7 = vadd.f32 %v5787_v0, %v2069_v5  ;;  %v4315_v28 = vpop.f32.mrb[74].mxu1  ;;  %v4429_v8 = vpop.f32.mrb[74].mxu0 }
 0x1dc   :  { %v4613_v6 = vadd.f32 %v4612_v4, %v4428_v30  ;;  %v4616_v35 = vadd.f32 %v4315_v28, %v5787_v0  ;;  %v2072_v11 = vpop.f32.mrb[75].mxu1  ;;  %v3230_v31 = vpop.f32.mrb[75].mxu0 }
 0x1dd   :  { %v4615_v17 = vadd.f32 %v4614_v7, %v3227_v10  ;;  %v4618_v29 = vadd.f32 %v5787_v0, %v2072_v11 }
 0x1de   :  { %3572 = vst.msk [vmem:[%s6420_s3 + $0x250] sm:$0xff] %vm416_vm1, %v4613_v6  ;;  %v4617_v34 = vadd.f32 %v4616_v35, %v4429_v8 }
 0x1df   :  { %3570 = vst.msk [vmem:[%s6420_s3 + $0x240] sm:$0xff] %vm416_vm1, %v4615_v17  ;;  %v4619_v48 = vadd.f32 %v4618_v29, %v3230_v31 }
 0x1e0   :  { %3573 = vst.msk [vmem:[%s6420_s3 + $0x258] sm:$0xff] %vm416_vm1, %v4617_v34 }
 0x1e1   :  { %3571 = vst.msk [vmem:[%s6420_s3 + $0x248] sm:$0xff] %vm416_vm1, %v4619_v48  ;;  %v4318_v9 = vpop.f32.mrb[76].mxu1  ;;  %v4432_v19 = vpop.f32.mrb[76].mxu0 }
 0x1e2   :  { %v4620_v14 = vadd.f32 %v4318_v9, %v5787_v0  ;;  %v2085_v22 = vpop.f32.mrb[77].mxu1  ;;  %v3243_v24 = vpop.f32.mrb[77].mxu0 }
 0x1e3   :  { %v4622_v32 = vadd.f32 %v5787_v0, %v2085_v22  ;;  %v4319_v27 = vpop.f32.mrb[78].mxu1  ;;  %v4433_v12 = vpop.f32.mrb[78].mxu0 }
 0x1e4   :  { %v4621_v33 = vadd.f32 %v4620_v14, %v4432_v19  ;;  %v4624_v60 = vadd.f32 %v4319_v27, %v5787_v0  ;;  %v2088_v36 = vpop.f32.mrb[79].mxu1  ;;  %v3246_v39 = vpop.f32.mrb[79].mxu0 }
 0x1e5   :  { %v4623_v41 = vadd.f32 %v4622_v32, %v3243_v24  ;;  %v4626_v37 = vadd.f32 %v5787_v0, %v2088_v36 }
 0x1e6   :  { %3576 = vst.msk [vmem:[%s6420_s3 + $0x270] sm:$0xff] %vm416_vm1, %v4621_v33  ;;  %v4625_v42 = vadd.f32 %v4624_v60, %v4433_v12 }
 0x1e7   :  { %3574 = vst.msk [vmem:[%s6420_s3 + $0x260] sm:$0xff] %vm416_vm1, %v4623_v41  ;;  %v4627_v38 = vadd.f32 %v4626_v37, %v3246_v39 }
 0x1e8   :  { %3577 = vst.msk [vmem:[%s6420_s3 + $0x278] sm:$0xff] %vm416_vm1, %v4625_v42 }
 0x1e9   :  { %3575 = vst.msk [vmem:[%s6420_s3 + $0x268] sm:$0xff] %vm416_vm1, %v4627_v38  ;;  %v4322_v13 = vpop.f32.mrb[80].mxu1  ;;  %v4436_v43 = vpop.f32.mrb[80].mxu0 }
 0x1ea   :  { %v4628_v40 = vadd.f32 %v4322_v13, %v5787_v0  ;;  %v2101_v49 = vpop.f32.mrb[81].mxu1  ;;  %v3259_v18 = vpop.f32.mrb[81].mxu0 }
 0x1eb   :  { %v4630_v15 = vadd.f32 %v5787_v0, %v2101_v49  ;;  %v4323_v61 = vpop.f32.mrb[82].mxu1  ;;  %v4437_v46 = vpop.f32.mrb[82].mxu0 }
 0x1ec   :  { %v4629_v63 = vadd.f32 %v4628_v40, %v4436_v43  ;;  %v4632_v2 = vadd.f32 %v4323_v61, %v5787_v0  ;;  %v2104_v44 = vpop.f32.mrb[83].mxu1  ;;  %v3262_v62 = vpop.f32.mrb[83].mxu0 }
 0x1ed   :  { %v4631_v57 = vadd.f32 %v4630_v15, %v3259_v18  ;;  %v4634_v52 = vadd.f32 %v5787_v0, %v2104_v44 }
 0x1ee   :  { %3580 = vst.msk [vmem:[%s6420_s3 + $0x290] sm:$0xff] %vm416_vm1, %v4629_v63  ;;  %v4633_v3 = vadd.f32 %v4632_v2, %v4437_v46 }
 0x1ef   :  { %3578 = vst.msk [vmem:[%s6420_s3 + $0x280] sm:$0xff] %vm416_vm1, %v4631_v57  ;;  %v4635_v16 = vadd.f32 %v4634_v52, %v3262_v62 }
 0x1f0   :  { %3581 = vst.msk [vmem:[%s6420_s3 + $0x298] sm:$0xff] %vm416_vm1, %v4633_v3 }
 0x1f1   :  { %3579 = vst.msk [vmem:[%s6420_s3 + $0x288] sm:$0xff] %vm416_vm1, %v4635_v16  ;;  %v4326_v45 = vpop.f32.mrb[84].mxu1  ;;  %v4440_v50 = vpop.f32.mrb[84].mxu0 }
 0x1f2   :  { %v4636_v47 = vadd.f32 %v4326_v45, %v5787_v0  ;;  %v2117_v51 = vpop.f32.mrb[85].mxu1  ;;  %v3275_v20 = vpop.f32.mrb[85].mxu0 }
 0x1f3   :  { %v4638_v53 = vadd.f32 %v5787_v0, %v2117_v51  ;;  %v4327_v55 = vpop.f32.mrb[86].mxu1  ;;  %v4441_v26 = vpop.f32.mrb[86].mxu0 }
 0x1f4   :  { %v4637_v21 = vadd.f32 %v4636_v47, %v4440_v50  ;;  %v4640_v23 = vadd.f32 %v4327_v55, %v5787_v0  ;;  %v2120_v54 = vpop.f32.mrb[87].mxu1  ;;  %v3278_v59 = vpop.f32.mrb[87].mxu0 }
 0x1f5   :  { %v4639_v58 = vadd.f32 %v4638_v53, %v3275_v20  ;;  %v4642_v56 = vadd.f32 %v5787_v0, %v2120_v54 }
 0x1f6   :  { %3584 = vst.msk [vmem:[%s6420_s3 + $0x2b0] sm:$0xff] %vm416_vm1, %v4637_v21  ;;  %v4641_v1 = vadd.f32 %v4640_v23, %v4441_v26 }
 0x1f7   :  { %3582 = vst.msk [vmem:[%s6420_s3 + $0x2a0] sm:$0xff] %vm416_vm1, %v4639_v58  ;;  %v4643_v25 = vadd.f32 %v4642_v56, %v3278_v59 }
 0x1f8   :  { %3585 = vst.msk [vmem:[%s6420_s3 + $0x2b8] sm:$0xff] %vm416_vm1, %v4641_v1 }
 0x1f9   :  { %3583 = vst.msk [vmem:[%s6420_s3 + $0x2a8] sm:$0xff] %vm416_vm1, %v4643_v25  ;;  %v4330_v4 = vpop.f32.mrb[88].mxu1  ;;  %v4444_v5 = vpop.f32.mrb[88].mxu0 }
 0x1fa   :  { %v4644_v30 = vadd.f32 %v4330_v4, %v5787_v0  ;;  %v2133_v7 = vpop.f32.mrb[89].mxu1  ;;  %v3291_v28 = vpop.f32.mrb[89].mxu0 }
 0x1fb   :  { %v4646_v10 = vadd.f32 %v5787_v0, %v2133_v7  ;;  %v4331_v6 = vpop.f32.mrb[90].mxu1  ;;  %v4445_v11 = vpop.f32.mrb[90].mxu0 }
 0x1fc   :  { %v4645_v35 = vadd.f32 %v4644_v30, %v4444_v5  ;;  %v4648_v8 = vadd.f32 %v4331_v6, %v5787_v0  ;;  %v2136_v17 = vpop.f32.mrb[91].mxu1  ;;  %v3294_v34 = vpop.f32.mrb[91].mxu0 }
 0x1fd   :  { %v4647_v29 = vadd.f32 %v4646_v10, %v3291_v28  ;;  %v4650_v31 = vadd.f32 %v5787_v0, %v2136_v17 }
 0x1fe   :  { %3588 = vst.msk [vmem:[%s6420_s3 + $0x2d0] sm:$0xff] %vm416_vm1, %v4645_v35  ;;  %v4649_v48 = vadd.f32 %v4648_v8, %v4445_v11 }
 0x1ff   :  { %3586 = vst.msk [vmem:[%s6420_s3 + $0x2c0] sm:$0xff] %vm416_vm1, %v4647_v29  ;;  %v4651_v9 = vadd.f32 %v4650_v31, %v3294_v34 }
 0x200   :  { %3589 = vst.msk [vmem:[%s6420_s3 + $0x2d8] sm:$0xff] %vm416_vm1, %v4649_v48 }
 0x201   :  { %3587 = vst.msk [vmem:[%s6420_s3 + $0x2c8] sm:$0xff] %vm416_vm1, %v4651_v9  ;;  %v4334_v14 = vpop.f32.mrb[92].mxu1  ;;  %v4448_v22 = vpop.f32.mrb[92].mxu0 }
 0x202   :  { %v4652_v19 = vadd.f32 %v4334_v14, %v5787_v0  ;;  %v2149_v32 = vpop.f32.mrb[93].mxu1  ;;  %v3307_v27 = vpop.f32.mrb[93].mxu0 }
 0x203   :  { %v4654_v24 = vadd.f32 %v5787_v0, %v2149_v32  ;;  %v4335_v33 = vpop.f32.mrb[94].mxu1  ;;  %v4449_v36 = vpop.f32.mrb[94].mxu0 }
 0x204   :  { %v4653_v60 = vadd.f32 %v4652_v19, %v4448_v22  ;;  %v4656_v12 = vadd.f32 %v4335_v33, %v5787_v0  ;;  %v2152_v41 = vpop.f32.mrb[95].mxu1  ;;  %v3310_v42 = vpop.f32.mrb[95].mxu0 }
 0x205   :  { %v4655_v37 = vadd.f32 %v4654_v24, %v3307_v27  ;;  %v4658_v39 = vadd.f32 %v5787_v0, %v2152_v41 }
 0x206   :  { %3592 = vst.msk [vmem:[%s6420_s3 + $0x2f0] sm:$0xff] %vm416_vm1, %v4653_v60  ;;  %v4657_v38 = vadd.f32 %v4656_v12, %v4449_v36 }
 0x207   :  { %3590 = vst.msk [vmem:[%s6420_s3 + $0x2e0] sm:$0xff] %vm416_vm1, %v4655_v37  ;;  %v4659_v13 = vadd.f32 %v4658_v39, %v3310_v42 }
 0x208   :  { %3593 = vst.msk [vmem:[%s6420_s3 + $0x2f8] sm:$0xff] %vm416_vm1, %v4657_v38 }
 0x209   :  { %3591 = vst.msk [vmem:[%s6420_s3 + $0x2e8] sm:$0xff] %vm416_vm1, %v4659_v13  ;;  %v4338_v40 = vpop.f32.mrb[96].mxu1  ;;  %v4452_v49 = vpop.f32.mrb[96].mxu0 }
 0x20a   :  { %v4660_v43 = vadd.f32 %v4338_v40, %v5787_v0  ;;  %v2165_v15 = vpop.f32.mrb[97].mxu1  ;;  %v3323_v61 = vpop.f32.mrb[97].mxu0 }
 0x20b   :  { %v4662_v18 = vadd.f32 %v5787_v0, %v2165_v15  ;;  %v4339_v63 = vpop.f32.mrb[98].mxu1  ;;  %v4453_v44 = vpop.f32.mrb[98].mxu0 }
 0x20c   :  { %v4661_v2 = vadd.f32 %v4660_v43, %v4452_v49  ;;  %v4664_v46 = vadd.f32 %v4339_v63, %v5787_v0  ;;  %v2168_v57 = vpop.f32.mrb[99].mxu1  ;;  %v3326_v3 = vpop.f32.mrb[99].mxu0 }
 0x20d   :  { %v4663_v52 = vadd.f32 %v4662_v18, %v3323_v61  ;;  %v4666_v62 = vadd.f32 %v5787_v0, %v2168_v57 }
 0x20e   :  { %3596 = vst.msk [vmem:[%s6420_s3 + $0x310] sm:$0xff] %vm416_vm1, %v4661_v2  ;;  %v4665_v16 = vadd.f32 %v4664_v46, %v4453_v44 }
 0x20f   :  { %3594 = vst.msk [vmem:[%s6420_s3 + $0x300] sm:$0xff] %vm416_vm1, %v4663_v52  ;;  %v4667_v45 = vadd.f32 %v4666_v62, %v3326_v3 }
 0x210   :  { %3597 = vst.msk [vmem:[%s6420_s3 + $0x318] sm:$0xff] %vm416_vm1, %v4665_v16 }
 0x211   :  { %3595 = vst.msk [vmem:[%s6420_s3 + $0x308] sm:$0xff] %vm416_vm1, %v4667_v45  ;;  %v4342_v47 = vpop.f32.mrb[100].mxu1  ;;  %v4456_v51 = vpop.f32.mrb[100].mxu0 }
 0x212   :  { %v4668_v50 = vadd.f32 %v4342_v47, %v5787_v0  ;;  %v2181_v53 = vpop.f32.mrb[101].mxu1  ;;  %v3339_v55 = vpop.f32.mrb[101].mxu0 }
 0x213   :  { %v4670_v20 = vadd.f32 %v5787_v0, %v2181_v53  ;;  %v4343_v21 = vpop.f32.mrb[102].mxu1  ;;  %v4457_v54 = vpop.f32.mrb[102].mxu0 }
 0x214   :  { %v4669_v23 = vadd.f32 %v4668_v50, %v4456_v51  ;;  %v4672_v26 = vadd.f32 %v4343_v21, %v5787_v0  ;;  %v2184_v58 = vpop.f32.mrb[103].mxu1  ;;  %v3342_v1 = vpop.f32.mrb[103].mxu0 }
 0x215   :  { %v4671_v56 = vadd.f32 %v4670_v20, %v3339_v55  ;;  %v4674_v59 = vadd.f32 %v5787_v0, %v2184_v58 }
 0x216   :  { %3600 = vst.msk [vmem:[%s6420_s3 + $0x330] sm:$0xff] %vm416_vm1, %v4669_v23  ;;  %v4673_v25 = vadd.f32 %v4672_v26, %v4457_v54 }
 0x217   :  { %3598 = vst.msk [vmem:[%s6420_s3 + $0x320] sm:$0xff] %vm416_vm1, %v4671_v56  ;;  %v4675_v4 = vadd.f32 %v4674_v59, %v3342_v1 }
 0x218   :  { %3601 = vst.msk [vmem:[%s6420_s3 + $0x338] sm:$0xff] %vm416_vm1, %v4673_v25 }
 0x219   :  { %3599 = vst.msk [vmem:[%s6420_s3 + $0x328] sm:$0xff] %vm416_vm1, %v4675_v4  ;;  %v4346_v30 = vpop.f32.mrb[104].mxu1  ;;  %v4460_v7 = vpop.f32.mrb[104].mxu0 }
 0x21a   :  { %v4676_v5 = vadd.f32 %v4346_v30, %v5787_v0  ;;  %v2197_v10 = vpop.f32.mrb[105].mxu1  ;;  %v3355_v6 = vpop.f32.mrb[105].mxu0 }
 0x21b   :  { %v4678_v28 = vadd.f32 %v5787_v0, %v2197_v10  ;;  %v4347_v35 = vpop.f32.mrb[106].mxu1  ;;  %v4461_v17 = vpop.f32.mrb[106].mxu0 }
 0x21c   :  { %v4677_v8 = vadd.f32 %v4676_v5, %v4460_v7  ;;  %v4680_v11 = vadd.f32 %v4347_v35, %v5787_v0  ;;  %v2200_v29 = vpop.f32.mrb[107].mxu1  ;;  %v3358_v48 = vpop.f32.mrb[107].mxu0 }
 0x21d   :  { %v4679_v31 = vadd.f32 %v4678_v28, %v3355_v6  ;;  %v4682_v34 = vadd.f32 %v5787_v0, %v2200_v29 }
 0x21e   :  { %3604 = vst.msk [vmem:[%s6420_s3 + $0x350] sm:$0xff] %vm416_vm1, %v4677_v8  ;;  %v4681_v9 = vadd.f32 %v4680_v11, %v4461_v17 }
 0x21f   :  { %3602 = vst.msk [vmem:[%s6420_s3 + $0x340] sm:$0xff] %vm416_vm1, %v4679_v31  ;;  %v4683_v14 = vadd.f32 %v4682_v34, %v3358_v48 }
 0x220   :  { %3605 = vst.msk [vmem:[%s6420_s3 + $0x358] sm:$0xff] %vm416_vm1, %v4681_v9 }
 0x221   :  { %3603 = vst.msk [vmem:[%s6420_s3 + $0x348] sm:$0xff] %vm416_vm1, %v4683_v14  ;;  %v4350_v19 = vpop.f32.mrb[108].mxu1  ;;  %v4464_v32 = vpop.f32.mrb[108].mxu0 }
 0x222   :  { %v4684_v22 = vadd.f32 %v4350_v19, %v5787_v0  ;;  %v2213_v24 = vpop.f32.mrb[109].mxu1  ;;  %v3371_v33 = vpop.f32.mrb[109].mxu0 }
 0x223   :  { %v4686_v27 = vadd.f32 %v5787_v0, %v2213_v24  ;;  %v4351_v60 = vpop.f32.mrb[110].mxu1  ;;  %v4465_v41 = vpop.f32.mrb[110].mxu0 }
 0x224   :  { %v4685_v12 = vadd.f32 %v4684_v22, %v4464_v32  ;;  %v4688_v36 = vadd.f32 %v4351_v60, %v5787_v0  ;;  %v2216_v37 = vpop.f32.mrb[111].mxu1  ;;  %v3374_v38 = vpop.f32.mrb[111].mxu0 }
 0x225   :  { %v4687_v39 = vadd.f32 %v4686_v27, %v3371_v33  ;;  %v4690_v42 = vadd.f32 %v5787_v0, %v2216_v37 }
 0x226   :  { %3608 = vst.msk [vmem:[%s6420_s3 + $0x370] sm:$0xff] %vm416_vm1, %v4685_v12  ;;  %v4689_v13 = vadd.f32 %v4688_v36, %v4465_v41 }
 0x227   :  { %3606 = vst.msk [vmem:[%s6420_s3 + $0x360] sm:$0xff] %vm416_vm1, %v4687_v39  ;;  %v4691_v40 = vadd.f32 %v4690_v42, %v3374_v38 }
 0x228   :  { %3609 = vst.msk [vmem:[%s6420_s3 + $0x378] sm:$0xff] %vm416_vm1, %v4689_v13 }
 0x229   :  { %3607 = vst.msk [vmem:[%s6420_s3 + $0x368] sm:$0xff] %vm416_vm1, %v4691_v40 }

// kernel: ms_tcn_forward.7
= control target key start
LH: loop header
LB: loop body
LE: loop exit
PB: predicated region body
PF: predicated region fallthrough
CT: control target
= control target key end

     0   :  { %vm585_vm0 = vcmask 1040384   ;;  %vm416_vm1 = vcmask 15360   ;;  %s6417_s1 = inlined_call_operand.vmem [shape: bf16[3,2,2], index: 1, kind: input, shape index: {}]   ;;  %s6418_s0 = inlined_call_operand.vmem [shape: bf16[1120,2], index: 0, kind: input, shape index: {}]   ;;  %s6419_s2 = inlined_call_operand.vmem [shape: f32[1,2], index: 2, kind: input, shape index: {}]   ;;  %s6420_s3 = inlined_call_operand.vmem [shape: f32[896,2], index: 3, kind: output, shape index: {}]  }
   0x1   :  { %v135_v0 = vld [vmem:[%s6417_s1] sm:$0x1]  ;;  %v3727_v1 = vld [vmem:[%s6417_s1 + $0x1] sm:$0x1]  ;;  %v4809_v5 = vld [vmem:[%s6418_s0 + $0x38] sm:$0xff]  }
   0x2   :  { %4804 = vmatprep.subr.msk.bf16.mxu1 %vm585_vm0, %v135_v0  ;;  %4805 = vmatprep.subr.msk.bf16.mxu0 %vm585_vm0, %v3727_v1  ;;  %v587_v2 = vsel %vm585_vm0, %v135_v0, 0  ;;  %v1745_v3 = vsel %vm585_vm0, %v3727_v1, 0  ;;  %v4808_v4 = vld [vmem:[%s6418_s0] sm:$0xff]   ;;  %v4810_v6 = vld [vmem:[%s6418_s0 + $0x8] sm:$0xff]   ;;  %v4812_v10 = vld [vmem:[%s6418_s0 + $0x10] sm:$0xff]  }
   0x3   :  { %4125 = vmatpush3.bf16.msra.mxu1 %v587_v2  ;;  %4239 = vmatpush3.bf16.msra.mxu0 %v1745_v3  ;;  %v4811_v7 = vld [vmem:[%s6418_s0 + $0x40] sm:$0xff]   ;;  %v4813_v11 = vld [vmem:[%s6418_s0 + $0x48] sm:$0xff]   ;;  %v4814_v12 = vld [vmem:[%s6418_s0 + $0x18] sm:$0xff]  }
   0x4   :  { %4126 = vmatprep.mubr.msk.bf16.mxu1 %vm416_vm1, %v4808_v4  ;;  %4240 = vmatprep.mubr.msk.bf16.mxu0 %vm416_vm1, %v4809_v5  ;;  %v3840_v8 = vld [vmem:[%s6417_s1 + $0x2] sm:$0x1]  ;;  %v4815_v13 = vld [vmem:[%s6418_s0 + $0x50] sm:$0xff]   ;;  %v4817_v15 = vld [vmem:[%s6418_s0 + $0x58] sm:$0xff]  }
   0x5   :  { %4806 = vmatprep.subr.msk.bf16.mxu1 %vm585_vm0, %v3727_v1  ;;  %4807 = vmatprep.subr.msk.bf16.mxu0 %vm585_vm0, %v3840_v8  ;;  %v2903_v9 = vsel %vm585_vm0, %v3840_v8, 0  ;;  %v4816_v14 = vld [vmem:[%s6418_s0 + $0x20] sm:$0xff]   ;;  %v4818_v16 = vld [vmem:[%s6418_s0 + $0x28] sm:$0xff]   ;;  %v4820_v18 = vld [vmem:[%s6418_s0 + $0x30] sm:$0xff]  }
   0x6   :  { %4127 = vmatmul.mubr.msk.bf16.vlgmr.msra.gmra.mrb[0].mxu1 %vm416_vm1, %v4810_v6  ;;  %4241 = vmatmul.mubr.msk.bf16.vlgmr.msra.gmra.mrb[0].mxu0 %vm416_vm1, %v4811_v7  ;;  %v4819_v17 = vld [vmem:[%s6418_s0 + $0x60] sm:$0xff]   ;;  %v4821_v19 = vld [vmem:[%s6418_s0 + $0x68] sm:$0xff]   ;;  %v4822_v20 = vld [vmem:[%s6418_s0 + $0x38] sm:$0xff]  }
   0x7   :  { %4467 = vmatpush3.bf16.msra.mxu1 %v1745_v3  ;;  %4353 = vmatpush3.bf16.msra.mxu0 %v2903_v9  ;;  %v4823_v21 = vld [vmem:[%s6418_s0 + $0x70] sm:$0xff]   ;;  %v4824_v22 = vld [vmem:[%s6418_s0 + $0x40] sm:$0xff]   ;;  %v4825_v23 = vld [vmem:[%s6418_s0 + $0x78] sm:$0xff]  }
   0x8   :  { %4130 = vmatprep.mubr.msk.bf16.mxu1 %vm416_vm1, %v4812_v10  ;;  %4244 = vmatprep.mubr.msk.bf16.mxu0 %vm416_vm1, %v4813_v11  ;;  %v4826_v24 = vld [vmem:[%s6418_s0 + $0x48] sm:$0xff]   ;;  %v4827_v25 = vld [vmem:[%s6418_s0 + $0x80] sm:$0xff]   ;;  %v4828_v26 = vld [vmem:[%s6418_s0 + $0x50] sm:$0xff]  }
   0x9   :  { %v4829_v27 = vld [vmem:[%s6418_s0 + $0x88] sm:$0xff]   ;;  %v4830_v28 = vld [vmem:[%s6418_s0 + $0x58] sm:$0xff]   ;;  %v4831_v29 = vld [vmem:[%s6418_s0 + $0x90] sm:$0xff]  }
   0xa   :  { %v4832_v30 = vld [vmem:[%s6418_s0 + $0x60] sm:$0xff]   ;;  %v4833_v31 = vld [vmem:[%s6418_s0 + $0x98] sm:$0xff]   ;;  %v4834_v32 = vld [vmem:[%s6418_s0 + $0x68] sm:$0xff]  }
   0xb   :  { %v4835_v33 = vld [vmem:[%s6418_s0 + $0xa0] sm:$0xff]   ;;  %v4836_v34 = vld [vmem:[%s6418_s0 + $0x70] sm:$0xff]   ;;  %v4837_v35 = vld [vmem:[%s6418_s0 + $0xa8] sm:$0xff]  }
   0xc   :  { %v4838_v36 = vld [vmem:[%s6418_s0 + $0x78] sm:$0xff]   ;;  %v4839_v37 = vld [vmem:[%s6418_s0 + $0xb0] sm:$0xff]   ;;  %v4840_v38 = vld [vmem:[%s6418_s0 + $0x80] sm:$0xff]  }
   0xd   :  { %v4841_v39 = vld [vmem:[%s6418_s0 + $0xb8] sm:$0xff]   ;;  %v4842_v40 = vld [vmem:[%s6418_s0 + $0x88] sm:$0xff]   ;;  %v4843_v41 = vld [vmem:[%s6418_s0 + $0xc0] sm:$0xff]  }
   0xe   :  { %4131 = vmatmul.mubr.msk.bf16.gmra.mrb[4].mxu1 %vm416_vm1, %v4814_v12  ;;  %4245 = vmatmul.mubr.msk.bf16.gmra.mrb[4].mxu0 %vm416_vm1, %v4815_v13  ;;  %v4844_v42 = vld [vmem:[%s6418_s0 + $0x90] sm:$0xff]   ;;  %v4845_v43 = vld [vmem:[%s6418_s0 + $0xc8] sm:$0xff]   ;;  %v4846_v44 = vld [vmem:[%s6418_s0 + $0x98] sm:$0xff]  }
   0xf   :  { %4134 = vmatprep.mubr.msk.bf16.mxu1 %vm416_vm1, %v4816_v14  ;;  %4248 = vmatprep.mubr.msk.bf16.mxu0 %vm416_vm1, %v4817_v15  ;;  %v4847_v45 = vld [vmem:[%s6418_s0 + $0xd0] sm:$0xff]   ;;  %v4848_v46 = vld [vmem:[%s6418_s0 + $0xa0] sm:$0xff]   ;;  %v4849_v47 = vld [vmem:[%s6418_s0 + $0xd8] sm:$0xff]  }
  0x10   :  { %v4850_v48 = vld [vmem:[%s6418_s0 + $0xa8] sm:$0xff]   ;;  %v4851_v49 = vld [vmem:[%s6418_s0 + $0xe0] sm:$0xff]   ;;  %v4852_v50 = vld [vmem:[%s6418_s0 + $0xb0] sm:$0xff]  }
  0x11   :  { %v4853_v51 = vld [vmem:[%s6418_s0 + $0xe8] sm:$0xff]   ;;  %v4854_v52 = vld [vmem:[%s6418_s0 + $0xb8] sm:$0xff]   ;;  %v4855_v53 = vld [vmem:[%s6418_s0 + $0xf0] sm:$0xff]  }
  0x12   :  { %v4856_v54 = vld [vmem:[%s6418_s0 + $0xc0] sm:$0xff]   ;;  %v4857_v55 = vld [vmem:[%s6418_s0 + $0xf8] sm:$0xff]   ;;  %v4858_v56 = vld [vmem:[%s6418_s0 + $0xc8] sm:$0xff]  }
  0x13   :  { %v4859_v57 = vld [vmem:[%s6418_s0 + $0x100] sm:$0xff]   ;;  %v4860_v58 = vld [vmem:[%s6418_s0 + $0xd0] sm:$0xff]   ;;  %v4861_v59 = vld [vmem:[%s6418_s0 + $0x108] sm:$0xff]  }
  0x14   :  { %v4862_v60 = vld [vmem:[%s6418_s0 + $0xd8] sm:$0xff]   ;;  %v4863_v61 = vld [vmem:[%s6418_s0 + $0x110] sm:$0xff]   ;;  %v4864_v62 = vld [vmem:[%s6418_s0 + $0xe0] sm:$0xff]  }
  0x15   :  { %v4865_v63 = vld [vmem:[%s6418_s0 + $0x70] sm:$0xff]   ;;  %v4866_v0 = vld [vmem:[%s6418_s0 + $0xe8] sm:$0xff]   ;;  %v4867_v1 = vld [vmem:[%s6418_s0 + $0x78] sm:$0xff]  }
  0x16   :  { %4135 = vmatmul.mubr.msk.bf16.gmra.mrb[8].mxu1 %vm416_vm1, %v4818_v16  ;;  %4249 = vmatmul.mubr.msk.bf16.gmra.mrb[8].mxu0 %vm416_vm1, %v4819_v17  ;;  %v4868_v2 = vld [vmem:[%s6418_s0 + $0xf0] sm:$0xff]   ;;  %v4869_v3 = vld [vmem:[%s6418_s0 + $0x80] sm:$0xff]   ;;  %v4870_v4 = vld [vmem:[%s6418_s0 + $0xf8] sm:$0xff]  }
  0x17   :  { %4138 = vmatprep.mubr.msk.bf16.mxu1 %vm416_vm1, %v4820_v18  ;;  %4252 = vmatprep.mubr.msk.bf16.mxu0 %vm416_vm1, %v4821_v19  ;;  %v4871_v5 = vld [vmem:[%s6418_s0 + $0x88] sm:$0xff]   ;;  %v4872_v6 = vld [vmem:[%s6418_s0 + $0x100] sm:$0xff]   ;;  %v4873_v7 = vld [vmem:[%s6418_s0 + $0x90] sm:$0xff]  }
  0x18   :  { %v4874_v8 = vld [vmem:[%s6418_s0 + $0x108] sm:$0xff]   ;;  %v4875_v9 = vld [vmem:[%s6418_s0 + $0x98] sm:$0xff]   ;;  %v4876_v10 = vld [vmem:[%s6418_s0 + $0x110] sm:$0xff]  }
  0x19   :  { %v4877_v11 = vld [vmem:[%s6418_s0 + $0xa0] sm:$0xff]   ;;  %v4878_v12 = vld [vmem:[%s6418_s0 + $0x118] sm:$0xff]   ;;  %v4879_v13 = vld [vmem:[%s6418_s0 + $0xa8] sm:$0xff]  }
  0x1a   :  { %v4880_v14 = vld [vmem:[%s6418_s0 + $0x120] sm:$0xff]   ;;  %v4881_v15 = vld [vmem:[%s6418_s0 + $0xb0] sm:$0xff]   ;;  %v4882_v16 = vld [vmem:[%s6418_s0 + $0x128] sm:$0xff]  }
  0x1b   :  { %v4883_v17 = vld [vmem:[%s6418_s0 + $0xb8] sm:$0xff]   ;;  %v4884_v18 = vld [vmem:[%s6418_s0 + $0x130] sm:$0xff]   ;;  %v4885_v19 = vld [vmem:[%s6418_s0 + $0xc0] sm:$0xff]  }
  0x1e   :  { %4139 = vmatmul.mubr.msk.bf16.gmra.mrb[12].mxu1 %vm416_vm1, %v4822_v20  ;;  %4253 = vmatmul.mubr.msk.bf16.gmra.mrb[12].mxu0 %vm416_vm1, %v4823_v21  ;;  %v4886_v20 = vld [vmem:[%s6418_s0 + $0x138] sm:$0xff]   ;;  %v4887_v21 = vld [vmem:[%s6418_s0 + $0xc8] sm:$0xff]  }
  0x1f   :  { %4142 = vmatprep.mubr.msk.bf16.mxu1 %vm416_vm1, %v4824_v22  ;;  %4256 = vmatprep.mubr.msk.bf16.mxu0 %vm416_vm1, %v4825_v23  ;;  %v4888_v22 = vld [vmem:[%s6418_s0 + $0x140] sm:$0xff]   ;;  %v4889_v23 = vld [vmem:[%s6418_s0 + $0xd0] sm:$0xff]  }
  0x26   :  { %4143 = vmatmul.mubr.msk.bf16.gmra.mrb[16].mxu1 %vm416_vm1, %v4826_v24  ;;  %4257 = vmatmul.mubr.msk.bf16.gmra.mrb[16].mxu0 %vm416_vm1, %v4827_v25  ;;  %v4890_v24 = vld [vmem:[%s6418_s0 + $0x148] sm:$0xff]   ;;  %v4891_v25 = vld [vmem:[%s6418_s0 + $0xd8] sm:$0xff]  }
  0x27   :  { %4146 = vmatprep.mubr.msk.bf16.mxu1 %vm416_vm1, %v4828_v26  ;;  %4260 = vmatprep.mubr.msk.bf16.mxu0 %vm416_vm1, %v4829_v27  ;;  %v4892_v26 = vld [vmem:[%s6418_s0 + $0x150] sm:$0xff]   ;;  %v4893_v27 = vld [vmem:[%s6418_s0 + $0xe0] sm:$0xff]  }
  0x2e   :  { %4147 = vmatmul.mubr.msk.bf16.gmra.mrb[20].mxu1 %vm416_vm1, %v4830_v28  ;;  %4261 = vmatmul.mubr.msk.bf16.gmra.mrb[20].mxu0 %vm416_vm1, %v4831_v29  ;;  %v4894_v28 = vld [vmem:[%s6418_s0 + $0x158] sm:$0xff]   ;;  %v4895_v29 = vld [vmem:[%s6418_s0 + $0xe8] sm:$0xff]  }
  0x2f   :  { %4150 = vmatprep.mubr.msk.bf16.mxu1 %vm416_vm1, %v4832_v30  ;;  %4264 = vmatprep.mubr.msk.bf16.mxu0 %vm416_vm1, %v4833_v31  ;;  %v4896_v30 = vld [vmem:[%s6418_s0 + $0x160] sm:$0xff]   ;;  %v4897_v31 = vld [vmem:[%s6418_s0 + $0xf0] sm:$0xff]  }
  0x36   :  { %4151 = vmatmul.mubr.msk.bf16.gmra.mrb[24].mxu1 %vm416_vm1, %v4834_v32  ;;  %4265 = vmatmul.mubr.msk.bf16.gmra.mrb[24].mxu0 %vm416_vm1, %v4835_v33  ;;  %v4898_v32 = vld [vmem:[%s6418_s0 + $0x168] sm:$0xff]   ;;  %v4899_v33 = vld [vmem:[%s6418_s0 + $0xf8] sm:$0xff]  }
  0x37   :  { %4154 = vmatprep.mubr.msk.bf16.mxu1 %vm416_vm1, %v4836_v34  ;;  %4268 = vmatprep.mubr.msk.bf16.mxu0 %vm416_vm1, %v4837_v35  ;;  %v4900_v34 = vld [vmem:[%s6418_s0 + $0x170] sm:$0xff]   ;;  %v4901_v35 = vld [vmem:[%s6418_s0 + $0x100] sm:$0xff]  }
  0x3e   :  { %4155 = vmatmul.mubr.msk.bf16.gmra.mrb[28].mxu1 %vm416_vm1, %v4838_v36  ;;  %4269 = vmatmul.mubr.msk.bf16.gmra.mrb[28].mxu0 %vm416_vm1, %v4839_v37  ;;  %v4902_v36 = vld [vmem:[%s6418_s0 + $0x178] sm:$0xff]   ;;  %v4903_v37 = vld [vmem:[%s6418_s0 + $0x108] sm:$0xff]  }
  0x3f   :  { %4158 = vmatprep.mubr.msk.bf16.mxu1 %vm416_vm1, %v4840_v38  ;;  %4272 = vmatprep.mubr.msk.bf16.mxu0 %vm416_vm1, %v4841_v39  ;;  %v4904_v38 = vld [vmem:[%s6418_s0 + $0x180] sm:$0xff]   ;;  %v4905_v39 = vld [vmem:[%s6418_s0 + $0x110] sm:$0xff]  }
  0x46   :  { %4159 = vmatmul.mubr.msk.bf16.gmra.mrb[32].mxu1 %vm416_vm1, %v4842_v40  ;;  %4273 = vmatmul.mubr.msk.bf16.gmra.mrb[32].mxu0 %vm416_vm1, %v4843_v41  ;;  %v4906_v40 = vld [vmem:[%s6418_s0 + $0x188] sm:$0xff]   ;;  %v4907_v41 = vld [vmem:[%s6418_s0 + $0x118] sm:$0xff]  }
  0x47   :  { %4162 = vmatprep.mubr.msk.bf16.mxu1 %vm416_vm1, %v4844_v42  ;;  %4276 = vmatprep.mubr.msk.bf16.mxu0 %vm416_vm1, %v4845_v43  ;;  %v4908_v42 = vld [vmem:[%s6418_s0 + $0x190] sm:$0xff]   ;;  %v4909_v43 = vld [vmem:[%s6418_s0 + $0x120] sm:$0xff]  }
  0x4e   :  { %4163 = vmatmul.mubr.msk.bf16.gmra.mrb[36].mxu1 %vm416_vm1, %v4846_v44  ;;  %4277 = vmatmul.mubr.msk.bf16.gmra.mrb[36].mxu0 %vm416_vm1, %v4847_v45  ;;  %v4910_v44 = vld [vmem:[%s6418_s0 + $0x198] sm:$0xff]   ;;  %v4911_v45 = vld [vmem:[%s6418_s0 + $0x128] sm:$0xff]  }
  0x4f   :  { %4166 = vmatprep.mubr.msk.bf16.mxu1 %vm416_vm1, %v4848_v46  ;;  %4280 = vmatprep.mubr.msk.bf16.mxu0 %vm416_vm1, %v4849_v47  ;;  %v4912_v46 = vld [vmem:[%s6418_s0 + $0x1a0] sm:$0xff]   ;;  %v4913_v47 = vld [vmem:[%s6418_s0 + $0x130] sm:$0xff]  }
  0x56   :  { %4167 = vmatmul.mubr.msk.bf16.gmra.mrb[40].mxu1 %vm416_vm1, %v4850_v48  ;;  %4281 = vmatmul.mubr.msk.bf16.gmra.mrb[40].mxu0 %vm416_vm1, %v4851_v49  ;;  %v4914_v48 = vld [vmem:[%s6418_s0 + $0x1a8] sm:$0xff]   ;;  %v4915_v49 = vld [vmem:[%s6418_s0 + $0x138] sm:$0xff]  }
  0x57   :  { %4170 = vmatprep.mubr.msk.bf16.mxu1 %vm416_vm1, %v4852_v50  ;;  %4284 = vmatprep.mubr.msk.bf16.mxu0 %vm416_vm1, %v4853_v51  ;;  %v4916_v50 = vld [vmem:[%s6418_s0 + $0x1b0] sm:$0xff]   ;;  %v4917_v51 = vld [vmem:[%s6418_s0 + $0x140] sm:$0xff]  }
  0x5e   :  { %4171 = vmatmul.mubr.msk.bf16.gmra.mrb[44].mxu1 %vm416_vm1, %v4854_v52  ;;  %4285 = vmatmul.mubr.msk.bf16.gmra.mrb[44].mxu0 %vm416_vm1, %v4855_v53 }
  0x5f   :  { %4174 = vmatprep.mubr.msk.bf16.mxu1 %vm416_vm1, %v4856_v54  ;;  %4288 = vmatprep.mubr.msk.bf16.mxu0 %vm416_vm1, %v4857_v55  ;;  %v4918_v54 = vld [vmem:[%s6418_s0 + $0x1b8] sm:$0xff]  }
  0x66   :  { %4175 = vmatmul.mubr.msk.bf16.gmra.mrb[48].mxu1 %vm416_vm1, %v4858_v56  ;;  %4289 = vmatmul.mubr.msk.bf16.gmra.mrb[48].mxu0 %vm416_vm1, %v4859_v57  ;;  %v4919_v56 = vld [vmem:[%s6418_s0 + $0x148] sm:$0xff]   ;;  %v4920_v57 = vld [vmem:[%s6418_s0 + $0x118] sm:$0xff]  }
  0x67   :  { %4178 = vmatprep.mubr.msk.bf16.mxu1 %vm416_vm1, %v4860_v58  ;;  %4292 = vmatprep.mubr.msk.bf16.mxu0 %vm416_vm1, %v4861_v59  ;;  %v4921_v59 = vld [vmem:[%s6418_s0 + $0x150] sm:$0xff]  }
  0x6e   :  { %4179 = vmatmul.mubr.msk.bf16.gmra.mrb[52].mxu1 %vm416_vm1, %v4862_v60  ;;  %4293 = vmatmul.mubr.msk.bf16.gmra.mrb[52].mxu0 %vm416_vm1, %v4863_v61 }
  0x6f   :  { %4182 = vmatprep.mubr.msk.bf16.mxu1 %vm416_vm1, %v4864_v62  ;;  %4354 = vmatprep.mubr.msk.bf16.mxu0 %vm416_vm1, %v4865_v63  ;;  %v4922_v62 = vld [vmem:[%s6418_s0 + $0x120] sm:$0xff]  }
  0x76   :  { %4183 = vmatmul.mubr.msk.bf16.gmra.mrb[56].mxu1 %vm416_vm1, %v4866_v0  ;;  %4355 = vmatmul.mubr.msk.bf16.vlgmr.msra.gmra.mrb[0].mxu0 %vm416_vm1, %v4867_v1  ;;  %v4923_v0 = vld [vmem:[%s6418_s0 + $0x158] sm:$0xff]   ;;  %v4924_v1 = vld [vmem:[%s6418_s0 + $0x128] sm:$0xff]  }
  0x77   :  { %4186 = vmatprep.mubr.msk.bf16.mxu1 %vm416_vm1, %v4868_v2  ;;  %4358 = vmatprep.mubr.msk.bf16.mxu0 %vm416_vm1, %v4869_v3  ;;  %v4925_v3 = vld [vmem:[%s6418_s0 + $0x160] sm:$0xff]  }
  0x7e   :  { %4187 = vmatmul.mubr.msk.bf16.gmra.mrb[60].mxu1 %vm416_vm1, %v4870_v4  ;;  %4359 = vmatmul.mubr.msk.bf16.gmra.mrb[4].mxu0 %vm416_vm1, %v4871_v5 }
  0x7f   :  { %4190 = vmatprep.mubr.msk.bf16.mxu1 %vm416_vm1, %v4872_v6  ;;  %4362 = vmatprep.mubr.msk.bf16.mxu0 %vm416_vm1, %v4873_v7  ;;  %v4926_v6 = vld [vmem:[%s6418_s0 + $0x130] sm:$0xff]  }
  0x86   :  { %4191 = vmatmul.mubr.msk.bf16.gmra.mrb[64].mxu1 %vm416_vm1, %v4874_v8  ;;  %4363 = vmatmul.mubr.msk.bf16.gmra.mrb[8].mxu0 %vm416_vm1, %v4875_v9  ;;  %v4927_v8 = vld [vmem:[%s6418_s0 + $0x168] sm:$0xff]   ;;  %v4928_v9 = vld [vmem:[%s6418_s0 + $0x138] sm:$0xff]  }
  0x87   :  { %4194 = vmatprep.mubr.msk.bf16.mxu1 %vm416_vm1, %v4876_v10  ;;  %4366 = vmatprep.mubr.msk.bf16.mxu0 %vm416_vm1, %v4877_v11  ;;  %v4929_v11 = vld [vmem:[%s6418_s0 + $0x170] sm:$0xff]  }
  0x8e   :  { %4195 = vmatmul.mubr.msk.bf16.gmra.mrb[68].mxu1 %vm416_vm1, %v4878_v12  ;;  %4367 = vmatmul.mubr.msk.bf16.gmra.mrb[12].mxu0 %vm416_vm1, %v4879_v13 }
  0x8f   :  { %4198 = vmatprep.mubr.msk.bf16.mxu1 %vm416_vm1, %v4880_v14  ;;  %4370 = vmatprep.mubr.msk.bf16.mxu0 %vm416_vm1, %v4881_v15  ;;  %v4930_v14 = vld [vmem:[%s6418_s0 + $0x140] sm:$0xff]  }
  0x96   :  { %4199 = vmatmul.mubr.msk.bf16.gmra.mrb[72].mxu1 %vm416_vm1, %v4882_v16  ;;  %4371 = vmatmul.mubr.msk.bf16.gmra.mrb[16].mxu0 %vm416_vm1, %v4883_v17  ;;  %v4931_v16 = vld [vmem:[%s6418_s0 + $0x178] sm:$0xff]   ;;  %v4932_v17 = vld [vmem:[%s6418_s0 + $0x148] sm:$0xff]  }
  0x97   :  { %4202 = vmatprep.mubr.msk.bf16.mxu1 %vm416_vm1, %v4884_v18  ;;  %4374 = vmatprep.mubr.msk.bf16.mxu0 %vm416_vm1, %v4885_v19  ;;  %v4933_v19 = vld [vmem:[%s6418_s0 + $0x180] sm:$0xff]  }
  0x9e   :  { %4203 = vmatmul.mubr.msk.bf16.gmra.mrb[76].mxu1 %vm416_vm1, %v4886_v20  ;;  %4375 = vmatmul.mubr.msk.bf16.gmra.mrb[20].mxu0 %vm416_vm1, %v4887_v21 }
  0x9f   :  { %4206 = vmatprep.mubr.msk.bf16.mxu1 %vm416_vm1, %v4888_v22  ;;  %4378 = vmatprep.mubr.msk.bf16.mxu0 %vm416_vm1, %v4889_v23  ;;  %v4934_v22 = vld [vmem:[%s6418_s0 + $0x150] sm:$0xff]  }
  0xa6   :  { %4207 = vmatmul.mubr.msk.bf16.gmra.mrb[80].mxu1 %vm416_vm1, %v4890_v24  ;;  %4379 = vmatmul.mubr.msk.bf16.gmra.mrb[24].mxu0 %vm416_vm1, %v4891_v25  ;;  %v4935_v24 = vld [vmem:[%s6418_s0 + $0x188] sm:$0xff]   ;;  %v4936_v25 = vld [vmem:[%s6418_s0 + $0x158] sm:$0xff]  }
  0xa7   :  { %4210 = vmatprep.mubr.msk.bf16.mxu1 %vm416_vm1, %v4892_v26  ;;  %4382 = vmatprep.mubr.msk.bf16.mxu0 %vm416_vm1, %v4893_v27  ;;  %v4937_v27 = vld [vmem:[%s6418_s0 + $0x190] sm:$0xff]  }
  0xae   :  { %4211 = vmatmul.mubr.msk.bf16.gmra.mrb[84].mxu1 %vm416_vm1, %v4894_v28  ;;  %4383 = vmatmul.mubr.msk.bf16.gmra.mrb[28].mxu0 %vm416_vm1, %v4895_v29 }
  0xaf   :  { %4214 = vmatprep.mubr.msk.bf16.mxu1 %vm416_vm1, %v4896_v30  ;;  %4386 = vmatprep.mubr.msk.bf16.mxu0 %vm416_vm1, %v4897_v31  ;;  %v4938_v30 = vld [vmem:[%s6418_s0 + $0x160] sm:$0xff]  }
  0xb6   :  { %4215 = vmatmul.mubr.msk.bf16.gmra.mrb[88].mxu1 %vm416_vm1, %v4898_v32  ;;  %4387 = vmatmul.mubr.msk.bf16.gmra.mrb[32].mxu0 %vm416_vm1, %v4899_v33  ;;  %v4939_v32 = vld [vmem:[%s6418_s0 + $0x198] sm:$0xff]   ;;  %v4940_v33 = vld [vmem:[%s6418_s0 + $0x168] sm:$0xff]  }
  0xb7   :  { %4218 = vmatprep.mubr.msk.bf16.mxu1 %vm416_vm1, %v4900_v34  ;;  %4390 = vmatprep.mubr.msk.bf16.mxu0 %vm416_vm1, %v4901_v35  ;;  %v4941_v35 = vld [vmem:[%s6418_s0 + $0x1a0] sm:$0xff]  }
  0xbe   :  { %4219 = vmatmul.mubr.msk.bf16.gmra.mrb[92].mxu1 %vm416_vm1, %v4902_v36  ;;  %4391 = vmatmul.mubr.msk.bf16.gmra.mrb[36].mxu0 %vm416_vm1, %v4903_v37 }
  0xbf   :  { %4222 = vmatprep.mubr.msk.bf16.mxu1 %vm416_vm1, %v4904_v38  ;;  %4394 = vmatprep.mubr.msk.bf16.mxu0 %vm416_vm1, %v4905_v39  ;;  %v4942_v38 = vld [vmem:[%s6418_s0 + $0x170] sm:$0xff]  }
  0xc6   :  { %4223 = vmatmul.mubr.msk.bf16.gmra.mrb[96].mxu1 %vm416_vm1, %v4906_v40  ;;  %4395 = vmatmul.mubr.msk.bf16.gmra.mrb[40].mxu0 %vm416_vm1, %v4907_v41  ;;  %v4943_v40 = vld [vmem:[%s6418_s0 + $0x1a8] sm:$0xff]   ;;  %v4944_v41 = vld [vmem:[%s6418_s0 + $0x178] sm:$0xff]  }
  0xc7   :  { %4226 = vmatprep.mubr.msk.bf16.mxu1 %vm416_vm1, %v4908_v42  ;;  %4398 = vmatprep.mubr.msk.bf16.mxu0 %vm416_vm1, %v4909_v43  ;;  %v4945_v43 = vld [vmem:[%s6418_s0 + $0x1b0] sm:$0xff]  }
  0xce   :  { %4227 = vmatmul.mubr.msk.bf16.gmra.mrb[100].mxu1 %vm416_vm1, %v4910_v44  ;;  %4399 = vmatmul.mubr.msk.bf16.gmra.mrb[44].mxu0 %vm416_vm1, %v4911_v45 }
  0xcf   :  { %4230 = vmatprep.mubr.msk.bf16.mxu1 %vm416_vm1, %v4912_v46  ;;  %4402 = vmatprep.mubr.msk.bf16.mxu0 %vm416_vm1, %v4913_v47  ;;  %v4946_v46 = vld [vmem:[%s6418_s0 + $0x180] sm:$0xff]  }
  0xd6   :  { %4231 = vmatmul.mubr.msk.bf16.gmra.mrb[104].mxu1 %vm416_vm1, %v4914_v48  ;;  %4403 = vmatmul.mubr.msk.bf16.gmra.mrb[48].mxu0 %vm416_vm1, %v4915_v49  ;;  %v4947_v48 = vld [vmem:[%s6418_s0 + $0x1b8] sm:$0xff]   ;;  %v4948_v49 = vld [vmem:[%s6418_s0 + $0x188] sm:$0xff]  }
  0xd7   :  { %4234 = vmatprep.mubr.msk.bf16.mxu1 %vm416_vm1, %v4916_v50  ;;  %4406 = vmatprep.mubr.msk.bf16.mxu0 %vm416_vm1, %v4917_v51  ;;  %v4949_v51 = vld [vmem:[%s6418_s0 + $0x1c0] sm:$0xff]  }
  0xd9   :  { %v5452_v52 = vpop.f32.mrb[0].mxu1 }
  0xda   :  { %v5454_v53 = vpop.f32.mrb[1].mxu1 }
  0xdb   :  { %v5459_v55 = vpop.f32.mrb[2].mxu1 }
  0xdc   :  { %v5467_v58 = vpop.f32.mrb[3].mxu1 }
  0xde   :  { %4235 = vmatmul.mubr.msk.bf16.gmra.mrb[108].mxu1 %vm416_vm1, %v4918_v54  ;;  %4407 = vmatmul.mubr.msk.bf16.gmra.mrb[52].mxu0 %vm416_vm1, %v4919_v56 }
  0xdf   :  { %4296 = vmatprep.mubr.msk.bf16.mxu1 %vm416_vm1, %v4920_v57  ;;  %4410 = vmatprep.mubr.msk.bf16.mxu0 %vm416_vm1, %v4921_v59  ;;  %v4950_v57 = vld [vmem:[%s6418_s0 + $0x190] sm:$0xff]  }
  0xe1   :  { %v5476_v60 = vpop.f32.mrb[4].mxu1 }
  0xe2   :  { %v5478_v61 = vpop.f32.mrb[5].mxu1 }
  0xe3   :  { %v5483_v63 = vpop.f32.mrb[6].mxu1 }
  0xe4   :  { %v5491_v2 = vpop.f32.mrb[7].mxu1 }
  0xe6   :  { %4297 = vmatmul.mubr.msk.bf16.vlgmr.msra.gmra.mrb[56].mxu1 %vm416_vm1, %v4922_v62  ;;  %4411 = vmatmul.mubr.msk.bf16.gmra.mrb[56].mxu0 %vm416_vm1, %v4923_v0  ;;  %v4951_v62 = vld [vmem:[%s6418_s0 + $0x1c8] sm:$0xff]   ;;  %v4952_v0 = vld [vmem:[%s6418_s0 + $0x198] sm:$0xff]  }
  0xe7   :  { %4300 = vmatprep.mubr.msk.bf16.mxu1 %vm416_vm1, %v4924_v1  ;;  %4414 = vmatprep.mubr.msk.bf16.mxu0 %vm416_vm1, %v4925_v3  ;;  %v4953_v3 = vld [vmem:[%s6418_s0 + $0x1d0] sm:$0xff]  }
  0xe9   :  { %v5500_v4 = vpop.f32.mrb[8].mxu1 }
  0xea   :  { %v5502_v5 = vpop.f32.mrb[9].mxu1 }
  0xeb   :  { %v5507_v7 = vpop.f32.mrb[10].mxu1 }
  0xec   :  { %v5515_v10 = vpop.f32.mrb[11].mxu1 }
  0xee   :  { %4301 = vmatmul.mubr.msk.bf16.gmra.mrb[60].mxu1 %vm416_vm1, %v4926_v6  ;;  %4415 = vmatmul.mubr.msk.bf16.gmra.mrb[60].mxu0 %vm416_vm1, %v4927_v8 }
  0xef   :  { %4304 = vmatprep.mubr.msk.bf16.mxu1 %vm416_vm1, %v4928_v9  ;;  %4418 = vmatprep.mubr.msk.bf16.mxu0 %vm416_vm1, %v4929_v11  ;;  %v4954_v9 = vld [vmem:[%s6418_s0 + $0x1a0] sm:$0xff]  }
  0xf1   :  { %v5524_v12 = vpop.f32.mrb[12].mxu1 }
  0xf2   :  { %v5526_v13 = vpop.f32.mrb[13].mxu1 }
  0xf3   :  { %v5531_v15 = vpop.f32.mrb[14].mxu1 }
  0xf4   :  { %v5539_v18 = vpop.f32.mrb[15].mxu1 }
  0xf6   :  { %4305 = vmatmul.mubr.msk.bf16.gmra.mrb[64].mxu1 %vm416_vm1, %v4930_v14  ;;  %4419 = vmatmul.mubr.msk.bf16.gmra.mrb[64].mxu0 %vm416_vm1, %v4931_v16  ;;  %v4955_v14 = vld [vmem:[%s6418_s0 + $0x1d8] sm:$0xff]   ;;  %v4956_v16 = vld [vmem:[%s6418_s0 + $0x1a8] sm:$0xff]  }
  0xf7   :  { %4308 = vmatprep.mubr.msk.bf16.mxu1 %vm416_vm1, %v4932_v17  ;;  %4422 = vmatprep.mubr.msk.bf16.mxu0 %vm416_vm1, %v4933_v19  ;;  %v4957_v19 = vld [vmem:[%s6418_s0 + $0x1e0] sm:$0xff]  }
  0xf9   :  { %v5548_v20 = vpop.f32.mrb[16].mxu1 }
  0xfa   :  { %v5550_v21 = vpop.f32.mrb[17].mxu1 }
  0xfb   :  { %v5555_v23 = vpop.f32.mrb[18].mxu1 }
  0xfc   :  { %v5563_v26 = vpop.f32.mrb[19].mxu1 }
  0xfe   :  { %4309 = vmatmul.mubr.msk.bf16.gmra.mrb[68].mxu1 %vm416_vm1, %v4934_v22  ;;  %4423 = vmatmul.mubr.msk.bf16.gmra.mrb[68].mxu0 %vm416_vm1, %v4935_v24 }
  0xff   :  { %4312 = vmatprep.mubr.msk.bf16.mxu1 %vm416_vm1, %v4936_v25  ;;  %4426 = vmatprep.mubr.msk.bf16.mxu0 %vm416_vm1, %v4937_v27  ;;  %v4958_v25 = vld [vmem:[%s6418_s0 + $0x1b0] sm:$0xff]  }
 0x101   :  { %v5572_v28 = vpop.f32.mrb[20].mxu1 }
 0x102   :  { %v5574_v29 = vpop.f32.mrb[21].mxu1 }
 0x103   :  { %v5579_v31 = vpop.f32.mrb[22].mxu1 }
 0x104   :  { %v5587_v34 = vpop.f32.mrb[23].mxu1 }
 0x106   :  { %4313 = vmatmul.mubr.msk.bf16.gmra.mrb[72].mxu1 %vm416_vm1, %v4938_v30  ;;  %4427 = vmatmul.mubr.msk.bf16.gmra.mrb[72].mxu0 %vm416_vm1, %v4939_v32  ;;  %v4959_v30 = vld [vmem:[%s6418_s0 + $0x1e8] sm:$0xff]   ;;  %v4960_v32 = vld [vmem:[%s6418_s0 + $0x1b8] sm:$0xff]  }
 0x107   :  { %4316 = vmatprep.mubr.msk.bf16.mxu1 %vm416_vm1, %v4940_v33  ;;  %4430 = vmatprep.mubr.msk.bf16.mxu0 %vm416_vm1, %v4941_v35  ;;  %v4961_v35 = vld [vmem:[%s6418_s0 + $0x1f0] sm:$0xff]  }
 0x109   :  { %v5596_v36 = vpop.f32.mrb[24].mxu1 }
 0x10a   :  { %v5598_v37 = vpop.f32.mrb[25].mxu1 }
 0x10b   :  { %v5603_v39 = vpop.f32.mrb[26].mxu1 }
 0x10c   :  { %v5611_v42 = vpop.f32.mrb[27].mxu1 }
 0x10e   :  { %4317 = vmatmul.mubr.msk.bf16.gmra.mrb[76].mxu1 %vm416_vm1, %v4942_v38  ;;  %4431 = vmatmul.mubr.msk.bf16.gmra.mrb[76].mxu0 %vm416_vm1, %v4943_v40 }
 0x10f   :  { %4320 = vmatprep.mubr.msk.bf16.mxu1 %vm416_vm1, %v4944_v41  ;;  %4434 = vmatprep.mubr.msk.bf16.mxu0 %vm416_vm1, %v4945_v43  ;;  %v4962_v41 = vld [vmem:[%s6418_s0 + $0x1c0] sm:$0xff]  }
 0x111   :  { %v5620_v44 = vpop.f32.mrb[28].mxu1 }
 0x112   :  { %v5622_v45 = vpop.f32.mrb[29].mxu1 }
 0x113   :  { %v5627_v47 = vpop.f32.mrb[30].mxu1 }
 0x114   :  { %v5635_v50 = vpop.f32.mrb[31].mxu1 }
 0x116   :  { %4321 = vmatmul.mubr.msk.bf16.gmra.mrb[80].mxu1 %vm416_vm1, %v4946_v46  ;;  %4435 = vmatmul.mubr.msk.bf16.gmra.mrb[80].mxu0 %vm416_vm1, %v4947_v48  ;;  %v4963_v46 = vld [vmem:[%s6418_s0 + $0x1f8] sm:$0xff]   ;;  %v4964_v48 = vld [vmem:[%s6418_s0 + $0x1c8] sm:$0xff]  }
 0x117   :  { %4324 = vmatprep.mubr.msk.bf16.mxu1 %vm416_vm1, %v4948_v49  ;;  %4438 = vmatprep.mubr.msk.bf16.mxu0 %vm416_vm1, %v4949_v51  ;;  %v4965_v51 = vld [vmem:[%s6418_s0 + $0x200] sm:$0xff]  }
 0x119   :  { %v5644_v54 = vpop.f32.mrb[32].mxu1 }
 0x11a   :  { %v5646_v56 = vpop.f32.mrb[33].mxu1 }
 0x11b   :  { %v5651_v59 = vpop.f32.mrb[34].mxu1 }
 0x11c   :  { %v5659_v1 = vpop.f32.mrb[35].mxu1 }
 0x11e   :  { %4325 = vmatmul.mubr.msk.bf16.gmra.mrb[84].mxu1 %vm416_vm1, %v4950_v57  ;;  %4439 = vmatmul.mubr.msk.bf16.gmra.mrb[84].mxu0 %vm416_vm1, %v4951_v62 }
 0x11f   :  { %4328 = vmatprep.mubr.msk.bf16.mxu1 %vm416_vm1, %v4952_v0  ;;  %4442 = vmatprep.mubr.msk.bf16.mxu0 %vm416_vm1, %v4953_v3  ;;  %v4966_v0 = vld [vmem:[%s6418_s0 + $0x1d0] sm:$0xff]  }
 0x121   :  { %v5668_v6 = vpop.f32.mrb[36].mxu1 }
 0x122   :  { %v5670_v8 = vpop.f32.mrb[37].mxu1 }
 0x123   :  { %v5675_v11 = vpop.f32.mrb[38].mxu1 }
 0x124   :  { %v5683_v17 = vpop.f32.mrb[39].mxu1 }
 0x126   :  { %4329 = vmatmul.mubr.msk.bf16.gmra.mrb[88].mxu1 %vm416_vm1, %v4954_v9  ;;  %4443 = vmatmul.mubr.msk.bf16.gmra.mrb[88].mxu0 %vm416_vm1, %v4955_v14  ;;  %v4967_v9 = vld [vmem:[%s6418_s0 + $0x208] sm:$0xff]   ;;  %v4968_v14 = vld [vmem:[%s6418_s0 + $0x1d8] sm:$0xff]  }
 0x127   :  { %4332 = vmatprep.mubr.msk.bf16.mxu1 %vm416_vm1, %v4956_v16  ;;  %4446 = vmatprep.mubr.msk.bf16.mxu0 %vm416_vm1, %v4957_v19  ;;  %v4969_v19 = vld [vmem:[%s6418_s0 + $0x210] sm:$0xff]  }
 0x129   :  { %v5692_v22 = vpop.f32.mrb[40].mxu1 }
 0x12a   :  { %v5694_v24 = vpop.f32.mrb[41].mxu1 }
 0x12b   :  { %v5699_v27 = vpop.f32.mrb[42].mxu1 }
 0x12c   :  { %v5707_v33 = vpop.f32.mrb[43].mxu1 }
 0x12e   :  { %4333 = vmatmul.mubr.msk.bf16.gmra.mrb[92].mxu1 %vm416_vm1, %v4958_v25  ;;  %4447 = vmatmul.mubr.msk.bf16.gmra.mrb[92].mxu0 %vm416_vm1, %v4959_v30 }
 0x12f   :  { %4336 = vmatprep.mubr.msk.bf16.mxu1 %vm416_vm1, %v4960_v32  ;;  %4450 = vmatprep.mubr.msk.bf16.mxu0 %vm416_vm1, %v4961_v35  ;;  %v4970_v32 = vld [vmem:[%s6418_s0 + $0x1e0] sm:$0xff]  }
 0x131   :  { %v5716_v38 = vpop.f32.mrb[44].mxu1 }
 0x132   :  { %v5718_v40 = vpop.f32.mrb[45].mxu1 }
 0x133   :  { %v5723_v43 = vpop.f32.mrb[46].mxu1 }
 0x134   :  { %v5731_v49 = vpop.f32.mrb[47].mxu1 }
 0x136   :  { %4337 = vmatmul.mubr.msk.bf16.gmra.mrb[96].mxu1 %vm416_vm1, %v4962_v41  ;;  %4451 = vmatmul.mubr.msk.bf16.gmra.mrb[96].mxu0 %vm416_vm1, %v4963_v46  ;;  %v4971_v41 = vld [vmem:[%s6418_s0 + $0x218] sm:$0xff]   ;;  %v4972_v46 = vld [vmem:[%s6418_s0 + $0x1e8] sm:$0xff]  }
 0x137   :  { %4340 = vmatprep.mubr.msk.bf16.mxu1 %vm416_vm1, %v4964_v48  ;;  %4454 = vmatprep.mubr.msk.bf16.mxu0 %vm416_vm1, %v4965_v51  ;;  %v4973_v51 = vld [vmem:[%s6418_s0 + $0x220] sm:$0xff]  }
 0x139   :  { %v5740_v57 = vpop.f32.mrb[48].mxu1 }
 0x13a   :  { %v5742_v62 = vpop.f32.mrb[49].mxu1 }
 0x13b   :  { %v5747_v3 = vpop.f32.mrb[50].mxu1 }
 0x13c   :  { %v5755_v16 = vpop.f32.mrb[51].mxu1 }
 0x13e   :  { %4341 = vmatmul.mubr.msk.bf16.gmra.mrb[100].mxu1 %vm416_vm1, %v4966_v0  ;;  %4455 = vmatmul.mubr.msk.bf16.gmra.mrb[100].mxu0 %vm416_vm1, %v4967_v9  ;;  %v5787_v0 = vld [vmem:[%s6419_s2] ss:$0 sm:$0xff] }
 0x13f   :  { %4344 = vmatprep.mubr.msk.bf16.mxu1 %vm416_vm1, %v4968_v14  ;;  %4458 = vmatprep.mubr.msk.bf16.mxu0 %vm416_vm1, %v4969_v19  ;;  %v1072_v9 = vadd.f32 %v5452_v52, %v5787_v0  ;;  %v1070_v14 = vadd.f32 %v5787_v0, %v5454_v53  ;;  %v1071_v52 = vadd.f32 %v5787_v0, %v5467_v58 }
 0x140   :  { %v1076_v58 = vadd.f32 %v5476_v60, %v5787_v0 }
 0x141   :  { %v5764_v25 = vpop.f32.mrb[52].mxu1 }
 0x142   :  { %6421 = vst [vmem:[#allocation2_spill] sm:$0xff] %v5764_v25  ;;  %v5766_v30 = vpop.f32.mrb[53].mxu1 }
 0x143   :  { %6422 = vst [vmem:[#allocation3_spill] sm:$0xff] %v5766_v30  ;;  %v5771_v35 = vpop.f32.mrb[54].mxu1 }
 0x144   :  { %6423 = vst [vmem:[#allocation4_spill] sm:$0xff] %v5771_v35  ;;  %v5779_v48 = vpop.f32.mrb[55].mxu1 }
 0x145   :  { %6424 = vst [vmem:[#allocation5_spill] sm:$0xff] %v5779_v48  ;;  %v4974_v48 = vld [vmem:[%s6418_s0 + $0x1f0] sm:$0xff]  }
 0x146   :  { %4345 = vmatmul.mubr.msk.bf16.gmra.mrb[104].mxu1 %vm416_vm1, %v4970_v32  ;;  %4459 = vmatmul.mubr.msk.bf16.gmra.mrb[104].mxu0 %vm416_vm1, %v4971_v41  ;;  %v1073_v32 = vadd.f32 %v5459_v55, %v5787_v0 }
 0x147   :  { %4348 = vmatprep.mubr.msk.bf16.mxu1 %vm416_vm1, %v4972_v46  ;;  %4462 = vmatprep.mubr.msk.bf16.mxu0 %vm416_vm1, %v4973_v51  ;;  %v4975_v46 = vld [vmem:[%s6418_s0 + $0x228] sm:$0xff]  }
 0x149   :  { %v4356_v19 = vpop.f32.mrb[0].mxu0 }
 0x14a   :  { %v4469_v35 = vadd.f32 %v4356_v19, %v1072_v9  ;;  %v2939_v41 = vpop.f32.mrb[1].mxu0 }
 0x14b   :  { %v4471_v51 = vadd.f32 %v2939_v41, %v1070_v14  ;;  %v4357_v30 = vpop.f32.mrb[2].mxu0  ;;  %v1075_v14 = vadd.f32 %v5787_v0, %v5491_v2  ;;  %v1078_v2 = vadd.f32 %v5787_v0, %v5502_v5 }
 0x14c   :  { %3500 = vst.msk [vmem:[%s6420_s3 + $0x10] sm:$0xff] %vm416_vm1, %v4469_v35  ;;  %v4473_v53 = vadd.f32 %v4357_v30, %v1073_v32  ;;  %v2942_v25 = vpop.f32.mrb[3].mxu0  ;;  %v1077_v35 = vadd.f32 %v5483_v63, %v5787_v0  ;;  %v1080_v63 = vadd.f32 %v5500_v4, %v5787_v0 }
 0x14d   :  { %3498 = vst.msk [vmem:[%s6420_s3] sm:$0xff] %vm416_vm1, %v4471_v51  ;;  %v4475_v55 = vadd.f32 %v2942_v25, %v1071_v52  ;;  %v1074_v25 = vadd.f32 %v5787_v0, %v5478_v61  ;;  %v1081_v52 = vadd.f32 %v5507_v7, %v5787_v0  ;;  %v1084_v7 = vadd.f32 %v5524_v12, %v5787_v0 }
 0x14e   :  { %4349 = vmatmul.mubr.msk.bf16.gmra.mrb[108].mxu1 %vm416_vm1, %v4974_v48  ;;  %3501 = vst.msk [vmem:[%s6420_s3 + $0x18] sm:$0xff] %vm416_vm1, %v4473_v53  ;;  %4463 = vmatmul.mubr.msk.bf16.gmra.mrb[108].mxu0 %vm416_vm1, %v4975_v46 }
 0x14f   :  { %3499 = vst.msk [vmem:[%s6420_s3 + $0x8] sm:$0xff] %vm416_vm1, %v4475_v55  ;;  %v1079_v55 = vadd.f32 %v5787_v0, %v5515_v10  ;;  %v1082_v10 = vadd.f32 %v5787_v0, %v5526_v13 }
 0x151   :  { %v4360_v30 = vpop.f32.mrb[4].mxu0 }
 0x152   :  { %v4477_v48 = vadd.f32 %v4360_v30, %v1076_v58  ;;  %v2955_v9 = vpop.f32.mrb[5].mxu0 }
 0x153   :  { %v4479_v19 = vadd.f32 %v2955_v9, %v1074_v25  ;;  %v4361_v32 = vpop.f32.mrb[6].mxu0 }
 0x154   :  { %3504 = vst.msk [vmem:[%s6420_s3 + $0x30] sm:$0xff] %vm416_vm1, %v4477_v48  ;;  %v4481_v60 = vadd.f32 %v4361_v32, %v1077_v35  ;;  %v2958_v41 = vpop.f32.mrb[7].mxu0  ;;  %v1085_v48 = vadd.f32 %v5531_v15, %v5787_v0  ;;  %v1088_v15 = vadd.f32 %v5548_v20, %v5787_v0 }
 0x155   :  { %3502 = vst.msk [vmem:[%s6420_s3 + $0x20] sm:$0xff] %vm416_vm1, %v4479_v19  ;;  %v4483_v61 = vadd.f32 %v2958_v41, %v1075_v14  ;;  %v1083_v19 = vadd.f32 %v5787_v0, %v5539_v18  ;;  %v1086_v18 = vadd.f32 %v5787_v0, %v5550_v21 }
 0x156   :  { %3505 = vst.msk [vmem:[%s6420_s3 + $0x38] sm:$0xff] %vm416_vm1, %v4481_v60 }
 0x157   :  { %3503 = vst.msk [vmem:[%s6420_s3 + $0x28] sm:$0xff] %vm416_vm1, %v4483_v61 }
 0x159   :  { %v4364_v46 = vpop.f32.mrb[8].mxu0 }
 0x15a   :  { %v4485_v51 = vadd.f32 %v4364_v46, %v1080_v63  ;;  %v2971_v53 = vpop.f32.mrb[9].mxu0  ;;  %v1089_v63 = vadd.f32 %v5555_v23, %v5787_v0  ;;  %v1092_v23 = vadd.f32 %v5572_v28, %v5787_v0 }
 0x15b   :  { %v4487_v58 = vadd.f32 %v2971_v53, %v1078_v2  ;;  %v4365_v25 = vpop.f32.mrb[10].mxu0 }
 0x15c   :  { %3508 = vst.msk [vmem:[%s6420_s3 + $0x50] sm:$0xff] %vm416_vm1, %v4485_v51  ;;  %v4489_v4 = vadd.f32 %v4365_v25, %v1081_v52  ;;  %v2974_v30 = vpop.f32.mrb[11].mxu0  ;;  %v1087_v52 = vadd.f32 %v5787_v0, %v5563_v26  ;;  %v1090_v26 = vadd.f32 %v5787_v0, %v5574_v29  ;;  %v1093_v25 = vadd.f32 %v5579_v31, %v5787_v0 }
 0x15d   :  { %3506 = vst.msk [vmem:[%s6420_s3 + $0x40] sm:$0xff] %vm416_vm1, %v4487_v58  ;;  %v4491_v5 = vadd.f32 %v2974_v30, %v1079_v55  ;;  %v1096_v31 = vadd.f32 %v5596_v36, %v5787_v0 }
 0x15e   :  { %3509 = vst.msk [vmem:[%s6420_s3 + $0x58] sm:$0xff] %vm416_vm1, %v4489_v4 }
 0x15f   :  { %3507 = vst.msk [vmem:[%s6420_s3 + $0x48] sm:$0xff] %vm416_vm1, %v4491_v5  ;;  %v1091_v5 = vadd.f32 %v5787_v0, %v5587_v34  ;;  %v1094_v34 = vadd.f32 %v5787_v0, %v5598_v37 }
 0x161   :  { %v4368_v35 = vpop.f32.mrb[12].mxu0 }
 0x162   :  { %v4493_v9 = vadd.f32 %v4368_v35, %v1084_v7  ;;  %v2987_v14 = vpop.f32.mrb[13].mxu0 }
 0x163   :  { %v4495_v32 = vadd.f32 %v2987_v14, %v1082_v10  ;;  %v4369_v60 = vpop.f32.mrb[14].mxu0 }
 0x164   :  { %3512 = vst.msk [vmem:[%s6420_s3 + $0x70] sm:$0xff] %vm416_vm1, %v4493_v9  ;;  %v4497_v12 = vadd.f32 %v4369_v60, %v1085_v48  ;;  %v2990_v41 = vpop.f32.mrb[15].mxu0  ;;  %v1097_v9 = vadd.f32 %v5603_v39, %v5787_v0  ;;  %v1100_v39 = vadd.f32 %v5620_v44, %v5787_v0 }
 0x165   :  { %3510 = vst.msk [vmem:[%s6420_s3 + $0x60] sm:$0xff] %vm416_vm1, %v4495_v32  ;;  %v4499_v13 = vadd.f32 %v2990_v41, %v1083_v19  ;;  %v1095_v32 = vadd.f32 %v5787_v0, %v5611_v42  ;;  %v1098_v42 = vadd.f32 %v5787_v0, %v5622_v45 }
 0x166   :  { %3513 = vst.msk [vmem:[%s6420_s3 + $0x78] sm:$0xff] %vm416_vm1, %v4497_v12 }
 0x167   :  { %3511 = vst.msk [vmem:[%s6420_s3 + $0x68] sm:$0xff] %vm416_vm1, %v4499_v13 }
 0x169   :  { %v4372_v61 = vpop.f32.mrb[16].mxu0 }
 0x16a   :  { %v4501_v2 = vadd.f32 %v4372_v61, %v1088_v15  ;;  %v3003_v46 = vpop.f32.mrb[17].mxu0  ;;  %v1101_v15 = vadd.f32 %v5627_v47, %v5787_v0  ;;  %v1104_v47 = vadd.f32 %v5644_v54, %v5787_v0 }
 0x16b   :  { %v4503_v51 = vadd.f32 %v3003_v46, %v1086_v18  ;;  %v4373_v53 = vpop.f32.mrb[18].mxu0 }
 0x16c   :  { %3516 = vst.msk [vmem:[%s6420_s3 + $0x90] sm:$0xff] %vm416_vm1, %v4501_v2  ;;  %v4505_v20 = vadd.f32 %v4373_v53, %v1089_v63  ;;  %v3006_v55 = vpop.f32.mrb[19].mxu0  ;;  %v1099_v63 = vadd.f32 %v5787_v0, %v5635_v50  ;;  %v1102_v50 = vadd.f32 %v5787_v0, %v5646_v56  ;;  %v1105_v53 = vadd.f32 %v5651_v59, %v5787_v0 }
 0x16d   :  { %3514 = vst.msk [vmem:[%s6420_s3 + $0x80] sm:$0xff] %vm416_vm1, %v4503_v51  ;;  %v4507_v21 = vadd.f32 %v3006_v55, %v1087_v52  ;;  %v1108_v59 = vadd.f32 %v5668_v6, %v5787_v0 }
 0x16e   :  { %3517 = vst.msk [vmem:[%s6420_s3 + $0x98] sm:$0xff] %vm416_vm1, %v4505_v20 }
 0x16f   :  { %3515 = vst.msk [vmem:[%s6420_s3 + $0x88] sm:$0xff] %vm416_vm1, %v4507_v21  ;;  %v1103_v21 = vadd.f32 %v5787_v0, %v5659_v1  ;;  %v1106_v1 = vadd.f32 %v5787_v0, %v5670_v8 }
 0x171   :  { %v4376_v58 = vpop.f32.mrb[20].mxu0 }
 0x172   :  { %v4509_v4 = vadd.f32 %v4376_v58, %v1092_v23  ;;  %v3019_v30 = vpop.f32.mrb[21].mxu0 }
 0x173   :  { %v4511_v7 = vadd.f32 %v3019_v30, %v1090_v26  ;;  %v4377_v10 = vpop.f32.mrb[22].mxu0 }
 0x174   :  { %3520 = vst.msk [vmem:[%s6420_s3 + $0xb0] sm:$0xff] %vm416_vm1, %v4509_v4  ;;  %v4513_v28 = vadd.f32 %v4377_v10, %v1093_v25  ;;  %v3022_v35 = vpop.f32.mrb[23].mxu0  ;;  %v1109_v4 = vadd.f32 %v5675_v11, %v5787_v0  ;;  %v1112_v11 = vadd.f32 %v5692_v22, %v5787_v0 }
 0x175   :  { %3518 = vst.msk [vmem:[%s6420_s3 + $0xa0] sm:$0xff] %vm416_vm1, %v4511_v7  ;;  %v4515_v29 = vadd.f32 %v3022_v35, %v1091_v5  ;;  %v1107_v7 = vadd.f32 %v5787_v0, %v5683_v17  ;;  %v1110_v17 = vadd.f32 %v5787_v0, %v5694_v24 }
 0x176   :  { %3521 = vst.msk [vmem:[%s6420_s3 + $0xb8] sm:$0xff] %vm416_vm1, %v4513_v28 }
 0x177   :  { %3519 = vst.msk [vmem:[%s6420_s3 + $0xa8] sm:$0xff] %vm416_vm1, %v4515_v29 }
 0x179   :  { %v4380_v48 = vpop.f32.mrb[24].mxu0 }
 0x17a   :  { %v4517_v14 = vadd.f32 %v4380_v48, %v1096_v31  ;;  %v3035_v19 = vpop.f32.mrb[25].mxu0  ;;  %v1113_v31 = vadd.f32 %v5699_v27, %v5787_v0  ;;  %v1116_v27 = vadd.f32 %v5716_v38, %v5787_v0 }
 0x17b   :  { %v4519_v60 = vadd.f32 %v3035_v19, %v1094_v34  ;;  %v4381_v12 = vpop.f32.mrb[26].mxu0 }
 0x17c   :  { %3524 = vst.msk [vmem:[%s6420_s3 + $0xd0] sm:$0xff] %vm416_vm1, %v4517_v14  ;;  %v4521_v36 = vadd.f32 %v4381_v12, %v1097_v9  ;;  %v3038_v41 = vpop.f32.mrb[27].mxu0  ;;  %v1111_v9 = vadd.f32 %v5787_v0, %v5707_v33  ;;  %v1114_v33 = vadd.f32 %v5787_v0, %v5718_v40  ;;  %v1117_v12 = vadd.f32 %v5723_v43, %v5787_v0 }
 0x17d   :  { %3522 = vst.msk [vmem:[%s6420_s3 + $0xc0] sm:$0xff] %vm416_vm1, %v4519_v60  ;;  %v4523_v37 = vadd.f32 %v3038_v41, %v1095_v32  ;;  %v1120_v43 = vadd.f32 %v5740_v57, %v5787_v0 }
 0x17e   :  { %3525 = vst.msk [vmem:[%s6420_s3 + $0xd8] sm:$0xff] %vm416_vm1, %v4521_v36 }
 0x17f   :  { %3523 = vst.msk [vmem:[%s6420_s3 + $0xc8] sm:$0xff] %vm416_vm1, %v4523_v37  ;;  %v1115_v37 = vadd.f32 %v5787_v0, %v5731_v49  ;;  %v1118_v49 = vadd.f32 %v5787_v0, %v5742_v62 }
 0x181   :  { %v4384_v13 = vpop.f32.mrb[28].mxu0 }
 0x182   :  { %v4525_v18 = vadd.f32 %v4384_v13, %v1100_v39  ;;  %v3051_v61 = vpop.f32.mrb[29].mxu0 }
 0x183   :  { %v4527_v2 = vadd.f32 %v3051_v61, %v1098_v42  ;;  %v4385_v46 = vpop.f32.mrb[30].mxu0 }
 0x184   :  { %3528 = vst.msk [vmem:[%s6420_s3 + $0xf0] sm:$0xff] %vm416_vm1, %v4525_v18  ;;  %v4529_v44 = vadd.f32 %v4385_v46, %v1101_v15  ;;  %v3054_v52 = vpop.f32.mrb[31].mxu0  ;;  %v1121_v18 = vadd.f32 %v5747_v3, %v5787_v0  ;;  %v6425_v3 = vld [vmem:[#allocation2_spill] sm:$0xff] }
 0x185   :  { %3526 = vst.msk [vmem:[%s6420_s3 + $0xe0] sm:$0xff] %vm416_vm1, %v4527_v2  ;;  %v4531_v45 = vadd.f32 %v3054_v52, %v1099_v63  ;;  %v1119_v2 = vadd.f32 %v5787_v0, %v5755_v16  ;;  %v1124_v16 = vadd.f32 %v6425_v3, %v5787_v0 }
 0x186   :  { %3529 = vst.msk [vmem:[%s6420_s3 + $0xf8] sm:$0xff] %vm416_vm1, %v4529_v44 }
 0x187   :  { %3527 = vst.msk [vmem:[%s6420_s3 + $0xe8] sm:$0xff] %vm416_vm1, %v4531_v45  ;;  %v6426_v45 = vld [vmem:[#allocation3_spill] sm:$0xff] }
 0x189   :  { %v4388_v51 = vpop.f32.mrb[32].mxu0 }
 0x18a   :  { %v4533_v20 = vadd.f32 %v4388_v51, %v1104_v47  ;;  %v3067_v55 = vpop.f32.mrb[33].mxu0  ;;  %v1122_v47 = vadd.f32 %v5787_v0, %v6426_v45  ;;  %v6427_v51 = vld [vmem:[#allocation4_spill] sm:$0xff] }
 0x18b   :  { %v4535_v23 = vadd.f32 %v3067_v55, %v1102_v50  ;;  %v4389_v26 = vpop.f32.mrb[34].mxu0 }
 0x18c   :  { %3532 = vst.msk [vmem:[%s6420_s3 + $0x110] sm:$0xff] %vm416_vm1, %v4533_v20  ;;  %v4537_v54 = vadd.f32 %v4389_v26, %v1105_v53  ;;  %v3070_v58 = vpop.f32.mrb[35].mxu0  ;;  %v1125_v53 = vadd.f32 %v6427_v51, %v5787_v0 }
 0x18d   :  { %3530 = vst.msk [vmem:[%s6420_s3 + $0x100] sm:$0xff] %vm416_vm1, %v4535_v23  ;;  %v4539_v56 = vadd.f32 %v3070_v58, %v1103_v21  ;;  %v6428_v21 = vld [vmem:[#allocation5_spill] sm:$0xff] }
 0x18e   :  { %3533 = vst.msk [vmem:[%s6420_s3 + $0x118] sm:$0xff] %vm416_vm1, %v4537_v54  ;;  %v1123_v23 = vadd.f32 %v5787_v0, %v6428_v21 }
 0x18f   :  { %3531 = vst.msk [vmem:[%s6420_s3 + $0x108] sm:$0xff] %vm416_vm1, %v4539_v56 }
 0x191   :  { %v4392_v25 = vpop.f32.mrb[36].mxu0 }
 0x192   :  { %v4541_v30 = vadd.f32 %v4392_v25, %v1108_v59  ;;  %v3083_v5 = vpop.f32.mrb[37].mxu0 }
 0x193   :  { %v4543_v10 = vadd.f32 %v3083_v5, %v1106_v1  ;;  %v4393_v28 = vpop.f32.mrb[38].mxu0 }
 0x194   :  { %3536 = vst.msk [vmem:[%s6420_s3 + $0x130] sm:$0xff] %vm416_vm1, %v4541_v30  ;;  %v4545_v6 = vadd.f32 %v4393_v28, %v1109_v4  ;;  %v3086_v35 = vpop.f32.mrb[39].mxu0 }
 0x195   :  { %3534 = vst.msk [vmem:[%s6420_s3 + $0x120] sm:$0xff] %vm416_vm1, %v4543_v10  ;;  %v4547_v8 = vadd.f32 %v3086_v35, %v1107_v7 }
 0x196   :  { %3537 = vst.msk [vmem:[%s6420_s3 + $0x138] sm:$0xff] %vm416_vm1, %v4545_v6 }
 0x197   :  { %3535 = vst.msk [vmem:[%s6420_s3 + $0x128] sm:$0xff] %vm416_vm1, %v4547_v8 }
 0x199   :  { %v4396_v29 = vpop.f32.mrb[40].mxu0 }
 0x19a   :  { %v4549_v34 = vadd.f32 %v4396_v29, %v1112_v11  ;;  %v3099_v48 = vpop.f32.mrb[41].mxu0 }
 0x19b   :  { %v4551_v14 = vadd.f32 %v3099_v48, %v1110_v17  ;;  %v4397_v19 = vpop.f32.mrb[42].mxu0 }
 0x19c   :  { %3540 = vst.msk [vmem:[%s6420_s3 + $0x150] sm:$0xff] %vm416_vm1, %v4549_v34  ;;  %v4553_v22 = vadd.f32 %v4397_v19, %v1113_v31  ;;  %v3102_v32 = vpop.f32.mrb[43].mxu0 }
 0x19d   :  { %3538 = vst.msk [vmem:[%s6420_s3 + $0x140] sm:$0xff] %vm416_vm1, %v4551_v14  ;;  %v4555_v24 = vadd.f32 %v3102_v32, %v1111_v9 }
 0x19e   :  { %3541 = vst.msk [vmem:[%s6420_s3 + $0x158] sm:$0xff] %vm416_vm1, %v4553_v22 }
 0x19f   :  { %3539 = vst.msk [vmem:[%s6420_s3 + $0x148] sm:$0xff] %vm416_vm1, %v4555_v24 }
 0x1a1   :  { %v4400_v60 = vpop.f32.mrb[44].mxu0 }
 0x1a2   :  { %v4557_v36 = vadd.f32 %v4400_v60, %v1116_v27  ;;  %v3115_v41 = vpop.f32.mrb[45].mxu0 }
 0x1a3   :  { %v4559_v39 = vadd.f32 %v3115_v41, %v1114_v33  ;;  %v4401_v42 = vpop.f32.mrb[46].mxu0 }
 0x1a4   :  { %3544 = vst.msk [vmem:[%s6420_s3 + $0x170] sm:$0xff] %vm416_vm1, %v4557_v36  ;;  %v4561_v38 = vadd.f32 %v4401_v42, %v1117_v12  ;;  %v3118_v13 = vpop.f32.mrb[47].mxu0 }
 0x1a5   :  { %3542 = vst.msk [vmem:[%s6420_s3 + $0x160] sm:$0xff] %vm416_vm1, %v4559_v39  ;;  %v4563_v40 = vadd.f32 %v3118_v13, %v1115_v37 }
 0x1a6   :  { %3545 = vst.msk [vmem:[%s6420_s3 + $0x178] sm:$0xff] %vm416_vm1, %v4561_v38 }
 0x1a7   :  { %3543 = vst.msk [vmem:[%s6420_s3 + $0x168] sm:$0xff] %vm416_vm1, %v4563_v40 }
 0x1a9   :  { %v4404_v15 = vpop.f32.mrb[48].mxu0 }
 0x1aa   :  { %v4565_v61 = vadd.f32 %v4404_v15, %v1120_v43  ;;  %v3131_v63 = vpop.f32.mrb[49].mxu0 }
 0x1ab   :  { %v4567_v46 = vadd.f32 %v3131_v63, %v1118_v49  ;;  %v4405_v44 = vpop.f32.mrb[50].mxu0 }
 0x1ac   :  { %3548 = vst.msk [vmem:[%s6420_s3 + $0x190] sm:$0xff] %vm416_vm1, %v4565_v61  ;;  %v4569_v57 = vadd.f32 %v4405_v44, %v1121_v18  ;;  %v3134_v52 = vpop.f32.mrb[51].mxu0 }
 0x1ad   :  { %3546 = vst.msk [vmem:[%s6420_s3 + $0x180] sm:$0xff] %vm416_vm1, %v4567_v46  ;;  %v4571_v62 = vadd.f32 %v3134_v52, %v1119_v2 }
 0x1ae   :  { %3549 = vst.msk [vmem:[%s6420_s3 + $0x198] sm:$0xff] %vm416_vm1, %v4569_v57 }
 0x1af   :  { %3547 = vst.msk [vmem:[%s6420_s3 + $0x188] sm:$0xff] %vm416_vm1, %v4571_v62 }
 0x1b1   :  { %v4408_v50 = vpop.f32.mrb[52].mxu0 }
 0x1b2   :  { %v4573_v20 = vadd.f32 %v4408_v50, %v1124_v16  ;;  %v3147_v55 = vpop.f32.mrb[53].mxu0 }
 0x1b3   :  { %v4575_v26 = vadd.f32 %v3147_v55, %v1122_v47  ;;  %v4409_v54 = vpop.f32.mrb[54].mxu0 }
 0x1b4   :  { %3552 = vst.msk [vmem:[%s6420_s3 + $0x1b0] sm:$0xff] %vm416_vm1, %v4573_v20  ;;  %v4577_v58 = vadd.f32 %v4409_v54, %v1125_v53  ;;  %v3150_v56 = vpop.f32.mrb[55].mxu0 }
 0x1b5   :  { %3550 = vst.msk [vmem:[%s6420_s3 + $0x1a0] sm:$0xff] %vm416_vm1, %v4575_v26  ;;  %v4579_v59 = vadd.f32 %v3150_v56, %v1123_v23 }
 0x1b6   :  { %3553 = vst.msk [vmem:[%s6420_s3 + $0x1b8] sm:$0xff] %vm416_vm1, %v4577_v58 }
 0x1b7   :  { %3551 = vst.msk [vmem:[%s6420_s3 + $0x1a8] sm:$0xff] %vm416_vm1, %v4579_v59 }
 0x1b9   :  { %v4298_v1 = vpop.f32.mrb[56].mxu1  ;;  %v4412_v4 = vpop.f32.mrb[56].mxu0 }
 0x1ba   :  { %v4580_v25 = vadd.f32 %v4298_v1, %v5787_v0  ;;  %v2005_v30 = vpop.f32.mrb[57].mxu1  ;;  %v3163_v7 = vpop.f32.mrb[57].mxu0 }
 0x1bb   :  { %v4582_v5 = vadd.f32 %v5787_v0, %v2005_v30  ;;  %v4299_v10 = vpop.f32.mrb[58].mxu1  ;;  %v4413_v35 = vpop.f32.mrb[58].mxu0 }
 0x1bc   :  { %v4581_v28 = vadd.f32 %v4580_v25, %v4412_v4  ;;  %v4584_v6 = vadd.f32 %v4299_v10, %v5787_v0  ;;  %v2008_v8 = vpop.f32.mrb[59].mxu1  ;;  %v3166_v29 = vpop.f32.mrb[59].mxu0 }
 0x1bd   :  { %v4583_v11 = vadd.f32 %v4582_v5, %v3163_v7  ;;  %v4586_v17 = vadd.f32 %v5787_v0, %v2008_v8 }
 0x1be   :  { %3556 = vst.msk [vmem:[%s6420_s3 + $0x1d0] sm:$0xff] %vm416_vm1, %v4581_v28  ;;  %v4585_v31 = vadd.f32 %v4584_v6, %v4413_v35 }
 0x1bf   :  { %3554 = vst.msk [vmem:[%s6420_s3 + $0x1c0] sm:$0xff] %vm416_vm1, %v4583_v11  ;;  %v4587_v34 = vadd.f32 %v4586_v17, %v3166_v29 }
 0x1c0   :  { %3557 = vst.msk [vmem:[%s6420_s3 + $0x1d8] sm:$0xff] %vm416_vm1, %v4585_v31 }
 0x1c1   :  { %3555 = vst.msk [vmem:[%s6420_s3 + $0x1c8] sm:$0xff] %vm416_vm1, %v4587_v34  ;;  %v4302_v48 = vpop.f32.mrb[60].mxu1  ;;  %v4416_v14 = vpop.f32.mrb[60].mxu0 }
 0x1c2   :  { %v4588_v9 = vadd.f32 %v4302_v48, %v5787_v0  ;;  %v2021_v19 = vpop.f32.mrb[61].mxu1  ;;  %v3179_v32 = vpop.f32.mrb[61].mxu0 }
 0x1c3   :  { %v4590_v22 = vadd.f32 %v5787_v0, %v2021_v19  ;;  %v4303_v24 = vpop.f32.mrb[62].mxu1  ;;  %v4417_v60 = vpop.f32.mrb[62].mxu0 }
 0x1c4   :  { %v4589_v27 = vadd.f32 %v4588_v9, %v4416_v14  ;;  %v4592_v33 = vadd.f32 %v4303_v24, %v5787_v0  ;;  %v2024_v12 = vpop.f32.mrb[63].mxu1  ;;  %v3182_v37 = vpop.f32.mrb[63].mxu0 }
 0x1c5   :  { %v4591_v36 = vadd.f32 %v4590_v22, %v3179_v32  ;;  %v4594_v41 = vadd.f32 %v5787_v0, %v2024_v12 }
 0x1c6   :  { %3560 = vst.msk [vmem:[%s6420_s3 + $0x1f0] sm:$0xff] %vm416_vm1, %v4589_v27  ;;  %v4593_v39 = vadd.f32 %v4592_v33, %v4417_v60 }
 0x1c7   :  { %3558 = vst.msk [vmem:[%s6420_s3 + $0x1e0] sm:$0xff] %vm416_vm1, %v4591_v36  ;;  %v4595_v42 = vadd.f32 %v4594_v41, %v3182_v37 }
 0x1c8   :  { %3561 = vst.msk [vmem:[%s6420_s3 + $0x1f8] sm:$0xff] %vm416_vm1, %v4593_v39 }
 0x1c9   :  { %3559 = vst.msk [vmem:[%s6420_s3 + $0x1e8] sm:$0xff] %vm416_vm1, %v4595_v42  ;;  %v4306_v38 = vpop.f32.mrb[64].mxu1  ;;  %v4420_v40 = vpop.f32.mrb[64].mxu0 }
 0x1ca   :  { %v4596_v13 = vadd.f32 %v4306_v38, %v5787_v0  ;;  %v2037_v43 = vpop.f32.mrb[65].mxu1  ;;  %v3195_v15 = vpop.f32.mrb[65].mxu0 }
 0x1cb   :  { %v4598_v49 = vadd.f32 %v5787_v0, %v2037_v43  ;;  %v4307_v18 = vpop.f32.mrb[66].mxu1  ;;  %v4421_v2 = vpop.f32.mrb[66].mxu0 }
 0x1cc   :  { %v4597_v61 = vadd.f32 %v4596_v13, %v4420_v40  ;;  %v4600_v63 = vadd.f32 %v4307_v18, %v5787_v0  ;;  %v2040_v46 = vpop.f32.mrb[67].mxu1  ;;  %v3198_v52 = vpop.f32.mrb[67].mxu0 }
 0x1cd   :  { %v4599_v44 = vadd.f32 %v4598_v49, %v3195_v15  ;;  %v4602_v57 = vadd.f32 %v5787_v0, %v2040_v46 }
 0x1ce   :  { %3564 = vst.msk [vmem:[%s6420_s3 + $0x210] sm:$0xff] %vm416_vm1, %v4597_v61  ;;  %v4601_v62 = vadd.f32 %v4600_v63, %v4421_v2 }
 0x1cf   :  { %3562 = vst.msk [vmem:[%s6420_s3 + $0x200] sm:$0xff] %vm416_vm1, %v4599_v44  ;;  %v4603_v3 = vadd.f32 %v4602_v57, %v3198_v52 }
 0x1d0   :  { %3565 = vst.msk [vmem:[%s6420_s3 + $0x218] sm:$0xff] %vm416_vm1, %v4601_v62 }
 0x1d1   :  { %3563 = vst.msk [vmem:[%s6420_s3 + $0x208] sm:$0xff] %vm416_vm1, %v4603_v3  ;;  %v4310_v16 = vpop.f32.mrb[68].mxu1  ;;  %v4424_v47 = vpop.f32.mrb[68].mxu0 }
 0x1d2   :  { %v4604_v45 = vadd.f32 %v4310_v16, %v5787_v0  ;;  %v2053_v50 = vpop.f32.mrb[69].mxu1  ;;  %v3211_v53 = vpop.f32.mrb[69].mxu0 }
 0x1d3   :  { %v4606_v51 = vadd.f32 %v5787_v0, %v2053_v50  ;;  %v4311_v20 = vpop.f32.mrb[70].mxu1  ;;  %v4425_v23 = vpop.f32.mrb[70].mxu0 }
 0x1d4   :  { %v4605_v55 = vadd.f32 %v4604_v45, %v4424_v47  ;;  %v4608_v21 = vadd.f32 %v4311_v20, %v5787_v0  ;;  %v2056_v26 = vpop.f32.mrb[71].mxu1  ;;  %v3214_v56 = vpop.f32.mrb[71].mxu0 }
 0x1d5   :  { %v4607_v54 = vadd.f32 %v4606_v51, %v3211_v53  ;;  %v4610_v58 = vadd.f32 %v5787_v0, %v2056_v26 }
 0x1d6   :  { %3568 = vst.msk [vmem:[%s6420_s3 + $0x230] sm:$0xff] %vm416_vm1, %v4605_v55  ;;  %v4609_v59 = vadd.f32 %v4608_v21, %v4425_v23 }
 0x1d7   :  { %3566 = vst.msk [vmem:[%s6420_s3 + $0x220] sm:$0xff] %vm416_vm1, %v4607_v54  ;;  %v4611_v1 = vadd.f32 %v4610_v58, %v3214_v56 }
 0x1d8   :  { %3569 = vst.msk [vmem:[%s6420_s3 + $0x238] sm:$0xff] %vm416_vm1, %v4609_v59 }
 0x1d9   :  { %3567 = vst.msk [vmem:[%s6420_s3 + $0x228] sm:$0xff] %vm416_vm1, %v4611_v1  ;;  %v4314_v25 = vpop.f32.mrb[72].mxu1  ;;  %v4428_v30 = vpop.f32.mrb[72].mxu0 }
 0x1da   :  { %v4612_v4 = vadd.f32 %v4314_v25, %v5787_v0  ;;  %v2069_v5 = vpop.f32.mrb[73].mxu1  ;;  %v3227_v10 = vpop.f32.mrb[73].mxu0 }
 0x1db   :  { %v4614_v7 = vadd.f32 %v5787_v0, %v2069_v5  ;;  %v4315_v28 = vpop.f32.mrb[74].mxu1  ;;  %v4429_v8 = vpop.f32.mrb[74].mxu0 }
 0x1dc   :  { %v4613_v6 = vadd.f32 %v4612_v4, %v4428_v30  ;;  %v4616_v35 = vadd.f32 %v4315_v28, %v5787_v0  ;;  %v2072_v11 = vpop.f32.mrb[75].mxu1  ;;  %v3230_v31 = vpop.f32.mrb[75].mxu0 }
 0x1dd   :  { %v4615_v17 = vadd.f32 %v4614_v7, %v3227_v10  ;;  %v4618_v29 = vadd.f32 %v5787_v0, %v2072_v11 }
 0x1de   :  { %3572 = vst.msk [vmem:[%s6420_s3 + $0x250] sm:$0xff] %vm416_vm1, %v4613_v6  ;;  %v4617_v34 = vadd.f32 %v4616_v35, %v4429_v8 }
 0x1df   :  { %3570 = vst.msk [vmem:[%s6420_s3 + $0x240] sm:$0xff] %vm416_vm1, %v4615_v17  ;;  %v4619_v48 = vadd.f32 %v4618_v29, %v3230_v31 }
 0x1e0   :  { %3573 = vst.msk [vmem:[%s6420_s3 + $0x258] sm:$0xff] %vm416_vm1, %v4617_v34 }
 0x1e1   :  { %3571 = vst.msk [vmem:[%s6420_s3 + $0x248] sm:$0xff] %vm416_vm1, %v4619_v48  ;;  %v4318_v9 = vpop.f32.mrb[76].mxu1  ;;  %v4432_v19 = vpop.f32.mrb[76].mxu0 }
 0x1e2   :  { %v4620_v14 = vadd.f32 %v4318_v9, %v5787_v0  ;;  %v2085_v22 = vpop.f32.mrb[77].mxu1  ;;  %v3243_v24 = vpop.f32.mrb[77].mxu0 }
 0x1e3   :  { %v4622_v32 = vadd.f32 %v5787_v0, %v2085_v22  ;;  %v4319_v27 = vpop.f32.mrb[78].mxu1  ;;  %v4433_v12 = vpop.f32.mrb[78].mxu0 }
 0x1e4   :  { %v4621_v33 = vadd.f32 %v4620_v14, %v4432_v19  ;;  %v4624_v60 = vadd.f32 %v4319_v27, %v5787_v0  ;;  %v2088_v36 = vpop.f32.mrb[79].mxu1  ;;  %v3246_v39 = vpop.f32.mrb[79].mxu0 }
 0x1e5   :  { %v4623_v41 = vadd.f32 %v4622_v32, %v3243_v24  ;;  %v4626_v37 = vadd.f32 %v5787_v0, %v2088_v36 }
 0x1e6   :  { %3576 = vst.msk [vmem:[%s6420_s3 + $0x270] sm:$0xff] %vm416_vm1, %v4621_v33  ;;  %v4625_v42 = vadd.f32 %v4624_v60, %v4433_v12 }
 0x1e7   :  { %3574 = vst.msk [vmem:[%s6420_s3 + $0x260] sm:$0xff] %vm416_vm1, %v4623_v41  ;;  %v4627_v38 = vadd.f32 %v4626_v37, %v3246_v39 }
 0x1e8   :  { %3577 = vst.msk [vmem:[%s6420_s3 + $0x278] sm:$0xff] %vm416_vm1, %v4625_v42 }
 0x1e9   :  { %3575 = vst.msk [vmem:[%s6420_s3 + $0x268] sm:$0xff] %vm416_vm1, %v4627_v38  ;;  %v4322_v13 = vpop.f32.mrb[80].mxu1  ;;  %v4436_v43 = vpop.f32.mrb[80].mxu0 }
 0x1ea   :  { %v4628_v40 = vadd.f32 %v4322_v13, %v5787_v0  ;;  %v2101_v49 = vpop.f32.mrb[81].mxu1  ;;  %v3259_v18 = vpop.f32.mrb[81].mxu0 }
 0x1eb   :  { %v4630_v15 = vadd.f32 %v5787_v0, %v2101_v49  ;;  %v4323_v61 = vpop.f32.mrb[82].mxu1  ;;  %v4437_v46 = vpop.f32.mrb[82].mxu0 }
 0x1ec   :  { %v4629_v63 = vadd.f32 %v4628_v40, %v4436_v43  ;;  %v4632_v2 = vadd.f32 %v4323_v61, %v5787_v0  ;;  %v2104_v44 = vpop.f32.mrb[83].mxu1  ;;  %v3262_v62 = vpop.f32.mrb[83].mxu0 }
 0x1ed   :  { %v4631_v57 = vadd.f32 %v4630_v15, %v3259_v18  ;;  %v4634_v52 = vadd.f32 %v5787_v0, %v2104_v44 }
 0x1ee   :  { %3580 = vst.msk [vmem:[%s6420_s3 + $0x290] sm:$0xff] %vm416_vm1, %v4629_v63  ;;  %v4633_v3 = vadd.f32 %v4632_v2, %v4437_v46 }
 0x1ef   :  { %3578 = vst.msk [vmem:[%s6420_s3 + $0x280] sm:$0xff] %vm416_vm1, %v4631_v57  ;;  %v4635_v16 = vadd.f32 %v4634_v52, %v3262_v62 }
 0x1f0   :  { %3581 = vst.msk [vmem:[%s6420_s3 + $0x298] sm:$0xff] %vm416_vm1, %v4633_v3 }
 0x1f1   :  { %3579 = vst.msk [vmem:[%s6420_s3 + $0x288] sm:$0xff] %vm416_vm1, %v4635_v16  ;;  %v4326_v45 = vpop.f32.mrb[84].mxu1  ;;  %v4440_v50 = vpop.f32.mrb[84].mxu0 }
 0x1f2   :  { %v4636_v47 = vadd.f32 %v4326_v45, %v5787_v0  ;;  %v2117_v51 = vpop.f32.mrb[85].mxu1  ;;  %v3275_v20 = vpop.f32.mrb[85].mxu0 }
 0x1f3   :  { %v4638_v53 = vadd.f32 %v5787_v0, %v2117_v51  ;;  %v4327_v55 = vpop.f32.mrb[86].mxu1  ;;  %v4441_v26 = vpop.f32.mrb[86].mxu0 }
 0x1f4   :  { %v4637_v21 = vadd.f32 %v4636_v47, %v4440_v50  ;;  %v4640_v23 = vadd.f32 %v4327_v55, %v5787_v0  ;;  %v2120_v54 = vpop.f32.mrb[87].mxu1  ;;  %v3278_v59 = vpop.f32.mrb[87].mxu0 }
 0x1f5   :  { %v4639_v58 = vadd.f32 %v4638_v53, %v3275_v20  ;;  %v4642_v56 = vadd.f32 %v5787_v0, %v2120_v54 }
 0x1f6   :  { %3584 = vst.msk [vmem:[%s6420_s3 + $0x2b0] sm:$0xff] %vm416_vm1, %v4637_v21  ;;  %v4641_v1 = vadd.f32 %v4640_v23, %v4441_v26 }
 0x1f7   :  { %3582 = vst.msk [vmem:[%s6420_s3 + $0x2a0] sm:$0xff] %vm416_vm1, %v4639_v58  ;;  %v4643_v25 = vadd.f32 %v4642_v56, %v3278_v59 }
 0x1f8   :  { %3585 = vst.msk [vmem:[%s6420_s3 + $0x2b8] sm:$0xff] %vm416_vm1, %v4641_v1 }
 0x1f9   :  { %3583 = vst.msk [vmem:[%s6420_s3 + $0x2a8] sm:$0xff] %vm416_vm1, %v4643_v25  ;;  %v4330_v4 = vpop.f32.mrb[88].mxu1  ;;  %v4444_v5 = vpop.f32.mrb[88].mxu0 }
 0x1fa   :  { %v4644_v30 = vadd.f32 %v4330_v4, %v5787_v0  ;;  %v2133_v7 = vpop.f32.mrb[89].mxu1  ;;  %v3291_v28 = vpop.f32.mrb[89].mxu0 }
 0x1fb   :  { %v4646_v10 = vadd.f32 %v5787_v0, %v2133_v7  ;;  %v4331_v6 = vpop.f32.mrb[90].mxu1  ;;  %v4445_v11 = vpop.f32.mrb[90].mxu0 }
 0x1fc   :  { %v4645_v35 = vadd.f32 %v4644_v30, %v4444_v5  ;;  %v4648_v8 = vadd.f32 %v4331_v6, %v5787_v0  ;;  %v2136_v17 = vpop.f32.mrb[91].mxu1  ;;  %v3294_v34 = vpop.f32.mrb[91].mxu0 }
 0x1fd   :  { %v4647_v29 = vadd.f32 %v4646_v10, %v3291_v28  ;;  %v4650_v31 = vadd.f32 %v5787_v0, %v2136_v17 }
 0x1fe   :  { %3588 = vst.msk [vmem:[%s6420_s3 + $0x2d0] sm:$0xff] %vm416_vm1, %v4645_v35  ;;  %v4649_v48 = vadd.f32 %v4648_v8, %v4445_v11 }
 0x1ff   :  { %3586 = vst.msk [vmem:[%s6420_s3 + $0x2c0] sm:$0xff] %vm416_vm1, %v4647_v29  ;;  %v4651_v9 = vadd.f32 %v4650_v31, %v3294_v34 }
 0x200   :  { %3589 = vst.msk [vmem:[%s6420_s3 + $0x2d8] sm:$0xff] %vm416_vm1, %v4649_v48 }
 0x201   :  { %3587 = vst.msk [vmem:[%s6420_s3 + $0x2c8] sm:$0xff] %vm416_vm1, %v4651_v9  ;;  %v4334_v14 = vpop.f32.mrb[92].mxu1  ;;  %v4448_v22 = vpop.f32.mrb[92].mxu0 }
 0x202   :  { %v4652_v19 = vadd.f32 %v4334_v14, %v5787_v0  ;;  %v2149_v32 = vpop.f32.mrb[93].mxu1  ;;  %v3307_v27 = vpop.f32.mrb[93].mxu0 }
 0x203   :  { %v4654_v24 = vadd.f32 %v5787_v0, %v2149_v32  ;;  %v4335_v33 = vpop.f32.mrb[94].mxu1  ;;  %v4449_v36 = vpop.f32.mrb[94].mxu0 }
 0x204   :  { %v4653_v60 = vadd.f32 %v4652_v19, %v4448_v22  ;;  %v4656_v12 = vadd.f32 %v4335_v33, %v5787_v0  ;;  %v2152_v41 = vpop.f32.mrb[95].mxu1  ;;  %v3310_v42 = vpop.f32.mrb[95].mxu0 }
 0x205   :  { %v4655_v37 = vadd.f32 %v4654_v24, %v3307_v27  ;;  %v4658_v39 = vadd.f32 %v5787_v0, %v2152_v41 }
 0x206   :  { %3592 = vst.msk [vmem:[%s6420_s3 + $0x2f0] sm:$0xff] %vm416_vm1, %v4653_v60  ;;  %v4657_v38 = vadd.f32 %v4656_v12, %v4449_v36 }
 0x207   :  { %3590 = vst.msk [vmem:[%s6420_s3 + $0x2e0] sm:$0xff] %vm416_vm1, %v4655_v37  ;;  %v4659_v13 = vadd.f32 %v4658_v39, %v3310_v42 }
 0x208   :  { %3593 = vst.msk [vmem:[%s6420_s3 + $0x2f8] sm:$0xff] %vm416_vm1, %v4657_v38 }
 0x209   :  { %3591 = vst.msk [vmem:[%s6420_s3 + $0x2e8] sm:$0xff] %vm416_vm1, %v4659_v13  ;;  %v4338_v40 = vpop.f32.mrb[96].mxu1  ;;  %v4452_v49 = vpop.f32.mrb[96].mxu0 }
 0x20a   :  { %v4660_v43 = vadd.f32 %v4338_v40, %v5787_v0  ;;  %v2165_v15 = vpop.f32.mrb[97].mxu1  ;;  %v3323_v61 = vpop.f32.mrb[97].mxu0 }
 0x20b   :  { %v4662_v18 = vadd.f32 %v5787_v0, %v2165_v15  ;;  %v4339_v63 = vpop.f32.mrb[98].mxu1  ;;  %v4453_v44 = vpop.f32.mrb[98].mxu0 }
 0x20c   :  { %v4661_v2 = vadd.f32 %v4660_v43, %v4452_v49  ;;  %v4664_v46 = vadd.f32 %v4339_v63, %v5787_v0  ;;  %v2168_v57 = vpop.f32.mrb[99].mxu1  ;;  %v3326_v3 = vpop.f32.mrb[99].mxu0 }
 0x20d   :  { %v4663_v52 = vadd.f32 %v4662_v18, %v3323_v61  ;;  %v4666_v62 = vadd.f32 %v5787_v0, %v2168_v57 }
 0x20e   :  { %3596 = vst.msk [vmem:[%s6420_s3 + $0x310] sm:$0xff] %vm416_vm1, %v4661_v2  ;;  %v4665_v16 = vadd.f32 %v4664_v46, %v4453_v44 }
 0x20f   :  { %3594 = vst.msk [vmem:[%s6420_s3 + $0x300] sm:$0xff] %vm416_vm1, %v4663_v52  ;;  %v4667_v45 = vadd.f32 %v4666_v62, %v3326_v3 }
 0x210   :  { %3597 = vst.msk [vmem:[%s6420_s3 + $0x318] sm:$0xff] %vm416_vm1, %v4665_v16 }
 0x211   :  { %3595 = vst.msk [vmem:[%s6420_s3 + $0x308] sm:$0xff] %vm416_vm1, %v4667_v45  ;;  %v4342_v47 = vpop.f32.mrb[100].mxu1  ;;  %v4456_v51 = vpop.f32.mrb[100].mxu0 }
 0x212   :  { %v4668_v50 = vadd.f32 %v4342_v47, %v5787_v0  ;;  %v2181_v53 = vpop.f32.mrb[101].mxu1  ;;  %v3339_v55 = vpop.f32.mrb[101].mxu0 }
 0x213   :  { %v4670_v20 = vadd.f32 %v5787_v0, %v2181_v53  ;;  %v4343_v21 = vpop.f32.mrb[102].mxu1  ;;  %v4457_v54 = vpop.f32.mrb[102].mxu0 }
 0x214   :  { %v4669_v23 = vadd.f32 %v4668_v50, %v4456_v51  ;;  %v4672_v26 = vadd.f32 %v4343_v21, %v5787_v0  ;;  %v2184_v58 = vpop.f32.mrb[103].mxu1  ;;  %v3342_v1 = vpop.f32.mrb[103].mxu0 }
 0x215   :  { %v4671_v56 = vadd.f32 %v4670_v20, %v3339_v55  ;;  %v4674_v59 = vadd.f32 %v5787_v0, %v2184_v58 }
 0x216   :  { %3600 = vst.msk [vmem:[%s6420_s3 + $0x330] sm:$0xff] %vm416_vm1, %v4669_v23  ;;  %v4673_v25 = vadd.f32 %v4672_v26, %v4457_v54 }
 0x217   :  { %3598 = vst.msk [vmem:[%s6420_s3 + $0x320] sm:$0xff] %vm416_vm1, %v4671_v56  ;;  %v4675_v4 = vadd.f32 %v4674_v59, %v3342_v1 }
 0x218   :  { %3601 = vst.msk [vmem:[%s6420_s3 + $0x338] sm:$0xff] %vm416_vm1, %v4673_v25 }
 0x219   :  { %3599 = vst.msk [vmem:[%s6420_s3 + $0x328] sm:$0xff] %vm416_vm1, %v4675_v4  ;;  %v4346_v30 = vpop.f32.mrb[104].mxu1  ;;  %v4460_v7 = vpop.f32.mrb[104].mxu0 }
 0x21a   :  { %v4676_v5 = vadd.f32 %v4346_v30, %v5787_v0  ;;  %v2197_v10 = vpop.f32.mrb[105].mxu1  ;;  %v3355_v6 = vpop.f32.mrb[105].mxu0 }
 0x21b   :  { %v4678_v28 = vadd.f32 %v5787_v0, %v2197_v10  ;;  %v4347_v35 = vpop.f32.mrb[106].mxu1  ;;  %v4461_v17 = vpop.f32.mrb[106].mxu0 }
 0x21c   :  { %v4677_v8 = vadd.f32 %v4676_v5, %v4460_v7  ;;  %v4680_v11 = vadd.f32 %v4347_v35, %v5787_v0  ;;  %v2200_v29 = vpop.f32.mrb[107].mxu1  ;;  %v3358_v48 = vpop.f32.mrb[107].mxu0 }
 0x21d   :  { %v4679_v31 = vadd.f32 %v4678_v28, %v3355_v6  ;;  %v4682_v34 = vadd.f32 %v5787_v0, %v2200_v29 }
 0x21e   :  { %3604 = vst.msk [vmem:[%s6420_s3 + $0x350] sm:$0xff] %vm416_vm1, %v4677_v8  ;;  %v4681_v9 = vadd.f32 %v4680_v11, %v4461_v17 }
 0x21f   :  { %3602 = vst.msk [vmem:[%s6420_s3 + $0x340] sm:$0xff] %vm416_vm1, %v4679_v31  ;;  %v4683_v14 = vadd.f32 %v4682_v34, %v3358_v48 }
 0x220   :  { %3605 = vst.msk [vmem:[%s6420_s3 + $0x358] sm:$0xff] %vm416_vm1, %v4681_v9 }
 0x221   :  { %3603 = vst.msk [vmem:[%s6420_s3 + $0x348] sm:$0xff] %vm416_vm1, %v4683_v14  ;;  %v4350_v19 = vpop.f32.mrb[108].mxu1  ;;  %v4464_v32 = vpop.f32.mrb[108].mxu0 }
 0x222   :  { %v4684_v22 = vadd.f32 %v4350_v19, %v5787_v0  ;;  %v2213_v24 = vpop.f32.mrb[109].mxu1  ;;  %v3371_v33 = vpop.f32.mrb[109].mxu0 }
 0x223   :  { %v4686_v27 = vadd.f32 %v5787_v0, %v2213_v24  ;;  %v4351_v60 = vpop.f32.mrb[110].mxu1  ;;  %v4465_v41 = vpop.f32.mrb[110].mxu0 }
 0x224   :  { %v4685_v12 = vadd.f32 %v4684_v22, %v4464_v32  ;;  %v4688_v36 = vadd.f32 %v4351_v60, %v5787_v0  ;;  %v2216_v37 = vpop.f32.mrb[111].mxu1  ;;  %v3374_v38 = vpop.f32.mrb[111].mxu0 }
 0x225   :  { %v4687_v39 = vadd.f32 %v4686_v27, %v3371_v33  ;;  %v4690_v42 = vadd.f32 %v5787_v0, %v2216_v37 }
 0x226   :  { %3608 = vst.msk [vmem:[%s6420_s3 + $0x370] sm:$0xff] %vm416_vm1, %v4685_v12  ;;  %v4689_v13 = vadd.f32 %v4688_v36, %v4465_v41 }
 0x227   :  { %3606 = vst.msk [vmem:[%s6420_s3 + $0x360] sm:$0xff] %vm416_vm1, %v4687_v39  ;;  %v4691_v40 = vadd.f32 %v4690_v42, %v3374_v38 }
 0x228   :  { %3609 = vst.msk [vmem:[%s6420_s3 + $0x378] sm:$0xff] %vm416_vm1, %v4689_v13 }
 0x229   :  { %3607 = vst.msk [vmem:[%s6420_s3 + $0x368] sm:$0xff] %vm416_vm1, %v4691_v40 }

// kernel: ms_tcn_forward.6
= control target key start
LH: loop header
LB: loop body
LE: loop exit
PB: predicated region body
PF: predicated region fallthrough
CT: control target
= control target key end

     0   :  { %vm585_vm0 = vcmask 1040384   ;;  %vm416_vm1 = vcmask 15360   ;;  %s6417_s1 = inlined_call_operand.vmem [shape: bf16[3,2,2], index: 1, kind: input, shape index: {}]   ;;  %s6418_s0 = inlined_call_operand.vmem [shape: bf16[1008,2], index: 0, kind: input, shape index: {}]   ;;  %s6419_s2 = inlined_call_operand.vmem [shape: f32[1,2], index: 2, kind: input, shape index: {}]   ;;  %s6420_s3 = inlined_call_operand.vmem [shape: f32[896,2], index: 3, kind: output, shape index: {}]  }
   0x1   :  { %v135_v0 = vld [vmem:[%s6417_s1] sm:$0x1]  ;;  %v3727_v1 = vld [vmem:[%s6417_s1 + $0x1] sm:$0x1]  ;;  %v4810_v6 = vld [vmem:[%s6418_s0 + $0x8] sm:$0xff]  }
   0x2   :  { %4804 = vmatprep.subr.msk.bf16.mxu1 %vm585_vm0, %v135_v0  ;;  %4805 = vmatprep.subr.msk.bf16.mxu0 %vm585_vm0, %v3727_v1  ;;  %v587_v2 = vsel %vm585_vm0, %v135_v0, 0  ;;  %v1745_v3 = vsel %vm585_vm0, %v3727_v1, 0  ;;  %v4808_v4 = vld [vmem:[%s6418_s0] sm:$0xff]   ;;  %v4812_v10 = vld [vmem:[%s6418_s0 + $0x10] sm:$0xff]   ;;  %v4814_v12 = vld [vmem:[%s6418_s0 + $0x18] sm:$0xff]  }
   0x3   :  { %v4809_v5 = vld [vmem:[%s6418_s0 + $0x1c] sm:$0xff]   ;;  %4125 = vmatpush3.bf16.msra.mxu1 %v587_v2  ;;  %4239 = vmatpush3.bf16.msra.mxu0 %v1745_v3  ;;  %v4811_v7 = vld [vmem:[%s6418_s0 + $0x24] sm:$0xff]   ;;  %v4813_v11 = vld [vmem:[%s6418_s0 + $0x2c] sm:$0xff]  }
   0x4   :  { %4126 = vmatprep.mubr.msk.bf16.mxu1 %vm416_vm1, %v4808_v4  ;;  %4240 = vmatprep.mubr.msk.bf16.mxu0 %vm416_vm1, %v4809_v5  ;;  %v3840_v8 = vld [vmem:[%s6417_s1 + $0x2] sm:$0x1]  ;;  %v4815_v13 = vld [vmem:[%s6418_s0 + $0x34] sm:$0xff]   ;;  %v4818_v16 = vld [vmem:[%s6418_s0 + $0x28] sm:$0xff]  }
   0x5   :  { %4806 = vmatprep.subr.msk.bf16.mxu1 %vm585_vm0, %v3727_v1  ;;  %4807 = vmatprep.subr.msk.bf16.mxu0 %vm585_vm0, %v3840_v8  ;;  %v2903_v9 = vsel %vm585_vm0, %v3840_v8, 0  ;;  %v4816_v14 = vld [vmem:[%s6418_s0 + $0x20] sm:$0xff]   ;;  %v4820_v18 = vld [vmem:[%s6418_s0 + $0x30] sm:$0xff]   ;;  %v4822_v20 = vld [vmem:[%s6418_s0 + $0x38] sm:$0xff]  }
   0x6   :  { %4127 = vmatmul.mubr.msk.bf16.vlgmr.msra.gmra.mrb[0].mxu1 %vm416_vm1, %v4810_v6  ;;  %4241 = vmatmul.mubr.msk.bf16.vlgmr.msra.gmra.mrb[0].mxu0 %vm416_vm1, %v4811_v7  ;;  %v4817_v15 = vld [vmem:[%s6418_s0 + $0x3c] sm:$0xff]   ;;  %v4819_v17 = vld [vmem:[%s6418_s0 + $0x44] sm:$0xff]   ;;  %v4821_v19 = vld [vmem:[%s6418_s0 + $0x4c] sm:$0xff]  }
   0x7   :  { %4467 = vmatpush3.bf16.msra.mxu1 %v1745_v3  ;;  %4353 = vmatpush3.bf16.msra.mxu0 %v2903_v9  ;;  %v4823_v21 = vld [vmem:[%s6418_s0 + $0x54] sm:$0xff]   ;;  %v4824_v22 = vld [vmem:[%s6418_s0 + $0x40] sm:$0xff]   ;;  %v4826_v24 = vld [vmem:[%s6418_s0 + $0x48] sm:$0xff]  }
   0x8   :  { %4130 = vmatprep.mubr.msk.bf16.mxu1 %vm416_vm1, %v4812_v10  ;;  %4244 = vmatprep.mubr.msk.bf16.mxu0 %vm416_vm1, %v4813_v11  ;;  %v4825_v23 = vld [vmem:[%s6418_s0 + $0x5c] sm:$0xff]   ;;  %v4827_v25 = vld [vmem:[%s6418_s0 + $0x64] sm:$0xff]   ;;  %v4828_v26 = vld [vmem:[%s6418_s0 + $0x50] sm:$0xff]  }
   0x9   :  { %v4829_v27 = vld [vmem:[%s6418_s0 + $0x6c] sm:$0xff]   ;;  %v4830_v28 = vld [vmem:[%s6418_s0 + $0x58] sm:$0xff]   ;;  %v4832_v30 = vld [vmem:[%s6418_s0 + $0x60] sm:$0xff]  }
   0xa   :  { %v4831_v29 = vld [vmem:[%s6418_s0 + $0x74] sm:$0xff]   ;;  %v4833_v31 = vld [vmem:[%s6418_s0 + $0x7c] sm:$0xff]   ;;  %v4834_v32 = vld [vmem:[%s6418_s0 + $0x68] sm:$0xff]  }
   0xb   :  { %v4835_v33 = vld [vmem:[%s6418_s0 + $0x84] sm:$0xff]   ;;  %v4836_v34 = vld [vmem:[%s6418_s0 + $0x70] sm:$0xff]   ;;  %v4838_v36 = vld [vmem:[%s6418_s0 + $0x78] sm:$0xff]  }
   0xc   :  { %v4837_v35 = vld [vmem:[%s6418_s0 + $0x8c] sm:$0xff]   ;;  %v4839_v37 = vld [vmem:[%s6418_s0 + $0x94] sm:$0xff]   ;;  %v4840_v38 = vld [vmem:[%s6418_s0 + $0x80] sm:$0xff]  }
   0xd   :  { %v4841_v39 = vld [vmem:[%s6418_s0 + $0x9c] sm:$0xff]   ;;  %v4842_v40 = vld [vmem:[%s6418_s0 + $0x88] sm:$0xff]   ;;  %v4844_v42 = vld [vmem:[%s6418_s0 + $0x90] sm:$0xff]  }
   0xe   :  { %4131 = vmatmul.mubr.msk.bf16.gmra.mrb[4].mxu1 %vm416_vm1, %v4814_v12  ;;  %4245 = vmatmul.mubr.msk.bf16.gmra.mrb[4].mxu0 %vm416_vm1, %v4815_v13  ;;  %v4843_v41 = vld [vmem:[%s6418_s0 + $0xa4] sm:$0xff]   ;;  %v4845_v43 = vld [vmem:[%s6418_s0 + $0xac] sm:$0xff]   ;;  %v4846_v44 = vld [vmem:[%s6418_s0 + $0x98] sm:$0xff]  }
   0xf   :  { %4134 = vmatprep.mubr.msk.bf16.mxu1 %vm416_vm1, %v4816_v14  ;;  %4248 = vmatprep.mubr.msk.bf16.mxu0 %vm416_vm1, %v4817_v15  ;;  %v4847_v45 = vld [vmem:[%s6418_s0 + $0xb4] sm:$0xff]   ;;  %v4848_v46 = vld [vmem:[%s6418_s0 + $0xa0] sm:$0xff]   ;;  %v4850_v48 = vld [vmem:[%s6418_s0 + $0xa8] sm:$0xff]  }
  0x10   :  { %v4849_v47 = vld [vmem:[%s6418_s0 + $0xbc] sm:$0xff]   ;;  %v4851_v49 = vld [vmem:[%s6418_s0 + $0xc4] sm:$0xff]   ;;  %v4852_v50 = vld [vmem:[%s6418_s0 + $0xb0] sm:$0xff]  }
  0x11   :  { %v4853_v51 = vld [vmem:[%s6418_s0 + $0xcc] sm:$0xff]   ;;  %v4854_v52 = vld [vmem:[%s6418_s0 + $0xb8] sm:$0xff]   ;;  %v4856_v54 = vld [vmem:[%s6418_s0 + $0xc0] sm:$0xff]  }
  0x12   :  { %v4855_v53 = vld [vmem:[%s6418_s0 + $0xd4] sm:$0xff]   ;;  %v4857_v55 = vld [vmem:[%s6418_s0 + $0xdc] sm:$0xff]   ;;  %v4858_v56 = vld [vmem:[%s6418_s0 + $0xc8] sm:$0xff]  }
  0x13   :  { %v4859_v57 = vld [vmem:[%s6418_s0 + $0xe4] sm:$0xff]   ;;  %v4860_v58 = vld [vmem:[%s6418_s0 + $0xd0] sm:$0xff]   ;;  %v4862_v60 = vld [vmem:[%s6418_s0 + $0xd8] sm:$0xff]  }
  0x14   :  { %v4861_v59 = vld [vmem:[%s6418_s0 + $0xec] sm:$0xff]   ;;  %v4863_v61 = vld [vmem:[%s6418_s0 + $0xf4] sm:$0xff]   ;;  %v4864_v62 = vld [vmem:[%s6418_s0 + $0xe0] sm:$0xff]  }
  0x15   :  { %v4865_v63 = vld [vmem:[%s6418_s0 + $0x38] sm:$0xff]   ;;  %v4866_v0 = vld [vmem:[%s6418_s0 + $0xe8] sm:$0xff]   ;;  %v4867_v1 = vld [vmem:[%s6418_s0 + $0x40] sm:$0xff]  }
  0x16   :  { %4135 = vmatmul.mubr.msk.bf16.gmra.mrb[8].mxu1 %vm416_vm1, %v4818_v16  ;;  %4249 = vmatmul.mubr.msk.bf16.gmra.mrb[8].mxu0 %vm416_vm1, %v4819_v17  ;;  %v4868_v2 = vld [vmem:[%s6418_s0 + $0xf0] sm:$0xff]   ;;  %v4869_v3 = vld [vmem:[%s6418_s0 + $0x48] sm:$0xff]   ;;  %v4870_v4 = vld [vmem:[%s6418_s0 + $0xf8] sm:$0xff]  }
  0x17   :  { %4138 = vmatprep.mubr.msk.bf16.mxu1 %vm416_vm1, %v4820_v18  ;;  %4252 = vmatprep.mubr.msk.bf16.mxu0 %vm416_vm1, %v4821_v19  ;;  %v4871_v5 = vld [vmem:[%s6418_s0 + $0x50] sm:$0xff]   ;;  %v4872_v6 = vld [vmem:[%s6418_s0 + $0x100] sm:$0xff]   ;;  %v4873_v7 = vld [vmem:[%s6418_s0 + $0x58] sm:$0xff]  }
  0x18   :  { %v4874_v8 = vld [vmem:[%s6418_s0 + $0x108] sm:$0xff]   ;;  %v4875_v9 = vld [vmem:[%s6418_s0 + $0x60] sm:$0xff]   ;;  %v4876_v10 = vld [vmem:[%s6418_s0 + $0x110] sm:$0xff]  }
  0x19   :  { %v4877_v11 = vld [vmem:[%s6418_s0 + $0x68] sm:$0xff]   ;;  %v4878_v12 = vld [vmem:[%s6418_s0 + $0x118] sm:$0xff]   ;;  %v4879_v13 = vld [vmem:[%s6418_s0 + $0x70] sm:$0xff]  }
  0x1a   :  { %v4880_v14 = vld [vmem:[%s6418_s0 + $0x120] sm:$0xff]   ;;  %v4881_v15 = vld [vmem:[%s6418_s0 + $0x78] sm:$0xff]   ;;  %v4882_v16 = vld [vmem:[%s6418_s0 + $0x128] sm:$0xff]  }
  0x1b   :  { %v4883_v17 = vld [vmem:[%s6418_s0 + $0x80] sm:$0xff]   ;;  %v4884_v18 = vld [vmem:[%s6418_s0 + $0x130] sm:$0xff]   ;;  %v4885_v19 = vld [vmem:[%s6418_s0 + $0x88] sm:$0xff]  }
  0x1e   :  { %4139 = vmatmul.mubr.msk.bf16.gmra.mrb[12].mxu1 %vm416_vm1, %v4822_v20  ;;  %4253 = vmatmul.mubr.msk.bf16.gmra.mrb[12].mxu0 %vm416_vm1, %v4823_v21  ;;  %v4886_v20 = vld [vmem:[%s6418_s0 + $0x138] sm:$0xff]   ;;  %v4887_v21 = vld [vmem:[%s6418_s0 + $0x90] sm:$0xff]  }
  0x1f   :  { %4142 = vmatprep.mubr.msk.bf16.mxu1 %vm416_vm1, %v4824_v22  ;;  %4256 = vmatprep.mubr.msk.bf16.mxu0 %vm416_vm1, %v4825_v23  ;;  %v4888_v22 = vld [vmem:[%s6418_s0 + $0x140] sm:$0xff]   ;;  %v4889_v23 = vld [vmem:[%s6418_s0 + $0x98] sm:$0xff]  }
  0x26   :  { %4143 = vmatmul.mubr.msk.bf16.gmra.mrb[16].mxu1 %vm416_vm1, %v4826_v24  ;;  %4257 = vmatmul.mubr.msk.bf16.gmra.mrb[16].mxu0 %vm416_vm1, %v4827_v25  ;;  %v4890_v24 = vld [vmem:[%s6418_s0 + $0x148] sm:$0xff]   ;;  %v4891_v25 = vld [vmem:[%s6418_s0 + $0xa0] sm:$0xff]  }
  0x27   :  { %4146 = vmatprep.mubr.msk.bf16.mxu1 %vm416_vm1, %v4828_v26  ;;  %4260 = vmatprep.mubr.msk.bf16.mxu0 %vm416_vm1, %v4829_v27  ;;  %v4892_v26 = vld [vmem:[%s6418_s0 + $0x150] sm:$0xff]   ;;  %v4893_v27 = vld [vmem:[%s6418_s0 + $0xa8] sm:$0xff]  }
  0x2e   :  { %4147 = vmatmul.mubr.msk.bf16.gmra.mrb[20].mxu1 %vm416_vm1, %v4830_v28  ;;  %4261 = vmatmul.mubr.msk.bf16.gmra.mrb[20].mxu0 %vm416_vm1, %v4831_v29  ;;  %v4894_v28 = vld [vmem:[%s6418_s0 + $0x158] sm:$0xff]   ;;  %v4895_v29 = vld [vmem:[%s6418_s0 + $0xb0] sm:$0xff]  }
  0x2f   :  { %4150 = vmatprep.mubr.msk.bf16.mxu1 %vm416_vm1, %v4832_v30  ;;  %4264 = vmatprep.mubr.msk.bf16.mxu0 %vm416_vm1, %v4833_v31  ;;  %v4896_v30 = vld [vmem:[%s6418_s0 + $0x160] sm:$0xff]   ;;  %v4897_v31 = vld [vmem:[%s6418_s0 + $0xb8] sm:$0xff]  }
  0x36   :  { %4151 = vmatmul.mubr.msk.bf16.gmra.mrb[24].mxu1 %vm416_vm1, %v4834_v32  ;;  %4265 = vmatmul.mubr.msk.bf16.gmra.mrb[24].mxu0 %vm416_vm1, %v4835_v33  ;;  %v4898_v32 = vld [vmem:[%s6418_s0 + $0x168] sm:$0xff]   ;;  %v4899_v33 = vld [vmem:[%s6418_s0 + $0xc0] sm:$0xff]  }
  0x37   :  { %4154 = vmatprep.mubr.msk.bf16.mxu1 %vm416_vm1, %v4836_v34  ;;  %4268 = vmatprep.mubr.msk.bf16.mxu0 %vm416_vm1, %v4837_v35  ;;  %v4900_v34 = vld [vmem:[%s6418_s0 + $0x170] sm:$0xff]   ;;  %v4901_v35 = vld [vmem:[%s6418_s0 + $0xc8] sm:$0xff]  }
  0x3e   :  { %4155 = vmatmul.mubr.msk.bf16.gmra.mrb[28].mxu1 %vm416_vm1, %v4838_v36  ;;  %4269 = vmatmul.mubr.msk.bf16.gmra.mrb[28].mxu0 %vm416_vm1, %v4839_v37  ;;  %v4902_v36 = vld [vmem:[%s6418_s0 + $0x178] sm:$0xff]   ;;  %v4903_v37 = vld [vmem:[%s6418_s0 + $0xd0] sm:$0xff]  }
  0x3f   :  { %4158 = vmatprep.mubr.msk.bf16.mxu1 %vm416_vm1, %v4840_v38  ;;  %4272 = vmatprep.mubr.msk.bf16.mxu0 %vm416_vm1, %v4841_v39  ;;  %v4904_v38 = vld [vmem:[%s6418_s0 + $0x180] sm:$0xff]   ;;  %v4905_v39 = vld [vmem:[%s6418_s0 + $0xd8] sm:$0xff]  }
  0x46   :  { %4159 = vmatmul.mubr.msk.bf16.gmra.mrb[32].mxu1 %vm416_vm1, %v4842_v40  ;;  %4273 = vmatmul.mubr.msk.bf16.gmra.mrb[32].mxu0 %vm416_vm1, %v4843_v41  ;;  %v4906_v40 = vld [vmem:[%s6418_s0 + $0x188] sm:$0xff]   ;;  %v4907_v41 = vld [vmem:[%s6418_s0 + $0xe0] sm:$0xff]  }
  0x47   :  { %4162 = vmatprep.mubr.msk.bf16.mxu1 %vm416_vm1, %v4844_v42  ;;  %4276 = vmatprep.mubr.msk.bf16.mxu0 %vm416_vm1, %v4845_v43  ;;  %v4908_v42 = vld [vmem:[%s6418_s0 + $0x190] sm:$0xff]   ;;  %v4909_v43 = vld [vmem:[%s6418_s0 + $0xe8] sm:$0xff]  }
  0x4e   :  { %4163 = vmatmul.mubr.msk.bf16.gmra.mrb[36].mxu1 %vm416_vm1, %v4846_v44  ;;  %4277 = vmatmul.mubr.msk.bf16.gmra.mrb[36].mxu0 %vm416_vm1, %v4847_v45  ;;  %v4910_v44 = vld [vmem:[%s6418_s0 + $0x198] sm:$0xff]   ;;  %v4911_v45 = vld [vmem:[%s6418_s0 + $0xf0] sm:$0xff]  }
  0x4f   :  { %4166 = vmatprep.mubr.msk.bf16.mxu1 %vm416_vm1, %v4848_v46  ;;  %4280 = vmatprep.mubr.msk.bf16.mxu0 %vm416_vm1, %v4849_v47  ;;  %v4912_v46 = vld [vmem:[%s6418_s0 + $0x1a0] sm:$0xff]   ;;  %v4913_v47 = vld [vmem:[%s6418_s0 + $0xf8] sm:$0xff]  }
  0x56   :  { %4167 = vmatmul.mubr.msk.bf16.gmra.mrb[40].mxu1 %vm416_vm1, %v4850_v48  ;;  %4281 = vmatmul.mubr.msk.bf16.gmra.mrb[40].mxu0 %vm416_vm1, %v4851_v49  ;;  %v4914_v48 = vld [vmem:[%s6418_s0 + $0x1a8] sm:$0xff]   ;;  %v4915_v49 = vld [vmem:[%s6418_s0 + $0x100] sm:$0xff]  }
  0x57   :  { %4170 = vmatprep.mubr.msk.bf16.mxu1 %vm416_vm1, %v4852_v50  ;;  %4284 = vmatprep.mubr.msk.bf16.mxu0 %vm416_vm1, %v4853_v51  ;;  %v4916_v50 = vld [vmem:[%s6418_s0 + $0x1b0] sm:$0xff]   ;;  %v4917_v51 = vld [vmem:[%s6418_s0 + $0x108] sm:$0xff]  }
  0x5e   :  { %4171 = vmatmul.mubr.msk.bf16.gmra.mrb[44].mxu1 %vm416_vm1, %v4854_v52  ;;  %4285 = vmatmul.mubr.msk.bf16.gmra.mrb[44].mxu0 %vm416_vm1, %v4855_v53 }
  0x5f   :  { %4174 = vmatprep.mubr.msk.bf16.mxu1 %vm416_vm1, %v4856_v54  ;;  %4288 = vmatprep.mubr.msk.bf16.mxu0 %vm416_vm1, %v4857_v55  ;;  %v4918_v54 = vld [vmem:[%s6418_s0 + $0x1b8] sm:$0xff]  }
  0x66   :  { %4175 = vmatmul.mubr.msk.bf16.gmra.mrb[48].mxu1 %vm416_vm1, %v4858_v56  ;;  %4289 = vmatmul.mubr.msk.bf16.gmra.mrb[48].mxu0 %vm416_vm1, %v4859_v57  ;;  %v4919_v56 = vld [vmem:[%s6418_s0 + $0x110] sm:$0xff]   ;;  %v4920_v57 = vld [vmem:[%s6418_s0 + $0xfc] sm:$0xff]  }
  0x67   :  { %4178 = vmatprep.mubr.msk.bf16.mxu1 %vm416_vm1, %v4860_v58  ;;  %4292 = vmatprep.mubr.msk.bf16.mxu0 %vm416_vm1, %v4861_v59  ;;  %v4921_v59 = vld [vmem:[%s6418_s0 + $0x118] sm:$0xff]  }
  0x6e   :  { %4179 = vmatmul.mubr.msk.bf16.gmra.mrb[52].mxu1 %vm416_vm1, %v4862_v60  ;;  %4293 = vmatmul.mubr.msk.bf16.gmra.mrb[52].mxu0 %vm416_vm1, %v4863_v61 }
  0x6f   :  { %4182 = vmatprep.mubr.msk.bf16.mxu1 %vm416_vm1, %v4864_v62  ;;  %4354 = vmatprep.mubr.msk.bf16.mxu0 %vm416_vm1, %v4865_v63  ;;  %v4922_v62 = vld [vmem:[%s6418_s0 + $0x104] sm:$0xff]  }
  0x76   :  { %4183 = vmatmul.mubr.msk.bf16.gmra.mrb[56].mxu1 %vm416_vm1, %v4866_v0  ;;  %4355 = vmatmul.mubr.msk.bf16.vlgmr.msra.gmra.mrb[0].mxu0 %vm416_vm1, %v4867_v1  ;;  %v4923_v0 = vld [vmem:[%s6418_s0 + $0x120] sm:$0xff]   ;;  %v4924_v1 = vld [vmem:[%s6418_s0 + $0x10c] sm:$0xff]  }
  0x77   :  { %4186 = vmatprep.mubr.msk.bf16.mxu1 %vm416_vm1, %v4868_v2  ;;  %4358 = vmatprep.mubr.msk.bf16.mxu0 %vm416_vm1, %v4869_v3  ;;  %v4925_v3 = vld [vmem:[%s6418_s0 + $0x128] sm:$0xff]  }
  0x7e   :  { %4187 = vmatmul.mubr.msk.bf16.gmra.mrb[60].mxu1 %vm416_vm1, %v4870_v4  ;;  %4359 = vmatmul.mubr.msk.bf16.gmra.mrb[4].mxu0 %vm416_vm1, %v4871_v5 }
  0x7f   :  { %4190 = vmatprep.mubr.msk.bf16.mxu1 %vm416_vm1, %v4872_v6  ;;  %4362 = vmatprep.mubr.msk.bf16.mxu0 %vm416_vm1, %v4873_v7  ;;  %v4926_v6 = vld [vmem:[%s6418_s0 + $0x114] sm:$0xff]  }
  0x86   :  { %4191 = vmatmul.mubr.msk.bf16.gmra.mrb[64].mxu1 %vm416_vm1, %v4874_v8  ;;  %4363 = vmatmul.mubr.msk.bf16.gmra.mrb[8].mxu0 %vm416_vm1, %v4875_v9  ;;  %v4927_v8 = vld [vmem:[%s6418_s0 + $0x130] sm:$0xff]   ;;  %v4928_v9 = vld [vmem:[%s6418_s0 + $0x11c] sm:$0xff]  }
  0x87   :  { %4194 = vmatprep.mubr.msk.bf16.mxu1 %vm416_vm1, %v4876_v10  ;;  %4366 = vmatprep.mubr.msk.bf16.mxu0 %vm416_vm1, %v4877_v11  ;;  %v4929_v11 = vld [vmem:[%s6418_s0 + $0x138] sm:$0xff]  }
  0x8e   :  { %4195 = vmatmul.mubr.msk.bf16.gmra.mrb[68].mxu1 %vm416_vm1, %v4878_v12  ;;  %4367 = vmatmul.mubr.msk.bf16.gmra.mrb[12].mxu0 %vm416_vm1, %v4879_v13 }
  0x8f   :  { %4198 = vmatprep.mubr.msk.bf16.mxu1 %vm416_vm1, %v4880_v14  ;;  %4370 = vmatprep.mubr.msk.bf16.mxu0 %vm416_vm1, %v4881_v15  ;;  %v4930_v14 = vld [vmem:[%s6418_s0 + $0x124] sm:$0xff]  }
  0x96   :  { %4199 = vmatmul.mubr.msk.bf16.gmra.mrb[72].mxu1 %vm416_vm1, %v4882_v16  ;;  %4371 = vmatmul.mubr.msk.bf16.gmra.mrb[16].mxu0 %vm416_vm1, %v4883_v17  ;;  %v4931_v16 = vld [vmem:[%s6418_s0 + $0x140] sm:$0xff]   ;;  %v4932_v17 = vld [vmem:[%s6418_s0 + $0x12c] sm:$0xff]  }
  0x97   :  { %4202 = vmatprep.mubr.msk.bf16.mxu1 %vm416_vm1, %v4884_v18  ;;  %4374 = vmatprep.mubr.msk.bf16.mxu0 %vm416_vm1, %v4885_v19  ;;  %v4933_v19 = vld [vmem:[%s6418_s0 + $0x148] sm:$0xff]  }
  0x9e   :  { %4203 = vmatmul.mubr.msk.bf16.gmra.mrb[76].mxu1 %vm416_vm1, %v4886_v20  ;;  %4375 = vmatmul.mubr.msk.bf16.gmra.mrb[20].mxu0 %vm416_vm1, %v4887_v21 }
  0x9f   :  { %4206 = vmatprep.mubr.msk.bf16.mxu1 %vm416_vm1, %v4888_v22  ;;  %4378 = vmatprep.mubr.msk.bf16.mxu0 %vm416_vm1, %v4889_v23  ;;  %v4934_v22 = vld [vmem:[%s6418_s0 + $0x134] sm:$0xff]  }
  0xa6   :  { %4207 = vmatmul.mubr.msk.bf16.gmra.mrb[80].mxu1 %vm416_vm1, %v4890_v24  ;;  %4379 = vmatmul.mubr.msk.bf16.gmra.mrb[24].mxu0 %vm416_vm1, %v4891_v25  ;;  %v4935_v24 = vld [vmem:[%s6418_s0 + $0x150] sm:$0xff]   ;;  %v4936_v25 = vld [vmem:[%s6418_s0 + $0x13c] sm:$0xff]  }
  0xa7   :  { %4210 = vmatprep.mubr.msk.bf16.mxu1 %vm416_vm1, %v4892_v26  ;;  %4382 = vmatprep.mubr.msk.bf16.mxu0 %vm416_vm1, %v4893_v27  ;;  %v4937_v27 = vld [vmem:[%s6418_s0 + $0x158] sm:$0xff]  }
  0xae   :  { %4211 = vmatmul.mubr.msk.bf16.gmra.mrb[84].mxu1 %vm416_vm1, %v4894_v28  ;;  %4383 = vmatmul.mubr.msk.bf16.gmra.mrb[28].mxu0 %vm416_vm1, %v4895_v29 }
  0xaf   :  { %4214 = vmatprep.mubr.msk.bf16.mxu1 %vm416_vm1, %v4896_v30  ;;  %4386 = vmatprep.mubr.msk.bf16.mxu0 %vm416_vm1, %v4897_v31  ;;  %v4938_v30 = vld [vmem:[%s6418_s0 + $0x144] sm:$0xff]  }
  0xb6   :  { %4215 = vmatmul.mubr.msk.bf16.gmra.mrb[88].mxu1 %vm416_vm1, %v4898_v32  ;;  %4387 = vmatmul.mubr.msk.bf16.gmra.mrb[32].mxu0 %vm416_vm1, %v4899_v33  ;;  %v4939_v32 = vld [vmem:[%s6418_s0 + $0x160] sm:$0xff]   ;;  %v4940_v33 = vld [vmem:[%s6418_s0 + $0x14c] sm:$0xff]  }
  0xb7   :  { %4218 = vmatprep.mubr.msk.bf16.mxu1 %vm416_vm1, %v4900_v34  ;;  %4390 = vmatprep.mubr.msk.bf16.mxu0 %vm416_vm1, %v4901_v35  ;;  %v4941_v35 = vld [vmem:[%s6418_s0 + $0x168] sm:$0xff]  }
  0xbe   :  { %4219 = vmatmul.mubr.msk.bf16.gmra.mrb[92].mxu1 %vm416_vm1, %v4902_v36  ;;  %4391 = vmatmul.mubr.msk.bf16.gmra.mrb[36].mxu0 %vm416_vm1, %v4903_v37 }
  0xbf   :  { %4222 = vmatprep.mubr.msk.bf16.mxu1 %vm416_vm1, %v4904_v38  ;;  %4394 = vmatprep.mubr.msk.bf16.mxu0 %vm416_vm1, %v4905_v39  ;;  %v4942_v38 = vld [vmem:[%s6418_s0 + $0x154] sm:$0xff]  }
  0xc6   :  { %4223 = vmatmul.mubr.msk.bf16.gmra.mrb[96].mxu1 %vm416_vm1, %v4906_v40  ;;  %4395 = vmatmul.mubr.msk.bf16.gmra.mrb[40].mxu0 %vm416_vm1, %v4907_v41  ;;  %v4943_v40 = vld [vmem:[%s6418_s0 + $0x170] sm:$0xff]   ;;  %v4944_v41 = vld [vmem:[%s6418_s0 + $0x15c] sm:$0xff]  }
  0xc7   :  { %4226 = vmatprep.mubr.msk.bf16.mxu1 %vm416_vm1, %v4908_v42  ;;  %4398 = vmatprep.mubr.msk.bf16.mxu0 %vm416_vm1, %v4909_v43  ;;  %v4945_v43 = vld [vmem:[%s6418_s0 + $0x178] sm:$0xff]  }
  0xce   :  { %4227 = vmatmul.mubr.msk.bf16.gmra.mrb[100].mxu1 %vm416_vm1, %v4910_v44  ;;  %4399 = vmatmul.mubr.msk.bf16.gmra.mrb[44].mxu0 %vm416_vm1, %v4911_v45 }
  0xcf   :  { %4230 = vmatprep.mubr.msk.bf16.mxu1 %vm416_vm1, %v4912_v46  ;;  %4402 = vmatprep.mubr.msk.bf16.mxu0 %vm416_vm1, %v4913_v47  ;;  %v4946_v46 = vld [vmem:[%s6418_s0 + $0x164] sm:$0xff]  }
  0xd6   :  { %4231 = vmatmul.mubr.msk.bf16.gmra.mrb[104].mxu1 %vm416_vm1, %v4914_v48  ;;  %4403 = vmatmul.mubr.msk.bf16.gmra.mrb[48].mxu0 %vm416_vm1, %v4915_v49  ;;  %v4947_v48 = vld [vmem:[%s6418_s0 + $0x180] sm:$0xff]   ;;  %v4948_v49 = vld [vmem:[%s6418_s0 + $0x16c] sm:$0xff]  }
  0xd7   :  { %4234 = vmatprep.mubr.msk.bf16.mxu1 %vm416_vm1, %v4916_v50  ;;  %4406 = vmatprep.mubr.msk.bf16.mxu0 %vm416_vm1, %v4917_v51  ;;  %v4949_v51 = vld [vmem:[%s6418_s0 + $0x188] sm:$0xff]  }
  0xd9   :  { %v5452_v52 = vpop.f32.mrb[0].mxu1 }
  0xda   :  { %v5454_v53 = vpop.f32.mrb[1].mxu1 }
  0xdb   :  { %v5459_v55 = vpop.f32.mrb[2].mxu1 }
  0xdc   :  { %v5467_v58 = vpop.f32.mrb[3].mxu1 }
  0xde   :  { %4235 = vmatmul.mubr.msk.bf16.gmra.mrb[108].mxu1 %vm416_vm1, %v4918_v54  ;;  %4407 = vmatmul.mubr.msk.bf16.gmra.mrb[52].mxu0 %vm416_vm1, %v4919_v56 }
  0xdf   :  { %4296 = vmatprep.mubr.msk.bf16.mxu1 %vm416_vm1, %v4920_v57  ;;  %4410 = vmatprep.mubr.msk.bf16.mxu0 %vm416_vm1, %v4921_v59  ;;  %v4950_v57 = vld [vmem:[%s6418_s0 + $0x174] sm:$0xff]  }
  0xe1   :  { %v5476_v60 = vpop.f32.mrb[4].mxu1 }
  0xe2   :  { %v5478_v61 = vpop.f32.mrb[5].mxu1 }
  0xe3   :  { %v5483_v63 = vpop.f32.mrb[6].mxu1 }
  0xe4   :  { %v5491_v2 = vpop.f32.mrb[7].mxu1 }
  0xe6   :  { %4297 = vmatmul.mubr.msk.bf16.vlgmr.msra.gmra.mrb[56].mxu1 %vm416_vm1, %v4922_v62  ;;  %4411 = vmatmul.mubr.msk.bf16.gmra.mrb[56].mxu0 %vm416_vm1, %v4923_v0  ;;  %v4951_v62 = vld [vmem:[%s6418_s0 + $0x190] sm:$0xff]   ;;  %v4952_v0 = vld [vmem:[%s6418_s0 + $0x17c] sm:$0xff]  }
  0xe7   :  { %4300 = vmatprep.mubr.msk.bf16.mxu1 %vm416_vm1, %v4924_v1  ;;  %4414 = vmatprep.mubr.msk.bf16.mxu0 %vm416_vm1, %v4925_v3  ;;  %v4953_v3 = vld [vmem:[%s6418_s0 + $0x198] sm:$0xff]  }
  0xe9   :  { %v5500_v4 = vpop.f32.mrb[8].mxu1 }
  0xea   :  { %v5502_v5 = vpop.f32.mrb[9].mxu1 }
  0xeb   :  { %v5507_v7 = vpop.f32.mrb[10].mxu1 }
  0xec   :  { %v5515_v10 = vpop.f32.mrb[11].mxu1 }
  0xee   :  { %4301 = vmatmul.mubr.msk.bf16.gmra.mrb[60].mxu1 %vm416_vm1, %v4926_v6  ;;  %4415 = vmatmul.mubr.msk.bf16.gmra.mrb[60].mxu0 %vm416_vm1, %v4927_v8 }
  0xef   :  { %4304 = vmatprep.mubr.msk.bf16.mxu1 %vm416_vm1, %v4928_v9  ;;  %4418 = vmatprep.mubr.msk.bf16.mxu0 %vm416_vm1, %v4929_v11  ;;  %v4954_v9 = vld [vmem:[%s6418_s0 + $0x184] sm:$0xff]  }
  0xf1   :  { %v5524_v12 = vpop.f32.mrb[12].mxu1 }
  0xf2   :  { %v5526_v13 = vpop.f32.mrb[13].mxu1 }
  0xf3   :  { %v5531_v15 = vpop.f32.mrb[14].mxu1 }
  0xf4   :  { %v5539_v18 = vpop.f32.mrb[15].mxu1 }
  0xf6   :  { %4305 = vmatmul.mubr.msk.bf16.gmra.mrb[64].mxu1 %vm416_vm1, %v4930_v14  ;;  %4419 = vmatmul.mubr.msk.bf16.gmra.mrb[64].mxu0 %vm416_vm1, %v4931_v16  ;;  %v4955_v14 = vld [vmem:[%s6418_s0 + $0x1a0] sm:$0xff]   ;;  %v4956_v16 = vld [vmem:[%s6418_s0 + $0x18c] sm:$0xff]  }
  0xf7   :  { %4308 = vmatprep.mubr.msk.bf16.mxu1 %vm416_vm1, %v4932_v17  ;;  %4422 = vmatprep.mubr.msk.bf16.mxu0 %vm416_vm1, %v4933_v19  ;;  %v4957_v19 = vld [vmem:[%s6418_s0 + $0x1a8] sm:$0xff]  }
  0xf9   :  { %v5548_v20 = vpop.f32.mrb[16].mxu1 }
  0xfa   :  { %v5550_v21 = vpop.f32.mrb[17].mxu1 }
  0xfb   :  { %v5555_v23 = vpop.f32.mrb[18].mxu1 }
  0xfc   :  { %v5563_v26 = vpop.f32.mrb[19].mxu1 }
  0xfe   :  { %4309 = vmatmul.mubr.msk.bf16.gmra.mrb[68].mxu1 %vm416_vm1, %v4934_v22  ;;  %4423 = vmatmul.mubr.msk.bf16.gmra.mrb[68].mxu0 %vm416_vm1, %v4935_v24 }
  0xff   :  { %4312 = vmatprep.mubr.msk.bf16.mxu1 %vm416_vm1, %v4936_v25  ;;  %4426 = vmatprep.mubr.msk.bf16.mxu0 %vm416_vm1, %v4937_v27  ;;  %v4958_v25 = vld [vmem:[%s6418_s0 + $0x194] sm:$0xff]  }
 0x101   :  { %v5572_v28 = vpop.f32.mrb[20].mxu1 }
 0x102   :  { %v5574_v29 = vpop.f32.mrb[21].mxu1 }
 0x103   :  { %v5579_v31 = vpop.f32.mrb[22].mxu1 }
 0x104   :  { %v5587_v34 = vpop.f32.mrb[23].mxu1 }
 0x106   :  { %4313 = vmatmul.mubr.msk.bf16.gmra.mrb[72].mxu1 %vm416_vm1, %v4938_v30  ;;  %4427 = vmatmul.mubr.msk.bf16.gmra.mrb[72].mxu0 %vm416_vm1, %v4939_v32  ;;  %v4959_v30 = vld [vmem:[%s6418_s0 + $0x1b0] sm:$0xff]   ;;  %v4960_v32 = vld [vmem:[%s6418_s0 + $0x19c] sm:$0xff]  }
 0x107   :  { %4316 = vmatprep.mubr.msk.bf16.mxu1 %vm416_vm1, %v4940_v33  ;;  %4430 = vmatprep.mubr.msk.bf16.mxu0 %vm416_vm1, %v4941_v35  ;;  %v4961_v35 = vld [vmem:[%s6418_s0 + $0x1b8] sm:$0xff]  }
 0x109   :  { %v5596_v36 = vpop.f32.mrb[24].mxu1 }
 0x10a   :  { %v5598_v37 = vpop.f32.mrb[25].mxu1 }
 0x10b   :  { %v5603_v39 = vpop.f32.mrb[26].mxu1 }
 0x10c   :  { %v5611_v42 = vpop.f32.mrb[27].mxu1 }
 0x10e   :  { %4317 = vmatmul.mubr.msk.bf16.gmra.mrb[76].mxu1 %vm416_vm1, %v4942_v38  ;;  %4431 = vmatmul.mubr.msk.bf16.gmra.mrb[76].mxu0 %vm416_vm1, %v4943_v40 }
 0x10f   :  { %4320 = vmatprep.mubr.msk.bf16.mxu1 %vm416_vm1, %v4944_v41  ;;  %4434 = vmatprep.mubr.msk.bf16.mxu0 %vm416_vm1, %v4945_v43  ;;  %v4962_v41 = vld [vmem:[%s6418_s0 + $0x1a4] sm:$0xff]  }
 0x111   :  { %v5620_v44 = vpop.f32.mrb[28].mxu1 }
 0x112   :  { %v5622_v45 = vpop.f32.mrb[29].mxu1 }
 0x113   :  { %v5627_v47 = vpop.f32.mrb[30].mxu1 }
 0x114   :  { %v5635_v50 = vpop.f32.mrb[31].mxu1 }
 0x116   :  { %4321 = vmatmul.mubr.msk.bf16.gmra.mrb[80].mxu1 %vm416_vm1, %v4946_v46  ;;  %4435 = vmatmul.mubr.msk.bf16.gmra.mrb[80].mxu0 %vm416_vm1, %v4947_v48  ;;  %v4963_v46 = vld [vmem:[%s6418_s0 + $0x1c0] sm:$0xff]   ;;  %v4964_v48 = vld [vmem:[%s6418_s0 + $0x1ac] sm:$0xff]  }
 0x117   :  { %4324 = vmatprep.mubr.msk.bf16.mxu1 %vm416_vm1, %v4948_v49  ;;  %4438 = vmatprep.mubr.msk.bf16.mxu0 %vm416_vm1, %v4949_v51  ;;  %v4965_v51 = vld [vmem:[%s6418_s0 + $0x1c8] sm:$0xff]  }
 0x119   :  { %v5644_v54 = vpop.f32.mrb[32].mxu1 }
 0x11a   :  { %v5646_v56 = vpop.f32.mrb[33].mxu1 }
 0x11b   :  { %v5651_v59 = vpop.f32.mrb[34].mxu1 }
 0x11c   :  { %v5659_v1 = vpop.f32.mrb[35].mxu1 }
 0x11e   :  { %4325 = vmatmul.mubr.msk.bf16.gmra.mrb[84].mxu1 %vm416_vm1, %v4950_v57  ;;  %4439 = vmatmul.mubr.msk.bf16.gmra.mrb[84].mxu0 %vm416_vm1, %v4951_v62 }
 0x11f   :  { %4328 = vmatprep.mubr.msk.bf16.mxu1 %vm416_vm1, %v4952_v0  ;;  %4442 = vmatprep.mubr.msk.bf16.mxu0 %vm416_vm1, %v4953_v3  ;;  %v4966_v0 = vld [vmem:[%s6418_s0 + $0x1b4] sm:$0xff]  }
 0x121   :  { %v5668_v6 = vpop.f32.mrb[36].mxu1 }
 0x122   :  { %v5670_v8 = vpop.f32.mrb[37].mxu1 }
 0x123   :  { %v5675_v11 = vpop.f32.mrb[38].mxu1 }
 0x124   :  { %v5683_v17 = vpop.f32.mrb[39].mxu1 }
 0x126   :  { %4329 = vmatmul.mubr.msk.bf16.gmra.mrb[88].mxu1 %vm416_vm1, %v4954_v9  ;;  %4443 = vmatmul.mubr.msk.bf16.gmra.mrb[88].mxu0 %vm416_vm1, %v4955_v14  ;;  %v4967_v9 = vld [vmem:[%s6418_s0 + $0x1d0] sm:$0xff]   ;;  %v4968_v14 = vld [vmem:[%s6418_s0 + $0x1bc] sm:$0xff]  }
 0x127   :  { %4332 = vmatprep.mubr.msk.bf16.mxu1 %vm416_vm1, %v4956_v16  ;;  %4446 = vmatprep.mubr.msk.bf16.mxu0 %vm416_vm1, %v4957_v19  ;;  %v4969_v19 = vld [vmem:[%s6418_s0 + $0x1d8] sm:$0xff]  }
 0x129   :  { %v5692_v22 = vpop.f32.mrb[40].mxu1 }
 0x12a   :  { %v5694_v24 = vpop.f32.mrb[41].mxu1 }
 0x12b   :  { %v5699_v27 = vpop.f32.mrb[42].mxu1 }
 0x12c   :  { %v5707_v33 = vpop.f32.mrb[43].mxu1 }
 0x12e   :  { %4333 = vmatmul.mubr.msk.bf16.gmra.mrb[92].mxu1 %vm416_vm1, %v4958_v25  ;;  %4447 = vmatmul.mubr.msk.bf16.gmra.mrb[92].mxu0 %vm416_vm1, %v4959_v30 }
 0x12f   :  { %4336 = vmatprep.mubr.msk.bf16.mxu1 %vm416_vm1, %v4960_v32  ;;  %4450 = vmatprep.mubr.msk.bf16.mxu0 %vm416_vm1, %v4961_v35  ;;  %v4970_v32 = vld [vmem:[%s6418_s0 + $0x1c4] sm:$0xff]  }
 0x131   :  { %v5716_v38 = vpop.f32.mrb[44].mxu1 }
 0x132   :  { %v5718_v40 = vpop.f32.mrb[45].mxu1 }
 0x133   :  { %v5723_v43 = vpop.f32.mrb[46].mxu1 }
 0x134   :  { %v5731_v49 = vpop.f32.mrb[47].mxu1 }
 0x136   :  { %4337 = vmatmul.mubr.msk.bf16.gmra.mrb[96].mxu1 %vm416_vm1, %v4962_v41  ;;  %4451 = vmatmul.mubr.msk.bf16.gmra.mrb[96].mxu0 %vm416_vm1, %v4963_v46  ;;  %v4971_v41 = vld [vmem:[%s6418_s0 + $0x1e0] sm:$0xff]   ;;  %v4972_v46 = vld [vmem:[%s6418_s0 + $0x1cc] sm:$0xff]  }
 0x137   :  { %4340 = vmatprep.mubr.msk.bf16.mxu1 %vm416_vm1, %v4964_v48  ;;  %4454 = vmatprep.mubr.msk.bf16.mxu0 %vm416_vm1, %v4965_v51  ;;  %v4973_v51 = vld [vmem:[%s6418_s0 + $0x1e8] sm:$0xff]  }
 0x139   :  { %v5740_v57 = vpop.f32.mrb[48].mxu1 }
 0x13a   :  { %v5742_v62 = vpop.f32.mrb[49].mxu1 }
 0x13b   :  { %v5747_v3 = vpop.f32.mrb[50].mxu1 }
 0x13c   :  { %v5755_v16 = vpop.f32.mrb[51].mxu1 }
 0x13e   :  { %4341 = vmatmul.mubr.msk.bf16.gmra.mrb[100].mxu1 %vm416_vm1, %v4966_v0  ;;  %4455 = vmatmul.mubr.msk.bf16.gmra.mrb[100].mxu0 %vm416_vm1, %v4967_v9  ;;  %v5787_v0 = vld [vmem:[%s6419_s2] ss:$0 sm:$0xff] }
 0x13f   :  { %4344 = vmatprep.mubr.msk.bf16.mxu1 %vm416_vm1, %v4968_v14  ;;  %4458 = vmatprep.mubr.msk.bf16.mxu0 %vm416_vm1, %v4969_v19  ;;  %v1072_v9 = vadd.f32 %v5452_v52, %v5787_v0  ;;  %v1070_v14 = vadd.f32 %v5787_v0, %v5454_v53  ;;  %v1071_v52 = vadd.f32 %v5787_v0, %v5467_v58 }
 0x140   :  { %v1076_v58 = vadd.f32 %v5476_v60, %v5787_v0 }
 0x141   :  { %v5764_v25 = vpop.f32.mrb[52].mxu1 }
 0x142   :  { %6421 = vst [vmem:[#allocation2_spill] sm:$0xff] %v5764_v25  ;;  %v5766_v30 = vpop.f32.mrb[53].mxu1 }
 0x143   :  { %6422 = vst [vmem:[#allocation3_spill] sm:$0xff] %v5766_v30  ;;  %v5771_v35 = vpop.f32.mrb[54].mxu1 }
 0x144   :  { %6423 = vst [vmem:[#allocation4_spill] sm:$0xff] %v5771_v35  ;;  %v5779_v48 = vpop.f32.mrb[55].mxu1 }
 0x145   :  { %6424 = vst [vmem:[#allocation5_spill] sm:$0xff] %v5779_v48  ;;  %v4974_v48 = vld [vmem:[%s6418_s0 + $0x1d4] sm:$0xff]  }
 0x146   :  { %4345 = vmatmul.mubr.msk.bf16.gmra.mrb[104].mxu1 %vm416_vm1, %v4970_v32  ;;  %4459 = vmatmul.mubr.msk.bf16.gmra.mrb[104].mxu0 %vm416_vm1, %v4971_v41  ;;  %v1073_v32 = vadd.f32 %v5459_v55, %v5787_v0 }
 0x147   :  { %4348 = vmatprep.mubr.msk.bf16.mxu1 %vm416_vm1, %v4972_v46  ;;  %4462 = vmatprep.mubr.msk.bf16.mxu0 %vm416_vm1, %v4973_v51  ;;  %v4975_v46 = vld [vmem:[%s6418_s0 + $0x1f0] sm:$0xff]  }
 0x149   :  { %v4356_v19 = vpop.f32.mrb[0].mxu0 }
 0x14a   :  { %v4469_v35 = vadd.f32 %v4356_v19, %v1072_v9  ;;  %v2939_v41 = vpop.f32.mrb[1].mxu0 }
 0x14b   :  { %v4471_v51 = vadd.f32 %v2939_v41, %v1070_v14  ;;  %v4357_v30 = vpop.f32.mrb[2].mxu0  ;;  %v1075_v14 = vadd.f32 %v5787_v0, %v5491_v2  ;;  %v1078_v2 = vadd.f32 %v5787_v0, %v5502_v5 }
 0x14c   :  { %3500 = vst.msk [vmem:[%s6420_s3 + $0x10] sm:$0xff] %vm416_vm1, %v4469_v35  ;;  %v4473_v53 = vadd.f32 %v4357_v30, %v1073_v32  ;;  %v2942_v25 = vpop.f32.mrb[3].mxu0  ;;  %v1077_v35 = vadd.f32 %v5483_v63, %v5787_v0  ;;  %v1080_v63 = vadd.f32 %v5500_v4, %v5787_v0 }
 0x14d   :  { %3498 = vst.msk [vmem:[%s6420_s3] sm:$0xff] %vm416_vm1, %v4471_v51  ;;  %v4475_v55 = vadd.f32 %v2942_v25, %v1071_v52  ;;  %v1074_v25 = vadd.f32 %v5787_v0, %v5478_v61  ;;  %v1081_v52 = vadd.f32 %v5507_v7, %v5787_v0  ;;  %v1084_v7 = vadd.f32 %v5524_v12, %v5787_v0 }
 0x14e   :  { %4349 = vmatmul.mubr.msk.bf16.gmra.mrb[108].mxu1 %vm416_vm1, %v4974_v48  ;;  %3501 = vst.msk [vmem:[%s6420_s3 + $0x18] sm:$0xff] %vm416_vm1, %v4473_v53  ;;  %4463 = vmatmul.mubr.msk.bf16.gmra.mrb[108].mxu0 %vm416_vm1, %v4975_v46 }
 0x14f   :  { %3499 = vst.msk [vmem:[%s6420_s3 + $0x8] sm:$0xff] %vm416_vm1, %v4475_v55  ;;  %v1079_v55 = vadd.f32 %v5787_v0, %v5515_v10  ;;  %v1082_v10 = vadd.f32 %v5787_v0, %v5526_v13 }
 0x151   :  { %v4360_v30 = vpop.f32.mrb[4].mxu0 }
 0x152   :  { %v4477_v48 = vadd.f32 %v4360_v30, %v1076_v58  ;;  %v2955_v9 = vpop.f32.mrb[5].mxu0 }
 0x153   :  { %v4479_v19 = vadd.f32 %v2955_v9, %v1074_v25  ;;  %v4361_v32 = vpop.f32.mrb[6].mxu0 }
 0x154   :  { %3504 = vst.msk [vmem:[%s6420_s3 + $0x30] sm:$0xff] %vm416_vm1, %v4477_v48  ;;  %v4481_v60 = vadd.f32 %v4361_v32, %v1077_v35  ;;  %v2958_v41 = vpop.f32.mrb[7].mxu0  ;;  %v1085_v48 = vadd.f32 %v5531_v15, %v5787_v0  ;;  %v1088_v15 = vadd.f32 %v5548_v20, %v5787_v0 }
 0x155   :  { %3502 = vst.msk [vmem:[%s6420_s3 + $0x20] sm:$0xff] %vm416_vm1, %v4479_v19  ;;  %v4483_v61 = vadd.f32 %v2958_v41, %v1075_v14  ;;  %v1083_v19 = vadd.f32 %v5787_v0, %v5539_v18  ;;  %v1086_v18 = vadd.f32 %v5787_v0, %v5550_v21 }
 0x156   :  { %3505 = vst.msk [vmem:[%s6420_s3 + $0x38] sm:$0xff] %vm416_vm1, %v4481_v60 }
 0x157   :  { %3503 = vst.msk [vmem:[%s6420_s3 + $0x28] sm:$0xff] %vm416_vm1, %v4483_v61 }
 0x159   :  { %v4364_v46 = vpop.f32.mrb[8].mxu0 }
 0x15a   :  { %v4485_v51 = vadd.f32 %v4364_v46, %v1080_v63  ;;  %v2971_v53 = vpop.f32.mrb[9].mxu0  ;;  %v1089_v63 = vadd.f32 %v5555_v23, %v5787_v0  ;;  %v1092_v23 = vadd.f32 %v5572_v28, %v5787_v0 }
 0x15b   :  { %v4487_v58 = vadd.f32 %v2971_v53, %v1078_v2  ;;  %v4365_v25 = vpop.f32.mrb[10].mxu0 }
 0x15c   :  { %3508 = vst.msk [vmem:[%s6420_s3 + $0x50] sm:$0xff] %vm416_vm1, %v4485_v51  ;;  %v4489_v4 = vadd.f32 %v4365_v25, %v1081_v52  ;;  %v2974_v30 = vpop.f32.mrb[11].mxu0  ;;  %v1087_v52 = vadd.f32 %v5787_v0, %v5563_v26  ;;  %v1090_v26 = vadd.f32 %v5787_v0, %v5574_v29  ;;  %v1093_v25 = vadd.f32 %v5579_v31, %v5787_v0 }
 0x15d   :  { %3506 = vst.msk [vmem:[%s6420_s3 + $0x40] sm:$0xff] %vm416_vm1, %v4487_v58  ;;  %v4491_v5 = vadd.f32 %v2974_v30, %v1079_v55  ;;  %v1096_v31 = vadd.f32 %v5596_v36, %v5787_v0 }
 0x15e   :  { %3509 = vst.msk [vmem:[%s6420_s3 + $0x58] sm:$0xff] %vm416_vm1, %v4489_v4 }
 0x15f   :  { %3507 = vst.msk [vmem:[%s6420_s3 + $0x48] sm:$0xff] %vm416_vm1, %v4491_v5  ;;  %v1091_v5 = vadd.f32 %v5787_v0, %v5587_v34  ;;  %v1094_v34 = vadd.f32 %v5787_v0, %v5598_v37 }
 0x161   :  { %v4368_v35 = vpop.f32.mrb[12].mxu0 }
 0x162   :  { %v4493_v9 = vadd.f32 %v4368_v35, %v1084_v7  ;;  %v2987_v14 = vpop.f32.mrb[13].mxu0 }
 0x163   :  { %v4495_v32 = vadd.f32 %v2987_v14, %v1082_v10  ;;  %v4369_v60 = vpop.f32.mrb[14].mxu0 }
 0x164   :  { %3512 = vst.msk [vmem:[%s6420_s3 + $0x70] sm:$0xff] %vm416_vm1, %v4493_v9  ;;  %v4497_v12 = vadd.f32 %v4369_v60, %v1085_v48  ;;  %v2990_v41 = vpop.f32.mrb[15].mxu0  ;;  %v1097_v9 = vadd.f32 %v5603_v39, %v5787_v0  ;;  %v1100_v39 = vadd.f32 %v5620_v44, %v5787_v0 }
 0x165   :  { %3510 = vst.msk [vmem:[%s6420_s3 + $0x60] sm:$0xff] %vm416_vm1, %v4495_v32  ;;  %v4499_v13 = vadd.f32 %v2990_v41, %v1083_v19  ;;  %v1095_v32 = vadd.f32 %v5787_v0, %v5611_v42  ;;  %v1098_v42 = vadd.f32 %v5787_v0, %v5622_v45 }
 0x166   :  { %3513 = vst.msk [vmem:[%s6420_s3 + $0x78] sm:$0xff] %vm416_vm1, %v4497_v12 }
 0x167   :  { %3511 = vst.msk [vmem:[%s6420_s3 + $0x68] sm:$0xff] %vm416_vm1, %v4499_v13 }
 0x169   :  { %v4372_v61 = vpop.f32.mrb[16].mxu0 }
 0x16a   :  { %v4501_v2 = vadd.f32 %v4372_v61, %v1088_v15  ;;  %v3003_v46 = vpop.f32.mrb[17].mxu0  ;;  %v1101_v15 = vadd.f32 %v5627_v47, %v5787_v0  ;;  %v1104_v47 = vadd.f32 %v5644_v54, %v5787_v0 }
 0x16b   :  { %v4503_v51 = vadd.f32 %v3003_v46, %v1086_v18  ;;  %v4373_v53 = vpop.f32.mrb[18].mxu0 }
 0x16c   :  { %3516 = vst.msk [vmem:[%s6420_s3 + $0x90] sm:$0xff] %vm416_vm1, %v4501_v2  ;;  %v4505_v20 = vadd.f32 %v4373_v53, %v1089_v63  ;;  %v3006_v55 = vpop.f32.mrb[19].mxu0  ;;  %v1099_v63 = vadd.f32 %v5787_v0, %v5635_v50  ;;  %v1102_v50 = vadd.f32 %v5787_v0, %v5646_v56  ;;  %v1105_v53 = vadd.f32 %v5651_v59, %v5787_v0 }
 0x16d   :  { %3514 = vst.msk [vmem:[%s6420_s3 + $0x80] sm:$0xff] %vm416_vm1, %v4503_v51  ;;  %v4507_v21 = vadd.f32 %v3006_v55, %v1087_v52  ;;  %v1108_v59 = vadd.f32 %v5668_v6, %v5787_v0 }
 0x16e   :  { %3517 = vst.msk [vmem:[%s6420_s3 + $0x98] sm:$0xff] %vm416_vm1, %v4505_v20 }
 0x16f   :  { %3515 = vst.msk [vmem:[%s6420_s3 + $0x88] sm:$0xff] %vm416_vm1, %v4507_v21  ;;  %v1103_v21 = vadd.f32 %v5787_v0, %v5659_v1  ;;  %v1106_v1 = vadd.f32 %v5787_v0, %v5670_v8 }
 0x171   :  { %v4376_v58 = vpop.f32.mrb[20].mxu0 }
 0x172   :  { %v4509_v4 = vadd.f32 %v4376_v58, %v1092_v23  ;;  %v3019_v30 = vpop.f32.mrb[21].mxu0 }
 0x173   :  { %v4511_v7 = vadd.f32 %v3019_v30, %v1090_v26  ;;  %v4377_v10 = vpop.f32.mrb[22].mxu0 }
 0x174   :  { %3520 = vst.msk [vmem:[%s6420_s3 + $0xb0] sm:$0xff] %vm416_vm1, %v4509_v4  ;;  %v4513_v28 = vadd.f32 %v4377_v10, %v1093_v25  ;;  %v3022_v35 = vpop.f32.mrb[23].mxu0  ;;  %v1109_v4 = vadd.f32 %v5675_v11, %v5787_v0  ;;  %v1112_v11 = vadd.f32 %v5692_v22, %v5787_v0 }
 0x175   :  { %3518 = vst.msk [vmem:[%s6420_s3 + $0xa0] sm:$0xff] %vm416_vm1, %v4511_v7  ;;  %v4515_v29 = vadd.f32 %v3022_v35, %v1091_v5  ;;  %v1107_v7 = vadd.f32 %v5787_v0, %v5683_v17  ;;  %v1110_v17 = vadd.f32 %v5787_v0, %v5694_v24 }
 0x176   :  { %3521 = vst.msk [vmem:[%s6420_s3 + $0xb8] sm:$0xff] %vm416_vm1, %v4513_v28 }
 0x177   :  { %3519 = vst.msk [vmem:[%s6420_s3 + $0xa8] sm:$0xff] %vm416_vm1, %v4515_v29 }
 0x179   :  { %v4380_v48 = vpop.f32.mrb[24].mxu0 }
 0x17a   :  { %v4517_v14 = vadd.f32 %v4380_v48, %v1096_v31  ;;  %v3035_v19 = vpop.f32.mrb[25].mxu0  ;;  %v1113_v31 = vadd.f32 %v5699_v27, %v5787_v0  ;;  %v1116_v27 = vadd.f32 %v5716_v38, %v5787_v0 }
 0x17b   :  { %v4519_v60 = vadd.f32 %v3035_v19, %v1094_v34  ;;  %v4381_v12 = vpop.f32.mrb[26].mxu0 }
 0x17c   :  { %3524 = vst.msk [vmem:[%s6420_s3 + $0xd0] sm:$0xff] %vm416_vm1, %v4517_v14  ;;  %v4521_v36 = vadd.f32 %v4381_v12, %v1097_v9  ;;  %v3038_v41 = vpop.f32.mrb[27].mxu0  ;;  %v1111_v9 = vadd.f32 %v5787_v0, %v5707_v33  ;;  %v1114_v33 = vadd.f32 %v5787_v0, %v5718_v40  ;;  %v1117_v12 = vadd.f32 %v5723_v43, %v5787_v0 }
 0x17d   :  { %3522 = vst.msk [vmem:[%s6420_s3 + $0xc0] sm:$0xff] %vm416_vm1, %v4519_v60  ;;  %v4523_v37 = vadd.f32 %v3038_v41, %v1095_v32  ;;  %v1120_v43 = vadd.f32 %v5740_v57, %v5787_v0 }
 0x17e   :  { %3525 = vst.msk [vmem:[%s6420_s3 + $0xd8] sm:$0xff] %vm416_vm1, %v4521_v36 }
 0x17f   :  { %3523 = vst.msk [vmem:[%s6420_s3 + $0xc8] sm:$0xff] %vm416_vm1, %v4523_v37  ;;  %v1115_v37 = vadd.f32 %v5787_v0, %v5731_v49  ;;  %v1118_v49 = vadd.f32 %v5787_v0, %v5742_v62 }
 0x181   :  { %v4384_v13 = vpop.f32.mrb[28].mxu0 }
 0x182   :  { %v4525_v18 = vadd.f32 %v4384_v13, %v1100_v39  ;;  %v3051_v61 = vpop.f32.mrb[29].mxu0 }
 0x183   :  { %v4527_v2 = vadd.f32 %v3051_v61, %v1098_v42  ;;  %v4385_v46 = vpop.f32.mrb[30].mxu0 }
 0x184   :  { %3528 = vst.msk [vmem:[%s6420_s3 + $0xf0] sm:$0xff] %vm416_vm1, %v4525_v18  ;;  %v4529_v44 = vadd.f32 %v4385_v46, %v1101_v15  ;;  %v3054_v52 = vpop.f32.mrb[31].mxu0  ;;  %v1121_v18 = vadd.f32 %v5747_v3, %v5787_v0  ;;  %v6425_v3 = vld [vmem:[#allocation2_spill] sm:$0xff] }
 0x185   :  { %3526 = vst.msk [vmem:[%s6420_s3 + $0xe0] sm:$0xff] %vm416_vm1, %v4527_v2  ;;  %v4531_v45 = vadd.f32 %v3054_v52, %v1099_v63  ;;  %v1119_v2 = vadd.f32 %v5787_v0, %v5755_v16  ;;  %v1124_v16 = vadd.f32 %v6425_v3, %v5787_v0 }
 0x186   :  { %3529 = vst.msk [vmem:[%s6420_s3 + $0xf8] sm:$0xff] %vm416_vm1, %v4529_v44 }
 0x187   :  { %3527 = vst.msk [vmem:[%s6420_s3 + $0xe8] sm:$0xff] %vm416_vm1, %v4531_v45  ;;  %v6426_v45 = vld [vmem:[#allocation3_spill] sm:$0xff] }
 0x189   :  { %v4388_v51 = vpop.f32.mrb[32].mxu0 }
 0x18a   :  { %v4533_v20 = vadd.f32 %v4388_v51, %v1104_v47  ;;  %v3067_v55 = vpop.f32.mrb[33].mxu0  ;;  %v1122_v47 = vadd.f32 %v5787_v0, %v6426_v45  ;;  %v6427_v51 = vld [vmem:[#allocation4_spill] sm:$0xff] }
 0x18b   :  { %v4535_v23 = vadd.f32 %v3067_v55, %v1102_v50  ;;  %v4389_v26 = vpop.f32.mrb[34].mxu0 }
 0x18c   :  { %3532 = vst.msk [vmem:[%s6420_s3 + $0x110] sm:$0xff] %vm416_vm1, %v4533_v20  ;;  %v4537_v54 = vadd.f32 %v4389_v26, %v1105_v53  ;;  %v3070_v58 = vpop.f32.mrb[35].mxu0  ;;  %v1125_v53 = vadd.f32 %v6427_v51, %v5787_v0 }
 0x18d   :  { %3530 = vst.msk [vmem:[%s6420_s3 + $0x100] sm:$0xff] %vm416_vm1, %v4535_v23  ;;  %v4539_v56 = vadd.f32 %v3070_v58, %v1103_v21  ;;  %v6428_v21 = vld [vmem:[#allocation5_spill] sm:$0xff] }
 0x18e   :  { %3533 = vst.msk [vmem:[%s6420_s3 + $0x118] sm:$0xff] %vm416_vm1, %v4537_v54  ;;  %v1123_v23 = vadd.f32 %v5787_v0, %v6428_v21 }
 0x18f   :  { %3531 = vst.msk [vmem:[%s6420_s3 + $0x108] sm:$0xff] %vm416_vm1, %v4539_v56 }
 0x191   :  { %v4392_v25 = vpop.f32.mrb[36].mxu0 }
 0x192   :  { %v4541_v30 = vadd.f32 %v4392_v25, %v1108_v59  ;;  %v3083_v5 = vpop.f32.mrb[37].mxu0 }
 0x193   :  { %v4543_v10 = vadd.f32 %v3083_v5, %v1106_v1  ;;  %v4393_v28 = vpop.f32.mrb[38].mxu0 }
 0x194   :  { %3536 = vst.msk [vmem:[%s6420_s3 + $0x130] sm:$0xff] %vm416_vm1, %v4541_v30  ;;  %v4545_v6 = vadd.f32 %v4393_v28, %v1109_v4  ;;  %v3086_v35 = vpop.f32.mrb[39].mxu0 }
 0x195   :  { %3534 = vst.msk [vmem:[%s6420_s3 + $0x120] sm:$0xff] %vm416_vm1, %v4543_v10  ;;  %v4547_v8 = vadd.f32 %v3086_v35, %v1107_v7 }
 0x196   :  { %3537 = vst.msk [vmem:[%s6420_s3 + $0x138] sm:$0xff] %vm416_vm1, %v4545_v6 }
 0x197   :  { %3535 = vst.msk [vmem:[%s6420_s3 + $0x128] sm:$0xff] %vm416_vm1, %v4547_v8 }
 0x199   :  { %v4396_v29 = vpop.f32.mrb[40].mxu0 }
 0x19a   :  { %v4549_v34 = vadd.f32 %v4396_v29, %v1112_v11  ;;  %v3099_v48 = vpop.f32.mrb[41].mxu0 }
 0x19b   :  { %v4551_v14 = vadd.f32 %v3099_v48, %v1110_v17  ;;  %v4397_v19 = vpop.f32.mrb[42].mxu0 }
 0x19c   :  { %3540 = vst.msk [vmem:[%s6420_s3 + $0x150] sm:$0xff] %vm416_vm1, %v4549_v34  ;;  %v4553_v22 = vadd.f32 %v4397_v19, %v1113_v31  ;;  %v3102_v32 = vpop.f32.mrb[43].mxu0 }
 0x19d   :  { %3538 = vst.msk [vmem:[%s6420_s3 + $0x140] sm:$0xff] %vm416_vm1, %v4551_v14  ;;  %v4555_v24 = vadd.f32 %v3102_v32, %v1111_v9 }
 0x19e   :  { %3541 = vst.msk [vmem:[%s6420_s3 + $0x158] sm:$0xff] %vm416_vm1, %v4553_v22 }
 0x19f   :  { %3539 = vst.msk [vmem:[%s6420_s3 + $0x148] sm:$0xff] %vm416_vm1, %v4555_v24 }
 0x1a1   :  { %v4400_v60 = vpop.f32.mrb[44].mxu0 }
 0x1a2   :  { %v4557_v36 = vadd.f32 %v4400_v60, %v1116_v27  ;;  %v3115_v41 = vpop.f32.mrb[45].mxu0 }
 0x1a3   :  { %v4559_v39 = vadd.f32 %v3115_v41, %v1114_v33  ;;  %v4401_v42 = vpop.f32.mrb[46].mxu0 }
 0x1a4   :  { %3544 = vst.msk [vmem:[%s6420_s3 + $0x170] sm:$0xff] %vm416_vm1, %v4557_v36  ;;  %v4561_v38 = vadd.f32 %v4401_v42, %v1117_v12  ;;  %v3118_v13 = vpop.f32.mrb[47].mxu0 }
 0x1a5   :  { %3542 = vst.msk [vmem:[%s6420_s3 + $0x160] sm:$0xff] %vm416_vm1, %v4559_v39  ;;  %v4563_v40 = vadd.f32 %v3118_v13, %v1115_v37 }
 0x1a6   :  { %3545 = vst.msk [vmem:[%s6420_s3 + $0x178] sm:$0xff] %vm416_vm1, %v4561_v38 }
 0x1a7   :  { %3543 = vst.msk [vmem:[%s6420_s3 + $0x168] sm:$0xff] %vm416_vm1, %v4563_v40 }
 0x1a9   :  { %v4404_v15 = vpop.f32.mrb[48].mxu0 }
 0x1aa   :  { %v4565_v61 = vadd.f32 %v4404_v15, %v1120_v43  ;;  %v3131_v63 = vpop.f32.mrb[49].mxu0 }
 0x1ab   :  { %v4567_v46 = vadd.f32 %v3131_v63, %v1118_v49  ;;  %v4405_v44 = vpop.f32.mrb[50].mxu0 }
 0x1ac   :  { %3548 = vst.msk [vmem:[%s6420_s3 + $0x190] sm:$0xff] %vm416_vm1, %v4565_v61  ;;  %v4569_v57 = vadd.f32 %v4405_v44, %v1121_v18  ;;  %v3134_v52 = vpop.f32.mrb[51].mxu0 }
 0x1ad   :  { %3546 = vst.msk [vmem:[%s6420_s3 + $0x180] sm:$0xff] %vm416_vm1, %v4567_v46  ;;  %v4571_v62 = vadd.f32 %v3134_v52, %v1119_v2 }
 0x1ae   :  { %3549 = vst.msk [vmem:[%s6420_s3 + $0x198] sm:$0xff] %vm416_vm1, %v4569_v57 }
 0x1af   :  { %3547 = vst.msk [vmem:[%s6420_s3 + $0x188] sm:$0xff] %vm416_vm1, %v4571_v62 }
 0x1b1   :  { %v4408_v50 = vpop.f32.mrb[52].mxu0 }
 0x1b2   :  { %v4573_v20 = vadd.f32 %v4408_v50, %v1124_v16  ;;  %v3147_v55 = vpop.f32.mrb[53].mxu0 }
 0x1b3   :  { %v4575_v26 = vadd.f32 %v3147_v55, %v1122_v47  ;;  %v4409_v54 = vpop.f32.mrb[54].mxu0 }
 0x1b4   :  { %3552 = vst.msk [vmem:[%s6420_s3 + $0x1b0] sm:$0xff] %vm416_vm1, %v4573_v20  ;;  %v4577_v58 = vadd.f32 %v4409_v54, %v1125_v53  ;;  %v3150_v56 = vpop.f32.mrb[55].mxu0 }
 0x1b5   :  { %3550 = vst.msk [vmem:[%s6420_s3 + $0x1a0] sm:$0xff] %vm416_vm1, %v4575_v26  ;;  %v4579_v59 = vadd.f32 %v3150_v56, %v1123_v23 }
 0x1b6   :  { %3553 = vst.msk [vmem:[%s6420_s3 + $0x1b8] sm:$0xff] %vm416_vm1, %v4577_v58 }
 0x1b7   :  { %3551 = vst.msk [vmem:[%s6420_s3 + $0x1a8] sm:$0xff] %vm416_vm1, %v4579_v59 }
 0x1b9   :  { %v4298_v1 = vpop.f32.mrb[56].mxu1  ;;  %v4412_v4 = vpop.f32.mrb[56].mxu0 }
 0x1ba   :  { %v4580_v25 = vadd.f32 %v4298_v1, %v5787_v0  ;;  %v2005_v30 = vpop.f32.mrb[57].mxu1  ;;  %v3163_v7 = vpop.f32.mrb[57].mxu0 }
 0x1bb   :  { %v4582_v5 = vadd.f32 %v5787_v0, %v2005_v30  ;;  %v4299_v10 = vpop.f32.mrb[58].mxu1  ;;  %v4413_v35 = vpop.f32.mrb[58].mxu0 }
 0x1bc   :  { %v4581_v28 = vadd.f32 %v4580_v25, %v4412_v4  ;;  %v4584_v6 = vadd.f32 %v4299_v10, %v5787_v0  ;;  %v2008_v8 = vpop.f32.mrb[59].mxu1  ;;  %v3166_v29 = vpop.f32.mrb[59].mxu0 }
 0x1bd   :  { %v4583_v11 = vadd.f32 %v4582_v5, %v3163_v7  ;;  %v4586_v17 = vadd.f32 %v5787_v0, %v2008_v8 }
 0x1be   :  { %3556 = vst.msk [vmem:[%s6420_s3 + $0x1d0] sm:$0xff] %vm416_vm1, %v4581_v28  ;;  %v4585_v31 = vadd.f32 %v4584_v6, %v4413_v35 }
 0x1bf   :  { %3554 = vst.msk [vmem:[%s6420_s3 + $0x1c0] sm:$0xff] %vm416_vm1, %v4583_v11  ;;  %v4587_v34 = vadd.f32 %v4586_v17, %v3166_v29 }
 0x1c0   :  { %3557 = vst.msk [vmem:[%s6420_s3 + $0x1d8] sm:$0xff] %vm416_vm1, %v4585_v31 }
 0x1c1   :  { %3555 = vst.msk [vmem:[%s6420_s3 + $0x1c8] sm:$0xff] %vm416_vm1, %v4587_v34  ;;  %v4302_v48 = vpop.f32.mrb[60].mxu1  ;;  %v4416_v14 = vpop.f32.mrb[60].mxu0 }
 0x1c2   :  { %v4588_v9 = vadd.f32 %v4302_v48, %v5787_v0  ;;  %v2021_v19 = vpop.f32.mrb[61].mxu1  ;;  %v3179_v32 = vpop.f32.mrb[61].mxu0 }
 0x1c3   :  { %v4590_v22 = vadd.f32 %v5787_v0, %v2021_v19  ;;  %v4303_v24 = vpop.f32.mrb[62].mxu1  ;;  %v4417_v60 = vpop.f32.mrb[62].mxu0 }
 0x1c4   :  { %v4589_v27 = vadd.f32 %v4588_v9, %v4416_v14  ;;  %v4592_v33 = vadd.f32 %v4303_v24, %v5787_v0  ;;  %v2024_v12 = vpop.f32.mrb[63].mxu1  ;;  %v3182_v37 = vpop.f32.mrb[63].mxu0 }
 0x1c5   :  { %v4591_v36 = vadd.f32 %v4590_v22, %v3179_v32  ;;  %v4594_v41 = vadd.f32 %v5787_v0, %v2024_v12 }
 0x1c6   :  { %3560 = vst.msk [vmem:[%s6420_s3 + $0x1f0] sm:$0xff] %vm416_vm1, %v4589_v27  ;;  %v4593_v39 = vadd.f32 %v4592_v33, %v4417_v60 }
 0x1c7   :  { %3558 = vst.msk [vmem:[%s6420_s3 + $0x1e0] sm:$0xff] %vm416_vm1, %v4591_v36  ;;  %v4595_v42 = vadd.f32 %v4594_v41, %v3182_v37 }
 0x1c8   :  { %3561 = vst.msk [vmem:[%s6420_s3 + $0x1f8] sm:$0xff] %vm416_vm1, %v4593_v39 }
 0x1c9   :  { %3559 = vst.msk [vmem:[%s6420_s3 + $0x1e8] sm:$0xff] %vm416_vm1, %v4595_v42  ;;  %v4306_v38 = vpop.f32.mrb[64].mxu1  ;;  %v4420_v40 = vpop.f32.mrb[64].mxu0 }
 0x1ca   :  { %v4596_v13 = vadd.f32 %v4306_v38, %v5787_v0  ;;  %v2037_v43 = vpop.f32.mrb[65].mxu1  ;;  %v3195_v15 = vpop.f32.mrb[65].mxu0 }
 0x1cb   :  { %v4598_v49 = vadd.f32 %v5787_v0, %v2037_v43  ;;  %v4307_v18 = vpop.f32.mrb[66].mxu1  ;;  %v4421_v2 = vpop.f32.mrb[66].mxu0 }
 0x1cc   :  { %v4597_v61 = vadd.f32 %v4596_v13, %v4420_v40  ;;  %v4600_v63 = vadd.f32 %v4307_v18, %v5787_v0  ;;  %v2040_v46 = vpop.f32.mrb[67].mxu1  ;;  %v3198_v52 = vpop.f32.mrb[67].mxu0 }
 0x1cd   :  { %v4599_v44 = vadd.f32 %v4598_v49, %v3195_v15  ;;  %v4602_v57 = vadd.f32 %v5787_v0, %v2040_v46 }
 0x1ce   :  { %3564 = vst.msk [vmem:[%s6420_s3 + $0x210] sm:$0xff] %vm416_vm1, %v4597_v61  ;;  %v4601_v62 = vadd.f32 %v4600_v63, %v4421_v2 }
 0x1cf   :  { %3562 = vst.msk [vmem:[%s6420_s3 + $0x200] sm:$0xff] %vm416_vm1, %v4599_v44  ;;  %v4603_v3 = vadd.f32 %v4602_v57, %v3198_v52 }
 0x1d0   :  { %3565 = vst.msk [vmem:[%s6420_s3 + $0x218] sm:$0xff] %vm416_vm1, %v4601_v62 }
 0x1d1   :  { %3563 = vst.msk [vmem:[%s6420_s3 + $0x208] sm:$0xff] %vm416_vm1, %v4603_v3  ;;  %v4310_v16 = vpop.f32.mrb[68].mxu1  ;;  %v4424_v47 = vpop.f32.mrb[68].mxu0 }
 0x1d2   :  { %v4604_v45 = vadd.f32 %v4310_v16, %v5787_v0  ;;  %v2053_v50 = vpop.f32.mrb[69].mxu1  ;;  %v3211_v53 = vpop.f32.mrb[69].mxu0 }
 0x1d3   :  { %v4606_v51 = vadd.f32 %v5787_v0, %v2053_v50  ;;  %v4311_v20 = vpop.f32.mrb[70].mxu1  ;;  %v4425_v23 = vpop.f32.mrb[70].mxu0 }
 0x1d4   :  { %v4605_v55 = vadd.f32 %v4604_v45, %v4424_v47  ;;  %v4608_v21 = vadd.f32 %v4311_v20, %v5787_v0  ;;  %v2056_v26 = vpop.f32.mrb[71].mxu1  ;;  %v3214_v56 = vpop.f32.mrb[71].mxu0 }
 0x1d5   :  { %v4607_v54 = vadd.f32 %v4606_v51, %v3211_v53  ;;  %v4610_v58 = vadd.f32 %v5787_v0, %v2056_v26 }
 0x1d6   :  { %3568 = vst.msk [vmem:[%s6420_s3 + $0x230] sm:$0xff] %vm416_vm1, %v4605_v55  ;;  %v4609_v59 = vadd.f32 %v4608_v21, %v4425_v23 }
 0x1d7   :  { %3566 = vst.msk [vmem:[%s6420_s3 + $0x220] sm:$0xff] %vm416_vm1, %v4607_v54  ;;  %v4611_v1 = vadd.f32 %v4610_v58, %v3214_v56 }
 0x1d8   :  { %3569 = vst.msk [vmem:[%s6420_s3 + $0x238] sm:$0xff] %vm416_vm1, %v4609_v59 }
 0x1d9   :  { %3567 = vst.msk [vmem:[%s6420_s3 + $0x228] sm:$0xff] %vm416_vm1, %v4611_v1  ;;  %v4314_v25 = vpop.f32.mrb[72].mxu1  ;;  %v4428_v30 = vpop.f32.mrb[72].mxu0 }
 0x1da   :  { %v4612_v4 = vadd.f32 %v4314_v25, %v5787_v0  ;;  %v2069_v5 = vpop.f32.mrb[73].mxu1  ;;  %v3227_v10 = vpop.f32.mrb[73].mxu0 }
 0x1db   :  { %v4614_v7 = vadd.f32 %v5787_v0, %v2069_v5  ;;  %v4315_v28 = vpop.f32.mrb[74].mxu1  ;;  %v4429_v8 = vpop.f32.mrb[74].mxu0 }
 0x1dc   :  { %v4613_v6 = vadd.f32 %v4612_v4, %v4428_v30  ;;  %v4616_v35 = vadd.f32 %v4315_v28, %v5787_v0  ;;  %v2072_v11 = vpop.f32.mrb[75].mxu1  ;;  %v3230_v31 = vpop.f32.mrb[75].mxu0 }
 0x1dd   :  { %v4615_v17 = vadd.f32 %v4614_v7, %v3227_v10  ;;  %v4618_v29 = vadd.f32 %v5787_v0, %v2072_v11 }
 0x1de   :  { %3572 = vst.msk [vmem:[%s6420_s3 + $0x250] sm:$0xff] %vm416_vm1, %v4613_v6  ;;  %v4617_v34 = vadd.f32 %v4616_v35, %v4429_v8 }
 0x1df   :  { %3570 = vst.msk [vmem:[%s6420_s3 + $0x240] sm:$0xff] %vm416_vm1, %v4615_v17  ;;  %v4619_v48 = vadd.f32 %v4618_v29, %v3230_v31 }
 0x1e0   :  { %3573 = vst.msk [vmem:[%s6420_s3 + $0x258] sm:$0xff] %vm416_vm1, %v4617_v34 }
 0x1e1   :  { %3571 = vst.msk [vmem:[%s6420_s3 + $0x248] sm:$0xff] %vm416_vm1, %v4619_v48  ;;  %v4318_v9 = vpop.f32.mrb[76].mxu1  ;;  %v4432_v19 = vpop.f32.mrb[76].mxu0 }
 0x1e2   :  { %v4620_v14 = vadd.f32 %v4318_v9, %v5787_v0  ;;  %v2085_v22 = vpop.f32.mrb[77].mxu1  ;;  %v3243_v24 = vpop.f32.mrb[77].mxu0 }
 0x1e3   :  { %v4622_v32 = vadd.f32 %v5787_v0, %v2085_v22  ;;  %v4319_v27 = vpop.f32.mrb[78].mxu1  ;;  %v4433_v12 = vpop.f32.mrb[78].mxu0 }
 0x1e4   :  { %v4621_v33 = vadd.f32 %v4620_v14, %v4432_v19  ;;  %v4624_v60 = vadd.f32 %v4319_v27, %v5787_v0  ;;  %v2088_v36 = vpop.f32.mrb[79].mxu1  ;;  %v3246_v39 = vpop.f32.mrb[79].mxu0 }
 0x1e5   :  { %v4623_v41 = vadd.f32 %v4622_v32, %v3243_v24  ;;  %v4626_v37 = vadd.f32 %v5787_v0, %v2088_v36 }
 0x1e6   :  { %3576 = vst.msk [vmem:[%s6420_s3 + $0x270] sm:$0xff] %vm416_vm1, %v4621_v33  ;;  %v4625_v42 = vadd.f32 %v4624_v60, %v4433_v12 }
 0x1e7   :  { %3574 = vst.msk [vmem:[%s6420_s3 + $0x260] sm:$0xff] %vm416_vm1, %v4623_v41  ;;  %v4627_v38 = vadd.f32 %v4626_v37, %v3246_v39 }
 0x1e8   :  { %3577 = vst.msk [vmem:[%s6420_s3 + $0x278] sm:$0xff] %vm416_vm1, %v4625_v42 }
 0x1e9   :  { %3575 = vst.msk [vmem:[%s6420_s3 + $0x268] sm:$0xff] %vm416_vm1, %v4627_v38  ;;  %v4322_v13 = vpop.f32.mrb[80].mxu1  ;;  %v4436_v43 = vpop.f32.mrb[80].mxu0 }
 0x1ea   :  { %v4628_v40 = vadd.f32 %v4322_v13, %v5787_v0  ;;  %v2101_v49 = vpop.f32.mrb[81].mxu1  ;;  %v3259_v18 = vpop.f32.mrb[81].mxu0 }
 0x1eb   :  { %v4630_v15 = vadd.f32 %v5787_v0, %v2101_v49  ;;  %v4323_v61 = vpop.f32.mrb[82].mxu1  ;;  %v4437_v46 = vpop.f32.mrb[82].mxu0 }
 0x1ec   :  { %v4629_v63 = vadd.f32 %v4628_v40, %v4436_v43  ;;  %v4632_v2 = vadd.f32 %v4323_v61, %v5787_v0  ;;  %v2104_v44 = vpop.f32.mrb[83].mxu1  ;;  %v3262_v62 = vpop.f32.mrb[83].mxu0 }
 0x1ed   :  { %v4631_v57 = vadd.f32 %v4630_v15, %v3259_v18  ;;  %v4634_v52 = vadd.f32 %v5787_v0, %v2104_v44 }
 0x1ee   :  { %3580 = vst.msk [vmem:[%s6420_s3 + $0x290] sm:$0xff] %vm416_vm1, %v4629_v63  ;;  %v4633_v3 = vadd.f32 %v4632_v2, %v4437_v46 }
 0x1ef   :  { %3578 = vst.msk [vmem:[%s6420_s3 + $0x280] sm:$0xff] %vm416_vm1, %v4631_v57  ;;  %v4635_v16 = vadd.f32 %v4634_v52, %v3262_v62 }
 0x1f0   :  { %3581 = vst.msk [vmem:[%s6420_s3 + $0x298] sm:$0xff] %vm416_vm1, %v4633_v3 }
 0x1f1   :  { %3579 = vst.msk [vmem:[%s6420_s3 + $0x288] sm:$0xff] %vm416_vm1, %v4635_v16  ;;  %v4326_v45 = vpop.f32.mrb[84].mxu1  ;;  %v4440_v50 = vpop.f32.mrb[84].mxu0 }
 0x1f2   :  { %v4636_v47 = vadd.f32 %v4326_v45, %v5787_v0  ;;  %v2117_v51 = vpop.f32.mrb[85].mxu1  ;;  %v3275_v20 = vpop.f32.mrb[85].mxu0 }
 0x1f3   :  { %v4638_v53 = vadd.f32 %v5787_v0, %v2117_v51  ;;  %v4327_v55 = vpop.f32.mrb[86].mxu1  ;;  %v4441_v26 = vpop.f32.mrb[86].mxu0 }
 0x1f4   :  { %v4637_v21 = vadd.f32 %v4636_v47, %v4440_v50  ;;  %v4640_v23 = vadd.f32 %v4327_v55, %v5787_v0  ;;  %v2120_v54 = vpop.f32.mrb[87].mxu1  ;;  %v3278_v59 = vpop.f32.mrb[87].mxu0 }
 0x1f5   :  { %v4639_v58 = vadd.f32 %v4638_v53, %v3275_v20  ;;  %v4642_v56 = vadd.f32 %v5787_v0, %v2120_v54 }
 0x1f6   :  { %3584 = vst.msk [vmem:[%s6420_s3 + $0x2b0] sm:$0xff] %vm416_vm1, %v4637_v21  ;;  %v4641_v1 = vadd.f32 %v4640_v23, %v4441_v26 }
 0x1f7   :  { %3582 = vst.msk [vmem:[%s6420_s3 + $0x2a0] sm:$0xff] %vm416_vm1, %v4639_v58  ;;  %v4643_v25 = vadd.f32 %v4642_v56, %v3278_v59 }
 0x1f8   :  { %3585 = vst.msk [vmem:[%s6420_s3 + $0x2b8] sm:$0xff] %vm416_vm1, %v4641_v1 }
 0x1f9   :  { %3583 = vst.msk [vmem:[%s6420_s3 + $0x2a8] sm:$0xff] %vm416_vm1, %v4643_v25  ;;  %v4330_v4 = vpop.f32.mrb[88].mxu1  ;;  %v4444_v5 = vpop.f32.mrb[88].mxu0 }
 0x1fa   :  { %v4644_v30 = vadd.f32 %v4330_v4, %v5787_v0  ;;  %v2133_v7 = vpop.f32.mrb[89].mxu1  ;;  %v3291_v28 = vpop.f32.mrb[89].mxu0 }
 0x1fb   :  { %v4646_v10 = vadd.f32 %v5787_v0, %v2133_v7  ;;  %v4331_v6 = vpop.f32.mrb[90].mxu1  ;;  %v4445_v11 = vpop.f32.mrb[90].mxu0 }
 0x1fc   :  { %v4645_v35 = vadd.f32 %v4644_v30, %v4444_v5  ;;  %v4648_v8 = vadd.f32 %v4331_v6, %v5787_v0  ;;  %v2136_v17 = vpop.f32.mrb[91].mxu1  ;;  %v3294_v34 = vpop.f32.mrb[91].mxu0 }
 0x1fd   :  { %v4647_v29 = vadd.f32 %v4646_v10, %v3291_v28  ;;  %v4650_v31 = vadd.f32 %v5787_v0, %v2136_v17 }
 0x1fe   :  { %3588 = vst.msk [vmem:[%s6420_s3 + $0x2d0] sm:$0xff] %vm416_vm1, %v4645_v35  ;;  %v4649_v48 = vadd.f32 %v4648_v8, %v4445_v11 }
 0x1ff   :  { %3586 = vst.msk [vmem:[%s6420_s3 + $0x2c0] sm:$0xff] %vm416_vm1, %v4647_v29  ;;  %v4651_v9 = vadd.f32 %v4650_v31, %v3294_v34 }
 0x200   :  { %3589 = vst.msk [vmem:[%s6420_s3 + $0x2d8] sm:$0xff] %vm416_vm1, %v4649_v48 }
 0x201   :  { %3587 = vst.msk [vmem:[%s6420_s3 + $0x2c8] sm:$0xff] %vm416_vm1, %v4651_v9  ;;  %v4334_v14 = vpop.f32.mrb[92].mxu1  ;;  %v4448_v22 = vpop.f32.mrb[92].mxu0 }
 0x202   :  { %v4652_v19 = vadd.f32 %v4334_v14, %v5787_v0  ;;  %v2149_v32 = vpop.f32.mrb[93].mxu1  ;;  %v3307_v27 = vpop.f32.mrb[93].mxu0 }
 0x203   :  { %v4654_v24 = vadd.f32 %v5787_v0, %v2149_v32  ;;  %v4335_v33 = vpop.f32.mrb[94].mxu1  ;;  %v4449_v36 = vpop.f32.mrb[94].mxu0 }
 0x204   :  { %v4653_v60 = vadd.f32 %v4652_v19, %v4448_v22  ;;  %v4656_v12 = vadd.f32 %v4335_v33, %v5787_v0  ;;  %v2152_v41 = vpop.f32.mrb[95].mxu1  ;;  %v3310_v42 = vpop.f32.mrb[95].mxu0 }
 0x205   :  { %v4655_v37 = vadd.f32 %v4654_v24, %v3307_v27  ;;  %v4658_v39 = vadd.f32 %v5787_v0, %v2152_v41 }
 0x206   :  { %3592 = vst.msk [vmem:[%s6420_s3 + $0x2f0] sm:$0xff] %vm416_vm1, %v4653_v60  ;;  %v4657_v38 = vadd.f32 %v4656_v12, %v4449_v36 }
 0x207   :  { %3590 = vst.msk [vmem:[%s6420_s3 + $0x2e0] sm:$0xff] %vm416_vm1, %v4655_v37  ;;  %v4659_v13 = vadd.f32 %v4658_v39, %v3310_v42 }
 0x208   :  { %3593 = vst.msk [vmem:[%s6420_s3 + $0x2f8] sm:$0xff] %vm416_vm1, %v4657_v38 }
 0x209   :  { %3591 = vst.msk [vmem:[%s6420_s3 + $0x2e8] sm:$0xff] %vm416_vm1, %v4659_v13  ;;  %v4338_v40 = vpop.f32.mrb[96].mxu1  ;;  %v4452_v49 = vpop.f32.mrb[96].mxu0 }
 0x20a   :  { %v4660_v43 = vadd.f32 %v4338_v40, %v5787_v0  ;;  %v2165_v15 = vpop.f32.mrb[97].mxu1  ;;  %v3323_v61 = vpop.f32.mrb[97].mxu0 }
 0x20b   :  { %v4662_v18 = vadd.f32 %v5787_v0, %v2165_v15  ;;  %v4339_v63 = vpop.f32.mrb[98].mxu1  ;;  %v4453_v44 = vpop.f32.mrb[98].mxu0 }
 0x20c   :  { %v4661_v2 = vadd.f32 %v4660_v43, %v4452_v49  ;;  %v4664_v46 = vadd.f32 %v4339_v63, %v5787_v0  ;;  %v2168_v57 = vpop.f32.mrb[99].mxu1  ;;  %v3326_v3 = vpop.f32.mrb[99].mxu0 }
 0x20d   :  { %v4663_v52 = vadd.f32 %v4662_v18, %v3323_v61  ;;  %v4666_v62 = vadd.f32 %v5787_v0, %v2168_v57 }
 0x20e   :  { %3596 = vst.msk [vmem:[%s6420_s3 + $0x310] sm:$0xff] %vm416_vm1, %v4661_v2  ;;  %v4665_v16 = vadd.f32 %v4664_v46, %v4453_v44 }
 0x20f   :  { %3594 = vst.msk [vmem:[%s6420_s3 + $0x300] sm:$0xff] %vm416_vm1, %v4663_v52  ;;  %v4667_v45 = vadd.f32 %v4666_v62, %v3326_v3 }
 0x210   :  { %3597 = vst.msk [vmem:[%s6420_s3 + $0x318] sm:$0xff] %vm416_vm1, %v4665_v16 }
 0x211   :  { %3595 = vst.msk [vmem:[%s6420_s3 + $0x308] sm:$0xff] %vm416_vm1, %v4667_v45  ;;  %v4342_v47 = vpop.f32.mrb[100].mxu1  ;;  %v4456_v51 = vpop.f32.mrb[100].mxu0 }
 0x212   :  { %v4668_v50 = vadd.f32 %v4342_v47, %v5787_v0  ;;  %v2181_v53 = vpop.f32.mrb[101].mxu1  ;;  %v3339_v55 = vpop.f32.mrb[101].mxu0 }
 0x213   :  { %v4670_v20 = vadd.f32 %v5787_v0, %v2181_v53  ;;  %v4343_v21 = vpop.f32.mrb[102].mxu1  ;;  %v4457_v54 = vpop.f32.mrb[102].mxu0 }
 0x214   :  { %v4669_v23 = vadd.f32 %v4668_v50, %v4456_v51  ;;  %v4672_v26 = vadd.f32 %v4343_v21, %v5787_v0  ;;  %v2184_v58 = vpop.f32.mrb[103].mxu1  ;;  %v3342_v1 = vpop.f32.mrb[103].mxu0 }
 0x215   :  { %v4671_v56 = vadd.f32 %v4670_v20, %v3339_v55  ;;  %v4674_v59 = vadd.f32 %v5787_v0, %v2184_v58 }
 0x216   :  { %3600 = vst.msk [vmem:[%s6420_s3 + $0x330] sm:$0xff] %vm416_vm1, %v4669_v23  ;;  %v4673_v25 = vadd.f32 %v4672_v26, %v4457_v54 }
 0x217   :  { %3598 = vst.msk [vmem:[%s6420_s3 + $0x320] sm:$0xff] %vm416_vm1, %v4671_v56  ;;  %v4675_v4 = vadd.f32 %v4674_v59, %v3342_v1 }
 0x218   :  { %3601 = vst.msk [vmem:[%s6420_s3 + $0x338] sm:$0xff] %vm416_vm1, %v4673_v25 }
 0x219   :  { %3599 = vst.msk [vmem:[%s6420_s3 + $0x328] sm:$0xff] %vm416_vm1, %v4675_v4  ;;  %v4346_v30 = vpop.f32.mrb[104].mxu1  ;;  %v4460_v7 = vpop.f32.mrb[104].mxu0 }
 0x21a   :  { %v4676_v5 = vadd.f32 %v4346_v30, %v5787_v0  ;;  %v2197_v10 = vpop.f32.mrb[105].mxu1  ;;  %v3355_v6 = vpop.f32.mrb[105].mxu0 }
 0x21b   :  { %v4678_v28 = vadd.f32 %v5787_v0, %v2197_v10  ;;  %v4347_v35 = vpop.f32.mrb[106].mxu1  ;;  %v4461_v17 = vpop.f32.mrb[106].mxu0 }
 0x21c   :  { %v4677_v8 = vadd.f32 %v4676_v5, %v4460_v7  ;;  %v4680_v11 = vadd.f32 %v4347_v35, %v5787_v0  ;;  %v2200_v29 = vpop.f32.mrb[107].mxu1  ;;  %v3358_v48 = vpop.f32.mrb[107].mxu0 }
 0x21d   :  { %v4679_v31 = vadd.f32 %v4678_v28, %v3355_v6  ;;  %v4682_v34 = vadd.f32 %v5787_v0, %v2200_v29 }
 0x21e   :  { %3604 = vst.msk [vmem:[%s6420_s3 + $0x350] sm:$0xff] %vm416_vm1, %v4677_v8  ;;  %v4681_v9 = vadd.f32 %v4680_v11, %v4461_v17 }
 0x21f   :  { %3602 = vst.msk [vmem:[%s6420_s3 + $0x340] sm:$0xff] %vm416_vm1, %v4679_v31  ;;  %v4683_v14 = vadd.f32 %v4682_v34, %v3358_v48 }
 0x220   :  { %3605 = vst.msk [vmem:[%s6420_s3 + $0x358] sm:$0xff] %vm416_vm1, %v4681_v9 }
 0x221   :  { %3603 = vst.msk [vmem:[%s6420_s3 + $0x348] sm:$0xff] %vm416_vm1, %v4683_v14  ;;  %v4350_v19 = vpop.f32.mrb[108].mxu1  ;;  %v4464_v32 = vpop.f32.mrb[108].mxu0 }
 0x222   :  { %v4684_v22 = vadd.f32 %v4350_v19, %v5787_v0  ;;  %v2213_v24 = vpop.f32.mrb[109].mxu1  ;;  %v3371_v33 = vpop.f32.mrb[109].mxu0 }
 0x223   :  { %v4686_v27 = vadd.f32 %v5787_v0, %v2213_v24  ;;  %v4351_v60 = vpop.f32.mrb[110].mxu1  ;;  %v4465_v41 = vpop.f32.mrb[110].mxu0 }
 0x224   :  { %v4685_v12 = vadd.f32 %v4684_v22, %v4464_v32  ;;  %v4688_v36 = vadd.f32 %v4351_v60, %v5787_v0  ;;  %v2216_v37 = vpop.f32.mrb[111].mxu1  ;;  %v3374_v38 = vpop.f32.mrb[111].mxu0 }
 0x225   :  { %v4687_v39 = vadd.f32 %v4686_v27, %v3371_v33  ;;  %v4690_v42 = vadd.f32 %v5787_v0, %v2216_v37 }
 0x226   :  { %3608 = vst.msk [vmem:[%s6420_s3 + $0x370] sm:$0xff] %vm416_vm1, %v4685_v12  ;;  %v4689_v13 = vadd.f32 %v4688_v36, %v4465_v41 }
 0x227   :  { %3606 = vst.msk [vmem:[%s6420_s3 + $0x360] sm:$0xff] %vm416_vm1, %v4687_v39  ;;  %v4691_v40 = vadd.f32 %v4690_v42, %v3374_v38 }
 0x228   :  { %3609 = vst.msk [vmem:[%s6420_s3 + $0x378] sm:$0xff] %vm416_vm1, %v4689_v13 }
 0x229   :  { %3607 = vst.msk [vmem:[%s6420_s3 + $0x368] sm:$0xff] %vm416_vm1, %v4691_v40 }

</bundles_post_ra>
